<compile_context>
chip_gen: v6e
topology: v6e:2x2x1
jax: 0.10.0
libtpu: 0.0.40
codegen_flags: <defaults>
</compile_context>

<pallas_src>
import functools

import jax
import jax.numpy as jnp
import numpy as np
from jax.experimental import pallas as pl
from jax.experimental.pallas import tpu as pltpu


_TM = 512            # row tile (adjacency LHS rows / output rows)
_TK = 512            # reduction tile (adjacency columns)
_FBLK = 1024         # max feature block (lane-dense, multiple of 256)
_LANE = 128
_FUSED_VMEM_BUDGET = 40 * 1024 * 1024      # fused path total working set
_RESIDENT_LAYER_BUDGET = 16 * 1024 * 1024  # double-buffered resident layer
_VMEM_LIMIT = 48 * 1024 * 1024


def _round_up(v: int, m: int) -> int:
    return ((v + m - 1) // m) * m


# --------------------------------------------------------------------------- #
# Fused kernel: adjacency resident in VMEM, all k hops in one pallas_call.
# --------------------------------------------------------------------------- #
def _gpr_fused_kernel(gamma_ref, adj_ref, x_ref, y_ref, lay_ref, *, k: int):
    """gamma: SMEM f32[k+1]; adj: VMEM bf16[N,N]; x: VMEM f32[N,F];
    y: VMEM f32[N,F] output; lay: VMEM bf16[N,F] scratch (current layer)."""
    x = x_ref[...]
    y_ref[...] = gamma_ref[0] * x              # step-0 identity term (f32)
    lay_ref[...] = x.astype(jnp.bfloat16)      # layer_0 in MXU feed dtype
    for step in range(1, k + 1):               # k is small & static -> unrolled
        nxt = jnp.dot(adj_ref[...], lay_ref[...],
                      preferred_element_type=jnp.float32)
        y_ref[...] += gamma_ref[step] * nxt
        if step < k:                           # last hop: next layer is dead
            lay_ref[...] = nxt.astype(jnp.bfloat16)


def _fused_call(gamma, adj_p, x_p, *, k, n_pad, f_pad):
    kernel = functools.partial(_gpr_fused_kernel, k=k)
    flops = 2 * k * n_pad * n_pad * f_pad
    bytes_accessed = n_pad * n_pad * 2 + 2 * n_pad * f_pad * 4   # adj once, x in, y out
    return pl.pallas_call(
        kernel,
        out_shape=jax.ShapeDtypeStruct((n_pad, f_pad), jnp.float32),
        grid_spec=pltpu.PrefetchScalarGridSpec(
            num_scalar_prefetch=0,
            grid=(1,),
            in_specs=[
                pl.BlockSpec(memory_space=pltpu.SMEM),             # gamma
                pl.BlockSpec((n_pad, n_pad), lambda i: (0, 0)),    # adj (resident)
                pl.BlockSpec((n_pad, f_pad), lambda i: (0, 0)),    # x
            ],
            out_specs=pl.BlockSpec((n_pad, f_pad), lambda i: (0, 0)),
            scratch_shapes=[pltpu.VMEM((n_pad, f_pad), jnp.bfloat16)],
        ),
        compiler_params=pltpu.CompilerParams(
            dimension_semantics=("arbitrary",),
            vmem_limit_bytes=_VMEM_LIMIT,
        ),
        cost_estimate=pl.CostEstimate(
            flops=flops, bytes_accessed=bytes_accessed, transcendentals=0),
    )(gamma, adj_p, x_p)


# --------------------------------------------------------------------------- #
# Streaming per-hop kernel (large graphs).
# --------------------------------------------------------------------------- #
def _gpr_hop_kernel(gamma_ref, adj_ref, lay_in_ref, y_in_ref, *refs,
                    step: int, is_first: bool, emit_layer: bool,
                    layer_resident: bool, tk: int):
    """One GPR hop: acc += adj[i,kk] @ layer[kk]; finalize layer/y at last kk.

    gamma_ref : SMEM f32[k+1]
    adj_ref   : VMEM bf16[TM, TK]            adjacency tile (i, kk)
    lay_in_ref: VMEM bf16[TK, FB]            previous layer tile  (streamed)
                VMEM bf16[n_pad, FB]         previous layer        (resident)
    y_in_ref  : VMEM f32[TM, FB]             running y (x itself when is_first)
    refs      : ([lay_out bf16 (TM,FB)], y_out f32 (TM,FB), acc f32 (TM,FB))
    """
    if emit_layer:
        lay_out_ref, y_out_ref, acc_ref = refs
    else:
        lay_out_ref = None
        y_out_ref, acc_ref = refs

    kk = pl.program_id(2)

    @pl.when(kk == 0)
    def _():
        acc_ref[...] = jnp.zeros_like(acc_ref)

    if layer_resident:
        off = pl.multiple_of(kk * tk, tk)
        lay_blk = lay_in_ref[pl.ds(off, tk), :]
    else:
        lay_blk = lay_in_ref[...]

    # bf16 MXU feed (both operands already bf16), f32 accumulation.
    acc_ref[...] += jnp.dot(adj_ref[...], lay_blk,
                            preferred_element_type=jnp.float32)

    @pl.when(kk == pl.num_programs(2) - 1)
    def _():
        layer = acc_ref[...]
        if emit_layer:                    # intermediate hop: write layer for hop+1
            lay_out_ref[...] = layer.astype(jnp.bfloat16)
        y_prev = y_in_ref[...]
        if is_first:                      # fold step-0 identity term into hop 1
            y_prev = gamma_ref[0] * y_prev
        y_out_ref[...] = y_prev + gamma_ref[step] * layer


def _hop_call(gamma, adj_p, lay_in, y_in, *, step, is_first, emit_layer,
              layer_resident, n_pad, f_pad, f_blk, tm, tk):
    grid = (n_pad // tm, f_pad // f_blk, n_pad // tk)
    y_shape = jax.ShapeDtypeStruct((n_pad, f_pad), jnp.float32)
    lay_shape = jax.ShapeDtypeStruct((n_pad, f_pad), jnp.bfloat16)

    out_row_spec = pl.BlockSpec((tm, f_blk), lambda i, j, kk: (i, j))
    if emit_layer:
        out_shape = (lay_shape, y_shape)
        out_specs = (out_row_spec, out_row_spec)
        y_out_idx = 1
    else:
        out_shape = (y_shape,)
        out_specs = (out_row_spec,)
        y_out_idx = 0

    # Accumulate y in place for hops >= 2.  (Hop 1's y_in is the f32 padded x,
    # which feeds the identity term, so it is left un-aliased.)
    io_aliases = {} if is_first else {3: y_out_idx}

    if layer_resident:
        lay_in_spec = pl.BlockSpec((n_pad, f_blk), lambda i, j, kk: (0, j))
    else:
        lay_in_spec = pl.BlockSpec((tk, f_blk), lambda i, j, kk: (kk, j))

    kernel = functools.partial(_gpr_hop_kernel, step=step, is_first=is_first,
                               emit_layer=emit_layer,
                               layer_resident=layer_resident, tk=tk)

    n_fblk = f_pad // f_blk
    flops = 2 * n_pad * n_pad * f_pad
    layer_in_bytes = (n_pad * f_pad * 2 if layer_resident
                      else (n_pad // tm) * n_pad * f_pad * 2)
    bytes_accessed = (n_fblk * n_pad * n_pad * 2        # adj (bf16, per f-block)
                      + layer_in_bytes                  # layer in (bf16)
                      + 2 * n_pad * f_pad * 4           # y in / y out (f32)
                      + (n_pad * f_pad * 2 if emit_layer else 0))  # layer out

    return pl.pallas_call(
        kernel,
        out_shape=out_shape,
        grid_spec=pltpu.PrefetchScalarGridSpec(
            num_scalar_prefetch=0,
            grid=grid,
            in_specs=[
                pl.BlockSpec(memory_space=pltpu.SMEM),                  # gamma
                pl.BlockSpec((tm, tk), lambda i, j, kk: (i, kk),        # adj
                             pipeline_mode=pl.Buffered(3)),
                lay_in_spec,                                            # layer in
                pl.BlockSpec((tm, f_blk), lambda i, j, kk: (i, j)),     # y in
            ],
            out_specs=out_specs,
            scratch_shapes=[pltpu.VMEM((tm, f_blk), jnp.float32)],
        ),
        input_output_aliases=io_aliases,
        compiler_params=pltpu.CompilerParams(
            dimension_semantics=("parallel", "parallel", "arbitrary"),
            vmem_limit_bytes=_VMEM_LIMIT,
        ),
        cost_estimate=pl.CostEstimate(
            flops=flops, bytes_accessed=bytes_accessed, transcendentals=0),
    )(gamma, adj_p, lay_in, y_in)


# --------------------------------------------------------------------------- #
# Wrapper.
# --------------------------------------------------------------------------- #
def gpr_conv(x: jax.Array, adj: jax.Array, gamma: jax.Array, *,
             force_streaming: bool = False,
             force_stream_layer: bool = False) -> jax.Array:
    """Pallas GPRConv forward.  x: (N, F), adj: (N, N), gamma: (k+1,)."""
    n, f = x.shape
    assert adj.shape == (n, n)
    k = int(gamma.shape[0]) - 1
    gamma = gamma.astype(jnp.float32)

    if k == 0:
        # Degenerate: no propagation, only the identity term.
        return gamma[0] * x.astype(jnp.float32)

    # Cast to bf16 BEFORE padding; accept an already-bf16 adjacency.
    adj_bf = adj if adj.dtype == jnp.bfloat16 else adj.astype(jnp.bfloat16)

    # ---- fused path: adjacency resident in VMEM, all hops in one kernel ---- #
    n_pad_f = _round_up(n, _LANE)
    f_pad_f = _round_up(f, _LANE)
    # adj (double-buffered bf16) + x/y blocks + layer scratch + f32 temporaries.
    fused_bytes = 4 * n_pad_f * n_pad_f + 30 * n_pad_f * f_pad_f
    if (not force_streaming) and fused_bytes <= _FUSED_VMEM_BUDGET:
        x_p = jnp.pad(x.astype(jnp.float32),
                      ((0, n_pad_f - n), (0, f_pad_f - f)))
        adj_p = jnp.pad(adj_bf, ((0, n_pad_f - n), (0, n_pad_f - n)))
        y = _fused_call(gamma, adj_p, x_p, k=k, n_pad=n_pad_f, f_pad=f_pad_f)
        return y[:n, :f]

    # ---- streaming path: one tiled pallas_call per hop --------------------- #
    tm, tk = _TM, _TK
    n_pad = _round_up(n, max(tm, tk))
    f_pad0 = _round_up(f, _LANE)
    if f_pad0 <= _FBLK:
        f_blk, f_pad = f_pad0, f_pad0
    else:
        f_blk, f_pad = _FBLK, _round_up(f, _FBLK)

    layer_resident = (not force_stream_layer) and (
        2 * n_pad * f_blk * 2 <= _RESIDENT_LAYER_BUDGET)

    # Zero-padding rows/cols is harmless for the propagation (padded rows stay 0).
    x_p = jnp.pad(x.astype(jnp.float32), ((0, n_pad - n), (0, f_pad - f)))
    adj_p = jnp.pad(adj_bf, ((0, n_pad - n), (0, n_pad - n)))

    layer = x_p.astype(jnp.bfloat16)   # bf16 layer end-to-end (MXU feed dtype)
    y = x_p                            # hop-1 kernel scales this by gamma[0]
    for step in range(1, k + 1):
        is_first = step == 1
        emit_layer = step < k
        outs = _hop_call(gamma, adj_p, layer, y, step=step, is_first=is_first,
                         emit_layer=emit_layer, layer_resident=layer_resident,
                         n_pad=n_pad, f_pad=f_pad, f_blk=f_blk, tm=tm, tk=tk)
        if emit_layer:
            layer, y = outs
        else:
            (y,) = outs
    return y[:n, :f]


def make_gamma(init_method: str, alpha, k: int, Gamma=None) -> np.ndarray:
    """Deterministic re-implementation of GPRConv.__init__ coefficient setup."""
    assert init_method in ["SGC", "PPR", "NPPR", "Random", "WS"]
    if init_method == "SGC":
        gamma = 0.0 * np.ones(k + 1)
        gamma[int(alpha)] = 1.0
    elif init_method == "PPR":
        gamma = alpha * (1 - alpha) ** np.arange(k + 1)
        gamma[-1] = (1 - alpha) ** k
    elif init_method == "NPPR":
        gamma = alpha ** np.arange(k + 1)
        gamma = gamma / np.sum(np.abs(gamma))
    elif init_method == "Random":
        rng = np.random.RandomState(0)  # deterministic
        bound = np.sqrt(3 / (k + 1))
        gamma = rng.uniform(-bound, bound, k + 1)
        gamma = gamma / np.sum(np.abs(gamma))
    else:  # 'WS'
        gamma = np.asarray(Gamma)
    return gamma.astype(np.float32)


def gpr_conv_reference(x, adj, gamma):
    """Plain-JAX reference matching the PyTorch forward exactly (all f32)."""
    y = gamma[0] * x
    layer = x
    for step in range(1, gamma.shape[0]):
        layer = adj @ layer
        y = y + gamma[step] * layer
    return y


# TODO(synk): conv_val (spectral response on precomputed eigenvalues) is host-side
# numpy analysis, not part of the device forward pass; left unimplemented.


if __name__ == "__main__":
    def normalized_adj(key, n):
        a = jax.random.uniform(key, (n, n), dtype=jnp.float32)
        a = (a + a.T) * 0.5
        deg = jnp.sum(a, axis=1)
        d_inv_sqrt = 1.0 / jnp.sqrt(deg)
        return d_inv_sqrt[:, None] * a * d_inv_sqrt[None, :]

    key = jax.random.PRNGKey(0)
    k1, k2, k3, k4 = jax.random.split(key, 4)

    gpr = jax.jit(gpr_conv,
                  static_argnames=("force_streaming", "force_stream_layer"))

    # 1) Fused resident-adj path (N=500 -> adj fits VMEM), K=4, PPR init.
    n1, f1, hops1 = 500, 96, 4
    x1 = jax.random.normal(k1, (n1, f1), dtype=jnp.float32)
    adj1 = normalized_adj(k2, n1)
    gamma1 = jnp.asarray(make_gamma("PPR", 0.1, hops1))
    y1 = jax.block_until_ready(gpr(x1, adj1, gamma1))
    y1_ref = gpr_conv_reference(x1, adj1, gamma1)
    # Tolerance loosened vs. a pure-f32 reference: adjacency/layer are bf16 at the MXU.
    np.testing.assert_allclose(np.asarray(y1), np.asarray(y1_ref),
                               rtol=2e-2, atol=5e-3)

    # 2) Streaming hop path with VMEM-resident layer (forced, small shapes).
    n2, f2, hops2 = 777, 96, 3
    x2 = jax.random.normal(k3, (n2, f2), dtype=jnp.float32)
    adj2 = normalized_adj(k4, n2)
    gamma2 = jnp.asarray(make_gamma("PPR", 0.2, hops2))
    y2 = jax.block_until_ready(gpr(x2, adj2, gamma2, force_streaming=True))
    y2_ref = gpr_conv_reference(x2, adj2, gamma2)
    np.testing.assert_allclose(np.asarray(y2), np.asarray(y2_ref),
                               rtol=2e-2, atol=5e-3)

    # 3) Streaming hop path with streamed (non-resident) layer tiles.
    y3 = jax.block_until_ready(
        gpr(x2, adj2, gamma2, force_streaming=True, force_stream_layer=True))
    np.testing.assert_allclose(np.asarray(y3), np.asarray(y2_ref),
                               rtol=2e-2, atol=5e-3)

    print("KERNEL_OK")
</pallas_src>

<mosaic_0001>
module attributes {stable_mosaic.version = 11 : i64} {
  func.func @_gpr_fused_kernel(%arg0: i32, %arg1: memref<5xf32, #tpu.memory_space<smem>>, %arg2: memref<512x512xbf16, #tpu.memory_space<vmem>>, %arg3: memref<512x128xf32, #tpu.memory_space<vmem>>, %arg4: memref<512x128xf32, #tpu.memory_space<vmem>>, %arg5: memref<512x128xbf16, #tpu.memory_space<vmem>>) attributes {dimension_semantics = [#tpu.dimension_semantics<arbitrary>], iteration_bounds = array<i64: 1>, scalar_prefetch = 0 : i64, scratch_operands = 1 : i64, tpu.core_type = #tpu.core_type<tc>, window_params = [{transform_indices = @transform_0, window_bounds = array<i64: 5>}, {pipeline_mode = #tpu.pipeline_mode<synchronous>, transform_indices = @transform_1, window_bounds = array<i64: 512, 512>}, {pipeline_mode = #tpu.pipeline_mode<synchronous>, transform_indices = @transform_2, window_bounds = array<i64: 512, 128>}, {pipeline_mode = #tpu.pipeline_mode<synchronous>, transform_indices = @transform_3, window_bounds = array<i64: 512, 128>}]} {
    %c0 = arith.constant 0 : index
    %c0_0 = arith.constant 0 : index
    %0 = vector.load %arg3[%c0, %c0_0] : memref<512x128xf32, #tpu.memory_space<vmem>>, vector<512x128xf32>
    %c0_1 = arith.constant 0 : index
    %1 = memref.load %arg1[%c0_1] : memref<5xf32, #tpu.memory_space<smem>>
    %2 = vector.broadcast %1 : f32 to vector<512x128xf32>
    %3 = arith.mulf %2, %0 : vector<512x128xf32>
    %c0_2 = arith.constant 0 : index
    %c0_3 = arith.constant 0 : index
    %4 = vector.load %arg4[%c0_2, %c0_3] : memref<512x128xf32, #tpu.memory_space<vmem>>, vector<512x128xf32>
    tpu.vector_store %arg4[%c0_2, %c0_3], %3 {strides = array<i32>} : memref<512x128xf32, #tpu.memory_space<vmem>>, vector<512x128xf32>,
    %5 = arith.truncf %0 : vector<512x128xf32> to vector<512x128xbf16>
    %c0_4 = arith.constant 0 : index
    %c0_5 = arith.constant 0 : index
    %6 = vector.load %arg5[%c0_4, %c0_5] : memref<512x128xbf16, #tpu.memory_space<vmem>>, vector<512x128xbf16>
    tpu.vector_store %arg5[%c0_4, %c0_5], %5 {strides = array<i32>} : memref<512x128xbf16, #tpu.memory_space<vmem>>, vector<512x128xbf16>,
    %c0_6 = arith.constant 0 : index
    %c0_7 = arith.constant 0 : index
    %7 = vector.load %arg2[%c0_6, %c0_7] : memref<512x512xbf16, #tpu.memory_space<vmem>>, vector<512x512xbf16>
    %c0_8 = arith.constant 0 : index
    %c0_9 = arith.constant 0 : index
    %8 = vector.load %arg5[%c0_8, %c0_9] : memref<512x128xbf16, #tpu.memory_space<vmem>>, vector<512x128xbf16>
    %cst = arith.constant dense<0.000000e+00> : vector<512x128xf32>
    %9 = tpu.matmul %7, %8, %cst {dimension_numbers = #tpu.dot_dimension_numbers<[1], [0], [0], [1], [0, 0, 1, 1], [], []>} : vector<512x512xbf16>, vector<512x128xbf16>, vector<512x128xf32> -> vector<512x128xf32>
    %c0_10 = arith.constant 0 : index
    %c0_11 = arith.constant 0 : index
    %10 = vector.load %arg4[%c0_10, %c0_11] : memref<512x128xf32, #tpu.memory_space<vmem>>, vector<512x128xf32>
    %c1 = arith.constant 1 : index
    %11 = memref.load %arg1[%c1] : memref<5xf32, #tpu.memory_space<smem>>
    %12 = vector.broadcast %11 : f32 to vector<512x128xf32>
    %13 = arith.mulf %12, %9 : vector<512x128xf32>
    %14 = arith.addf %10, %13 : vector<512x128xf32>
    %c0_12 = arith.constant 0 : index
    %c0_13 = arith.constant 0 : index
    %15 = vector.load %arg4[%c0_12, %c0_13] : memref<512x128xf32, #tpu.memory_space<vmem>>, vector<512x128xf32>
    tpu.vector_store %arg4[%c0_12, %c0_13], %14 {strides = array<i32>} : memref<512x128xf32, #tpu.memory_space<vmem>>, vector<512x128xf32>,
    %16 = arith.truncf %9 : vector<512x128xf32> to vector<512x128xbf16>
    %c0_14 = arith.constant 0 : index
    %c0_15 = arith.constant 0 : index
    %17 = vector.load %arg5[%c0_14, %c0_15] : memref<512x128xbf16, #tpu.memory_space<vmem>>, vector<512x128xbf16>
    tpu.vector_store %arg5[%c0_14, %c0_15], %16 {strides = array<i32>} : memref<512x128xbf16, #tpu.memory_space<vmem>>, vector<512x128xbf16>,
    %c0_16 = arith.constant 0 : index
    %c0_17 = arith.constant 0 : index
    %18 = vector.load %arg2[%c0_16, %c0_17] : memref<512x512xbf16, #tpu.memory_space<vmem>>, vector<512x512xbf16>
    %c0_18 = arith.constant 0 : index
    %c0_19 = arith.constant 0 : index
    %19 = vector.load %arg5[%c0_18, %c0_19] : memref<512x128xbf16, #tpu.memory_space<vmem>>, vector<512x128xbf16>
    %cst_20 = arith.constant dense<0.000000e+00> : vector<512x128xf32>
    %20 = tpu.matmul %18, %19, %cst_20 {dimension_numbers = #tpu.dot_dimension_numbers<[1], [0], [0], [1], [0, 0, 1, 1], [], []>} : vector<512x512xbf16>, vector<512x128xbf16>, vector<512x128xf32> -> vector<512x128xf32>
    %c0_21 = arith.constant 0 : index
    %c0_22 = arith.constant 0 : index
    %21 = vector.load %arg4[%c0_21, %c0_22] : memref<512x128xf32, #tpu.memory_space<vmem>>, vector<512x128xf32>
    %c2 = arith.constant 2 : index
    %22 = memref.load %arg1[%c2] : memref<5xf32, #tpu.memory_space<smem>>
    %23 = vector.broadcast %22 : f32 to vector<512x128xf32>
    %24 = arith.mulf %23, %20 : vector<512x128xf32>
    %25 = arith.addf %21, %24 : vector<512x128xf32>
    %c0_23 = arith.constant 0 : index
    %c0_24 = arith.constant 0 : index
    %26 = vector.load %arg4[%c0_23, %c0_24] : memref<512x128xf32, #tpu.memory_space<vmem>>, vector<512x128xf32>
    tpu.vector_store %arg4[%c0_23, %c0_24], %25 {strides = array<i32>} : memref<512x128xf32, #tpu.memory_space<vmem>>, vector<512x128xf32>,
    %27 = arith.truncf %20 : vector<512x128xf32> to vector<512x128xbf16>
    %c0_25 = arith.constant 0 : index
    %c0_26 = arith.constant 0 : index
    %28 = vector.load %arg5[%c0_25, %c0_26] : memref<512x128xbf16, #tpu.memory_space<vmem>>, vector<512x128xbf16>
    tpu.vector_store %arg5[%c0_25, %c0_26], %27 {strides = array<i32>} : memref<512x128xbf16, #tpu.memory_space<vmem>>, vector<512x128xbf16>,
    %c0_27 = arith.constant 0 : index
    %c0_28 = arith.constant 0 : index
    %29 = vector.load %arg2[%c0_27, %c0_28] : memref<512x512xbf16, #tpu.memory_space<vmem>>, vector<512x512xbf16>
    %c0_29 = arith.constant 0 : index
    %c0_30 = arith.constant 0 : index
    %30 = vector.load %arg5[%c0_29, %c0_30] : memref<512x128xbf16, #tpu.memory_space<vmem>>, vector<512x128xbf16>
    %cst_31 = arith.constant dense<0.000000e+00> : vector<512x128xf32>
    %31 = tpu.matmul %29, %30, %cst_31 {dimension_numbers = #tpu.dot_dimension_numbers<[1], [0], [0], [1], [0, 0, 1, 1], [], []>} : vector<512x512xbf16>, vector<512x128xbf16>, vector<512x128xf32> -> vector<512x128xf32>
    %c0_32 = arith.constant 0 : index
    %c0_33 = arith.constant 0 : index
    %32 = vector.load %arg4[%c0_32, %c0_33] : memref<512x128xf32, #tpu.memory_space<vmem>>, vector<512x128xf32>
    %c3 = arith.constant 3 : index
    %33 = memref.load %arg1[%c3] : memref<5xf32, #tpu.memory_space<smem>>
    %34 = vector.broadcast %33 : f32 to vector<512x128xf32>
    %35 = arith.mulf %34, %31 : vector<512x128xf32>
    %36 = arith.addf %32, %35 : vector<512x128xf32>
    %c0_34 = arith.constant 0 : index
    %c0_35 = arith.constant 0 : index
    %37 = vector.load %arg4[%c0_34, %c0_35] : memref<512x128xf32, #tpu.memory_space<vmem>>, vector<512x128xf32>
    tpu.vector_store %arg4[%c0_34, %c0_35], %36 {strides = array<i32>} : memref<512x128xf32, #tpu.memory_space<vmem>>, vector<512x128xf32>,
    %38 = arith.truncf %31 : vector<512x128xf32> to vector<512x128xbf16>
    %c0_36 = arith.constant 0 : index
    %c0_37 = arith.constant 0 : index
    %39 = vector.load %arg5[%c0_36, %c0_37] : memref<512x128xbf16, #tpu.memory_space<vmem>>, vector<512x128xbf16>
    tpu.vector_store %arg5[%c0_36, %c0_37], %38 {strides = array<i32>} : memref<512x128xbf16, #tpu.memory_space<vmem>>, vector<512x128xbf16>,
    %c0_38 = arith.constant 0 : index
    %c0_39 = arith.constant 0 : index
    %40 = vector.load %arg2[%c0_38, %c0_39] : memref<512x512xbf16, #tpu.memory_space<vmem>>, vector<512x512xbf16>
    %c0_40 = arith.constant 0 : index
    %c0_41 = arith.constant 0 : index
    %41 = vector.load %arg5[%c0_40, %c0_41] : memref<512x128xbf16, #tpu.memory_space<vmem>>, vector<512x128xbf16>
    %cst_42 = arith.constant dense<0.000000e+00> : vector<512x128xf32>
    %42 = tpu.matmul %40, %41, %cst_42 {dimension_numbers = #tpu.dot_dimension_numbers<[1], [0], [0], [1], [0, 0, 1, 1], [], []>} : vector<512x512xbf16>, vector<512x128xbf16>, vector<512x128xf32> -> vector<512x128xf32>
    %c0_43 = arith.constant 0 : index
    %c0_44 = arith.constant 0 : index
    %43 = vector.load %arg4[%c0_43, %c0_44] : memref<512x128xf32, #tpu.memory_space<vmem>>, vector<512x128xf32>
    %c4 = arith.constant 4 : index
    %44 = memref.load %arg1[%c4] : memref<5xf32, #tpu.memory_space<smem>>
    %45 = vector.broadcast %44 : f32 to vector<512x128xf32>
    %46 = arith.mulf %45, %42 : vector<512x128xf32>
    %47 = arith.addf %43, %46 : vector<512x128xf32>
    %c0_45 = arith.constant 0 : index
    %c0_46 = arith.constant 0 : index
    %48 = vector.load %arg4[%c0_45, %c0_46] : memref<512x128xf32, #tpu.memory_space<vmem>>, vector<512x128xf32>
    tpu.vector_store %arg4[%c0_45, %c0_46], %47 {strides = array<i32>} : memref<512x128xf32, #tpu.memory_space<vmem>>, vector<512x128xf32>,
    return
  }
  func.func @transform_0(%arg0: i32) -> i32 {
    %c0_i32 = arith.constant 0 : i32
    %c0_i32_0 = arith.constant 0 : i32
    return %c0_i32 : i32
  }
  func.func @transform_1(%arg0: i32) -> (i32, i32) {
    %c0_i32 = arith.constant 0 : i32
    %c0_i32_0 = arith.constant 0 : i32
    %c0_i32_1 = arith.constant 0 : i32
    return %c0_i32, %c0_i32_0 : i32, i32
  }
  func.func @transform_2(%arg0: i32) -> (i32, i32) {
    %c0_i32 = arith.constant 0 : i32
    %c0_i32_0 = arith.constant 0 : i32
    %c0_i32_1 = arith.constant 0 : i32
    return %c0_i32, %c0_i32_0 : i32, i32
  }
  func.func @transform_3(%arg0: i32) -> (i32, i32) {
    %c0_i32 = arith.constant 0 : i32
    %c0_i32_0 = arith.constant 0 : i32
    %c0_i32_1 = arith.constant 0 : i32
    return %c0_i32, %c0_i32_0 : i32, i32
  }
}

</mosaic_0001>

<bundles_post_ra>
// kernel: gpr_conv.1
= control target key start
LH: loop header
LB: loop body
LE: loop exit
PB: predicated region body
PF: predicated region fallthrough
CT: control target
= control target key end

     0   :  { %8 = vsyncpa [#allocation4], 0  ;;  %s16166_s0 = inlined_call_operand.vmem [shape: f32[5], index: 0, kind: input, shape index: {}]   ;;  %s16167_s1 = inlined_call_operand.vmem [shape: bf16[512,512], index: 1, kind: input, shape index: {}]   ;;  %s16168_s2 = inlined_call_operand.vmem [shape: f32[512,128], index: 2, kind: input, shape index: {}]   ;;  %s16169_s3 = inlined_call_operand.vmem [shape: f32[512,128], index: 3, kind: output, shape index: {}]  }
   0x1   :  { %s15_s14 = sshll.u32 %s16166_s0, 4  ;;  %s16_s14 = int_to_ptr.vmem [resolvable:$true] %s15_s14 }
   0x2   :  { %s11829_s15 = scalar_lea.vmem %s16_s14, 16  ;;  %p11834_p1 = scmp.lt.s32.totalorder %s16_s14, %s16_s14 }
   0x3   :  { %p11830_p0 = scmp.ne.s32.totalorder %s16_s14, %s11829_s15  ;;  %p11835_p2 = scmp.lt.s32.totalorder %s11829_s15, %s11829_s15 }
   0x5   :  { %p11836_p3 = por %p11835_p2, %p11834_p1 }
   0x7   :  { %p11837_p4 = pnand %p11836_p3, %p11830_p0 }
   0x9   :  { %11840 = shalt.err (!%p11837_p4)
}
   0xa   :  { %s11843_s16 = smov [#allocation3]  }
   0xb   :  { %18 = dma.vmem_to_smem %s16_s14, 16, %s11843_s16, [#allocation4]  }
   0xc   :  { %11841 = dma.done.wait [#allocation4], 16  }
   0xd   :  { %11842 = vsyncadd [#allocation4], 4294967280 }
   0xe   :  { %26 = sfence }
   0xf   :  { %v42_v0 = vld [vmem:[%s16168_s2 + $0x70] sm:$0xff]  ;;  %v43_v1 = vld [vmem:[%s16168_s2 + $0x78] sm:$0xff]  ;;  %v11844_v3 = vmov 0   ;;  %v40_v6 = vld [vmem:[%s16168_s2 + $0x60] sm:$0xff]  ;;  %s92_s5 = sld [smem:[#allocation3]] }
  0x10   :  { %v74_v2 = vld [vmem:[%s16168_s2 + $0x170] sm:$0xff]  ;;  %1566 = vmatprep.subr.bf16.mxu0 %v11844_v3  ;;  %1855 = vmatprep.subr.bf16.mxu1 %v11844_v3  ;;  %v10141_v4 = vpack.c.bf16 %v43_v1, %v42_v0  ;;  %v75_v5 = vld [vmem:[%s16168_s2 + $0x178] sm:$0xff]  ;;  %v41_v7 = vld [vmem:[%s16168_s2 + $0x68] sm:$0xff]  ;;  %s9171_s6 = sld [smem:[#allocation3 + $0x1]] }
  0x11   :  { %v10221_v8 = vpack.c.bf16 %v75_v5, %v74_v2  ;;  %v10136_v9 = vpack.c.bf16 %v41_v7, %v40_v6  ;;  %v72_v10 = vld [vmem:[%s16168_s2 + $0x160] sm:$0xff]  ;;  %v73_v11 = vld [vmem:[%s16168_s2 + $0x168] sm:$0xff]  ;;  %v38_v12 = vld [vmem:[%s16168_s2 + $0x50] sm:$0xff]  ;;  %s9396_s10 = sld [smem:[#allocation3 + $0x2]] }
  0x12   :  { %10749 = vst [vmem:[#allocation2 + $0x38] sm:$0xff] %v10141_v4   ;;  %v10216_v13 = vpack.c.bf16 %v73_v11, %v72_v10  ;;  %v39_v14 = vld [vmem:[%s16168_s2 + $0x58] sm:$0xff]  ;;  %v70_v15 = vld [vmem:[%s16168_s2 + $0x150] sm:$0xff]  ;;  %v36_v19 = vld [vmem:[%s16168_s2 + $0x40] sm:$0xff]  ;;  %s9621_s29 = sld [smem:[#allocation3 + $0x3]] }
  0x13   :  { %v71_v16 = vld [vmem:[%s16168_s2 + $0x158] sm:$0xff]  ;;  %10765 = vst [vmem:[#allocation2 + $0xb8] sm:$0xff] %v10221_v8   ;;  %10748 = vst [vmem:[#allocation2 + $0x30] sm:$0xff] %v10136_v9   ;;  %v10131_v17 = vpack.c.bf16 %v39_v14, %v38_v12  ;;  %v37_v20 = vld [vmem:[%s16168_s2 + $0x48] sm:$0xff]  ;;  %s9846_s0 = sld [smem:[#allocation3 + $0x4]] }
  0x14   :  { %v10211_v18 = vpack.c.bf16 %v71_v16, %v70_v15  ;;  %v68_v21 = vld [vmem:[%s16168_s2 + $0x140] sm:$0xff]  ;;  %10764 = vst [vmem:[#allocation2 + $0xb0] sm:$0xff] %v10216_v13   ;;  %v10126_v22 = vpack.c.bf16 %v37_v20, %v36_v19  ;;  %v69_v23 = vld [vmem:[%s16168_s2 + $0x148] sm:$0xff]  ;;  %v34_v24 = vld [vmem:[%s16168_s2 + $0x30] sm:$0xff] }
  0x15   :  { %v35_v25 = vld [vmem:[%s16168_s2 + $0x38] sm:$0xff]  ;;  %10747 = vst [vmem:[#allocation2 + $0x28] sm:$0xff] %v10131_v17   ;;  %v10206_v26 = vpack.c.bf16 %v69_v23, %v68_v21  ;;  %v66_v28 = vld [vmem:[%s16168_s2 + $0x130] sm:$0xff]  ;;  %v32_v30 = vld [vmem:[%s16168_s2 + $0x20] sm:$0xff] }
  0x16   :  { %10763 = vst [vmem:[#allocation2 + $0xa8] sm:$0xff] %v10211_v18   ;;  %v10121_v27 = vpack.c.bf16 %v35_v25, %v34_v24  ;;  %v67_v29 = vld [vmem:[%s16168_s2 + $0x138] sm:$0xff]  ;;  %10746 = vst [vmem:[#allocation2 + $0x20] sm:$0xff] %v10126_v22   ;;  %v33_v32 = vld [vmem:[%s16168_s2 + $0x28] sm:$0xff] }
  0x17   :  { %v10201_v31 = vpack.c.bf16 %v67_v29, %v66_v28  ;;  %v64_v33 = vld [vmem:[%s16168_s2 + $0x120] sm:$0xff]  ;;  %v65_v34 = vld [vmem:[%s16168_s2 + $0x128] sm:$0xff]  ;;  %10762 = vst [vmem:[#allocation2 + $0xa0] sm:$0xff] %v10206_v26   ;;  %v10116_v35 = vpack.c.bf16 %v33_v32, %v32_v30  ;;  %v30_v37 = vld [vmem:[%s16168_s2 + $0x10] sm:$0xff] }
  0x18   :  { %10745 = vst [vmem:[#allocation2 + $0x18] sm:$0xff] %v10121_v27   ;;  %v10196_v36 = vpack.c.bf16 %v65_v34, %v64_v33  ;;  %v31_v38 = vld [vmem:[%s16168_s2 + $0x18] sm:$0xff]  ;;  %v62_v39 = vld [vmem:[%s16168_s2 + $0x110] sm:$0xff]  ;;  %v28_v42 = vld [vmem:[%s16168_s2] sm:$0xff] }
  0x19   :  { %10761 = vst [vmem:[#allocation2 + $0x98] sm:$0xff] %v10201_v31   ;;  %v10111_v40 = vpack.c.bf16 %v31_v38, %v30_v37  ;;  %v63_v41 = vld [vmem:[%s16168_s2 + $0x118] sm:$0xff]  ;;  %v29_v43 = vld [vmem:[%s16168_s2 + $0x8] sm:$0xff]  ;;  %10744 = vst [vmem:[#allocation2 + $0x10] sm:$0xff] %v10116_v35  }
  0x1a   :  { %v10869_v44 = vld [vmem:[#allocation2 + $0x38] sm:$0xff]   ;;  %10760 = vst [vmem:[#allocation2 + $0x90] sm:$0xff] %v10196_v36   ;;  %v10191_v45 = vpack.c.bf16 %v63_v41, %v62_v39  ;;  %v10106_v46 = vpack.c.bf16 %v29_v43, %v28_v42  ;;  %v10871_v48 = vld [vmem:[#allocation2 + $0x30] sm:$0xff]   ;;  %v60_v56 = vld [vmem:[%s16168_s2 + $0x100] sm:$0xff] }
  0x1b   :  { %v10870_v47 = vld [vmem:[#allocation2 + $0xb8] sm:$0xff]   ;;  %10743 = vst [vmem:[#allocation2 + $0x8] sm:$0xff] %v10111_v40   ;;  %1567 = vmatpush1.bf16.msra.mxu0 %v10869_v44  ;;  %v10872_v49 = vld [vmem:[#allocation2 + $0xb0] sm:$0xff]   ;;  %v61_v57 = vld [vmem:[%s16168_s2 + $0x108] sm:$0xff] }
  0x1c   :  { %10759 = vst [vmem:[#allocation2 + $0x88] sm:$0xff] %v10191_v45   ;;  %10107 = vst [vmem:[#allocation2] sm:$0xff] %v10106_v46   ;;  %1856 = vmatpush1.bf16.msra.mxu1 %v10870_v47  ;;  %1568 = vmatprep.subr.bf16.mxu0 %v11844_v3  ;;  %v10873_v50 = vld [vmem:[#allocation2 + $0x28] sm:$0xff]   ;;  %v58_v58 = vld [vmem:[%s16168_s2 + $0xf0] sm:$0xff]  ;;  %v10186_v60 = vpack.c.bf16 %v61_v57, %v60_v56 }
  0x1d   :  { %1857 = vmatprep.subr.bf16.mxu1 %v11844_v3  ;;  %v10874_v51 = vld [vmem:[#allocation2 + $0xa8] sm:$0xff]   ;;  %v10875_v52 = vld [vmem:[#allocation2 + $0x20] sm:$0xff]   ;;  %v59_v61 = vld [vmem:[%s16168_s2 + $0xf8] sm:$0xff] }
  0x1e   :  { %v10876_v53 = vld [vmem:[#allocation2 + $0xa0] sm:$0xff]   ;;  %v90_v62 = vld [vmem:[%s16168_s2 + $0x1f0] sm:$0xff]  ;;  %v91_v63 = vld [vmem:[%s16168_s2 + $0x1f8] sm:$0xff]  ;;  %v10181_v1 = vpack.c.bf16 %v59_v61, %v58_v58  ;;  %10758 = vst [vmem:[#allocation2 + $0x80] sm:$0xff] %v10186_v60  }
  0x1f   :  { %1569 = vmatpush1.bf16.msra.mxu0 %v10871_v48  ;;  %v10877_v54 = vld [vmem:[#allocation2 + $0x18] sm:$0xff]   ;;  %v10261_v2 = vpack.c.bf16 %v91_v63, %v90_v62  ;;  %v56_v4 = vld [vmem:[%s16168_s2 + $0xe0] sm:$0xff]  ;;  %v57_v5 = vld [vmem:[%s16168_s2 + $0xe8] sm:$0xff] }
  0x20   :  { %1858 = vmatpush1.bf16.msra.mxu1 %v10872_v49  ;;  %1570 = vmatprep.subr.bf16.mxu0 %v11844_v3  ;;  %v10878_v55 = vld [vmem:[#allocation2 + $0x98] sm:$0xff]   ;;  %v10879_v59 = vld [vmem:[#allocation2 + $0x10] sm:$0xff]   ;;  %v88_v6 = vld [vmem:[%s16168_s2 + $0x1e0] sm:$0xff]  ;;  %v10176_v7 = vpack.c.bf16 %v57_v5, %v56_v4  ;;  %10757 = vst [vmem:[#allocation2 + $0x78] sm:$0xff] %v10181_v1  }
  0x21   :  { %1859 = vmatprep.subr.bf16.mxu1 %v11844_v3  ;;  %v10880_v0 = vld [vmem:[#allocation2 + $0x90] sm:$0xff]   ;;  %v89_v8 = vld [vmem:[%s16168_s2 + $0x1e8] sm:$0xff]  ;;  %v55_v10 = vld [vmem:[%s16168_s2 + $0xd8] sm:$0xff]  ;;  %10773 = vst [vmem:[#allocation2 + $0xf8] sm:$0xff] %v10261_v2  }
  0x22   :  { %v54_v9 = vld [vmem:[%s16168_s2 + $0xd0] sm:$0xff]  ;;  %v10256_v11 = vpack.c.bf16 %v89_v8, %v88_v6  ;;  %v87_v14 = vld [vmem:[%s16168_s2 + $0x1d8] sm:$0xff]  ;;  %v52_v15 = vld [vmem:[%s16168_s2 + $0xc0] sm:$0xff]  ;;  %10756 = vst [vmem:[#allocation2 + $0x70] sm:$0xff] %v10176_v7  }
  0x23   :  { %1571 = vmatpush1.bf16.msra.mxu0 %v10873_v50  ;;  %v10171_v12 = vpack.c.bf16 %v55_v10, %v54_v9  ;;  %v86_v13 = vld [vmem:[%s16168_s2 + $0x1d0] sm:$0xff]  ;;  %v10881_v16 = vld [vmem:[#allocation2 + $0x8] sm:$0xff]   ;;  %v84_v19 = vld [vmem:[%s16168_s2 + $0x1c0] sm:$0xff] }
  0x24   :  { %1860 = vmatpush1.bf16.msra.mxu1 %v10874_v51  ;;  %1572 = vmatprep.subr.bf16.mxu0 %v11844_v3  ;;  %v10251_v17 = vpack.c.bf16 %v87_v14, %v86_v13  ;;  %v53_v18 = vld [vmem:[%s16168_s2 + $0xc8] sm:$0xff]  ;;  %10772 = vst [vmem:[#allocation2 + $0xf0] sm:$0xff] %v10256_v11   ;;  %v50_v24 = vld [vmem:[%s16168_s2 + $0xb0] sm:$0xff]  ;;  %v51_v25 = vld [vmem:[%s16168_s2 + $0xb8] sm:$0xff] }
  0x25   :  { %1861 = vmatprep.subr.bf16.mxu1 %v11844_v3  ;;  %v85_v20 = vld [vmem:[%s16168_s2 + $0x1c8] sm:$0xff]  ;;  %10755 = vst [vmem:[#allocation2 + $0x68] sm:$0xff] %v10171_v12   ;;  %v10166_v22 = vpack.c.bf16 %v53_v18, %v52_v15  ;;  %v82_v26 = vld [vmem:[%s16168_s2 + $0x1b0] sm:$0xff]  ;;  %v10161_v27 = vpack.c.bf16 %v51_v25, %v50_v24  ;;  %v83_v28 = vld [vmem:[%s16168_s2 + $0x1b8] sm:$0xff] }
  0x26   :  { %v10882_v21 = vld [vmem:[#allocation2 + $0x88] sm:$0xff]   ;;  %v10246_v23 = vpack.c.bf16 %v85_v20, %v84_v19  ;;  %10771 = vst [vmem:[#allocation2 + $0xe8] sm:$0xff] %v10251_v17   ;;  %v48_v29 = vld [vmem:[%s16168_s2 + $0xa0] sm:$0xff]  ;;  %v10241_v31 = vpack.c.bf16 %v83_v28, %v82_v26  ;;  %v46_v35 = vld [vmem:[%s16168_s2 + $0x90] sm:$0xff] }
  0x27   :  { %1573 = vmatpush1.bf16.msra.mxu0 %v10875_v52  ;;  %v49_v30 = vld [vmem:[%s16168_s2 + $0xa8] sm:$0xff]  ;;  %10754 = vst [vmem:[#allocation2 + $0x60] sm:$0xff] %v10166_v22   ;;  %v80_v33 = vld [vmem:[%s16168_s2 + $0x1a0] sm:$0xff]  ;;  %10753 = vst [vmem:[#allocation2 + $0x58] sm:$0xff] %v10161_v27  }
  0x28   :  { %1862 = vmatpush1.bf16.msra.mxu1 %v10876_v53  ;;  %1574 = vmatprep.subr.bf16.mxu0 %v11844_v3  ;;  %10770 = vst [vmem:[#allocation2 + $0xe0] sm:$0xff] %v10246_v23   ;;  %v10156_v32 = vpack.c.bf16 %v49_v30, %v48_v29  ;;  %v81_v34 = vld [vmem:[%s16168_s2 + $0x1a8] sm:$0xff]  ;;  %v47_v37 = vld [vmem:[%s16168_s2 + $0x98] sm:$0xff]  ;;  %v78_v38 = vld [vmem:[%s16168_s2 + $0x190] sm:$0xff] }
  0x29   :  { %1863 = vmatprep.subr.bf16.mxu1 %v11844_v3  ;;  %v10236_v36 = vpack.c.bf16 %v81_v34, %v80_v33  ;;  %v79_v39 = vld [vmem:[%s16168_s2 + $0x198] sm:$0xff]  ;;  %10769 = vst [vmem:[#allocation2 + $0xd8] sm:$0xff] %v10241_v31   ;;  %v10151_v40 = vpack.c.bf16 %v47_v37, %v46_v35  ;;  %v10883_v42 = vld [vmem:[#allocation2] sm:$0xff]   ;;  %v10887_v46 = vld [vmem:[#allocation2 + $0x70] sm:$0xff]  }
  0x2a   :  { %10752 = vst [vmem:[#allocation2 + $0x50] sm:$0xff] %v10156_v32   ;;  %v10231_v41 = vpack.c.bf16 %v79_v39, %v78_v38  ;;  %v10884_v43 = vld [vmem:[#allocation2 + $0x80] sm:$0xff]   ;;  %v10885_v44 = vld [vmem:[#allocation2 + $0x78] sm:$0xff]   ;;  %v45_v51 = vld [vmem:[%s16168_s2 + $0x88] sm:$0xff] }
  0x2b   :  { %1575 = vmatpush1.bf16.msra.mxu0 %v10877_v54  ;;  %10768 = vst [vmem:[#allocation2 + $0xd0] sm:$0xff] %v10236_v36   ;;  %10751 = vst [vmem:[#allocation2 + $0x48] sm:$0xff] %v10151_v40   ;;  %v10886_v45 = vld [vmem:[#allocation2 + $0xf8] sm:$0xff]   ;;  %v10888_v47 = vld [vmem:[#allocation2 + $0xf0] sm:$0xff]  }
  0x2c   :  { %1864 = vmatpush1.bf16.msra.mxu1 %v10878_v55  ;;  %1576 = vmatprep.subr.bf16.mxu0 %v11844_v3  ;;  %10767 = vst [vmem:[#allocation2 + $0xc8] sm:$0xff] %v10231_v41   ;;  %v10889_v48 = vld [vmem:[#allocation2 + $0x68] sm:$0xff]   ;;  %v44_v50 = vld [vmem:[%s16168_s2 + $0x80] sm:$0xff] }
  0x2d   :  { %1865 = vmatprep.subr.bf16.mxu1 %v11844_v3  ;;  %v10890_v49 = vld [vmem:[#allocation2 + $0xe8] sm:$0xff]   ;;  %v76_v52 = vld [vmem:[%s16168_s2 + $0x180] sm:$0xff]  ;;  %v10146_v53 = vpack.c.bf16 %v45_v51, %v44_v50 }
  0x2e   :  { %v77_v54 = vld [vmem:[%s16168_s2 + $0x188] sm:$0xff]  ;;  %v10891_v55 = vld [vmem:[#allocation2 + $0x60] sm:$0xff]   ;;  %v10893_v60 = vld [vmem:[#allocation2 + $0x58] sm:$0xff]  }
  0x2f   :  { %1577 = vmatpush1.bf16.msra.mxu0 %v10879_v59  ;;  %v10226_v56 = vpack.c.bf16 %v77_v54, %v76_v52  ;;  %v10903_v57 = vld [vmem:[%s16167_s1 + $0x4] ss:$16 sps:$4 sm:$0xff]   ;;  %10750 = vst [vmem:[#allocation2 + $0x40] sm:$0xff] %v10146_v53   ;;  %v10906_v59 = vld [vmem:[%s16167_s1 + $0xc] ss:$16 sps:$4 sm:$0xff]  }
  0x30   :  { %1866 = vmatpush1.bf16.msra.mxu1 %v10880_v0  ;;  %1578 = vmatprep.subr.bf16.mxu0 %v11844_v3  ;;  %v10892_v58 = vld [vmem:[#allocation2 + $0xe0] sm:$0xff]   ;;  %v10894_v61 = vld [vmem:[#allocation2 + $0xd8] sm:$0xff]  }
  0x31   :  { %1867 = vmatprep.subr.bf16.mxu1 %v11844_v3  ;;  %10766 = vst [vmem:[#allocation2 + $0xc0] sm:$0xff] %v10226_v56   ;;  %1598 = vmatprep.mubr.bf16.mxu0 %v10903_v57  ;;  %v10895_v62 = vld [vmem:[#allocation2 + $0x50] sm:$0xff]   ;;  %v10904_v6 = vld [vmem:[%s16167_s1 + $0x8] ss:$16 sps:$4 sm:$0xff]   ;;  %v10909_v8 = vld [vmem:[%s16167_s1 + $0x2c] ss:$16 sps:$4 sm:$0xff]  }
  0x32   :  { %1887 = vmatprep.mubr.bf16.mxu1 %v10906_v59  ;;  %v10896_v63 = vld [vmem:[#allocation2 + $0xd0] sm:$0xff]   ;;  %v10897_v0 = vld [vmem:[#allocation2 + $0x48] sm:$0xff]  }
  0x33   :  { %1579 = vmatpush1.bf16.msra.mxu0 %v10881_v16  ;;  %v10898_v1 = vld [vmem:[#allocation2 + $0xc8] sm:$0xff]   ;;  %v10901_v5 = vld [vmem:[%s16167_s1] ss:$16 sps:$4 sm:$0xff]   ;;  %v10907_v7 = vld [vmem:[%s16167_s1 + $0x24] ss:$16 sps:$4 sm:$0xff]  }
  0x34   :  { %1868 = vmatpush1.bf16.msra.mxu1 %v10882_v21  ;;  %1580 = vmatprep.subr.bf16.mxu0 %v11844_v3  ;;  %v10911_v9 = vld [vmem:[%s16167_s1 + $0x20] ss:$16 sps:$4 sm:$0xff]   ;;  %v10912_v10 = vld [vmem:[%s16167_s1 + $0x28] ss:$16 sps:$4 sm:$0xff]   ;;  %v10913_v11 = vld [vmem:[%s16167_s1 + $0x44] ss:$16 sps:$4 sm:$0xff]  }
  0x35   :  { %1869 = vmatprep.subr.bf16.mxu1 %v11844_v3  ;;  %v10915_v12 = vld [vmem:[%s16167_s1 + $0x4c] ss:$16 sps:$4 sm:$0xff]   ;;  %v10917_v13 = vld [vmem:[%s16167_s1 + $0x40] ss:$16 sps:$4 sm:$0xff]   ;;  %v10918_v14 = vld [vmem:[%s16167_s1 + $0x48] ss:$16 sps:$4 sm:$0xff]  }
  0x36   :  { %v10899_v2 = vld [vmem:[#allocation2 + $0x40] sm:$0xff]   ;;  %v10921_v16 = vld [vmem:[%s16167_s1 + $0x6c] ss:$16 sps:$4 sm:$0xff]   ;;  %v10924_v18 = vld [vmem:[%s16167_s1 + $0x68] ss:$16 sps:$4 sm:$0xff]  }
  0x37   :  { %1581 = vmatpush1.bf16.msra.mxu0 %v10883_v42  ;;  %v10919_v15 = vld [vmem:[%s16167_s1 + $0x64] ss:$16 sps:$4 sm:$0xff]   ;;  %v10923_v17 = vld [vmem:[%s16167_s1 + $0x60] ss:$16 sps:$4 sm:$0xff]   ;;  %v10927_v20 = vld [vmem:[%s16167_s1 + $0x8c] ss:$16 sps:$4 sm:$0xff]  }
  0x38   :  { %1870 = vmatpush1.bf16.msra.mxu1 %v10884_v43  ;;  %1582 = vmatprep.subr.bf16.mxu0 %v11844_v3  ;;  %v10900_v4 = vld [vmem:[#allocation2 + $0xc0] sm:$0xff]   ;;  %v10930_v22 = vld [vmem:[%s16167_s1 + $0x88] ss:$16 sps:$4 sm:$0xff]   ;;  %v10933_v24 = vld [vmem:[%s16167_s1 + $0xac] ss:$16 sps:$4 sm:$0xff]  }
  0x39   :  { %1871 = vmatprep.subr.bf16.mxu1 %v11844_v3  ;;  %v10925_v19 = vld [vmem:[%s16167_s1 + $0x84] ss:$16 sps:$4 sm:$0xff]   ;;  %v10929_v21 = vld [vmem:[%s16167_s1 + $0x80] ss:$16 sps:$4 sm:$0xff]   ;;  %v10936_v26 = vld [vmem:[%s16167_s1 + $0xa8] ss:$16 sps:$4 sm:$0xff]  }
  0x3a   :  { %v10931_v23 = vld [vmem:[%s16167_s1 + $0xa4] ss:$16 sps:$4 sm:$0xff]   ;;  %v10935_v25 = vld [vmem:[%s16167_s1 + $0xa0] ss:$16 sps:$4 sm:$0xff]   ;;  %v10939_v28 = vld [vmem:[%s16167_s1 + $0xcc] ss:$16 sps:$4 sm:$0xff]  }
  0x3b   :  { %1583 = vmatpush2.bf16.msra.mxu0 %v10885_v44  ;;  %v10937_v27 = vld [vmem:[%s16167_s1 + $0xc4] ss:$16 sps:$4 sm:$0xff]   ;;  %v10941_v29 = vld [vmem:[%s16167_s1 + $0xc0] ss:$16 sps:$4 sm:$0xff]   ;;  %v10942_v30 = vld [vmem:[%s16167_s1 + $0xc8] ss:$16 sps:$4 sm:$0xff]  }
  0x3c   :  { %1872 = vmatpush2.bf16.msra.mxu1 %v10886_v45  ;;  %1584 = vmatprep.subr.bf16.mxu0 %v11844_v3  ;;  %v10943_v31 = vld [vmem:[%s16167_s1 + $0xe4] ss:$16 sps:$4 sm:$0xff]   ;;  %v10945_v32 = vld [vmem:[%s16167_s1 + $0xec] ss:$16 sps:$4 sm:$0xff]   ;;  %v10947_v33 = vld [vmem:[%s16167_s1 + $0xe0] ss:$16 sps:$4 sm:$0xff]  }
  0x3d   :  { %1873 = vmatprep.subr.bf16.mxu1 %v11844_v3  ;;  %v10948_v34 = vld [vmem:[%s16167_s1 + $0xe8] ss:$16 sps:$4 sm:$0xff]   ;;  %v10949_v35 = vld [vmem:[%s16167_s1 + $0x104] ss:$16 sps:$4 sm:$0xff]   ;;  %v10951_v36 = vld [vmem:[%s16167_s1 + $0x10c] ss:$16 sps:$4 sm:$0xff]  }
  0x3e   :  { %v10953_v37 = vld [vmem:[%s16167_s1 + $0x100] ss:$16 sps:$4 sm:$0xff]   ;;  %v10954_v38 = vld [vmem:[%s16167_s1 + $0x108] ss:$16 sps:$4 sm:$0xff]   ;;  %v10955_v39 = vld [vmem:[%s16167_s1 + $0x124] ss:$16 sps:$4 sm:$0xff]  }
  0x3f   :  { %1585 = vmatpush2.bf16.msra.mxu0 %v10887_v46  ;;  %v10957_v40 = vld [vmem:[%s16167_s1 + $0x12c] ss:$16 sps:$4 sm:$0xff]   ;;  %v10959_v41 = vld [vmem:[%s16167_s1 + $0x120] ss:$16 sps:$4 sm:$0xff]   ;;  %v10960_v42 = vld [vmem:[%s16167_s1 + $0x128] ss:$16 sps:$4 sm:$0xff]  }
  0x40   :  { %1874 = vmatpush2.bf16.msra.mxu1 %v10888_v47  ;;  %1586 = vmatprep.subr.bf16.mxu0 %v11844_v3  ;;  %v10961_v43 = vld [vmem:[%s16167_s1 + $0x144] ss:$16 sps:$4 sm:$0xff]   ;;  %v10963_v44 = vld [vmem:[%s16167_s1 + $0x14c] ss:$16 sps:$4 sm:$0xff]   ;;  %v10965_v45 = vld [vmem:[%s16167_s1 + $0x140] ss:$16 sps:$4 sm:$0xff]  }
  0x41   :  { %1875 = vmatprep.subr.bf16.mxu1 %v11844_v3  ;;  %v10966_v46 = vld [vmem:[%s16167_s1 + $0x148] ss:$16 sps:$4 sm:$0xff]   ;;  %v10967_v47 = vld [vmem:[%s16167_s1 + $0x164] ss:$16 sps:$4 sm:$0xff]   ;;  %v10975_v52 = vld [vmem:[%s16167_s1 + $0x18c] ss:$16 sps:$4 sm:$0xff]  }
  0x42   :  { %v10972_v50 = vld [vmem:[%s16167_s1 + $0x168] ss:$16 sps:$4 sm:$0xff]   ;;  %v10973_v51 = vld [vmem:[%s16167_s1 + $0x184] ss:$16 sps:$4 sm:$0xff]   ;;  %v10977_v53 = vld [vmem:[%s16167_s1 + $0x180] ss:$16 sps:$4 sm:$0xff]  }
  0x43   :  { %1587 = vmatpush2.bf16.msra.mxu0 %v10889_v48  ;;  %v10969_v48 = vld [vmem:[%s16167_s1 + $0x16c] ss:$16 sps:$4 sm:$0xff]   ;;  %v10978_v54 = vld [vmem:[%s16167_s1 + $0x188] ss:$16 sps:$4 sm:$0xff]   ;;  %v10983_v57 = vld [vmem:[%s16167_s1 + $0x1a0] ss:$16 sps:$4 sm:$0xff]  }
  0x44   :  { %1876 = vmatpush2.bf16.msra.mxu1 %v10890_v49  ;;  %1588 = vmatprep.subr.bf16.mxu0 %v11844_v3  ;;  %v10971_v49 = vld [vmem:[%s16167_s1 + $0x160] ss:$16 sps:$4 sm:$0xff]   ;;  %v10981_v56 = vld [vmem:[%s16167_s1 + $0x1ac] ss:$16 sps:$4 sm:$0xff]   ;;  %v10985_v59 = vld [vmem:[%s16167_s1 + $0x1c4] ss:$16 sps:$4 sm:$0xff]  }
  0x45   :  { %1877 = vmatprep.subr.bf16.mxu1 %v11844_v3 }
  0x47   :  { %1589 = vmatpush2.bf16.msra.mxu0 %v10891_v55  ;;  %v10979_v55 = vld [vmem:[%s16167_s1 + $0x1a4] ss:$16 sps:$4 sm:$0xff]  }
  0x48   :  { %1878 = vmatpush2.bf16.msra.mxu1 %v10892_v58  ;;  %1590 = vmatprep.subr.bf16.mxu0 %v11844_v3  ;;  %v10984_v58 = vld [vmem:[%s16167_s1 + $0x1a8] ss:$16 sps:$4 sm:$0xff]  }
  0x49   :  { %1879 = vmatprep.subr.bf16.mxu1 %v11844_v3 }
  0x4b   :  { %1591 = vmatpush2.bf16.msra.mxu0 %v10893_v60  ;;  %v10987_v60 = vld [vmem:[%s16167_s1 + $0x1cc] ss:$16 sps:$4 sm:$0xff]  }
  0x4c   :  { %1880 = vmatpush2.bf16.msra.mxu1 %v10894_v61  ;;  %1592 = vmatprep.subr.bf16.mxu0 %v11844_v3  ;;  %v10989_v61 = vld [vmem:[%s16167_s1 + $0x1c0] ss:$16 sps:$4 sm:$0xff]  }
  0x4d   :  { %1881 = vmatprep.subr.bf16.mxu1 %v11844_v3 }
  0x4f   :  { %1593 = vmatpush2.bf16.msra.mxu0 %v10895_v62  ;;  %v10990_v62 = vld [vmem:[%s16167_s1 + $0x1c8] ss:$16 sps:$4 sm:$0xff]  }
  0x50   :  { %1882 = vmatpush2.bf16.msra.mxu1 %v10896_v63  ;;  %1594 = vmatprep.subr.bf16.mxu0 %v11844_v3  ;;  %v10991_v63 = vld [vmem:[%s16167_s1 + $0x1e4] ss:$16 sps:$4 sm:$0xff]  }
  0x51   :  { %1883 = vmatprep.subr.bf16.mxu1 %v11844_v3 }
  0x53   :  { %1595 = vmatpush2.bf16.msra.mxu0 %v10897_v0  ;;  %v10993_v0 = vld [vmem:[%s16167_s1 + $0x1ec] ss:$16 sps:$4 sm:$0xff]  }
  0x54   :  { %1884 = vmatpush2.bf16.msra.mxu1 %v10898_v1  ;;  %1596 = vmatprep.subr.bf16.mxu0 %v11844_v3  ;;  %v10995_v1 = vld [vmem:[%s16167_s1 + $0x1e0] ss:$16 sps:$4 sm:$0xff]  }
  0x55   :  { %1885 = vmatprep.subr.bf16.mxu1 %v11844_v3 }
  0x57   :  { %1597 = vmatpush2.bf16.msra.mxu0 %v10899_v2  ;;  %v10996_v2 = vld [vmem:[%s16167_s1 + $0x1e8] ss:$16 sps:$4 sm:$0xff]  }
  0x58   :  { %1886 = vmatpush2.bf16.msra.mxu1 %v10900_v4  ;;  %3746 = vmatprep.subr.bf16.mxu0 %v11844_v3  ;;  %v10997_v4 = vld [vmem:[%s16167_s1 + $0x204] ss:$16 sps:$4 sm:$0xff]  }
  0x59   :  { %4035 = vmatprep.subr.bf16.mxu1 %v11844_v3 }
  0x5a   :  { %1599 = vmatmul.mubr.bf16.vlgmr.msra.gmra.mxu0 %v10901_v5  ;;  %v10999_v5 = vld [vmem:[%s16167_s1 + $0x20c] ss:$16 sps:$4 sm:$0xff]  }
  0x5b   :  { %1888 = vmatmul.mubr.bf16.vlgmr.msra.gmra.mxu1 %v10904_v6  ;;  %1606 = vmatprep.mubr.bf16.mxu0 %v10907_v7  ;;  %v11001_v6 = vld [vmem:[%s16167_s1 + $0x200] ss:$16 sps:$4 sm:$0xff]   ;;  %v11002_v7 = vld [vmem:[%s16167_s1 + $0x208] ss:$16 sps:$4 sm:$0xff]  }
  0x5c   :  { %1895 = vmatprep.mubr.bf16.mxu1 %v10909_v8  ;;  %v11003_v8 = vld [vmem:[%s16167_s1 + $0x224] ss:$16 sps:$4 sm:$0xff]  }
  0x62   :  { %1607 = vmatmul.mubr.bf16.gmra.mxu0 %v10911_v9  ;;  %v11005_v9 = vld [vmem:[%s16167_s1 + $0x22c] ss:$16 sps:$4 sm:$0xff]  }
  0x63   :  { %1896 = vmatmul.mubr.bf16.gmra.mxu1 %v10912_v10  ;;  %1614 = vmatprep.mubr.bf16.mxu0 %v10913_v11  ;;  %v11007_v10 = vld [vmem:[%s16167_s1 + $0x220] ss:$16 sps:$4 sm:$0xff]   ;;  %v11008_v11 = vld [vmem:[%s16167_s1 + $0x228] ss:$16 sps:$4 sm:$0xff]  }
  0x64   :  { %1903 = vmatprep.mubr.bf16.mxu1 %v10915_v12  ;;  %v11009_v12 = vld [vmem:[%s16167_s1 + $0x244] ss:$16 sps:$4 sm:$0xff]  }
  0x6a   :  { %1615 = vmatmul.mubr.bf16.gmra.mxu0 %v10917_v13  ;;  %v11011_v13 = vld [vmem:[%s16167_s1 + $0x24c] ss:$16 sps:$4 sm:$0xff]  }
  0x6b   :  { %1904 = vmatmul.mubr.bf16.gmra.mxu1 %v10918_v14  ;;  %1622 = vmatprep.mubr.bf16.mxu0 %v10919_v15  ;;  %v11013_v14 = vld [vmem:[%s16167_s1 + $0x240] ss:$16 sps:$4 sm:$0xff]   ;;  %v11014_v15 = vld [vmem:[%s16167_s1 + $0x248] ss:$16 sps:$4 sm:$0xff]  }
  0x6c   :  { %1911 = vmatprep.mubr.bf16.mxu1 %v10921_v16  ;;  %v11015_v16 = vld [vmem:[%s16167_s1 + $0x264] ss:$16 sps:$4 sm:$0xff]  }
  0x72   :  { %1623 = vmatmul.mubr.bf16.gmra.mxu0 %v10923_v17  ;;  %v11017_v17 = vld [vmem:[%s16167_s1 + $0x26c] ss:$16 sps:$4 sm:$0xff]  }
  0x73   :  { %1912 = vmatmul.mubr.bf16.gmra.mxu1 %v10924_v18  ;;  %1630 = vmatprep.mubr.bf16.mxu0 %v10925_v19  ;;  %v11019_v18 = vld [vmem:[%s16167_s1 + $0x260] ss:$16 sps:$4 sm:$0xff]   ;;  %v11020_v19 = vld [vmem:[%s16167_s1 + $0x268] ss:$16 sps:$4 sm:$0xff]  }
  0x74   :  { %1919 = vmatprep.mubr.bf16.mxu1 %v10927_v20  ;;  %v11021_v20 = vld [vmem:[%s16167_s1 + $0x284] ss:$16 sps:$4 sm:$0xff]  }
  0x7a   :  { %1631 = vmatmul.mubr.bf16.gmra.mxu0 %v10929_v21  ;;  %v11023_v21 = vld [vmem:[%s16167_s1 + $0x28c] ss:$16 sps:$4 sm:$0xff]  }
  0x7b   :  { %1920 = vmatmul.mubr.bf16.gmra.mxu1 %v10930_v22  ;;  %1638 = vmatprep.mubr.bf16.mxu0 %v10931_v23  ;;  %v11025_v22 = vld [vmem:[%s16167_s1 + $0x280] ss:$16 sps:$4 sm:$0xff]   ;;  %v11026_v23 = vld [vmem:[%s16167_s1 + $0x288] ss:$16 sps:$4 sm:$0xff]  }
  0x7c   :  { %1927 = vmatprep.mubr.bf16.mxu1 %v10933_v24  ;;  %v11027_v24 = vld [vmem:[%s16167_s1 + $0x2a4] ss:$16 sps:$4 sm:$0xff]  }
  0x82   :  { %1639 = vmatmul.mubr.bf16.gmra.mxu0 %v10935_v25  ;;  %v11029_v25 = vld [vmem:[%s16167_s1 + $0x2ac] ss:$16 sps:$4 sm:$0xff]  }
  0x83   :  { %1928 = vmatmul.mubr.bf16.gmra.mxu1 %v10936_v26  ;;  %1646 = vmatprep.mubr.bf16.mxu0 %v10937_v27  ;;  %v11031_v26 = vld [vmem:[%s16167_s1 + $0x2a0] ss:$16 sps:$4 sm:$0xff]   ;;  %v11032_v27 = vld [vmem:[%s16167_s1 + $0x2a8] ss:$16 sps:$4 sm:$0xff]  }
  0x84   :  { %1935 = vmatprep.mubr.bf16.mxu1 %v10939_v28  ;;  %v11033_v28 = vld [vmem:[%s16167_s1 + $0x2c4] ss:$16 sps:$4 sm:$0xff]  }
  0x8a   :  { %1647 = vmatmul.mubr.bf16.gmra.mxu0 %v10941_v29  ;;  %v11035_v29 = vld [vmem:[%s16167_s1 + $0x2cc] ss:$16 sps:$4 sm:$0xff]  }
  0x8b   :  { %1936 = vmatmul.mubr.bf16.gmra.mxu1 %v10942_v30  ;;  %1654 = vmatprep.mubr.bf16.mxu0 %v10943_v31  ;;  %v11037_v30 = vld [vmem:[%s16167_s1 + $0x2c0] ss:$16 sps:$4 sm:$0xff]   ;;  %v11038_v31 = vld [vmem:[%s16167_s1 + $0x2c8] ss:$16 sps:$4 sm:$0xff]  }
  0x8c   :  { %1943 = vmatprep.mubr.bf16.mxu1 %v10945_v32  ;;  %v11039_v32 = vld [vmem:[%s16167_s1 + $0x2e4] ss:$16 sps:$4 sm:$0xff]  }
  0x92   :  { %1655 = vmatmul.mubr.bf16.gmra.mxu0 %v10947_v33  ;;  %v11041_v33 = vld [vmem:[%s16167_s1 + $0x2ec] ss:$16 sps:$4 sm:$0xff]  }
  0x93   :  { %1944 = vmatmul.mubr.bf16.gmra.mxu1 %v10948_v34  ;;  %1662 = vmatprep.mubr.bf16.mxu0 %v10949_v35  ;;  %v11043_v34 = vld [vmem:[%s16167_s1 + $0x2e0] ss:$16 sps:$4 sm:$0xff]   ;;  %v11044_v35 = vld [vmem:[%s16167_s1 + $0x2e8] ss:$16 sps:$4 sm:$0xff]  }
  0x94   :  { %1951 = vmatprep.mubr.bf16.mxu1 %v10951_v36  ;;  %v11045_v36 = vld [vmem:[%s16167_s1 + $0x304] ss:$16 sps:$4 sm:$0xff]  }
  0x9a   :  { %1663 = vmatmul.mubr.bf16.gmra.mxu0 %v10953_v37  ;;  %v11047_v37 = vld [vmem:[%s16167_s1 + $0x30c] ss:$16 sps:$4 sm:$0xff]  }
  0x9b   :  { %1952 = vmatmul.mubr.bf16.gmra.mxu1 %v10954_v38  ;;  %1670 = vmatprep.mubr.bf16.mxu0 %v10955_v39  ;;  %v11049_v38 = vld [vmem:[%s16167_s1 + $0x300] ss:$16 sps:$4 sm:$0xff]   ;;  %v11050_v39 = vld [vmem:[%s16167_s1 + $0x308] ss:$16 sps:$4 sm:$0xff]  }
  0x9c   :  { %1959 = vmatprep.mubr.bf16.mxu1 %v10957_v40  ;;  %v11051_v40 = vld [vmem:[%s16167_s1 + $0x324] ss:$16 sps:$4 sm:$0xff]  }
  0xa2   :  { %1671 = vmatmul.mubr.bf16.gmra.mxu0 %v10959_v41  ;;  %v11053_v41 = vld [vmem:[%s16167_s1 + $0x32c] ss:$16 sps:$4 sm:$0xff]  }
  0xa3   :  { %1960 = vmatmul.mubr.bf16.gmra.mxu1 %v10960_v42  ;;  %1678 = vmatprep.mubr.bf16.mxu0 %v10961_v43  ;;  %v12400_v42 = vstv %s92_s5 }
  0xa4   :  { %1967 = vmatprep.mubr.bf16.mxu1 %v10963_v44 }
  0xaa   :  { %1679 = vmatmul.mubr.bf16.gmra.mxu0 %v10965_v45  ;;  %v12402_v45 = vstv %s9171_s6 }
  0xab   :  { %1968 = vmatmul.mubr.bf16.gmra.mxu1 %v10966_v46  ;;  %1686 = vmatprep.mubr.bf16.mxu0 %v10967_v47  ;;  %v11765_v46 = vld [vmem:[%s16168_s2] sm:$0xff] }
  0xac   :  { %1975 = vmatprep.mubr.bf16.mxu1 %v10969_v48  ;;  %v94_v47 = vmul.f32 %v11765_v46, %v12400_v42 }
  0xb2   :  { %1687 = vmatmul.mubr.bf16.gmra.mxu0 %v10971_v49 }
  0xb3   :  { %1976 = vmatmul.mubr.bf16.gmra.mxu1 %v10972_v50  ;;  %1694 = vmatprep.mubr.bf16.mxu0 %v10973_v51 }
  0xb4   :  { %1983 = vmatprep.mubr.bf16.mxu1 %v10975_v52 }
  0xba   :  { %1695 = vmatmul.mubr.bf16.gmra.mxu0 %v10977_v53  ;;  %v11055_v53 = vld [vmem:[%s16167_s1 + $0x320] ss:$16 sps:$4 sm:$0xff]  }
  0xbb   :  { %1984 = vmatmul.mubr.bf16.gmra.mxu1 %v10978_v54  ;;  %1702 = vmatprep.mubr.bf16.mxu0 %v10979_v55  ;;  %v11056_v55 = vld [vmem:[%s16167_s1 + $0x328] ss:$16 sps:$4 sm:$0xff]  }
  0xbc   :  { %1991 = vmatprep.mubr.bf16.mxu1 %v10981_v56  ;;  %v11057_v56 = vld [vmem:[%s16167_s1 + $0x344] ss:$16 sps:$4 sm:$0xff]  }
  0xc2   :  { %1703 = vmatmul.mubr.bf16.gmra.mxu0 %v10983_v57 }
  0xc3   :  { %1992 = vmatmul.mubr.bf16.gmra.mxu1 %v10984_v58  ;;  %1710 = vmatprep.mubr.bf16.mxu0 %v10985_v59  ;;  %v11766_v58 = vld [vmem:[%s16168_s2 + $0x8] sm:$0xff] }
  0xc4   :  { %1999 = vmatprep.mubr.bf16.mxu1 %v10987_v60  ;;  %v95_v59 = vmul.f32 %v11766_v58, %v12400_v42 }
  0xca   :  { %1711 = vmatmul.mubr.bf16.gmra.mxu0 %v10989_v61 }
  0xcb   :  { %2000 = vmatmul.mubr.bf16.gmra.mxu1 %v10990_v62  ;;  %1718 = vmatprep.mubr.bf16.mxu0 %v10991_v63  ;;  %v11059_v62 = vld [vmem:[%s16167_s1 + $0x34c] ss:$16 sps:$4 sm:$0xff]  }
  0xcc   :  { %2007 = vmatprep.mubr.bf16.mxu1 %v10993_v0 }
  0xd2   :  { %1719 = vmatmul.mubr.bf16.gmra.mxu0 %v10995_v1 }
  0xd3   :  { %2008 = vmatmul.mubr.bf16.gmra.mxu1 %v10996_v2  ;;  %1726 = vmatprep.mubr.bf16.mxu0 %v10997_v4 }
  0xd4   :  { %2015 = vmatprep.mubr.bf16.mxu1 %v10999_v5 }
  0xda   :  { %1727 = vmatmul.mubr.bf16.gmra.mxu0 %v11001_v6  ;;  %v11767_v6 = vld [vmem:[%s16168_s2 + $0x10] sm:$0xff] }
  0xdb   :  { %2016 = vmatmul.mubr.bf16.gmra.mxu1 %v11002_v7  ;;  %1734 = vmatprep.mubr.bf16.mxu0 %v11003_v8  ;;  %v96_v7 = vmul.f32 %v11767_v6, %v12400_v42 }
  0xdc   :  { %2023 = vmatprep.mubr.bf16.mxu1 %v11005_v9 }
  0xe2   :  { %1735 = vmatmul.mubr.bf16.gmra.mxu0 %v11007_v10 }
  0xe3   :  { %2024 = vmatmul.mubr.bf16.gmra.mxu1 %v11008_v11  ;;  %1742 = vmatprep.mubr.bf16.mxu0 %v11009_v12 }
  0xe4   :  { %2031 = vmatprep.mubr.bf16.mxu1 %v11011_v13  ;;  %v11061_v13 = vld [vmem:[%s16167_s1 + $0x340] ss:$16 sps:$4 sm:$0xff]  }
  0xea   :  { %1743 = vmatmul.mubr.bf16.gmra.mxu0 %v11013_v14 }
  0xeb   :  { %2032 = vmatmul.mubr.bf16.gmra.mxu1 %v11014_v15  ;;  %1750 = vmatprep.mubr.bf16.mxu0 %v11015_v16  ;;  %v11062_v15 = vld [vmem:[%s16167_s1 + $0x348] ss:$16 sps:$4 sm:$0xff]   ;;  %v11063_v16 = vld [vmem:[%s16167_s1 + $0x364] ss:$16 sps:$4 sm:$0xff]  }
  0xec   :  { %2039 = vmatprep.mubr.bf16.mxu1 %v11017_v17 }
  0xf2   :  { %1751 = vmatmul.mubr.bf16.gmra.mxu0 %v11019_v18  ;;  %v11768_v18 = vld [vmem:[%s16168_s2 + $0x18] sm:$0xff] }
  0xf3   :  { %2040 = vmatmul.mubr.bf16.gmra.mxu1 %v11020_v19  ;;  %1758 = vmatprep.mubr.bf16.mxu0 %v11021_v20  ;;  %v97_v19 = vmul.f32 %v11768_v18, %v12400_v42 }
  0xf4   :  { %2047 = vmatprep.mubr.bf16.mxu1 %v11023_v21 }
  0xfa   :  { %1759 = vmatmul.mubr.bf16.gmra.mxu0 %v11025_v22  ;;  %v11065_v22 = vld [vmem:[%s16167_s1 + $0x36c] ss:$16 sps:$4 sm:$0xff]  }
  0xfb   :  { %2048 = vmatmul.mubr.bf16.gmra.mxu1 %v11026_v23  ;;  %1766 = vmatprep.mubr.bf16.mxu0 %v11027_v24 }
  0xfc   :  { %2055 = vmatprep.mubr.bf16.mxu1 %v11029_v25 }
 0x102   :  { %1767 = vmatmul.mubr.bf16.gmra.mxu0 %v11031_v26 }
 0x103   :  { %2056 = vmatmul.mubr.bf16.gmra.mxu1 %v11032_v27  ;;  %1774 = vmatprep.mubr.bf16.mxu0 %v11033_v28 }
 0x104   :  { %2063 = vmatprep.mubr.bf16.mxu1 %v11035_v29  ;;  %v11769_v29 = vld [vmem:[%s16168_s2 + $0x20] sm:$0xff] }
 0x10a   :  { %1775 = vmatmul.mubr.bf16.gmra.mxu0 %v11037_v30  ;;  %v98_v30 = vmul.f32 %v11769_v29, %v12400_v42 }
 0x10b   :  { %2064 = vmatmul.mubr.bf16.gmra.mxu1 %v11038_v31  ;;  %1782 = vmatprep.mubr.bf16.mxu0 %v11039_v32 }
 0x10c   :  { %2071 = vmatprep.mubr.bf16.mxu1 %v11041_v33 }
 0x112   :  { %1783 = vmatmul.mubr.bf16.gmra.mxu0 %v11043_v34 }
 0x113   :  { %2072 = vmatmul.mubr.bf16.gmra.mxu1 %v11044_v35  ;;  %1790 = vmatprep.mubr.bf16.mxu0 %v11045_v36  ;;  %v11067_v36 = vld [vmem:[%s16167_s1 + $0x360] ss:$16 sps:$4 sm:$0xff]  }
 0x114   :  { %2079 = vmatprep.mubr.bf16.mxu1 %v11047_v37 }
 0x11a   :  { %v1600_v43 = vpop.f32.mrf.mxu0  ;;  %1791 = vmatmul.mubr.bf16.gmra.mxu0 %v11049_v38  ;;  %v11068_v38 = vld [vmem:[%s16167_s1 + $0x368] ss:$16 sps:$4 sm:$0xff]  }
 0x11b   :  { %v1889_v44 = vpop.f32.mrf.mxu1  ;;  %2080 = vmatmul.mubr.bf16.gmra.mxu1 %v11050_v39  ;;  %1798 = vmatprep.mubr.bf16.mxu0 %v11051_v40  ;;  %v11071_v39 = vld [vmem:[%s16167_s1 + $0x384] ss:$16 sps:$4 sm:$0xff]  }
 0x11c   :  { %v1890_v48 = vadd.f32 %v1889_v44, %v1600_v43  ;;  %v1602_v49 = vpop.f32.mrf.mxu0  ;;  %2087 = vmatprep.mubr.bf16.mxu1 %v11053_v41  ;;  %v11770_v41 = vld [vmem:[%s16168_s2 + $0x28] sm:$0xff] }
 0x11d   :  { %v1891_v50 = vpop.f32.mrf.mxu1  ;;  %v99_v43 = vmul.f32 %v11770_v41, %v12400_v42 }
 0x11e   :  { %v2210_v51 = vmul.f32 %v12402_v45, %v1890_v48  ;;  %v1603_v52 = vpop.f32.mrf.mxu0 }
 0x11f   :  { %v1892_v54 = vpop.f32.mrf.mxu1 }
 0x120   :  { %v2274_v57 = vadd.f32 %v2210_v51, %v94_v47  ;;  %v1893_v60 = vadd.f32 %v1892_v54, %v1603_v52  ;;  %v1605_v61 = vpop.f32.mrf.mxu0  ;;  %v11074_v47 = vld [vmem:[%s16167_s1 + $0x38c] ss:$16 sps:$4 sm:$0xff]   ;;  %v11771_v54 = vld [vmem:[%s16168_s2 + $0x30] sm:$0xff] }
 0x121   :  { %v1894_v63 = vpop.f32.mrf.mxu1  ;;  %v11069_v61 = vld [vmem:[%s16167_s1 + $0x380] ss:$16 sps:$4 sm:$0xff]  }
 0x122   :  { %2338 = vst [vmem:[%s16169_s3] sm:$0xff] %v2274_v57  ;;  %v2211_v0 = vmul.f32 %v12402_v45, %v1893_v60  ;;  %v10266_v1 = vpack.c.bf16 %v1893_v60, %v1890_v48  ;;  %v1608_v2 = vpop.f32.mrf.mxu0  ;;  %1799 = vmatmul.mubr.bf16.gmra.mxu0 %v11055_v53  ;;  %v11072_v63 = vld [vmem:[%s16167_s1 + $0x388] ss:$16 sps:$4 sm:$0xff]  }
 0x123   :  { %v1897_v4 = vpop.f32.mrf.mxu1  ;;  %2088 = vmatmul.mubr.bf16.gmra.mxu1 %v11056_v55  ;;  %1806 = vmatprep.mubr.bf16.mxu0 %v11057_v56  ;;  %v100_v55 = vmul.f32 %v11771_v54, %v12400_v42 }
 0x124   :  { %v2275_v5 = vadd.f32 %v2211_v0, %v95_v59  ;;  %10267 = vst [vmem:[#allocation2] sm:$0xff] %v10266_v1   ;;  %v1898_v8 = vadd.f32 %v1897_v4, %v1608_v2  ;;  %v1610_v9 = vpop.f32.mrf.mxu0  ;;  %2095 = vmatprep.mubr.bf16.mxu1 %v11059_v62  ;;  %v11077_v0 = vld [vmem:[%s16167_s1 + $0x3a4] ss:$16 sps:$4 sm:$0xff]   ;;  %v11772_v2 = vld [vmem:[%s16168_s2 + $0x38] sm:$0xff] }
 0x125   :  { %v1899_v10 = vpop.f32.mrf.mxu1  ;;  %v101_v4 = vmul.f32 %v11772_v2, %v12400_v42 }
 0x126   :  { %2339 = vst [vmem:[%s16169_s3 + $0x8] sm:$0xff] %v2275_v5  ;;  %v2212_v11 = vmul.f32 %v12402_v45, %v1898_v8  ;;  %v1611_v12 = vpop.f32.mrf.mxu0 }
 0x127   :  { %v1900_v14 = vpop.f32.mrf.mxu1 }
 0x128   :  { %v2276_v17 = vadd.f32 %v2212_v11, %v96_v7  ;;  %v1901_v20 = vadd.f32 %v1900_v14, %v1611_v12  ;;  %v1613_v21 = vpop.f32.mrf.mxu0  ;;  %v11080_v7 = vld [vmem:[%s16167_s1 + $0x3ac] ss:$16 sps:$4 sm:$0xff]   ;;  %v11773_v14 = vld [vmem:[%s16168_s2 + $0x40] sm:$0xff] }
 0x129   :  { %v1902_v23 = vpop.f32.mrf.mxu1  ;;  %v11075_v21 = vld [vmem:[%s16167_s1 + $0x3a0] ss:$16 sps:$4 sm:$0xff]  }
 0x12a   :  { %2340 = vst [vmem:[%s16169_s3 + $0x10] sm:$0xff] %v2276_v17  ;;  %v2213_v24 = vmul.f32 %v12402_v45, %v1901_v20  ;;  %v10271_v25 = vpack.c.bf16 %v1901_v20, %v1898_v8  ;;  %v1616_v26 = vpop.f32.mrf.mxu0  ;;  %1807 = vmatmul.mubr.bf16.gmra.mxu0 %v11061_v13  ;;  %v11078_v23 = vld [vmem:[%s16167_s1 + $0x3a8] ss:$16 sps:$4 sm:$0xff]  }
 0x12b   :  { %v1905_v27 = vpop.f32.mrf.mxu1  ;;  %2096 = vmatmul.mubr.bf16.gmra.mxu1 %v11062_v15  ;;  %1814 = vmatprep.mubr.bf16.mxu0 %v11063_v16  ;;  %v102_v15 = vmul.f32 %v11773_v14, %v12400_v42 }
 0x12c   :  { %v2277_v28 = vadd.f32 %v2213_v24, %v97_v19  ;;  %10774 = vst [vmem:[#allocation2 + $0x8] sm:$0xff] %v10271_v25   ;;  %v1906_v31 = vadd.f32 %v1905_v27, %v1616_v26  ;;  %v1618_v32 = vpop.f32.mrf.mxu0  ;;  %2103 = vmatprep.mubr.bf16.mxu1 %v11065_v22  ;;  %v11083_v24 = vld [vmem:[%s16167_s1 + $0x3c4] ss:$16 sps:$4 sm:$0xff]   ;;  %v11774_v26 = vld [vmem:[%s16168_s2 + $0x48] sm:$0xff] }
 0x12d   :  { %v1907_v33 = vpop.f32.mrf.mxu1  ;;  %v103_v27 = vmul.f32 %v11774_v26, %v12400_v42 }
 0x12e   :  { %2341 = vst [vmem:[%s16169_s3 + $0x18] sm:$0xff] %v2277_v28  ;;  %v2214_v34 = vmul.f32 %v12402_v45, %v1906_v31  ;;  %v1619_v35 = vpop.f32.mrf.mxu0 }
 0x12f   :  { %v1908_v37 = vpop.f32.mrf.mxu1 }
 0x130   :  { %v2278_v40 = vadd.f32 %v2214_v34, %v98_v30  ;;  %v1909_v44 = vadd.f32 %v1908_v37, %v1619_v35  ;;  %v1621_v46 = vpop.f32.mrf.mxu0  ;;  %v11086_v30 = vld [vmem:[%s16167_s1 + $0x3cc] ss:$16 sps:$4 sm:$0xff]   ;;  %v11775_v37 = vld [vmem:[%s16168_s2 + $0x50] sm:$0xff] }
 0x131   :  { %v1910_v48 = vpop.f32.mrf.mxu1  ;;  %v11081_v46 = vld [vmem:[%s16167_s1 + $0x3c0] ss:$16 sps:$4 sm:$0xff]  }
 0x132   :  { %2342 = vst [vmem:[%s16169_s3 + $0x20] sm:$0xff] %v2278_v40  ;;  %v2215_v49 = vmul.f32 %v12402_v45, %v1909_v44  ;;  %v10276_v50 = vpack.c.bf16 %v1909_v44, %v1906_v31  ;;  %v1624_v51 = vpop.f32.mrf.mxu0  ;;  %1815 = vmatmul.mubr.bf16.gmra.mxu0 %v11067_v36  ;;  %v11084_v48 = vld [vmem:[%s16167_s1 + $0x3c8] ss:$16 sps:$4 sm:$0xff]  }
 0x133   :  { %v1913_v52 = vpop.f32.mrf.mxu1  ;;  %2104 = vmatmul.mubr.bf16.gmra.mxu1 %v11068_v38  ;;  %1822 = vmatprep.mubr.bf16.mxu0 %v11071_v39  ;;  %v104_v38 = vmul.f32 %v11775_v37, %v12400_v42 }
 0x134   :  { %v2279_v53 = vadd.f32 %v2215_v49, %v99_v43  ;;  %10775 = vst [vmem:[#allocation2 + $0x10] sm:$0xff] %v10276_v50   ;;  %v1914_v56 = vadd.f32 %v1913_v52, %v1624_v51  ;;  %v1626_v57 = vpop.f32.mrf.mxu0  ;;  %2111 = vmatprep.mubr.bf16.mxu1 %v11074_v47  ;;  %v11089_v49 = vld [vmem:[%s16167_s1 + $0x3e4] ss:$16 sps:$4 sm:$0xff]   ;;  %v11776_v51 = vld [vmem:[%s16168_s2 + $0x58] sm:$0xff] }
 0x135   :  { %v1915_v58 = vpop.f32.mrf.mxu1  ;;  %v105_v52 = vmul.f32 %v11776_v51, %v12400_v42 }
 0x136   :  { %2343 = vst [vmem:[%s16169_s3 + $0x28] sm:$0xff] %v2279_v53  ;;  %v2216_v59 = vmul.f32 %v12402_v45, %v1914_v56  ;;  %v1627_v60 = vpop.f32.mrf.mxu0 }
 0x137   :  { %v1916_v62 = vpop.f32.mrf.mxu1 }
 0x138   :  { %v2280_v1 = vadd.f32 %v2216_v59, %v100_v55  ;;  %v1917_v5 = vadd.f32 %v1916_v62, %v1627_v60  ;;  %v1629_v6 = vpop.f32.mrf.mxu0  ;;  %v11092_v55 = vld [vmem:[%s16167_s1 + $0x3ec] ss:$16 sps:$4 sm:$0xff]   ;;  %v11777_v62 = vld [vmem:[%s16168_s2 + $0x60] sm:$0xff] }
 0x139   :  { %v1918_v8 = vpop.f32.mrf.mxu1  ;;  %v11087_v6 = vld [vmem:[%s16167_s1 + $0x3e0] ss:$16 sps:$4 sm:$0xff]  }
 0x13a   :  { %2344 = vst [vmem:[%s16169_s3 + $0x30] sm:$0xff] %v2280_v1  ;;  %v2217_v9 = vmul.f32 %v12402_v45, %v1917_v5  ;;  %v10281_v10 = vpack.c.bf16 %v1917_v5, %v1914_v56  ;;  %v1632_v11 = vpop.f32.mrf.mxu0  ;;  %1823 = vmatmul.mubr.bf16.gmra.mxu0 %v11069_v61  ;;  %v11090_v8 = vld [vmem:[%s16167_s1 + $0x3e8] ss:$16 sps:$4 sm:$0xff]  }
 0x13b   :  { %v1921_v12 = vpop.f32.mrf.mxu1  ;;  %2112 = vmatmul.mubr.bf16.gmra.mxu1 %v11072_v63  ;;  %1830 = vmatprep.mubr.bf16.mxu0 %v11077_v0  ;;  %v106_v63 = vmul.f32 %v11777_v62, %v12400_v42 }
 0x13c   :  { %v2281_v13 = vadd.f32 %v2217_v9, %v101_v4  ;;  %10776 = vst [vmem:[#allocation2 + $0x18] sm:$0xff] %v10281_v10   ;;  %v1922_v16 = vadd.f32 %v1921_v12, %v1632_v11  ;;  %v1634_v17 = vpop.f32.mrf.mxu0  ;;  %2119 = vmatprep.mubr.bf16.mxu1 %v11080_v7  ;;  %v11778_v10 = vld [vmem:[%s16168_s2 + $0x68] sm:$0xff] }
 0x13d   :  { %v1923_v18 = vpop.f32.mrf.mxu1  ;;  %v107_v11 = vmul.f32 %v11778_v10, %v12400_v42 }
 0x13e   :  { %2345 = vst [vmem:[%s16169_s3 + $0x38] sm:$0xff] %v2281_v13  ;;  %v2218_v19 = vmul.f32 %v12402_v45, %v1922_v16  ;;  %v1635_v20 = vpop.f32.mrf.mxu0 }
 0x13f   :  { %v1924_v22 = vpop.f32.mrf.mxu1 }
 0x140   :  { %v2282_v25 = vadd.f32 %v2218_v19, %v102_v15  ;;  %v1925_v28 = vadd.f32 %v1924_v22, %v1635_v20  ;;  %v1637_v29 = vpop.f32.mrf.mxu0  ;;  %v11779_v20 = vld [vmem:[%s16168_s2 + $0x70] sm:$0xff] }
 0x141   :  { %v1926_v31 = vpop.f32.mrf.mxu1  ;;  %v11780_v29 = vld [vmem:[%s16168_s2 + $0x78] sm:$0xff] }
 0x142   :  { %2346 = vst [vmem:[%s16169_s3 + $0x40] sm:$0xff] %v2282_v25  ;;  %v2219_v32 = vmul.f32 %v12402_v45, %v1925_v28  ;;  %v10286_v33 = vpack.c.bf16 %v1925_v28, %v1922_v16  ;;  %v1640_v34 = vpop.f32.mrf.mxu0  ;;  %1831 = vmatmul.mubr.bf16.gmra.mxu0 %v11075_v21  ;;  %v108_v21 = vmul.f32 %v11779_v20, %v12400_v42 }
 0x143   :  { %v1929_v35 = vpop.f32.mrf.mxu1  ;;  %2120 = vmatmul.mubr.bf16.gmra.mxu1 %v11078_v23  ;;  %1838 = vmatprep.mubr.bf16.mxu0 %v11083_v24 }
 0x144   :  { %v2283_v36 = vadd.f32 %v2219_v32, %v103_v27  ;;  %10777 = vst [vmem:[#allocation2 + $0x20] sm:$0xff] %v10286_v33   ;;  %v1930_v39 = vadd.f32 %v1929_v35, %v1640_v34  ;;  %v1642_v40 = vpop.f32.mrf.mxu0  ;;  %2127 = vmatprep.mubr.bf16.mxu1 %v11086_v30  ;;  %v109_v30 = vmul.f32 %v11780_v29, %v12400_v42  ;;  %v11786_v29 = vld [vmem:[%s16168_s2 + $0xa8] sm:$0xff] }
 0x145   :  { %v1931_v41 = vpop.f32.mrf.mxu1 }
 0x146   :  { %2347 = vst [vmem:[%s16169_s3 + $0x48] sm:$0xff] %v2283_v36  ;;  %v2220_v43 = vmul.f32 %v12402_v45, %v1930_v39  ;;  %v1643_v44 = vpop.f32.mrf.mxu0 }
 0x147   :  { %v1932_v47 = vpop.f32.mrf.mxu1 }
 0x148   :  { %v2284_v50 = vadd.f32 %v2220_v43, %v104_v38  ;;  %v1933_v53 = vadd.f32 %v1932_v47, %v1643_v44  ;;  %v1645_v54 = vpop.f32.mrf.mxu0 }
 0x149   :  { %v1934_v56 = vpop.f32.mrf.mxu1 }
 0x14a   :  { %2348 = vst [vmem:[%s16169_s3 + $0x50] sm:$0xff] %v2284_v50  ;;  %v2221_v57 = vmul.f32 %v12402_v45, %v1933_v53  ;;  %v10291_v58 = vpack.c.bf16 %v1933_v53, %v1930_v39  ;;  %v1648_v59 = vpop.f32.mrf.mxu0  ;;  %1839 = vmatmul.mubr.bf16.gmra.mxu0 %v11081_v46  ;;  %v11781_v39 = vld [vmem:[%s16168_s2 + $0x80] sm:$0xff]  ;;  %v11782_v50 = vld [vmem:[%s16168_s2 + $0x88] sm:$0xff] }
 0x14b   :  { %v1937_v60 = vpop.f32.mrf.mxu1  ;;  %2128 = vmatmul.mubr.bf16.gmra.mxu1 %v11084_v48  ;;  %1846 = vmatprep.mubr.bf16.mxu0 %v11089_v49  ;;  %v110_v40 = vmul.f32 %v11781_v39, %v12400_v42  ;;  %v111_v51 = vmul.f32 %v11782_v50, %v12400_v42  ;;  %v11098_v50 = vld [vmem:[#allocation2 + $0x10] sm:$0xff]  }
 0x14c   :  { %v2285_v61 = vadd.f32 %v2221_v57, %v105_v52  ;;  %10778 = vst [vmem:[#allocation2 + $0x28] sm:$0xff] %v10291_v58   ;;  %v1938_v0 = vadd.f32 %v1937_v60, %v1648_v59  ;;  %v1650_v1 = vpop.f32.mrf.mxu0  ;;  %2135 = vmatprep.mubr.bf16.mxu1 %v11092_v55 }
 0x14d   :  { %v1939_v2 = vpop.f32.mrf.mxu1 }
 0x14e   :  { %2349 = vst [vmem:[%s16169_s3 + $0x58] sm:$0xff] %v2285_v61  ;;  %v2222_v4 = vmul.f32 %v12402_v45, %v1938_v0  ;;  %v1651_v5 = vpop.f32.mrf.mxu0  ;;  %v11783_v61 = vld [vmem:[%s16168_s2 + $0x90] sm:$0xff] }
 0x14f   :  { %v1940_v7 = vpop.f32.mrf.mxu1  ;;  %v112_v62 = vmul.f32 %v11783_v61, %v12400_v42  ;;  %v11099_v61 = vld [vmem:[#allocation2 + $0x8] sm:$0xff]  }
 0x150   :  { %v2286_v9 = vadd.f32 %v2222_v4, %v106_v63  ;;  %v1941_v12 = vadd.f32 %v1940_v7, %v1651_v5  ;;  %v1653_v13 = vpop.f32.mrf.mxu0 }
 0x151   :  { %v1942_v14 = vpop.f32.mrf.mxu1 }
 0x152   :  { %2350 = vst [vmem:[%s16169_s3 + $0x60] sm:$0xff] %v2286_v9  ;;  %v2223_v15 = vmul.f32 %v12402_v45, %v1941_v12  ;;  %v10296_v16 = vpack.c.bf16 %v1941_v12, %v1938_v0  ;;  %v1656_v17 = vpop.f32.mrf.mxu0  ;;  %1847 = vmatmul.mubr.bf16.gmra.mxu0 %v11087_v6 }
 0x153   :  { %v1945_v18 = vpop.f32.mrf.mxu1  ;;  %2136 = vmatmul.mubr.bf16.gmra.mxu1 %v11090_v8  ;;  %v11784_v8 = vld [vmem:[%s16168_s2 + $0x98] sm:$0xff] }
 0x154   :  { %v2287_v19 = vadd.f32 %v2223_v15, %v107_v11  ;;  %10779 = vst [vmem:[#allocation2 + $0x30] sm:$0xff] %v10296_v16   ;;  %v1946_v22 = vadd.f32 %v1945_v18, %v1656_v17  ;;  %v1658_v23 = vpop.f32.mrf.mxu0  ;;  %v113_v9 = vmul.f32 %v11784_v8, %v12400_v42  ;;  %v11095_v17 = vld [vmem:[#allocation2 + $0x28] sm:$0xff]   ;;  %v11100_v8 = vld [vmem:[#allocation2] sm:$0xff]  }
 0x155   :  { %v1947_v24 = vpop.f32.mrf.mxu1 }
 0x156   :  { %2351 = vst [vmem:[%s16169_s3 + $0x68] sm:$0xff] %v2287_v19  ;;  %v2224_v25 = vmul.f32 %v12402_v45, %v1946_v22  ;;  %v1659_v26 = vpop.f32.mrf.mxu0  ;;  %v11785_v19 = vld [vmem:[%s16168_s2 + $0xa0] sm:$0xff] }
 0x157   :  { %v1948_v27 = vpop.f32.mrf.mxu1  ;;  %v114_v20 = vmul.f32 %v11785_v19, %v12400_v42 }
 0x158   :  { %v2288_v28 = vadd.f32 %v2224_v25, %v108_v21  ;;  %v1949_v31 = vadd.f32 %v1948_v27, %v1659_v26  ;;  %v1661_v32 = vpop.f32.mrf.mxu0  ;;  %v11096_v27 = vld [vmem:[#allocation2 + $0x20] sm:$0xff]  }
 0x159   :  { %v1950_v33 = vpop.f32.mrf.mxu1 }
 0x15a   :  { %2352 = vst [vmem:[%s16169_s3 + $0x70] sm:$0xff] %v2288_v28  ;;  %v2225_v34 = vmul.f32 %v12402_v45, %v1949_v31  ;;  %v10301_v35 = vpack.c.bf16 %v1949_v31, %v1946_v22  ;;  %v1664_v36 = vpop.f32.mrf.mxu0 }
 0x15b   :  { %v1953_v37 = vpop.f32.mrf.mxu1  ;;  %v11094_v6 = vld [vmem:[#allocation2 + $0x30] sm:$0xff]  }
 0x15c   :  { %v2289_v38 = vadd.f32 %v2225_v34, %v109_v30  ;;  %10780 = vst [vmem:[#allocation2 + $0x38] sm:$0xff] %v10301_v35   ;;  %v1954_v41 = vadd.f32 %v1953_v37, %v1664_v36  ;;  %v1666_v43 = vpop.f32.mrf.mxu0  ;;  %v115_v30 = vmul.f32 %v11786_v29, %v12400_v42  ;;  %v11792_v29 = vld [vmem:[%s16168_s2 + $0xd8] sm:$0xff] }
 0x15d   :  { %v1955_v44 = vpop.f32.mrf.mxu1 }
 0x15e   :  { %2353 = vst [vmem:[%s16169_s3 + $0x78] sm:$0xff] %v2289_v38  ;;  %v2226_v46 = vmul.f32 %v12402_v45, %v1954_v41  ;;  %v1667_v47 = vpop.f32.mrf.mxu0  ;;  %v11097_v38 = vld [vmem:[#allocation2 + $0x18] sm:$0xff]  }
 0x15f   :  { %v1956_v48 = vpop.f32.mrf.mxu1 }
 0x160   :  { %v2290_v49 = vadd.f32 %v2226_v46, %v110_v40  ;;  %v1957_v52 = vadd.f32 %v1956_v48, %v1667_v47  ;;  %v1669_v53 = vpop.f32.mrf.mxu0  ;;  %v11787_v40 = vld [vmem:[%s16168_s2 + $0xb0] sm:$0xff] }
 0x161   :  { %v1958_v54 = vpop.f32.mrf.mxu1 }
 0x162   :  { %2354 = vst [vmem:[%s16169_s3 + $0x80] sm:$0xff] %v2290_v49  ;;  %v2227_v55 = vmul.f32 %v12402_v45, %v1957_v52  ;;  %v10306_v56 = vpack.c.bf16 %v1957_v52, %v1954_v41  ;;  %v1672_v57 = vpop.f32.mrf.mxu0  ;;  %v116_v41 = vmul.f32 %v11787_v40, %v12400_v42  ;;  %v11788_v52 = vld [vmem:[%s16168_s2 + $0xb8] sm:$0xff] }
 0x163   :  { %v1961_v58 = vpop.f32.mrf.mxu1  ;;  %v11093_v59 = vld [vmem:[#allocation2 + $0x38] sm:$0xff]   ;;  %v117_v53 = vmul.f32 %v11788_v52, %v12400_v42 }
 0x164   :  { %v2291_v60 = vadd.f32 %v2227_v55, %v111_v51  ;;  %10781 = vst [vmem:[#allocation2 + $0x40] sm:$0xff] %v10306_v56   ;;  %v1962_v63 = vadd.f32 %v1961_v58, %v1672_v57  ;;  %v1674_v0 = vpop.f32.mrf.mxu0  ;;  %3747 = vmatpush1.bf16.msra.mxu0 %v11093_v59 }
 0x165   :  { %v1963_v1 = vpop.f32.mrf.mxu1  ;;  %3748 = vmatprep.subr.bf16.mxu0 %v11844_v3 }
 0x166   :  { %2355 = vst [vmem:[%s16169_s3 + $0x88] sm:$0xff] %v2291_v60  ;;  %v2228_v2 = vmul.f32 %v12402_v45, %v1962_v63  ;;  %v1675_v4 = vpop.f32.mrf.mxu0 }
 0x167   :  { %v1964_v5 = vpop.f32.mrf.mxu1 }
 0x168   :  { %v2292_v7 = vadd.f32 %v2228_v2, %v112_v62  ;;  %v1965_v10 = vadd.f32 %v1964_v5, %v1675_v4  ;;  %v1677_v11 = vpop.f32.mrf.mxu0  ;;  %3749 = vmatpush1.bf16.msra.mxu0 %v11094_v6 }
 0x169   :  { %v1966_v12 = vpop.f32.mrf.mxu1  ;;  %3750 = vmatprep.subr.bf16.mxu0 %v11844_v3 }
 0x16a   :  { %2356 = vst [vmem:[%s16169_s3 + $0x90] sm:$0xff] %v2292_v7  ;;  %v2229_v13 = vmul.f32 %v12402_v45, %v1965_v10  ;;  %v10311_v14 = vpack.c.bf16 %v1965_v10, %v1962_v63  ;;  %v1680_v15 = vpop.f32.mrf.mxu0  ;;  %v11789_v63 = vld [vmem:[%s16168_s2 + $0xc0] sm:$0xff]  ;;  %v11790_v10 = vld [vmem:[%s16168_s2 + $0xc8] sm:$0xff] }
 0x16b   :  { %v1969_v16 = vpop.f32.mrf.mxu1  ;;  %v118_v0 = vmul.f32 %v11789_v63, %v12400_v42  ;;  %v119_v11 = vmul.f32 %v11790_v10, %v12400_v42 }
 0x16c   :  { %v2293_v18 = vadd.f32 %v2229_v13, %v113_v9  ;;  %10782 = vst [vmem:[#allocation2 + $0x48] sm:$0xff] %v10311_v14   ;;  %v1970_v21 = vadd.f32 %v1969_v16, %v1680_v15  ;;  %v1682_v22 = vpop.f32.mrf.mxu0  ;;  %3751 = vmatpush1.bf16.msra.mxu0 %v11095_v17 }
 0x16d   :  { %v1971_v23 = vpop.f32.mrf.mxu1  ;;  %3752 = vmatprep.subr.bf16.mxu0 %v11844_v3 }
 0x16e   :  { %2357 = vst [vmem:[%s16169_s3 + $0x98] sm:$0xff] %v2293_v18  ;;  %v2230_v24 = vmul.f32 %v12402_v45, %v1970_v21  ;;  %v1683_v25 = vpop.f32.mrf.mxu0 }
 0x16f   :  { %v1972_v26 = vpop.f32.mrf.mxu1 }
 0x170   :  { %v2294_v28 = vadd.f32 %v2230_v24, %v114_v20  ;;  %v1973_v31 = vadd.f32 %v1972_v26, %v1683_v25  ;;  %v1685_v32 = vpop.f32.mrf.mxu0  ;;  %3753 = vmatpush1.bf16.msra.mxu0 %v11096_v27  ;;  %v11791_v20 = vld [vmem:[%s16168_s2 + $0xd0] sm:$0xff] }
 0x171   :  { %v1974_v33 = vpop.f32.mrf.mxu1  ;;  %3754 = vmatprep.subr.bf16.mxu0 %v11844_v3 }
 0x172   :  { %2358 = vst [vmem:[%s16169_s3 + $0xa0] sm:$0xff] %v2294_v28  ;;  %v2231_v34 = vmul.f32 %v12402_v45, %v1973_v31  ;;  %v10316_v35 = vpack.c.bf16 %v1973_v31, %v1970_v21  ;;  %v1688_v36 = vpop.f32.mrf.mxu0  ;;  %v120_v21 = vmul.f32 %v11791_v20, %v12400_v42 }
 0x173   :  { %v1977_v37 = vpop.f32.mrf.mxu1 }
 0x174   :  { %v2295_v39 = vadd.f32 %v2231_v34, %v115_v30  ;;  %10783 = vst [vmem:[#allocation2 + $0x50] sm:$0xff] %v10316_v35   ;;  %v1978_v43 = vadd.f32 %v1977_v37, %v1688_v36  ;;  %v1690_v44 = vpop.f32.mrf.mxu0  ;;  %3755 = vmatpush1.bf16.msra.mxu0 %v11097_v38  ;;  %v121_v30 = vmul.f32 %v11792_v29, %v12400_v42 }
 0x175   :  { %v1979_v46 = vpop.f32.mrf.mxu1  ;;  %3756 = vmatprep.subr.bf16.mxu0 %v11844_v3 }
 0x176   :  { %2359 = vst [vmem:[%s16169_s3 + $0xa8] sm:$0xff] %v2295_v39  ;;  %v2232_v47 = vmul.f32 %v12402_v45, %v1978_v43  ;;  %v1691_v48 = vpop.f32.mrf.mxu0  ;;  %v11793_v39 = vld [vmem:[%s16168_s2 + $0xe0] sm:$0xff] }
 0x177   :  { %v1980_v49 = vpop.f32.mrf.mxu1  ;;  %v122_v40 = vmul.f32 %v11793_v39, %v12400_v42 }
 0x178   :  { %v2296_v51 = vadd.f32 %v2232_v47, %v116_v41  ;;  %v1981_v54 = vadd.f32 %v1980_v49, %v1691_v48  ;;  %v1693_v55 = vpop.f32.mrf.mxu0  ;;  %3757 = vmatpush1.bf16.msra.mxu0 %v11098_v50  ;;  %v11794_v50 = vld [vmem:[%s16168_s2 + $0xe8] sm:$0xff] }
 0x179   :  { %v1982_v56 = vpop.f32.mrf.mxu1  ;;  %3758 = vmatprep.subr.bf16.mxu0 %v11844_v3 }
 0x17a   :  { %2360 = vst [vmem:[%s16169_s3 + $0xb0] sm:$0xff] %v2296_v51  ;;  %v2233_v57 = vmul.f32 %v12402_v45, %v1981_v54  ;;  %v10321_v58 = vpack.c.bf16 %v1981_v54, %v1978_v43  ;;  %v1696_v59 = vpop.f32.mrf.mxu0  ;;  %v123_v51 = vmul.f32 %v11794_v50, %v12400_v42 }
 0x17b   :  { %v1985_v60 = vpop.f32.mrf.mxu1 }
 0x17c   :  { %v2297_v62 = vadd.f32 %v2233_v57, %v117_v53  ;;  %10784 = vst [vmem:[#allocation2 + $0x58] sm:$0xff] %v10321_v58   ;;  %v1986_v1 = vadd.f32 %v1985_v60, %v1696_v59  ;;  %v1698_v2 = vpop.f32.mrf.mxu0  ;;  %3759 = vmatpush1.bf16.msra.mxu0 %v11099_v61  ;;  %v11795_v60 = vld [vmem:[%s16168_s2 + $0xf0] sm:$0xff] }
 0x17d   :  { %v1987_v4 = vpop.f32.mrf.mxu1  ;;  %3760 = vmatprep.subr.bf16.mxu0 %v11844_v3  ;;  %v124_v61 = vmul.f32 %v11795_v60, %v12400_v42 }
 0x17e   :  { %2361 = vst [vmem:[%s16169_s3 + $0xb8] sm:$0xff] %v2297_v62  ;;  %v2234_v5 = vmul.f32 %v12402_v45, %v1986_v1  ;;  %v1699_v6 = vpop.f32.mrf.mxu0 }
 0x17f   :  { %v1988_v7 = vpop.f32.mrf.mxu1 }
 0x180   :  { %v2298_v9 = vadd.f32 %v2234_v5, %v118_v0  ;;  %v1989_v12 = vadd.f32 %v1988_v7, %v1699_v6  ;;  %v1701_v13 = vpop.f32.mrf.mxu0  ;;  %3761 = vmatpush1.bf16.msra.mxu0 %v11100_v8  ;;  %v11796_v6 = vld [vmem:[%s16168_s2 + $0xf8] sm:$0xff] }
 0x181   :  { %v1990_v14 = vpop.f32.mrf.mxu1  ;;  %3762 = vmatprep.subr.bf16.mxu0 %v11844_v3  ;;  %v125_v7 = vmul.f32 %v11796_v6, %v12400_v42  ;;  %v11802_v6 = vld [vmem:[%s16168_s2 + $0x128] sm:$0xff] }
 0x182   :  { %2362 = vst [vmem:[%s16169_s3 + $0xc0] sm:$0xff] %v2298_v9  ;;  %v2235_v15 = vmul.f32 %v12402_v45, %v1989_v12  ;;  %v10326_v16 = vpack.c.bf16 %v1989_v12, %v1986_v1  ;;  %v1704_v17 = vpop.f32.mrf.mxu0 }
 0x183   :  { %v1993_v18 = vpop.f32.mrf.mxu1 }
 0x184   :  { %v2299_v19 = vadd.f32 %v2235_v15, %v119_v11  ;;  %10785 = vst [vmem:[#allocation2 + $0x60] sm:$0xff] %v10326_v16   ;;  %v1994_v22 = vadd.f32 %v1993_v18, %v1704_v17  ;;  %v1706_v23 = vpop.f32.mrf.mxu0  ;;  %v11797_v16 = vld [vmem:[%s16168_s2 + $0x100] sm:$0xff] }
 0x185   :  { %v1995_v24 = vpop.f32.mrf.mxu1  ;;  %v126_v17 = vmul.f32 %v11797_v16, %v12400_v42 }
 0x186   :  { %2363 = vst [vmem:[%s16169_s3 + $0xc8] sm:$0xff] %v2299_v19  ;;  %v2236_v25 = vmul.f32 %v12402_v45, %v1994_v22  ;;  %v1707_v26 = vpop.f32.mrf.mxu0 }
 0x187   :  { %v1996_v27 = vpop.f32.mrf.mxu1 }
 0x188   :  { %v2300_v28 = vadd.f32 %v2236_v25, %v120_v21  ;;  %v1997_v31 = vadd.f32 %v1996_v27, %v1707_v26  ;;  %v1709_v32 = vpop.f32.mrf.mxu0  ;;  %v11798_v25 = vld [vmem:[%s16168_s2 + $0x108] sm:$0xff] }
 0x189   :  { %v1998_v33 = vpop.f32.mrf.mxu1  ;;  %v127_v26 = vmul.f32 %v11798_v25, %v12400_v42  ;;  %v11106_v25 = vld [vmem:[#allocation2 + $0x50] sm:$0xff]  }
 0x18a   :  { %2364 = vst [vmem:[%s16169_s3 + $0xd0] sm:$0xff] %v2300_v28  ;;  %v2237_v34 = vmul.f32 %v12402_v45, %v1997_v31  ;;  %v10331_v35 = vpack.c.bf16 %v1997_v31, %v1994_v22  ;;  %v1712_v36 = vpop.f32.mrf.mxu0 }
 0x18b   :  { %v2001_v37 = vpop.f32.mrf.mxu1 }
 0x18c   :  { %v2301_v38 = vadd.f32 %v2237_v34, %v121_v30  ;;  %10786 = vst [vmem:[#allocation2 + $0x68] sm:$0xff] %v10331_v35   ;;  %v2002_v41 = vadd.f32 %v2001_v37, %v1712_v36  ;;  %v1714_v43 = vpop.f32.mrf.mxu0  ;;  %v11799_v36 = vld [vmem:[%s16168_s2 + $0x110] sm:$0xff] }
 0x18d   :  { %v2003_v44 = vpop.f32.mrf.mxu1  ;;  %v128_v37 = vmul.f32 %v11799_v36, %v12400_v42 }
 0x18e   :  { %2365 = vst [vmem:[%s16169_s3 + $0xd8] sm:$0xff] %v2301_v38  ;;  %v2238_v46 = vmul.f32 %v12402_v45, %v2002_v41  ;;  %v1715_v47 = vpop.f32.mrf.mxu0 }
 0x18f   :  { %v2004_v48 = vpop.f32.mrf.mxu1 }
 0x190   :  { %v2302_v49 = vadd.f32 %v2238_v46, %v122_v40  ;;  %v2005_v52 = vadd.f32 %v2004_v48, %v1715_v47  ;;  %v1717_v53 = vpop.f32.mrf.mxu0  ;;  %v11800_v48 = vld [vmem:[%s16168_s2 + $0x118] sm:$0xff] }
 0x191   :  { %v2006_v54 = vpop.f32.mrf.mxu1 }
 0x192   :  { %2366 = vst [vmem:[%s16169_s3 + $0xe0] sm:$0xff] %v2302_v49  ;;  %v2239_v55 = vmul.f32 %v12402_v45, %v2005_v52  ;;  %v10336_v56 = vpack.c.bf16 %v2005_v52, %v2002_v41  ;;  %v1720_v57 = vpop.f32.mrf.mxu0  ;;  %v129_v49 = vmul.f32 %v11800_v48, %v12400_v42 }
 0x193   :  { %v2009_v58 = vpop.f32.mrf.mxu1 }
 0x194   :  { %v2303_v59 = vadd.f32 %v2239_v55, %v123_v51  ;;  %10787 = vst [vmem:[#allocation2 + $0x70] sm:$0xff] %v10336_v56   ;;  %v2010_v62 = vadd.f32 %v2009_v58, %v1720_v57  ;;  %v1722_v63 = vpop.f32.mrf.mxu0  ;;  %v11103_v57 = vld [vmem:[#allocation2 + $0x68] sm:$0xff]  }
 0x195   :  { %v2011_v0 = vpop.f32.mrf.mxu1 }
 0x196   :  { %2367 = vst [vmem:[%s16169_s3 + $0xe8] sm:$0xff] %v2303_v59  ;;  %v2240_v1 = vmul.f32 %v12402_v45, %v2010_v62  ;;  %v1723_v2 = vpop.f32.mrf.mxu0  ;;  %v11801_v59 = vld [vmem:[%s16168_s2 + $0x120] sm:$0xff] }
 0x197   :  { %v2012_v4 = vpop.f32.mrf.mxu1  ;;  %v130_v60 = vmul.f32 %v11801_v59, %v12400_v42 }
 0x198   :  { %v2304_v5 = vadd.f32 %v2240_v1, %v124_v61  ;;  %v2013_v8 = vadd.f32 %v2012_v4, %v1723_v2  ;;  %v1725_v9 = vpop.f32.mrf.mxu0  ;;  %v11104_v4 = vld [vmem:[#allocation2 + $0x60] sm:$0xff]  }
 0x199   :  { %v2014_v10 = vpop.f32.mrf.mxu1 }
 0x19a   :  { %2368 = vst [vmem:[%s16169_s3 + $0xf0] sm:$0xff] %v2304_v5  ;;  %v2241_v11 = vmul.f32 %v12402_v45, %v2013_v8  ;;  %v10341_v12 = vpack.c.bf16 %v2013_v8, %v2010_v62  ;;  %v1728_v13 = vpop.f32.mrf.mxu0 }
 0x19b   :  { %v2017_v14 = vpop.f32.mrf.mxu1  ;;  %v11102_v46 = vld [vmem:[#allocation2 + $0x70] sm:$0xff]  }
 0x19c   :  { %v2305_v15 = vadd.f32 %v2241_v11, %v125_v7  ;;  %10788 = vst [vmem:[#allocation2 + $0x78] sm:$0xff] %v10341_v12   ;;  %v2018_v18 = vadd.f32 %v2017_v14, %v1728_v13  ;;  %v1730_v19 = vpop.f32.mrf.mxu0  ;;  %v131_v7 = vmul.f32 %v11802_v6, %v12400_v42 }
 0x19d   :  { %v2019_v20 = vpop.f32.mrf.mxu1 }
 0x19e   :  { %2369 = vst [vmem:[%s16169_s3 + $0xf8] sm:$0xff] %v2305_v15  ;;  %v2242_v21 = vmul.f32 %v12402_v45, %v2018_v18  ;;  %v1731_v22 = vpop.f32.mrf.mxu0  ;;  %v11105_v15 = vld [vmem:[#allocation2 + $0x58] sm:$0xff]  }
 0x19f   :  { %v2020_v23 = vpop.f32.mrf.mxu1 }
 0x1a0   :  { %v2306_v24 = vadd.f32 %v2242_v21, %v126_v17  ;;  %v2021_v27 = vadd.f32 %v2020_v23, %v1731_v22  ;;  %v1733_v28 = vpop.f32.mrf.mxu0  ;;  %v11803_v17 = vld [vmem:[%s16168_s2 + $0x130] sm:$0xff] }
 0x1a1   :  { %v2022_v29 = vpop.f32.mrf.mxu1 }
 0x1a2   :  { %2370 = vst [vmem:[%s16169_s3 + $0x100] sm:$0xff] %v2306_v24  ;;  %v2243_v30 = vmul.f32 %v12402_v45, %v2021_v27  ;;  %v10346_v31 = vpack.c.bf16 %v2021_v27, %v2018_v18  ;;  %v1736_v32 = vpop.f32.mrf.mxu0  ;;  %v132_v18 = vmul.f32 %v11803_v17, %v12400_v42  ;;  %v11804_v27 = vld [vmem:[%s16168_s2 + $0x138] sm:$0xff] }
 0x1a3   :  { %v2025_v33 = vpop.f32.mrf.mxu1  ;;  %v11101_v34 = vld [vmem:[#allocation2 + $0x78] sm:$0xff]   ;;  %v133_v28 = vmul.f32 %v11804_v27, %v12400_v42 }
 0x1a4   :  { %v2307_v35 = vadd.f32 %v2243_v30, %v127_v26  ;;  %10789 = vst [vmem:[#allocation2 + $0x80] sm:$0xff] %v10346_v31   ;;  %v2026_v38 = vadd.f32 %v2025_v33, %v1736_v32  ;;  %v1738_v39 = vpop.f32.mrf.mxu0  ;;  %3763 = vmatpush2.bf16.msra.mxu0 %v11101_v34 }
 0x1a5   :  { %v2027_v40 = vpop.f32.mrf.mxu1  ;;  %3764 = vmatprep.subr.bf16.mxu0 %v11844_v3  ;;  %v11805_v39 = vld [vmem:[%s16168_s2 + $0x140] sm:$0xff] }
 0x1a6   :  { %2371 = vst [vmem:[%s16169_s3 + $0x108] sm:$0xff] %v2307_v35  ;;  %v2244_v41 = vmul.f32 %v12402_v45, %v2026_v38  ;;  %v1739_v43 = vpop.f32.mrf.mxu0  ;;  %v11125_v35 = vld [vmem:[%s16167_s1 + $0x4] ss:$16 sps:$4 sm:$0xff]   ;;  %v134_v40 = vmul.f32 %v11805_v39, %v12400_v42 }
 0x1a7   :  { %v2028_v44 = vpop.f32.mrf.mxu1  ;;  %3778 = vmatprep.mubr.bf16.mxu0 %v11125_v35  ;;  %v11137_v35 = vld [vmem:[%s16167_s1 + $0x40] ss:$16 sps:$4 sm:$0xff]  }
 0x1a8   :  { %v2308_v47 = vadd.f32 %v2244_v41, %v128_v37  ;;  %v2029_v50 = vadd.f32 %v2028_v44, %v1739_v43  ;;  %v1741_v51 = vpop.f32.mrf.mxu0  ;;  %3765 = vmatpush2.bf16.msra.mxu0 %v11102_v46  ;;  %v11107_v37 = vld [vmem:[#allocation2 + $0x48] sm:$0xff]  }
 0x1a9   :  { %v2030_v52 = vpop.f32.mrf.mxu1  ;;  %3766 = vmatprep.subr.bf16.mxu0 %v11844_v3  ;;  %v11806_v51 = vld [vmem:[%s16168_s2 + $0x148] sm:$0xff] }
 0x1aa   :  { %2372 = vst [vmem:[%s16169_s3 + $0x110] sm:$0xff] %v2308_v47  ;;  %v2245_v53 = vmul.f32 %v12402_v45, %v2029_v50  ;;  %v10351_v54 = vpack.c.bf16 %v2029_v50, %v2026_v38  ;;  %v1744_v55 = vpop.f32.mrf.mxu0  ;;  %v135_v52 = vmul.f32 %v11806_v51, %v12400_v42 }
 0x1ab   :  { %v2033_v56 = vpop.f32.mrf.mxu1 }
 0x1ac   :  { %v2309_v58 = vadd.f32 %v2245_v53, %v129_v49  ;;  %10790 = vst [vmem:[#allocation2 + $0x88] sm:$0xff] %v10351_v54   ;;  %v2034_v61 = vadd.f32 %v2033_v56, %v1744_v55  ;;  %v1746_v62 = vpop.f32.mrf.mxu0  ;;  %3767 = vmatpush2.bf16.msra.mxu0 %v11103_v57  ;;  %v11108_v49 = vld [vmem:[#allocation2 + $0x40] sm:$0xff]   ;;  %v11130_v57 = vld [vmem:[%s16167_s1 + $0xc] ss:$16 sps:$4 sm:$0xff]  }
 0x1ad   :  { %v2035_v63 = vpop.f32.mrf.mxu1  ;;  %3768 = vmatprep.subr.bf16.mxu0 %v11844_v3  ;;  %v11123_v55 = vld [vmem:[%s16167_s1] ss:$16 sps:$4 sm:$0xff]   ;;  %4067 = vmatprep.mubr.bf16.mxu1 %v11130_v57 }
 0x1ae   :  { %2373 = vst [vmem:[%s16169_s3 + $0x118] sm:$0xff] %v2309_v58  ;;  %v2246_v0 = vmul.f32 %v12402_v45, %v2034_v61  ;;  %v1747_v1 = vpop.f32.mrf.mxu0  ;;  %v11807_v63 = vld [vmem:[%s16168_s2 + $0x150] sm:$0xff] }
 0x1af   :  { %v2036_v2 = vpop.f32.mrf.mxu1 }
 0x1b0   :  { %v2310_v5 = vadd.f32 %v2246_v0, %v130_v60  ;;  %v2037_v8 = vadd.f32 %v2036_v2, %v1747_v1  ;;  %v1749_v9 = vpop.f32.mrf.mxu0  ;;  %3769 = vmatpush2.bf16.msra.mxu0 %v11104_v4  ;;  %v136_v0 = vmul.f32 %v11807_v63, %v12400_v42  ;;  %v11133_v4 = vld [vmem:[%s16167_s1 + $0x24] ss:$16 sps:$4 sm:$0xff]  }
 0x1b1   :  { %v2038_v10 = vpop.f32.mrf.mxu1  ;;  %3770 = vmatprep.subr.bf16.mxu0 %v11844_v3 }
 0x1b2   :  { %2374 = vst [vmem:[%s16169_s3 + $0x120] sm:$0xff] %v2310_v5  ;;  %v2247_v11 = vmul.f32 %v12402_v45, %v2037_v8  ;;  %v10356_v12 = vpack.c.bf16 %v2037_v8, %v2034_v61  ;;  %v1752_v13 = vpop.f32.mrf.mxu0  ;;  %v11808_v10 = vld [vmem:[%s16168_s2 + $0x158] sm:$0xff] }
 0x1b3   :  { %v2041_v14 = vpop.f32.mrf.mxu1 }
 0x1b4   :  { %v2311_v16 = vadd.f32 %v2247_v11, %v131_v7  ;;  %10791 = vst [vmem:[#allocation2 + $0x90] sm:$0xff] %v10356_v12   ;;  %v2042_v19 = vadd.f32 %v2041_v14, %v1752_v13  ;;  %v1754_v20 = vpop.f32.mrf.mxu0  ;;  %3771 = vmatpush2.bf16.msra.mxu0 %v11105_v15  ;;  %v137_v11 = vmul.f32 %v11808_v10, %v12400_v42  ;;  %v11131_v14 = vld [vmem:[%s16167_s1 + $0x20] ss:$16 sps:$4 sm:$0xff]  }
 0x1b5   :  { %v2043_v21 = vpop.f32.mrf.mxu1  ;;  %3772 = vmatprep.subr.bf16.mxu0 %v11844_v3 }
 0x1b6   :  { %2375 = vst [vmem:[%s16169_s3 + $0x128] sm:$0xff] %v2311_v16  ;;  %v2248_v22 = vmul.f32 %v12402_v45, %v2042_v19  ;;  %v1755_v23 = vpop.f32.mrf.mxu0  ;;  %v11809_v21 = vld [vmem:[%s16168_s2 + $0x160] sm:$0xff] }
 0x1b7   :  { %v2044_v24 = vpop.f32.mrf.mxu1 }
 0x1b8   :  { %v2312_v26 = vadd.f32 %v2248_v22, %v132_v18  ;;  %v2045_v29 = vadd.f32 %v2044_v24, %v1755_v23  ;;  %v1757_v30 = vpop.f32.mrf.mxu0  ;;  %3773 = vmatpush2.bf16.msra.mxu0 %v11106_v25  ;;  %v138_v22 = vmul.f32 %v11809_v21, %v12400_v42  ;;  %v11139_v25 = vld [vmem:[%s16167_s1 + $0x44] ss:$16 sps:$4 sm:$0xff]  }
 0x1b9   :  { %v2046_v31 = vpop.f32.mrf.mxu1  ;;  %3774 = vmatprep.subr.bf16.mxu0 %v11844_v3 }
 0x1ba   :  { %2376 = vst [vmem:[%s16169_s3 + $0x130] sm:$0xff] %v2312_v26  ;;  %v2249_v32 = vmul.f32 %v12402_v45, %v2045_v29  ;;  %v10361_v33 = vpack.c.bf16 %v2045_v29, %v2042_v19  ;;  %v1760_v34 = vpop.f32.mrf.mxu0  ;;  %v11810_v31 = vld [vmem:[%s16168_s2 + $0x168] sm:$0xff] }
 0x1bb   :  { %v2049_v36 = vpop.f32.mrf.mxu1 }
 0x1bc   :  { %v2313_v38 = vadd.f32 %v2249_v32, %v133_v28  ;;  %10792 = vst [vmem:[#allocation2 + $0x98] sm:$0xff] %v10361_v33   ;;  %v2050_v41 = vadd.f32 %v2049_v36, %v1760_v34  ;;  %v1762_v43 = vpop.f32.mrf.mxu0  ;;  %3775 = vmatpush2.bf16.msra.mxu0 %v11107_v37  ;;  %v139_v32 = vmul.f32 %v11810_v31, %v12400_v42 }
 0x1bd   :  { %v2051_v44 = vpop.f32.mrf.mxu1  ;;  %3776 = vmatprep.subr.bf16.mxu0 %v11844_v3  ;;  %v11811_v43 = vld [vmem:[%s16168_s2 + $0x170] sm:$0xff] }
 0x1be   :  { %2377 = vst [vmem:[%s16169_s3 + $0x138] sm:$0xff] %v2313_v38  ;;  %v2250_v46 = vmul.f32 %v12402_v45, %v2050_v41  ;;  %v1763_v47 = vpop.f32.mrf.mxu0  ;;  %v140_v44 = vmul.f32 %v11811_v43, %v12400_v42 }
 0x1bf   :  { %v2052_v48 = vpop.f32.mrf.mxu1 }
 0x1c0   :  { %v2314_v50 = vadd.f32 %v2250_v46, %v134_v40  ;;  %v2053_v53 = vadd.f32 %v2052_v48, %v1763_v47  ;;  %v1765_v54 = vpop.f32.mrf.mxu0  ;;  %3777 = vmatpush2.bf16.msra.mxu0 %v11108_v49  ;;  %v11145_v48 = vld [vmem:[%s16167_s1 + $0x64] ss:$16 sps:$4 sm:$0xff]  }
 0x1c1   :  { %v2054_v56 = vpop.f32.mrf.mxu1  ;;  %5926 = vmatprep.subr.bf16.mxu0 %v11844_v3  ;;  %v11812_v54 = vld [vmem:[%s16168_s2 + $0x178] sm:$0xff] }
 0x1c2   :  { %2378 = vst [vmem:[%s16169_s3 + $0x140] sm:$0xff] %v2314_v50  ;;  %v2251_v58 = vmul.f32 %v12402_v45, %v2053_v53  ;;  %v10366_v59 = vpack.c.bf16 %v2053_v53, %v2050_v41  ;;  %v1768_v60 = vpop.f32.mrf.mxu0 }
 0x1c3   :  { %v2057_v61 = vpop.f32.mrf.mxu1  ;;  %3779 = vmatmul.mubr.bf16.vlgmr.msra.gmra.mxu0 %v11123_v55  ;;  %v141_v55 = vmul.f32 %v11812_v54, %v12400_v42 }
 0x1c4   :  { %v2315_v62 = vadd.f32 %v2251_v58, %v135_v52  ;;  %10793 = vst [vmem:[#allocation2 + $0xa0] sm:$0xff] %v10366_v59   ;;  %v2058_v1 = vadd.f32 %v2057_v61, %v1768_v60  ;;  %v1770_v2 = vpop.f32.mrf.mxu0  ;;  %3786 = vmatprep.mubr.bf16.mxu0 %v11133_v4  ;;  %v11143_v58 = vld [vmem:[%s16167_s1 + $0x60] ss:$16 sps:$4 sm:$0xff]  }
 0x1c5   :  { %v2059_v5 = vpop.f32.mrf.mxu1 }
 0x1c6   :  { %2379 = vst [vmem:[%s16169_s3 + $0x148] sm:$0xff] %v2315_v62  ;;  %v2252_v6 = vmul.f32 %v12402_v45, %v2058_v1  ;;  %v1771_v7 = vpop.f32.mrf.mxu0 }
 0x1c7   :  { %v2060_v8 = vpop.f32.mrf.mxu1 }
 0x1c8   :  { %v2316_v9 = vadd.f32 %v2252_v6, %v136_v0  ;;  %v2061_v12 = vadd.f32 %v2060_v8, %v1771_v7  ;;  %v1773_v13 = vpop.f32.mrf.mxu0  ;;  %v11151_v6 = vld [vmem:[%s16167_s1 + $0x84] ss:$16 sps:$4 sm:$0xff]  }
 0x1c9   :  { %v2062_v15 = vpop.f32.mrf.mxu1 }
 0x1ca   :  { %2380 = vst [vmem:[%s16169_s3 + $0x150] sm:$0xff] %v2316_v9  ;;  %v2253_v16 = vmul.f32 %v12402_v45, %v2061_v12  ;;  %v10371_v17 = vpack.c.bf16 %v2061_v12, %v2058_v1  ;;  %v1776_v18 = vpop.f32.mrf.mxu0  ;;  %v11813_v1 = vld [vmem:[%s16168_s2 + $0x180] sm:$0xff]  ;;  %v11814_v12 = vld [vmem:[%s16168_s2 + $0x188] sm:$0xff] }
 0x1cb   :  { %v2065_v19 = vpop.f32.mrf.mxu1  ;;  %3787 = vmatmul.mubr.bf16.gmra.mxu0 %v11131_v14  ;;  %v142_v2 = vmul.f32 %v11813_v1, %v12400_v42  ;;  %v143_v13 = vmul.f32 %v11814_v12, %v12400_v42 }
 0x1cc   :  { %v2317_v20 = vadd.f32 %v2253_v16, %v137_v11  ;;  %10794 = vst [vmem:[#allocation2 + $0xa8] sm:$0xff] %v10371_v17   ;;  %v2066_v23 = vadd.f32 %v2065_v19, %v1776_v18  ;;  %v1778_v24 = vpop.f32.mrf.mxu0  ;;  %3794 = vmatprep.mubr.bf16.mxu0 %v11139_v25  ;;  %v11149_v16 = vld [vmem:[%s16167_s1 + $0x80] ss:$16 sps:$4 sm:$0xff]  }
 0x1cd   :  { %v2067_v26 = vpop.f32.mrf.mxu1  ;;  %v11815_v24 = vld [vmem:[%s16168_s2 + $0x190] sm:$0xff] }
 0x1ce   :  { %2381 = vst [vmem:[%s16169_s3 + $0x158] sm:$0xff] %v2317_v20  ;;  %v2254_v27 = vmul.f32 %v12402_v45, %v2066_v23  ;;  %v1779_v28 = vpop.f32.mrf.mxu0  ;;  %v144_v25 = vmul.f32 %v11815_v24, %v12400_v42  ;;  %v11167_v24 = vld [vmem:[%s16167_s1 + $0xe0] ss:$16 sps:$4 sm:$0xff]  }
 0x1cf   :  { %v2068_v29 = vpop.f32.mrf.mxu1 }
 0x1d0   :  { %v2318_v30 = vadd.f32 %v2254_v27, %v138_v22  ;;  %v2069_v33 = vadd.f32 %v2068_v29, %v1779_v28  ;;  %v1781_v34 = vpop.f32.mrf.mxu0  ;;  %v11157_v28 = vld [vmem:[%s16167_s1 + $0xa4] ss:$16 sps:$4 sm:$0xff]  }
 0x1d1   :  { %v2070_v36 = vpop.f32.mrf.mxu1 }
 0x1d2   :  { %2382 = vst [vmem:[%s16169_s3 + $0x160] sm:$0xff] %v2318_v30  ;;  %v2255_v37 = vmul.f32 %v12402_v45, %v2069_v33  ;;  %v10376_v38 = vpack.c.bf16 %v2069_v33, %v2066_v23  ;;  %v1784_v39 = vpop.f32.mrf.mxu0 }
 0x1d3   :  { %v2073_v40 = vpop.f32.mrf.mxu1  ;;  %3795 = vmatmul.mubr.bf16.gmra.mxu0 %v11137_v35  ;;  %v11816_v35 = vld [vmem:[%s16168_s2 + $0x198] sm:$0xff] }
 0x1d4   :  { %v2319_v41 = vadd.f32 %v2255_v37, %v139_v32  ;;  %10795 = vst [vmem:[#allocation2 + $0xb0] sm:$0xff] %v10376_v38   ;;  %v2074_v46 = vadd.f32 %v2073_v40, %v1784_v39  ;;  %v1786_v47 = vpop.f32.mrf.mxu0  ;;  %3802 = vmatprep.mubr.bf16.mxu0 %v11145_v48  ;;  %v145_v36 = vmul.f32 %v11816_v35, %v12400_v42  ;;  %v11155_v39 = vld [vmem:[%s16167_s1 + $0xa0] ss:$16 sps:$4 sm:$0xff]  }
 0x1d5   :  { %v2075_v49 = vpop.f32.mrf.mxu1  ;;  %v11111_v47 = vld [vmem:[#allocation2 + $0xa8] sm:$0xff]  }
 0x1d6   :  { %2383 = vst [vmem:[%s16169_s3 + $0x168] sm:$0xff] %v2319_v41  ;;  %v2256_v50 = vmul.f32 %v12402_v45, %v2074_v46  ;;  %v1787_v51 = vpop.f32.mrf.mxu0  ;;  %v11817_v49 = vld [vmem:[%s16168_s2 + $0x1a0] sm:$0xff] }
 0x1d7   :  { %v2076_v52 = vpop.f32.mrf.mxu1 }
 0x1d8   :  { %v2320_v53 = vadd.f32 %v2256_v50, %v140_v44  ;;  %v2077_v56 = vadd.f32 %v2076_v52, %v1787_v51  ;;  %v1789_v57 = vpop.f32.mrf.mxu0  ;;  %v146_v50 = vmul.f32 %v11817_v49, %v12400_v42  ;;  %v11173_v49 = vld [vmem:[%s16167_s1 + $0x100] ss:$16 sps:$4 sm:$0xff]  }
 0x1d9   :  { %v2078_v59 = vpop.f32.mrf.mxu1 }
 0x1da   :  { %2384 = vst [vmem:[%s16169_s3 + $0x170] sm:$0xff] %v2320_v53  ;;  %v2257_v60 = vmul.f32 %v12402_v45, %v2077_v56  ;;  %v10381_v61 = vpack.c.bf16 %v2077_v56, %v2074_v46  ;;  %v1792_v62 = vpop.f32.mrf.mxu0  ;;  %v11163_v53 = vld [vmem:[%s16167_s1 + $0xc4] ss:$16 sps:$4 sm:$0xff]  }
 0x1db   :  { %v2081_v63 = vpop.f32.mrf.mxu1  ;;  %3803 = vmatmul.mubr.bf16.gmra.mxu0 %v11143_v58  ;;  %v11110_v33 = vld [vmem:[#allocation2 + $0xb0] sm:$0xff]   ;;  %v11112_v58 = vld [vmem:[#allocation2 + $0xa0] sm:$0xff]  }
 0x1dc   :  { %v2321_v0 = vadd.f32 %v2257_v60, %v141_v55  ;;  %10796 = vst [vmem:[#allocation2 + $0xb8] sm:$0xff] %v10381_v61   ;;  %v2082_v4 = vadd.f32 %v2081_v63, %v1792_v62  ;;  %v1794_v5 = vpop.f32.mrf.mxu0  ;;  %3810 = vmatprep.mubr.bf16.mxu0 %v11151_v6  ;;  %v11818_v60 = vld [vmem:[%s16168_s2 + $0x1a8] sm:$0xff] }
 0x1dd   :  { %v2083_v7 = vpop.f32.mrf.mxu1  ;;  %v147_v61 = vmul.f32 %v11818_v60, %v12400_v42  ;;  %v11181_v60 = vld [vmem:[%s16167_s1 + $0x124] ss:$16 sps:$4 sm:$0xff]  }
 0x1de   :  { %2385 = vst [vmem:[%s16169_s3 + $0x178] sm:$0xff] %v2321_v0  ;;  %v2258_v8 = vmul.f32 %v12402_v45, %v2082_v4  ;;  %v1795_v9 = vpop.f32.mrf.mxu0  ;;  %v11161_v0 = vld [vmem:[%s16167_s1 + $0xc0] ss:$16 sps:$4 sm:$0xff]   ;;  %v11113_v7 = vld [vmem:[#allocation2 + $0x98] sm:$0xff]  }
 0x1df   :  { %v2084_v10 = vpop.f32.mrf.mxu1 }
 0x1e0   :  { %v2322_v11 = vadd.f32 %v2258_v8, %v142_v2  ;;  %v2085_v14 = vadd.f32 %v2084_v10, %v1795_v9  ;;  %v1797_v15 = vpop.f32.mrf.mxu0  ;;  %v11819_v9 = vld [vmem:[%s16168_s2 + $0x1b0] sm:$0xff] }
 0x1e1   :  { %v2086_v17 = vpop.f32.mrf.mxu1  ;;  %v148_v10 = vmul.f32 %v11819_v9, %v12400_v42 }
 0x1e2   :  { %2386 = vst [vmem:[%s16169_s3 + $0x180] sm:$0xff] %v2322_v11  ;;  %v2259_v18 = vmul.f32 %v12402_v45, %v2085_v14  ;;  %v10386_v19 = vpack.c.bf16 %v2085_v14, %v2082_v4  ;;  %v1800_v20 = vpop.f32.mrf.mxu0 }
 0x1e3   :  { %v2089_v21 = vpop.f32.mrf.mxu1  ;;  %v11109_v22 = vld [vmem:[#allocation2 + $0xb8] sm:$0xff]   ;;  %3811 = vmatmul.mubr.bf16.gmra.mxu0 %v11149_v16 }
 0x1e4   :  { %v2323_v23 = vadd.f32 %v2259_v18, %v143_v13  ;;  %10797 = vst [vmem:[#allocation2 + $0xc0] sm:$0xff] %v10386_v19   ;;  %v2090_v26 = vadd.f32 %v2089_v21, %v1800_v20  ;;  %v1802_v27 = vpop.f32.mrf.mxu0  ;;  %4036 = vmatpush1.bf16.msra.mxu1 %v11109_v22  ;;  %3818 = vmatprep.mubr.bf16.mxu0 %v11157_v28  ;;  %v11169_v13 = vld [vmem:[%s16167_s1 + $0xe4] ss:$16 sps:$4 sm:$0xff]   ;;  %v11820_v20 = vld [vmem:[%s16168_s2 + $0x1b8] sm:$0xff] }
 0x1e5   :  { %v2091_v29 = vpop.f32.mrf.mxu1  ;;  %4037 = vmatprep.subr.bf16.mxu1 %v11844_v3  ;;  %v11114_v18 = vld [vmem:[#allocation2 + $0x90] sm:$0xff]   ;;  %v149_v21 = vmul.f32 %v11820_v20, %v12400_v42 }
 0x1e6   :  { %2387 = vst [vmem:[%s16169_s3 + $0x188] sm:$0xff] %v2323_v23  ;;  %v2260_v30 = vmul.f32 %v12402_v45, %v2090_v26  ;;  %v1803_v31 = vpop.f32.mrf.mxu0 }
 0x1e7   :  { %v2092_v32 = vpop.f32.mrf.mxu1 }
 0x1e8   :  { %v2324_v34 = vadd.f32 %v2260_v30, %v144_v25  ;;  %v2093_v37 = vadd.f32 %v2092_v32, %v1803_v31  ;;  %v1805_v38 = vpop.f32.mrf.mxu0  ;;  %4038 = vmatpush1.bf16.msra.mxu1 %v11110_v33  ;;  %v11115_v30 = vld [vmem:[#allocation2 + $0x88] sm:$0xff]   ;;  %v11821_v32 = vld [vmem:[%s16168_s2 + $0x1c0] sm:$0xff] }
 0x1e9   :  { %v2094_v40 = vpop.f32.mrf.mxu1  ;;  %4039 = vmatprep.subr.bf16.mxu1 %v11844_v3  ;;  %v150_v33 = vmul.f32 %v11821_v32, %v12400_v42 }
 0x1ea   :  { %2388 = vst [vmem:[%s16169_s3 + $0x190] sm:$0xff] %v2324_v34  ;;  %v2261_v41 = vmul.f32 %v12402_v45, %v2093_v37  ;;  %v10391_v43 = vpack.c.bf16 %v2093_v37, %v2090_v26  ;;  %v1808_v44 = vpop.f32.mrf.mxu0 }
 0x1eb   :  { %v2097_v46 = vpop.f32.mrf.mxu1  ;;  %3819 = vmatmul.mubr.bf16.gmra.mxu0 %v11155_v39 }
 0x1ec   :  { %v2325_v48 = vadd.f32 %v2261_v41, %v145_v36  ;;  %10798 = vst [vmem:[#allocation2 + $0xc8] sm:$0xff] %v10391_v43   ;;  %v2098_v51 = vadd.f32 %v2097_v46, %v1808_v44  ;;  %v1810_v52 = vpop.f32.mrf.mxu0  ;;  %4040 = vmatpush1.bf16.msra.mxu1 %v11111_v47  ;;  %3826 = vmatprep.mubr.bf16.mxu0 %v11163_v53  ;;  %v11175_v36 = vld [vmem:[%s16167_s1 + $0x104] ss:$16 sps:$4 sm:$0xff]   ;;  %v11822_v44 = vld [vmem:[%s16168_s2 + $0x1c8] sm:$0xff] }
 0x1ed   :  { %v2099_v54 = vpop.f32.mrf.mxu1  ;;  %4041 = vmatprep.subr.bf16.mxu1 %v11844_v3  ;;  %v11116_v41 = vld [vmem:[#allocation2 + $0x80] sm:$0xff]   ;;  %v151_v46 = vmul.f32 %v11822_v44, %v12400_v42 }
 0x1ee   :  { %2389 = vst [vmem:[%s16169_s3 + $0x198] sm:$0xff] %v2325_v48  ;;  %v2262_v55 = vmul.f32 %v12402_v45, %v2098_v51  ;;  %v1811_v56 = vpop.f32.mrf.mxu0 }
 0x1ef   :  { %v2100_v57 = vpop.f32.mrf.mxu1 }
 0x1f0   :  { %v2326_v59 = vadd.f32 %v2262_v55, %v146_v50  ;;  %v2101_v62 = vadd.f32 %v2100_v57, %v1811_v56  ;;  %v1813_v63 = vpop.f32.mrf.mxu0  ;;  %4042 = vmatpush1.bf16.msra.mxu1 %v11112_v58  ;;  %v11823_v56 = vld [vmem:[%s16168_s2 + $0x1d0] sm:$0xff] }
 0x1f1   :  { %v2102_v1 = vpop.f32.mrf.mxu1  ;;  %4043 = vmatprep.subr.bf16.mxu1 %v11844_v3  ;;  %v152_v57 = vmul.f32 %v11823_v56, %v12400_v42  ;;  %v11197_v56 = vld [vmem:[%s16167_s1 + $0x180] ss:$16 sps:$4 sm:$0xff]  }
 0x1f2   :  { %2390 = vst [vmem:[%s16169_s3 + $0x1a0] sm:$0xff] %v2326_v59  ;;  %v2263_v2 = vmul.f32 %v12402_v45, %v2101_v62  ;;  %v10396_v4 = vpack.c.bf16 %v2101_v62, %v2098_v51  ;;  %v1816_v5 = vpop.f32.mrf.mxu0 }
 0x1f3   :  { %v2105_v6 = vpop.f32.mrf.mxu1  ;;  %3827 = vmatmul.mubr.bf16.gmra.mxu0 %v11161_v0 }
 0x1f4   :  { %v2327_v8 = vadd.f32 %v2263_v2, %v147_v61  ;;  %10799 = vst [vmem:[#allocation2 + $0xd0] sm:$0xff] %v10396_v4   ;;  %v2106_v11 = vadd.f32 %v2105_v6, %v1816_v5  ;;  %v1818_v12 = vpop.f32.mrf.mxu0  ;;  %4044 = vmatpush1.bf16.msra.mxu1 %v11113_v7  ;;  %3834 = vmatprep.mubr.bf16.mxu0 %v11169_v13  ;;  %v11824_v2 = vld [vmem:[%s16168_s2 + $0x1d8] sm:$0xff]  ;;  %v11179_v7 = vld [vmem:[%s16167_s1 + $0x120] ss:$16 sps:$4 sm:$0xff]  }
 0x1f5   :  { %v2107_v14 = vpop.f32.mrf.mxu1  ;;  %4045 = vmatprep.subr.bf16.mxu1 %v11844_v3  ;;  %v153_v4 = vmul.f32 %v11824_v2, %v12400_v42 }
 0x1f6   :  { %2391 = vst [vmem:[%s16169_s3 + $0x1a8] sm:$0xff] %v2327_v8  ;;  %v2264_v15 = vmul.f32 %v12402_v45, %v2106_v11  ;;  %v1819_v16 = vpop.f32.mrf.mxu0  ;;  %v11825_v14 = vld [vmem:[%s16168_s2 + $0x1e0] sm:$0xff] }
 0x1f7   :  { %v2108_v17 = vpop.f32.mrf.mxu1 }
 0x1f8   :  { %v2328_v19 = vadd.f32 %v2264_v15, %v148_v10  ;;  %v2109_v22 = vadd.f32 %v2108_v17, %v1819_v16  ;;  %v1821_v23 = vpop.f32.mrf.mxu0  ;;  %4046 = vmatpush1.bf16.msra.mxu1 %v11114_v18  ;;  %v154_v15 = vmul.f32 %v11825_v14, %v12400_v42  ;;  %v11187_v18 = vld [vmem:[%s16167_s1 + $0x144] ss:$16 sps:$4 sm:$0xff]   ;;  %v11142_v14 = vld [vmem:[%s16167_s1 + $0x4c] ss:$16 sps:$4 sm:$0xff]  }
 0x1f9   :  { %v2110_v25 = vpop.f32.mrf.mxu1  ;;  %4047 = vmatprep.subr.bf16.mxu1 %v11844_v3 }
 0x1fa   :  { %2392 = vst [vmem:[%s16169_s3 + $0x1b0] sm:$0xff] %v2328_v19  ;;  %v2265_v26 = vmul.f32 %v12402_v45, %v2109_v22  ;;  %v10401_v27 = vpack.c.bf16 %v2109_v22, %v2106_v11  ;;  %v1824_v28 = vpop.f32.mrf.mxu0 }
 0x1fb   :  { %v2113_v29 = vpop.f32.mrf.mxu1  ;;  %3835 = vmatmul.mubr.bf16.gmra.mxu0 %v11167_v24  ;;  %v11826_v24 = vld [vmem:[%s16168_s2 + $0x1e8] sm:$0xff]  ;;  %v11122_v2 = vld [vmem:[#allocation2 + $0xd0] sm:$0xff]  }
 0x1fc   :  { %v2329_v31 = vadd.f32 %v2265_v26, %v149_v21  ;;  %10800 = vst [vmem:[#allocation2 + $0xd8] sm:$0xff] %v10401_v27   ;;  %v2114_v34 = vadd.f32 %v2113_v29, %v1824_v28  ;;  %v1826_v35 = vpop.f32.mrf.mxu0  ;;  %4048 = vmatpush1.bf16.msra.mxu1 %v11115_v30  ;;  %3842 = vmatprep.mubr.bf16.mxu0 %v11175_v36  ;;  %v11185_v28 = vld [vmem:[%s16167_s1 + $0x140] ss:$16 sps:$4 sm:$0xff]  }
 0x1fd   :  { %v2115_v37 = vpop.f32.mrf.mxu1  ;;  %4049 = vmatprep.subr.bf16.mxu1 %v11844_v3  ;;  %v155_v25 = vmul.f32 %v11826_v24, %v12400_v42  ;;  %v11827_v35 = vld [vmem:[%s16168_s2 + $0x1f0] sm:$0xff]  ;;  %v11152_v24 = vld [vmem:[%s16167_s1 + $0x88] ss:$16 sps:$4 sm:$0xff]  }
 0x1fe   :  { %2393 = vst [vmem:[%s16169_s3 + $0x1b8] sm:$0xff] %v2329_v31  ;;  %v2266_v38 = vmul.f32 %v12402_v45, %v2114_v34  ;;  %v1827_v39 = vpop.f32.mrf.mxu0  ;;  %v156_v36 = vmul.f32 %v11827_v35, %v12400_v42  ;;  %v11265_v35 = vld [vmem:[%s16167_s1 + $0x2e4] ss:$16 sps:$4 sm:$0xff]  }
 0x1ff   :  { %v2116_v40 = vpop.f32.mrf.mxu1 }
 0x200   :  { %v2330_v43 = vadd.f32 %v2266_v38, %v150_v33  ;;  %v2117_v47 = vadd.f32 %v2116_v40, %v1827_v39  ;;  %v1829_v48 = vpop.f32.mrf.mxu0  ;;  %4050 = vmatpush1.bf16.msra.mxu1 %v11116_v41  ;;  %v11193_v39 = vld [vmem:[%s16167_s1 + $0x164] ss:$16 sps:$4 sm:$0xff]  }
 0x201   :  { %v2118_v50 = vpop.f32.mrf.mxu1  ;;  %4051 = vmatprep.subr.bf16.mxu1 %v11844_v3 }
 0x202   :  { %2394 = vst [vmem:[%s16169_s3 + $0x1c0] sm:$0xff] %v2330_v43  ;;  %v2267_v51 = vmul.f32 %v12402_v45, %v2117_v47  ;;  %v10406_v52 = vpack.c.bf16 %v2117_v47, %v2114_v34  ;;  %v1832_v53 = vpop.f32.mrf.mxu0  ;;  %v11828_v47 = vld [vmem:[%s16168_s2 + $0x1f8] sm:$0xff] }
 0x203   :  { %v2121_v54 = vpop.f32.mrf.mxu1  ;;  %3843 = vmatmul.mubr.bf16.gmra.mxu0 %v11173_v49  ;;  %v157_v48 = vmul.f32 %v11828_v47, %v12400_v42  ;;  %v11199_v42 = vld [vmem:[%s16167_s1 + $0x184] ss:$16 sps:$4 sm:$0xff]  }
 0x204   :  { %v2331_v55 = vadd.f32 %v2267_v51, %v151_v46  ;;  %10801 = vst [vmem:[#allocation2 + $0xe0] sm:$0xff] %v10406_v52   ;;  %v2122_v58 = vadd.f32 %v2121_v54, %v1832_v53  ;;  %v1834_v59 = vpop.f32.mrf.mxu0  ;;  %3850 = vmatprep.mubr.bf16.mxu0 %v11181_v60  ;;  %v11191_v51 = vld [vmem:[%s16167_s1 + $0x160] ss:$16 sps:$4 sm:$0xff]  }
 0x205   :  { %v2123_v61 = vpop.f32.mrf.mxu1  ;;  %v11203_v59 = vld [vmem:[%s16167_s1 + $0x1a0] ss:$16 sps:$4 sm:$0xff]  }
 0x206   :  { %2395 = vst [vmem:[%s16169_s3 + $0x1c8] sm:$0xff] %v2331_v55  ;;  %v2268_v62 = vmul.f32 %v12402_v45, %v2122_v58  ;;  %v1835_v63 = vpop.f32.mrf.mxu0  ;;  %v11211_v61 = vld [vmem:[%s16167_s1 + $0x1c4] ss:$16 sps:$4 sm:$0xff]  }
 0x207   :  { %v2124_v0 = vpop.f32.mrf.mxu1 }
 0x208   :  { %v2332_v1 = vadd.f32 %v2268_v62, %v152_v57  ;;  %v2125_v5 = vadd.f32 %v2124_v0, %v1835_v63  ;;  %v1837_v6 = vpop.f32.mrf.mxu0  ;;  %v11209_v63 = vld [vmem:[%s16167_s1 + $0x1c0] ss:$16 sps:$4 sm:$0xff]   ;;  %v11121_v0 = vld [vmem:[#allocation2 + $0xd8] sm:$0xff]  }
 0x209   :  { %v2126_v8 = vpop.f32.mrf.mxu1  ;;  %v11223_v6 = vld [vmem:[%s16167_s1 + $0x204] ss:$16 sps:$4 sm:$0xff]  }
 0x20a   :  { %2396 = vst [vmem:[%s16169_s3 + $0x1d0] sm:$0xff] %v2332_v1  ;;  %v2269_v9 = vmul.f32 %v12402_v45, %v2125_v5  ;;  %v10411_v10 = vpack.c.bf16 %v2125_v5, %v2122_v58  ;;  %v1840_v11 = vpop.f32.mrf.mxu0  ;;  %v11217_v1 = vld [vmem:[%s16167_s1 + $0x1e4] ss:$16 sps:$4 sm:$0xff]   ;;  %v11126_v5 = vld [vmem:[#allocation2 + $0xc8] sm:$0xff]  }
 0x20b   :  { %v2129_v12 = vpop.f32.mrf.mxu1  ;;  %3851 = vmatmul.mubr.bf16.gmra.mxu0 %v11179_v7  ;;  %v11120_v62 = vld [vmem:[#allocation2 + $0xe0] sm:$0xff]   ;;  %v11128_v8 = vld [vmem:[%s16167_s1 + $0x8] ss:$16 sps:$4 sm:$0xff]  }
 0x20c   :  { %v2333_v13 = vadd.f32 %v2269_v9, %v153_v4  ;;  %10802 = vst [vmem:[#allocation2 + $0xe8] sm:$0xff] %v10411_v10   ;;  %v2130_v16 = vadd.f32 %v2129_v12, %v1840_v11  ;;  %v1842_v17 = vpop.f32.mrf.mxu0  ;;  %3858 = vmatprep.mubr.bf16.mxu0 %v11187_v18  ;;  %v11215_v4 = vld [vmem:[%s16167_s1 + $0x1e0] ss:$16 sps:$4 sm:$0xff]   ;;  %v11136_v10 = vld [vmem:[%s16167_s1 + $0x2c] ss:$16 sps:$4 sm:$0xff]  }
 0x20d   :  { %v2131_v19 = vpop.f32.mrf.mxu1  ;;  %v11127_v7 = vld [vmem:[#allocation2 + $0xc0] sm:$0xff]   ;;  %v11134_v12 = vld [vmem:[%s16167_s1 + $0x28] ss:$16 sps:$4 sm:$0xff]   ;;  %v11148_v18 = vld [vmem:[%s16167_s1 + $0x6c] ss:$16 sps:$4 sm:$0xff]  }
 0x20e   :  { %2397 = vst [vmem:[%s16169_s3 + $0x1d8] sm:$0xff] %v2333_v13  ;;  %v2270_v20 = vmul.f32 %v12402_v45, %v2130_v16  ;;  %v1843_v21 = vpop.f32.mrf.mxu0  ;;  %v11221_v9 = vld [vmem:[%s16167_s1 + $0x200] ss:$16 sps:$4 sm:$0xff]   ;;  %v11229_v11 = vld [vmem:[%s16167_s1 + $0x224] ss:$16 sps:$4 sm:$0xff]  }
 0x20f   :  { %v2132_v22 = vpop.f32.mrf.mxu1  ;;  %v11227_v13 = vld [vmem:[%s16167_s1 + $0x220] ss:$16 sps:$4 sm:$0xff]   ;;  %v11241_v19 = vld [vmem:[%s16167_s1 + $0x264] ss:$16 sps:$4 sm:$0xff]  }
 0x210   :  { %v2334_v23 = vadd.f32 %v2270_v20, %v154_v15  ;;  %v2133_v26 = vadd.f32 %v2132_v22, %v1843_v21  ;;  %v1845_v27 = vpop.f32.mrf.mxu0  ;;  %v11235_v15 = vld [vmem:[%s16167_s1 + $0x244] ss:$16 sps:$4 sm:$0xff]   ;;  %v11233_v17 = vld [vmem:[%s16167_s1 + $0x240] ss:$16 sps:$4 sm:$0xff]   ;;  %v11146_v20 = vld [vmem:[%s16167_s1 + $0x68] ss:$16 sps:$4 sm:$0xff]  }
 0x211   :  { %v2134_v29 = vpop.f32.mrf.mxu1  ;;  %v11239_v21 = vld [vmem:[%s16167_s1 + $0x260] ss:$16 sps:$4 sm:$0xff]   ;;  %v11154_v22 = vld [vmem:[%s16167_s1 + $0x8c] ss:$16 sps:$4 sm:$0xff]   ;;  %v11253_v27 = vld [vmem:[%s16167_s1 + $0x2a4] ss:$16 sps:$4 sm:$0xff]  }
 0x212   :  { %2398 = vst [vmem:[%s16169_s3 + $0x1e0] sm:$0xff] %v2334_v23  ;;  %v2271_v30 = vmul.f32 %v12402_v45, %v2133_v26  ;;  %v10416_v31 = vpack.c.bf16 %v2133_v26, %v2130_v16  ;;  %v1848_v32 = vpop.f32.mrf.mxu0  ;;  %v11140_v16 = vld [vmem:[%s16167_s1 + $0x48] ss:$16 sps:$4 sm:$0xff]   ;;  %v11247_v23 = vld [vmem:[%s16167_s1 + $0x284] ss:$16 sps:$4 sm:$0xff]  }
 0x213   :  { %v2137_v33 = vpop.f32.mrf.mxu1  ;;  %3859 = vmatmul.mubr.bf16.gmra.mxu0 %v11185_v28  ;;  %v11119_v60 = vld [vmem:[#allocation2 + $0xe8] sm:$0xff]   ;;  %v11251_v29 = vld [vmem:[%s16167_s1 + $0x2a0] ss:$16 sps:$4 sm:$0xff]  }
 0x214   :  { %v2335_v34 = vadd.f32 %v2271_v30, %v155_v25  ;;  %10803 = vst [vmem:[#allocation2 + $0xf0] sm:$0xff] %v10416_v31   ;;  %v2138_v37 = vadd.f32 %v2137_v33, %v1848_v32  ;;  %v1850_v38 = vpop.f32.mrf.mxu0  ;;  %3866 = vmatprep.mubr.bf16.mxu0 %v11193_v39  ;;  %v11245_v25 = vld [vmem:[%s16167_s1 + $0x280] ss:$16 sps:$4 sm:$0xff]   ;;  %v11160_v26 = vld [vmem:[%s16167_s1 + $0xac] ss:$16 sps:$4 sm:$0xff]  }
 0x215   :  { %v2139_v40 = vpop.f32.mrf.mxu1  ;;  %v11158_v28 = vld [vmem:[%s16167_s1 + $0xa8] ss:$16 sps:$4 sm:$0xff]   ;;  %v11166_v30 = vld [vmem:[%s16167_s1 + $0xcc] ss:$16 sps:$4 sm:$0xff]   ;;  %v11259_v31 = vld [vmem:[%s16167_s1 + $0x2c4] ss:$16 sps:$4 sm:$0xff]  }
 0x216   :  { %2399 = vst [vmem:[%s16169_s3 + $0x1e8] sm:$0xff] %v2335_v34  ;;  %v2272_v41 = vmul.f32 %v12402_v45, %v2138_v37  ;;  %v1851_v43 = vpop.f32.mrf.mxu0  ;;  %v11164_v32 = vld [vmem:[%s16167_s1 + $0xc8] ss:$16 sps:$4 sm:$0xff]   ;;  %v11257_v33 = vld [vmem:[%s16167_s1 + $0x2c0] ss:$16 sps:$4 sm:$0xff]  }
 0x217   :  { %v2140_v44 = vpop.f32.mrf.mxu1  ;;  %v11172_v34 = vld [vmem:[%s16167_s1 + $0xec] ss:$16 sps:$4 sm:$0xff]   ;;  %v11271_v39 = vld [vmem:[%s16167_s1 + $0x304] ss:$16 sps:$4 sm:$0xff]   ;;  %v11176_v40 = vld [vmem:[%s16167_s1 + $0x108] ss:$16 sps:$4 sm:$0xff]  }
 0x218   :  { %v2336_v46 = vadd.f32 %v2272_v41, %v156_v36  ;;  %v2141_v49 = vadd.f32 %v2140_v44, %v1851_v43  ;;  %v1853_v50 = vpop.f32.mrf.mxu0  ;;  %v11170_v36 = vld [vmem:[%s16167_s1 + $0xe8] ss:$16 sps:$4 sm:$0xff]   ;;  %v11178_v38 = vld [vmem:[%s16167_s1 + $0x10c] ss:$16 sps:$4 sm:$0xff]   ;;  %v11269_v41 = vld [vmem:[%s16167_s1 + $0x300] ss:$16 sps:$4 sm:$0xff]  }
 0x219   :  { %v2142_v52 = vpop.f32.mrf.mxu1  ;;  %v11184_v43 = vld [vmem:[%s16167_s1 + $0x12c] ss:$16 sps:$4 sm:$0xff]   ;;  %v11277_v44 = vld [vmem:[%s16167_s1 + $0x324] ss:$16 sps:$4 sm:$0xff]   ;;  %v11275_v50 = vld [vmem:[%s16167_s1 + $0x320] ss:$16 sps:$4 sm:$0xff]  }
 0x21a   :  { %2400 = vst [vmem:[%s16169_s3 + $0x1f0] sm:$0xff] %v2336_v46  ;;  %v2273_v53 = vmul.f32 %v12402_v45, %v2141_v49  ;;  %v10421_v54 = vpack.c.bf16 %v2141_v49, %v2138_v37  ;;  %v11205_v45 = vld [vmem:[%s16167_s1 + $0x1a4] ss:$16 sps:$4 sm:$0xff]   ;;  %v11263_v37 = vld [vmem:[%s16167_s1 + $0x2e0] ss:$16 sps:$4 sm:$0xff]  }
 0x21b   :  { %3867 = vmatmul.mubr.bf16.gmra.mxu0 %v11191_v51  ;;  %v11118_v58 = vld [vmem:[#allocation2 + $0xf0] sm:$0xff]   ;;  %v11190_v51 = vld [vmem:[%s16167_s1 + $0x14c] ss:$16 sps:$4 sm:$0xff]  }
 0x21c   :  { %v2337_v55 = vadd.f32 %v2273_v53, %v157_v48  ;;  %10804 = vst [vmem:[#allocation2 + $0xf8] sm:$0xff] %v10421_v54   ;;  %3874 = vmatprep.mubr.bf16.mxu0 %v11199_v42  ;;  %v11182_v48 = vld [vmem:[%s16167_s1 + $0x128] ss:$16 sps:$4 sm:$0xff]   ;;  %v11283_v53 = vld [vmem:[%s16167_s1 + $0x344] ss:$16 sps:$4 sm:$0xff]  }
 0x21d   :  { %v11188_v42 = vld [vmem:[%s16167_s1 + $0x148] ss:$16 sps:$4 sm:$0xff]  }
 0x21e   :  { %2401 = vst [vmem:[%s16169_s3 + $0x1f8] sm:$0xff] %v2337_v55 }
 0x223   :  { %v11117_v57 = vld [vmem:[#allocation2 + $0xf8] sm:$0xff]   ;;  %3875 = vmatmul.mubr.bf16.gmra.mxu0 %v11197_v56 }
 0x224   :  { %4052 = vmatpush2.bf16.msra.mxu1 %v11117_v57  ;;  %3882 = vmatprep.mubr.bf16.mxu0 %v11205_v45  ;;  %v11281_v57 = vld [vmem:[%s16167_s1 + $0x340] ss:$16 sps:$4 sm:$0xff]   ;;  %v11196_v45 = vld [vmem:[%s16167_s1 + $0x16c] ss:$16 sps:$4 sm:$0xff]  }
 0x225   :  { %4053 = vmatprep.subr.bf16.mxu1 %v11844_v3 }
 0x228   :  { %4054 = vmatpush2.bf16.msra.mxu1 %v11118_v58 }
 0x229   :  { %4055 = vmatprep.subr.bf16.mxu1 %v11844_v3 }
 0x22b   :  { %3883 = vmatmul.mubr.bf16.gmra.mxu0 %v11203_v59  ;;  %v11289_v59 = vld [vmem:[%s16167_s1 + $0x364] ss:$16 sps:$4 sm:$0xff]  }
 0x22c   :  { %4056 = vmatpush2.bf16.msra.mxu1 %v11119_v60  ;;  %3890 = vmatprep.mubr.bf16.mxu0 %v11211_v61 }
 0x22d   :  { %4057 = vmatprep.subr.bf16.mxu1 %v11844_v3 }
 0x230   :  { %4058 = vmatpush2.bf16.msra.mxu1 %v11120_v62  ;;  %v11194_v62 = vld [vmem:[%s16167_s1 + $0x168] ss:$16 sps:$4 sm:$0xff]  }
 0x231   :  { %4059 = vmatprep.subr.bf16.mxu1 %v11844_v3 }
 0x233   :  { %3891 = vmatmul.mubr.bf16.gmra.mxu0 %v11209_v63 }
 0x234   :  { %4060 = vmatpush2.bf16.msra.mxu1 %v11121_v0  ;;  %3898 = vmatprep.mubr.bf16.mxu0 %v11217_v1  ;;  %v11287_v0 = vld [vmem:[%s16167_s1 + $0x360] ss:$16 sps:$4 sm:$0xff]   ;;  %v11202_v1 = vld [vmem:[%s16167_s1 + $0x18c] ss:$16 sps:$4 sm:$0xff]  }
 0x235   :  { %4061 = vmatprep.subr.bf16.mxu1 %v11844_v3 }
 0x238   :  { %4062 = vmatpush2.bf16.msra.mxu1 %v11122_v2 }
 0x239   :  { %4063 = vmatprep.subr.bf16.mxu1 %v11844_v3 }
 0x23b   :  { %3899 = vmatmul.mubr.bf16.gmra.mxu0 %v11215_v4  ;;  %v11295_v4 = vld [vmem:[%s16167_s1 + $0x384] ss:$16 sps:$4 sm:$0xff]  }
 0x23c   :  { %4064 = vmatpush2.bf16.msra.mxu1 %v11126_v5  ;;  %3906 = vmatprep.mubr.bf16.mxu0 %v11223_v6 }
 0x23d   :  { %4065 = vmatprep.subr.bf16.mxu1 %v11844_v3 }
 0x240   :  { %4066 = vmatpush2.bf16.msra.mxu1 %v11127_v7  ;;  %v11200_v7 = vld [vmem:[%s16167_s1 + $0x188] ss:$16 sps:$4 sm:$0xff]  }
 0x241   :  { %6215 = vmatprep.subr.bf16.mxu1 %v11844_v3 }
 0x243   :  { %4068 = vmatmul.mubr.bf16.vlgmr.msra.gmra.mxu1 %v11128_v8  ;;  %3907 = vmatmul.mubr.bf16.gmra.mxu0 %v11221_v9  ;;  %v11293_v9 = vld [vmem:[%s16167_s1 + $0x380] ss:$16 sps:$4 sm:$0xff]  }
 0x244   :  { %4075 = vmatprep.mubr.bf16.mxu1 %v11136_v10  ;;  %3914 = vmatprep.mubr.bf16.mxu0 %v11229_v11  ;;  %v11208_v10 = vld [vmem:[%s16167_s1 + $0x1ac] ss:$16 sps:$4 sm:$0xff]  }
 0x24b   :  { %4076 = vmatmul.mubr.bf16.gmra.mxu1 %v11134_v12  ;;  %3915 = vmatmul.mubr.bf16.gmra.mxu0 %v11227_v13  ;;  %v11301_v12 = vld [vmem:[%s16167_s1 + $0x3a4] ss:$16 sps:$4 sm:$0xff]  }
 0x24c   :  { %4083 = vmatprep.mubr.bf16.mxu1 %v11142_v14  ;;  %3922 = vmatprep.mubr.bf16.mxu0 %v11235_v15  ;;  %v11206_v15 = vld [vmem:[%s16167_s1 + $0x1a8] ss:$16 sps:$4 sm:$0xff]  }
 0x253   :  { %4084 = vmatmul.mubr.bf16.gmra.mxu1 %v11140_v16  ;;  %3923 = vmatmul.mubr.bf16.gmra.mxu0 %v11233_v17  ;;  %v11299_v17 = vld [vmem:[%s16167_s1 + $0x3a0] ss:$16 sps:$4 sm:$0xff]  }
 0x254   :  { %4091 = vmatprep.mubr.bf16.mxu1 %v11148_v18  ;;  %3930 = vmatprep.mubr.bf16.mxu0 %v11241_v19  ;;  %v11214_v18 = vld [vmem:[%s16167_s1 + $0x1cc] ss:$16 sps:$4 sm:$0xff]  }
 0x25b   :  { %4092 = vmatmul.mubr.bf16.gmra.mxu1 %v11146_v20  ;;  %3931 = vmatmul.mubr.bf16.gmra.mxu0 %v11239_v21  ;;  %v11307_v20 = vld [vmem:[%s16167_s1 + $0x3c4] ss:$16 sps:$4 sm:$0xff]  }
 0x25c   :  { %4099 = vmatprep.mubr.bf16.mxu1 %v11154_v22  ;;  %3938 = vmatprep.mubr.bf16.mxu0 %v11247_v23  ;;  %v11212_v23 = vld [vmem:[%s16167_s1 + $0x1c8] ss:$16 sps:$4 sm:$0xff]  }
 0x263   :  { %4100 = vmatmul.mubr.bf16.gmra.mxu1 %v11152_v24  ;;  %3939 = vmatmul.mubr.bf16.gmra.mxu0 %v11245_v25  ;;  %v11305_v25 = vld [vmem:[%s16167_s1 + $0x3c0] ss:$16 sps:$4 sm:$0xff]  }
 0x264   :  { %4107 = vmatprep.mubr.bf16.mxu1 %v11160_v26  ;;  %3946 = vmatprep.mubr.bf16.mxu0 %v11253_v27  ;;  %v11220_v26 = vld [vmem:[%s16167_s1 + $0x1ec] ss:$16 sps:$4 sm:$0xff]  }
 0x26b   :  { %4108 = vmatmul.mubr.bf16.gmra.mxu1 %v11158_v28  ;;  %3947 = vmatmul.mubr.bf16.gmra.mxu0 %v11251_v29  ;;  %v11313_v28 = vld [vmem:[%s16167_s1 + $0x3e4] ss:$16 sps:$4 sm:$0xff]  }
 0x26c   :  { %4115 = vmatprep.mubr.bf16.mxu1 %v11166_v30  ;;  %3954 = vmatprep.mubr.bf16.mxu0 %v11259_v31  ;;  %v11218_v31 = vld [vmem:[%s16167_s1 + $0x1e8] ss:$16 sps:$4 sm:$0xff]  }
 0x273   :  { %4116 = vmatmul.mubr.bf16.gmra.mxu1 %v11164_v32  ;;  %3955 = vmatmul.mubr.bf16.gmra.mxu0 %v11257_v33  ;;  %v11311_v33 = vld [vmem:[%s16167_s1 + $0x3e0] ss:$16 sps:$4 sm:$0xff]  }
 0x274   :  { %4123 = vmatprep.mubr.bf16.mxu1 %v11172_v34  ;;  %3962 = vmatprep.mubr.bf16.mxu0 %v11265_v35  ;;  %v11226_v34 = vld [vmem:[%s16167_s1 + $0x20c] ss:$16 sps:$4 sm:$0xff]  }
 0x27b   :  { %4124 = vmatmul.mubr.bf16.gmra.mxu1 %v11170_v36  ;;  %3963 = vmatmul.mubr.bf16.gmra.mxu0 %v11263_v37 }
 0x27c   :  { %4131 = vmatprep.mubr.bf16.mxu1 %v11178_v38  ;;  %3970 = vmatprep.mubr.bf16.mxu0 %v11271_v39  ;;  %v11224_v38 = vld [vmem:[%s16167_s1 + $0x208] ss:$16 sps:$4 sm:$0xff]  }
 0x283   :  { %4132 = vmatmul.mubr.bf16.gmra.mxu1 %v11176_v40  ;;  %v13236_v46 = vpop.f32.mrf.mxu0  ;;  %3971 = vmatmul.mubr.bf16.gmra.mxu0 %v11269_v41  ;;  %v11232_v40 = vld [vmem:[%s16167_s1 + $0x22c] ss:$16 sps:$4 sm:$0xff]  }
 0x284   :  { %4139 = vmatprep.mubr.bf16.mxu1 %v11184_v43  ;;  %3978 = vmatprep.mubr.bf16.mxu0 %v11277_v44 }
 0x285   :  { %v3782_v47 = vpop.f32.mrf.mxu0 }
 0x286   :  { %v11230_v47 = vld [vmem:[%s16167_s1 + $0x228] ss:$16 sps:$4 sm:$0xff]  }
 0x287   :  { %v13241_v49 = vpop.f32.mrf.mxu0 }
 0x289   :  { %v3785_v52 = vpop.f32.mrf.mxu0 }
 0x28b   :  { %4140 = vmatmul.mubr.bf16.gmra.mxu1 %v11182_v48  ;;  %v13252_v54 = vpop.f32.mrf.mxu0  ;;  %3979 = vmatmul.mubr.bf16.gmra.mxu0 %v11275_v50  ;;  %v11238_v50 = vld [vmem:[%s16167_s1 + $0x24c] ss:$16 sps:$4 sm:$0xff]  }
 0x28c   :  { %4147 = vmatprep.mubr.bf16.mxu1 %v11190_v51  ;;  %3986 = vmatprep.mubr.bf16.mxu0 %v11283_v53 }
 0x28d   :  { %v3790_v55 = vpop.f32.mrf.mxu0 }
 0x28e   :  { %v11236_v55 = vld [vmem:[%s16167_s1 + $0x248] ss:$16 sps:$4 sm:$0xff]  }
 0x28f   :  { %v13257_v56 = vpop.f32.mrf.mxu0 }
 0x291   :  { %v3793_v58 = vpop.f32.mrf.mxu0 }
 0x293   :  { %4148 = vmatmul.mubr.bf16.gmra.mxu1 %v11188_v42  ;;  %v13268_v60 = vpop.f32.mrf.mxu0  ;;  %3987 = vmatmul.mubr.bf16.gmra.mxu0 %v11281_v57  ;;  %v11244_v57 = vld [vmem:[%s16167_s1 + $0x26c] ss:$16 sps:$4 sm:$0xff]  }
 0x294   :  { %4155 = vmatprep.mubr.bf16.mxu1 %v11196_v45  ;;  %3994 = vmatprep.mubr.bf16.mxu0 %v11289_v59 }
 0x295   :  { %v3798_v61 = vpop.f32.mrf.mxu0 }
 0x296   :  { %v11242_v61 = vld [vmem:[%s16167_s1 + $0x268] ss:$16 sps:$4 sm:$0xff]  }
 0x297   :  { %v13273_v63 = vpop.f32.mrf.mxu0 }
 0x299   :  { %v3801_v2 = vpop.f32.mrf.mxu0 }
 0x29b   :  { %4156 = vmatmul.mubr.bf16.gmra.mxu1 %v11194_v62  ;;  %v13284_v5 = vpop.f32.mrf.mxu0  ;;  %3995 = vmatmul.mubr.bf16.gmra.mxu0 %v11287_v0  ;;  %v11250_v0 = vld [vmem:[%s16167_s1 + $0x28c] ss:$16 sps:$4 sm:$0xff]  }
 0x29c   :  { %4163 = vmatprep.mubr.bf16.mxu1 %v11202_v1  ;;  %4002 = vmatprep.mubr.bf16.mxu0 %v11295_v4 }
 0x29d   :  { %v3806_v6 = vpop.f32.mrf.mxu0 }
 0x29e   :  { %v11248_v6 = vld [vmem:[%s16167_s1 + $0x288] ss:$16 sps:$4 sm:$0xff]  }
 0x29f   :  { %v13289_v8 = vpop.f32.mrf.mxu0 }
 0x2a1   :  { %v3809_v11 = vpop.f32.mrf.mxu0 }
 0x2a3   :  { %4164 = vmatmul.mubr.bf16.gmra.mxu1 %v11200_v7  ;;  %v13300_v13 = vpop.f32.mrf.mxu0  ;;  %4003 = vmatmul.mubr.bf16.gmra.mxu0 %v11293_v9  ;;  %v11256_v9 = vld [vmem:[%s16167_s1 + $0x2ac] ss:$16 sps:$4 sm:$0xff]  }
 0x2a4   :  { %4171 = vmatprep.mubr.bf16.mxu1 %v11208_v10  ;;  %4010 = vmatprep.mubr.bf16.mxu0 %v11301_v12 }
 0x2a5   :  { %v3814_v14 = vpop.f32.mrf.mxu0 }
 0x2a6   :  { %v11254_v14 = vld [vmem:[%s16167_s1 + $0x2a8] ss:$16 sps:$4 sm:$0xff]  }
 0x2a7   :  { %v13305_v16 = vpop.f32.mrf.mxu0 }
 0x2a9   :  { %v3817_v19 = vpop.f32.mrf.mxu0 }
 0x2ab   :  { %4172 = vmatmul.mubr.bf16.gmra.mxu1 %v11206_v15  ;;  %v13316_v21 = vpop.f32.mrf.mxu0  ;;  %4011 = vmatmul.mubr.bf16.gmra.mxu0 %v11299_v17  ;;  %v11262_v17 = vld [vmem:[%s16167_s1 + $0x2cc] ss:$16 sps:$4 sm:$0xff]  }
 0x2ac   :  { %4179 = vmatprep.mubr.bf16.mxu1 %v11214_v18  ;;  %4018 = vmatprep.mubr.bf16.mxu0 %v11307_v20 }
 0x2ad   :  { %v3822_v22 = vpop.f32.mrf.mxu0 }
 0x2ae   :  { %v11260_v22 = vld [vmem:[%s16167_s1 + $0x2c8] ss:$16 sps:$4 sm:$0xff]  }
 0x2af   :  { %v13321_v24 = vpop.f32.mrf.mxu0 }
 0x2b1   :  { %v3825_v27 = vpop.f32.mrf.mxu0 }
 0x2b3   :  { %4180 = vmatmul.mubr.bf16.gmra.mxu1 %v11212_v23  ;;  %v13332_v29 = vpop.f32.mrf.mxu0  ;;  %4019 = vmatmul.mubr.bf16.gmra.mxu0 %v11305_v25  ;;  %v11268_v25 = vld [vmem:[%s16167_s1 + $0x2ec] ss:$16 sps:$4 sm:$0xff]  }
 0x2b4   :  { %4187 = vmatprep.mubr.bf16.mxu1 %v11220_v26  ;;  %4026 = vmatprep.mubr.bf16.mxu0 %v11313_v28 }
 0x2b5   :  { %v3830_v30 = vpop.f32.mrf.mxu0 }
 0x2b6   :  { %v11266_v30 = vld [vmem:[%s16167_s1 + $0x2e8] ss:$16 sps:$4 sm:$0xff]  }
 0x2b7   :  { %v13337_v32 = vpop.f32.mrf.mxu0 }
 0x2b9   :  { %v3833_v35 = vpop.f32.mrf.mxu0 }
 0x2bb   :  { %4188 = vmatmul.mubr.bf16.gmra.mxu1 %v11218_v31  ;;  %v13345_v36 = vpop.f32.mrf.mxu0  ;;  %4027 = vmatmul.mubr.bf16.gmra.mxu0 %v11311_v33  ;;  %v11274_v33 = vld [vmem:[%s16167_s1 + $0x30c] ss:$16 sps:$4 sm:$0xff]  }
 0x2bc   :  { %4195 = vmatprep.mubr.bf16.mxu1 %v11226_v34 }
 0x2bd   :  { %v3838_v37 = vpop.f32.mrf.mxu0 }
 0x2bf   :  { %v13350_v39 = vpop.f32.mrf.mxu0 }
 0x2c1   :  { %v3841_v41 = vpop.f32.mrf.mxu0 }
 0x2c2   :  { %v11280_v41 = vld [vmem:[%s16167_s1 + $0x32c] ss:$16 sps:$4 sm:$0xff]  }
 0x2c3   :  { %4196 = vmatmul.mubr.bf16.gmra.mxu1 %v11224_v38  ;;  %v13355_v43 = vpop.f32.mrf.mxu0  ;;  %v11272_v38 = vld [vmem:[%s16167_s1 + $0x308] ss:$16 sps:$4 sm:$0xff]  }
 0x2c4   :  { %4203 = vmatprep.mubr.bf16.mxu1 %v11232_v40 }
 0x2c5   :  { %v3846_v44 = vpop.f32.mrf.mxu0 }
 0x2c7   :  { %v13360_v48 = vpop.f32.mrf.mxu0 }
 0x2c9   :  { %v3849_v51 = vpop.f32.mrf.mxu0 }
 0x2cb   :  { %4204 = vmatmul.mubr.bf16.gmra.mxu1 %v11230_v47  ;;  %v13365_v52 = vpop.f32.mrf.mxu0 }
 0x2cc   :  { %4211 = vmatprep.mubr.bf16.mxu1 %v11238_v50  ;;  %v13435_v50 = vstv %s9396_s10 }
 0x2cd   :  { %v3854_v53 = vpop.f32.mrf.mxu0 }
 0x2cf   :  { %v13370_v42 = vpop.f32.mrf.mxu0 }
 0x2d1   :  { %v3857_v45 = vpop.f32.mrf.mxu0 }
 0x2d3   :  { %4212 = vmatmul.mubr.bf16.gmra.mxu1 %v11236_v55  ;;  %v13375_v58 = vpop.f32.mrf.mxu0 }
 0x2d4   :  { %4219 = vmatprep.mubr.bf16.mxu1 %v11244_v57 }
 0x2d5   :  { %v3862_v59 = vpop.f32.mrf.mxu0 }
 0x2d6   :  { %v4324_v59 = vld [vmem:[%s16169_s3] sm:$0xff] }
 0x2d7   :  { %v13380_v62 = vpop.f32.mrf.mxu0 }
 0x2d9   :  { %v3865_v1 = vpop.f32.mrf.mxu0 }
 0x2db   :  { %4220 = vmatmul.mubr.bf16.gmra.mxu1 %v11242_v61  ;;  %v13385_v2 = vpop.f32.mrf.mxu0 }
 0x2dc   :  { %4227 = vmatprep.mubr.bf16.mxu1 %v11250_v0  ;;  %v11278_v0 = vld [vmem:[%s16167_s1 + $0x328] ss:$16 sps:$4 sm:$0xff]  }
 0x2dd   :  { %v3870_v4 = vpop.f32.mrf.mxu0 }
 0x2df   :  { %v13390_v7 = vpop.f32.mrf.mxu0 }
 0x2e1   :  { %v3873_v10 = vpop.f32.mrf.mxu0 }
 0x2e3   :  { %4228 = vmatmul.mubr.bf16.gmra.mxu1 %v11248_v6  ;;  %v13395_v11 = vpop.f32.mrf.mxu0 }
 0x2e4   :  { %4235 = vmatprep.mubr.bf16.mxu1 %v11256_v9 }
 0x2e5   :  { %v3878_v12 = vpop.f32.mrf.mxu0 }
 0x2e7   :  { %v13400_v15 = vpop.f32.mrf.mxu0 }
 0x2e9   :  { %v3881_v18 = vpop.f32.mrf.mxu0 }
 0x2eb   :  { %4236 = vmatmul.mubr.bf16.gmra.mxu1 %v11254_v14  ;;  %v13405_v19 = vpop.f32.mrf.mxu0 }
 0x2ec   :  { %4243 = vmatprep.mubr.bf16.mxu1 %v11262_v17  ;;  %v4325_v17 = vld [vmem:[%s16169_s3 + $0x8] sm:$0xff] }
 0x2ed   :  { %v3886_v20 = vpop.f32.mrf.mxu0 }
 0x2ef   :  { %v13410_v23 = vpop.f32.mrf.mxu0 }
 0x2f1   :  { %v3889_v26 = vpop.f32.mrf.mxu0 }
 0x2f3   :  { %4244 = vmatmul.mubr.bf16.gmra.mxu1 %v11260_v22  ;;  %v13415_v27 = vpop.f32.mrf.mxu0 }
 0x2f4   :  { %4251 = vmatprep.mubr.bf16.mxu1 %v11268_v25 }
 0x2f5   :  { %v3894_v28 = vpop.f32.mrf.mxu0 }
 0x2f7   :  { %v13420_v31 = vpop.f32.mrf.mxu0 }
 0x2f9   :  { %v3897_v34 = vpop.f32.mrf.mxu0 }
 0x2fa   :  { %v11284_v34 = vld [vmem:[%s16167_s1 + $0x348] ss:$16 sps:$4 sm:$0xff]  }
 0x2fb   :  { %4252 = vmatmul.mubr.bf16.gmra.mxu1 %v11266_v30  ;;  %v13425_v35 = vpop.f32.mrf.mxu0  ;;  %v4326_v30 = vld [vmem:[%s16169_s3 + $0x10] sm:$0xff] }
 0x2fc   :  { %4259 = vmatprep.mubr.bf16.mxu1 %v11274_v33 }
 0x2fd   :  { %v3902_v37 = vpop.f32.mrf.mxu0 }
 0x2ff   :  { %v13430_v40 = vpop.f32.mrf.mxu0 }
 0x301   :  { %v3905_v44 = vpop.f32.mrf.mxu0 }
 0x303   :  { %v4069_v47 = vpop.f32.mrf.mxu1  ;;  %4260 = vmatmul.mubr.bf16.gmra.mxu1 %v11272_v38  ;;  %v13437_v51 = vpop.f32.mrf.mxu0 }
 0x304   :  { %v4070_v53 = vadd.f32 %v4069_v47, %v13236_v46  ;;  %4267 = vmatprep.mubr.bf16.mxu1 %v11280_v41  ;;  %v11286_v46 = vld [vmem:[%s16167_s1 + $0x34c] ss:$16 sps:$4 sm:$0xff]  }
 0x305   :  { %v4071_v55 = vpop.f32.mrf.mxu1  ;;  %v3910_v57 = vpop.f32.mrf.mxu0  ;;  %v11292_v41 = vld [vmem:[%s16167_s1 + $0x36c] ss:$16 sps:$4 sm:$0xff]  }
 0x306   :  { %v4390_v45 = vmul.f32 %v13435_v50, %v4070_v53  ;;  %v4327_v57 = vld [vmem:[%s16169_s3 + $0x18] sm:$0xff] }
 0x307   :  { %v4072_v61 = vpop.f32.mrf.mxu1  ;;  %v13447_v1 = vpop.f32.mrf.mxu0 }
 0x308   :  { %v4454_v4 = vadd.f32 %v4390_v45, %v4324_v59  ;;  %v4073_v6 = vadd.f32 %v4072_v61, %v13241_v49 }
 0x309   :  { %v4074_v9 = vpop.f32.mrf.mxu1  ;;  %v3913_v10 = vpop.f32.mrf.mxu0 }
 0x30a   :  { %4518 = vst [vmem:[%s16169_s3] sm:$0xff] %v4454_v4  ;;  %v4391_v12 = vmul.f32 %v13435_v50, %v4073_v6  ;;  %v10426_v14 = vpack.c.bf16 %v4073_v6, %v4070_v53  ;;  %v11290_v10 = vld [vmem:[%s16167_s1 + $0x368] ss:$16 sps:$4 sm:$0xff]  }
 0x30b   :  { %v4077_v18 = vpop.f32.mrf.mxu1  ;;  %4268 = vmatmul.mubr.bf16.gmra.mxu1 %v11278_v0  ;;  %v13460_v49 = vpop.f32.mrf.mxu0 }
 0x30c   :  { %v4455_v20 = vadd.f32 %v4391_v12, %v4325_v17  ;;  %10427 = vst [vmem:[#allocation2] sm:$0xff] %v10426_v14   ;;  %v4078_v22 = vadd.f32 %v4077_v18, %v13252_v54  ;;  %4275 = vmatprep.mubr.bf16.mxu1 %v11286_v46  ;;  %v4328_v46 = vld [vmem:[%s16169_s3 + $0x20] sm:$0xff]  ;;  %v11298_v17 = vld [vmem:[%s16167_s1 + $0x38c] ss:$16 sps:$4 sm:$0xff]  }
 0x30d   :  { %v4079_v25 = vpop.f32.mrf.mxu1  ;;  %v3918_v26 = vpop.f32.mrf.mxu0 }
 0x30e   :  { %4519 = vst [vmem:[%s16169_s3 + $0x8] sm:$0xff] %v4455_v20  ;;  %v4392_v28 = vmul.f32 %v13435_v50, %v4078_v22  ;;  %v4329_v26 = vld [vmem:[%s16169_s3 + $0x28] sm:$0xff] }
 0x30f   :  { %v4080_v33 = vpop.f32.mrf.mxu1  ;;  %v13473_v37 = vpop.f32.mrf.mxu0 }
 0x310   :  { %v4456_v54 = vadd.f32 %v4392_v28, %v4326_v30  ;;  %v4081_v38 = vadd.f32 %v4080_v33, %v13257_v56 }
 0x311   :  { %v4082_v44 = vpop.f32.mrf.mxu1  ;;  %v3921_v47 = vpop.f32.mrf.mxu0 }
 0x312   :  { %4520 = vst [vmem:[%s16169_s3 + $0x10] sm:$0xff] %v4456_v54  ;;  %v4393_v53 = vmul.f32 %v13435_v50, %v4081_v38  ;;  %v10431_v55 = vpack.c.bf16 %v4081_v38, %v4078_v22  ;;  %v11296_v47 = vld [vmem:[%s16167_s1 + $0x388] ss:$16 sps:$4 sm:$0xff]  }
 0x313   :  { %v4085_v45 = vpop.f32.mrf.mxu1  ;;  %4276 = vmatmul.mubr.bf16.gmra.mxu1 %v11284_v34  ;;  %v13486_v56 = vpop.f32.mrf.mxu0 }
 0x314   :  { %v4457_v59 = vadd.f32 %v4393_v53, %v4327_v57  ;;  %10805 = vst [vmem:[#allocation2 + $0x8] sm:$0xff] %v10431_v55   ;;  %v4086_v61 = vadd.f32 %v4085_v45, %v13268_v60  ;;  %4283 = vmatprep.mubr.bf16.mxu1 %v11292_v41  ;;  %v4330_v41 = vld [vmem:[%s16169_s3 + $0x30] sm:$0xff]  ;;  %v11304_v57 = vld [vmem:[%s16167_s1 + $0x3ac] ss:$16 sps:$4 sm:$0xff]  }
 0x315   :  { %v4087_v0 = vpop.f32.mrf.mxu1  ;;  %v3926_v4 = vpop.f32.mrf.mxu0 }
 0x316   :  { %4521 = vst [vmem:[%s16169_s3 + $0x18] sm:$0xff] %v4457_v59  ;;  %v4394_v6 = vmul.f32 %v13435_v50, %v4086_v61  ;;  %v4331_v4 = vld [vmem:[%s16169_s3 + $0x38] sm:$0xff] }
 0x317   :  { %v4088_v9 = vpop.f32.mrf.mxu1  ;;  %v13499_v12 = vpop.f32.mrf.mxu0 }
 0x318   :  { %v4458_v60 = vadd.f32 %v4394_v6, %v4328_v46  ;;  %v4089_v14 = vadd.f32 %v4088_v9, %v13273_v63 }
 0x319   :  { %v4090_v18 = vpop.f32.mrf.mxu1  ;;  %v3929_v20 = vpop.f32.mrf.mxu0 }
 0x31a   :  { %4522 = vst [vmem:[%s16169_s3 + $0x20] sm:$0xff] %v4458_v60  ;;  %v4395_v22 = vmul.f32 %v13435_v50, %v4089_v14  ;;  %v10436_v25 = vpack.c.bf16 %v4089_v14, %v4086_v61  ;;  %v11302_v20 = vld [vmem:[%s16167_s1 + $0x3a8] ss:$16 sps:$4 sm:$0xff]  }
 0x31b   :  { %v4093_v28 = vpop.f32.mrf.mxu1  ;;  %4284 = vmatmul.mubr.bf16.gmra.mxu1 %v11290_v10  ;;  %v13512_v63 = vpop.f32.mrf.mxu0 }
 0x31c   :  { %v4459_v30 = vadd.f32 %v4395_v22, %v4329_v26  ;;  %10806 = vst [vmem:[#allocation2 + $0x10] sm:$0xff] %v10436_v25   ;;  %v4094_v33 = vadd.f32 %v4093_v28, %v13284_v5  ;;  %4291 = vmatprep.mubr.bf16.mxu1 %v11298_v17  ;;  %v4332_v17 = vld [vmem:[%s16169_s3 + $0x40] sm:$0xff]  ;;  %v11310_v26 = vld [vmem:[%s16167_s1 + $0x3cc] ss:$16 sps:$4 sm:$0xff]  }
 0x31d   :  { %v4095_v34 = vpop.f32.mrf.mxu1  ;;  %v3934_v54 = vpop.f32.mrf.mxu0 }
 0x31e   :  { %4523 = vst [vmem:[%s16169_s3 + $0x28] sm:$0xff] %v4459_v30  ;;  %v4396_v38 = vmul.f32 %v13435_v50, %v4094_v33  ;;  %v4333_v54 = vld [vmem:[%s16169_s3 + $0x48] sm:$0xff] }
 0x31f   :  { %v4096_v44 = vpop.f32.mrf.mxu1  ;;  %v13525_v53 = vpop.f32.mrf.mxu0 }
 0x320   :  { %v4460_v5 = vadd.f32 %v4396_v38, %v4330_v41  ;;  %v4097_v55 = vadd.f32 %v4096_v44, %v13289_v8 }
 0x321   :  { %v4098_v45 = vpop.f32.mrf.mxu1  ;;  %v3937_v59 = vpop.f32.mrf.mxu0 }
 0x322   :  { %4524 = vst [vmem:[%s16169_s3 + $0x30] sm:$0xff] %v4460_v5  ;;  %v4397_v61 = vmul.f32 %v13435_v50, %v4097_v55  ;;  %v10441_v0 = vpack.c.bf16 %v4097_v55, %v4094_v33  ;;  %v11308_v59 = vld [vmem:[%s16167_s1 + $0x3c8] ss:$16 sps:$4 sm:$0xff]  }
 0x323   :  { %v4101_v6 = vpop.f32.mrf.mxu1  ;;  %4292 = vmatmul.mubr.bf16.gmra.mxu1 %v11296_v47  ;;  %v13538_v8 = vpop.f32.mrf.mxu0 }
 0x324   :  { %v4461_v46 = vadd.f32 %v4397_v61, %v4331_v4  ;;  %10807 = vst [vmem:[#allocation2 + $0x18] sm:$0xff] %v10441_v0   ;;  %v4102_v9 = vadd.f32 %v4101_v6, %v13300_v13  ;;  %4299 = vmatprep.mubr.bf16.mxu1 %v11304_v57  ;;  %v4334_v57 = vld [vmem:[%s16169_s3 + $0x50] sm:$0xff]  ;;  %v11316_v4 = vld [vmem:[%s16167_s1 + $0x3ec] ss:$16 sps:$4 sm:$0xff]  }
 0x325   :  { %v4103_v10 = vpop.f32.mrf.mxu1  ;;  %v3942_v60 = vpop.f32.mrf.mxu0 }
 0x326   :  { %4525 = vst [vmem:[%s16169_s3 + $0x38] sm:$0xff] %v4461_v46  ;;  %v4398_v14 = vmul.f32 %v13435_v50, %v4102_v9  ;;  %v4335_v60 = vld [vmem:[%s16169_s3 + $0x58] sm:$0xff] }
 0x327   :  { %v4104_v18 = vpop.f32.mrf.mxu1  ;;  %v13551_v22 = vpop.f32.mrf.mxu0 }
 0x328   :  { %v4462_v13 = vadd.f32 %v4398_v14, %v4332_v17  ;;  %v4105_v25 = vadd.f32 %v4104_v18, %v13305_v16 }
 0x329   :  { %v4106_v28 = vpop.f32.mrf.mxu1  ;;  %v3945_v30 = vpop.f32.mrf.mxu0 }
 0x32a   :  { %4526 = vst [vmem:[%s16169_s3 + $0x40] sm:$0xff] %v4462_v13  ;;  %v4399_v33 = vmul.f32 %v13435_v50, %v4105_v25  ;;  %v10446_v34 = vpack.c.bf16 %v4105_v25, %v4102_v9  ;;  %v11314_v30 = vld [vmem:[%s16167_s1 + $0x3e8] ss:$16 sps:$4 sm:$0xff]  }
 0x32b   :  { %v4109_v38 = vpop.f32.mrf.mxu1  ;;  %4300 = vmatmul.mubr.bf16.gmra.mxu1 %v11302_v20  ;;  %v13564_v16 = vpop.f32.mrf.mxu0 }
 0x32c   :  { %v4463_v41 = vadd.f32 %v4399_v33, %v4333_v54  ;;  %10808 = vst [vmem:[#allocation2 + $0x20] sm:$0xff] %v10446_v34   ;;  %v4110_v44 = vadd.f32 %v4109_v38, %v13316_v21  ;;  %4307 = vmatprep.mubr.bf16.mxu1 %v11310_v26  ;;  %v4336_v26 = vld [vmem:[%s16169_s3 + $0x60] sm:$0xff] }
 0x32d   :  { %v4111_v47 = vpop.f32.mrf.mxu1  ;;  %v3950_v5 = vpop.f32.mrf.mxu0 }
 0x32e   :  { %4527 = vst [vmem:[%s16169_s3 + $0x48] sm:$0xff] %v4463_v41  ;;  %v4400_v55 = vmul.f32 %v13435_v50, %v4110_v44  ;;  %v4337_v47 = vld [vmem:[%s16169_s3 + $0x68] sm:$0xff] }
 0x32f   :  { %v4112_v45 = vpop.f32.mrf.mxu1  ;;  %v13577_v61 = vpop.f32.mrf.mxu0 }
 0x330   :  { %v4464_v21 = vadd.f32 %v4400_v55, %v4334_v57  ;;  %v4113_v0 = vadd.f32 %v4112_v45, %v13321_v24 }
 0x331   :  { %v4114_v6 = vpop.f32.mrf.mxu1  ;;  %v3953_v46 = vpop.f32.mrf.mxu0 }
 0x332   :  { %4528 = vst [vmem:[%s16169_s3 + $0x50] sm:$0xff] %v4464_v21  ;;  %v4401_v9 = vmul.f32 %v13435_v50, %v4113_v0  ;;  %v10451_v10 = vpack.c.bf16 %v4113_v0, %v4110_v44  ;;  %v4338_v0 = vld [vmem:[%s16169_s3 + $0x70] sm:$0xff] }
 0x333   :  { %v4117_v14 = vpop.f32.mrf.mxu1  ;;  %4308 = vmatmul.mubr.bf16.gmra.mxu1 %v11308_v59  ;;  %v13590_v24 = vpop.f32.mrf.mxu0 }
 0x334   :  { %v4465_v17 = vadd.f32 %v4401_v9, %v4335_v60  ;;  %10809 = vst [vmem:[#allocation2 + $0x28] sm:$0xff] %v10451_v10   ;;  %v4118_v18 = vadd.f32 %v4117_v14, %v13332_v29  ;;  %4315 = vmatprep.mubr.bf16.mxu1 %v11316_v4 }
 0x335   :  { %v4119_v20 = vpop.f32.mrf.mxu1  ;;  %v3958_v13 = vpop.f32.mrf.mxu0 }
 0x336   :  { %4529 = vst [vmem:[%s16169_s3 + $0x58] sm:$0xff] %v4465_v17  ;;  %v4402_v25 = vmul.f32 %v13435_v50, %v4118_v18  ;;  %v4339_v17 = vld [vmem:[%s16169_s3 + $0x78] sm:$0xff] }
 0x337   :  { %v4120_v28 = vpop.f32.mrf.mxu1  ;;  %v13603_v33 = vpop.f32.mrf.mxu0 }
 0x338   :  { %v4466_v29 = vadd.f32 %v4402_v25, %v4336_v26  ;;  %v4121_v34 = vadd.f32 %v4120_v28, %v13337_v32 }
 0x339   :  { %v4122_v54 = vpop.f32.mrf.mxu1  ;;  %v3961_v38 = vpop.f32.mrf.mxu0 }
 0x33a   :  { %4530 = vst [vmem:[%s16169_s3 + $0x60] sm:$0xff] %v4466_v29  ;;  %v4403_v41 = vmul.f32 %v13435_v50, %v4121_v34  ;;  %v10456_v44 = vpack.c.bf16 %v4121_v34, %v4118_v18 }
 0x33b   :  { %v4125_v5 = vpop.f32.mrf.mxu1  ;;  %4316 = vmatmul.mubr.bf16.gmra.mxu1 %v11314_v30  ;;  %v13613_v55 = vpop.f32.mrf.mxu0  ;;  %v4340_v30 = vld [vmem:[%s16169_s3 + $0x80] sm:$0xff] }
 0x33c   :  { %v4467_v57 = vadd.f32 %v4403_v41, %v4337_v47  ;;  %10810 = vst [vmem:[#allocation2 + $0x30] sm:$0xff] %v10456_v44   ;;  %v4126_v32 = vadd.f32 %v4125_v5, %v13345_v36  ;;  %v4341_v44 = vld [vmem:[%s16169_s3 + $0x88] sm:$0xff] }
 0x33d   :  { %v4127_v45 = vpop.f32.mrf.mxu1  ;;  %v3966_v59 = vpop.f32.mrf.mxu0 }
 0x33e   :  { %4531 = vst [vmem:[%s16169_s3 + $0x68] sm:$0xff] %v4467_v57  ;;  %v4404_v21 = vmul.f32 %v13435_v50, %v4126_v32 }
 0x33f   :  { %v4128_v4 = vpop.f32.mrf.mxu1  ;;  %v13623_v6 = vpop.f32.mrf.mxu0 }
 0x340   :  { %v4468_v46 = vadd.f32 %v4404_v21, %v4338_v0  ;;  %v4129_v9 = vadd.f32 %v4128_v4, %v13350_v39 }
 0x341   :  { %v4130_v10 = vpop.f32.mrf.mxu1  ;;  %v3969_v36 = vpop.f32.mrf.mxu0 }
 0x342   :  { %4532 = vst [vmem:[%s16169_s3 + $0x70] sm:$0xff] %v4468_v46  ;;  %v4405_v60 = vmul.f32 %v13435_v50, %v4129_v9  ;;  %v10461_v14 = vpack.c.bf16 %v4129_v9, %v4126_v32  ;;  %v4342_v46 = vld [vmem:[%s16169_s3 + $0x90] sm:$0xff] }
 0x343   :  { %v4133_v18 = vpop.f32.mrf.mxu1  ;;  %v13633_v20 = vpop.f32.mrf.mxu0  ;;  %v11318_v10 = vld [vmem:[#allocation2 + $0x30] sm:$0xff]  }
 0x344   :  { %v4469_v13 = vadd.f32 %v4405_v60, %v4339_v17  ;;  %10811 = vst [vmem:[#allocation2 + $0x38] sm:$0xff] %v10461_v14   ;;  %v4134_v39 = vadd.f32 %v4133_v18, %v13355_v43  ;;  %v4343_v18 = vld [vmem:[%s16169_s3 + $0x98] sm:$0xff] }
 0x345   :  { %v4135_v25 = vpop.f32.mrf.mxu1  ;;  %v3974_v26 = vpop.f32.mrf.mxu0 }
 0x346   :  { %4533 = vst [vmem:[%s16169_s3 + $0x78] sm:$0xff] %v4469_v13  ;;  %v4406_v28 = vmul.f32 %v13435_v50, %v4134_v39  ;;  %v11319_v26 = vld [vmem:[#allocation2 + $0x28] sm:$0xff]  }
 0x347   :  { %v4136_v29 = vpop.f32.mrf.mxu1  ;;  %v13643_v34 = vpop.f32.mrf.mxu0 }
 0x348   :  { %v4470_v54 = vadd.f32 %v4406_v28, %v4340_v30  ;;  %v4137_v38 = vadd.f32 %v4136_v29, %v13360_v48 }
 0x349   :  { %v4138_v41 = vpop.f32.mrf.mxu1  ;;  %v3977_v43 = vpop.f32.mrf.mxu0 }
 0x34a   :  { %4534 = vst [vmem:[%s16169_s3 + $0x80] sm:$0xff] %v4470_v54  ;;  %v4407_v47 = vmul.f32 %v13435_v50, %v4137_v38  ;;  %v10466_v5 = vpack.c.bf16 %v4137_v38, %v4134_v39  ;;  %v4344_v41 = vld [vmem:[%s16169_s3 + $0xa0] sm:$0xff] }
 0x34b   :  { %v4141_v57 = vpop.f32.mrf.mxu1  ;;  %v11317_v32 = vld [vmem:[#allocation2 + $0x38] sm:$0xff]   ;;  %v13653_v45 = vpop.f32.mrf.mxu0 }
 0x34c   :  { %v4471_v59 = vadd.f32 %v4407_v47, %v4341_v44  ;;  %10812 = vst [vmem:[#allocation2 + $0x40] sm:$0xff] %v10466_v5   ;;  %v4142_v48 = vadd.f32 %v4141_v57, %v13365_v52  ;;  %5927 = vmatpush1.bf16.msra.mxu0 %v11317_v32  ;;  %v11320_v44 = vld [vmem:[#allocation2 + $0x20] sm:$0xff]  }
 0x34d   :  { %v4143_v21 = vpop.f32.mrf.mxu1  ;;  %v3982_v0 = vpop.f32.mrf.mxu0  ;;  %5928 = vmatprep.subr.bf16.mxu0 %v11844_v3 }
 0x34e   :  { %4535 = vst [vmem:[%s16169_s3 + $0x88] sm:$0xff] %v4471_v59  ;;  %v4408_v4 = vmul.f32 %v13435_v50, %v4142_v48  ;;  %v4345_v59 = vld [vmem:[%s16169_s3 + $0xa8] sm:$0xff] }
 0x34f   :  { %v4144_v9 = vpop.f32.mrf.mxu1  ;;  %v13664_v36 = vpop.f32.mrf.mxu0 }
 0x350   :  { %v4472_v52 = vadd.f32 %v4408_v4, %v4342_v46  ;;  %v4145_v60 = vadd.f32 %v4144_v9, %v13370_v42  ;;  %5929 = vmatpush1.bf16.msra.mxu0 %v11318_v10  ;;  %v11321_v4 = vld [vmem:[#allocation2 + $0x18] sm:$0xff]  }
 0x351   :  { %v4146_v14 = vpop.f32.mrf.mxu1  ;;  %v3985_v17 = vpop.f32.mrf.mxu0  ;;  %5930 = vmatprep.subr.bf16.mxu0 %v11844_v3 }
 0x352   :  { %4536 = vst [vmem:[%s16169_s3 + $0x90] sm:$0xff] %v4472_v52  ;;  %v4409_v13 = vmul.f32 %v13435_v50, %v4145_v60  ;;  %v10471_v39 = vpack.c.bf16 %v4145_v60, %v4142_v48  ;;  %v4346_v14 = vld [vmem:[%s16169_s3 + $0xb0] sm:$0xff] }
 0x353   :  { %v4149_v25 = vpop.f32.mrf.mxu1  ;;  %v13675_v28 = vpop.f32.mrf.mxu0 }
 0x354   :  { %v4473_v42 = vadd.f32 %v4409_v13, %v4343_v18  ;;  %10813 = vst [vmem:[#allocation2 + $0x48] sm:$0xff] %v10471_v39   ;;  %v4150_v30 = vadd.f32 %v4149_v25, %v13375_v58  ;;  %5931 = vmatpush1.bf16.msra.mxu0 %v11319_v26  ;;  %v11322_v18 = vld [vmem:[#allocation2 + $0x10] sm:$0xff]  }
 0x355   :  { %v4151_v29 = vpop.f32.mrf.mxu1  ;;  %v3990_v54 = vpop.f32.mrf.mxu0  ;;  %5932 = vmatprep.subr.bf16.mxu0 %v11844_v3 }
 0x356   :  { %4537 = vst [vmem:[%s16169_s3 + $0x98] sm:$0xff] %v4473_v42  ;;  %v4410_v38 = vmul.f32 %v13435_v50, %v4150_v30  ;;  %v4347_v42 = vld [vmem:[%s16169_s3 + $0xb8] sm:$0xff] }
 0x357   :  { %v4152_v43 = vpop.f32.mrf.mxu1  ;;  %v13686_v47 = vpop.f32.mrf.mxu0 }
 0x358   :  { %v4474_v58 = vadd.f32 %v4410_v38, %v4344_v41  ;;  %v4153_v5 = vadd.f32 %v4152_v43, %v13380_v62  ;;  %5933 = vmatpush1.bf16.msra.mxu0 %v11320_v44  ;;  %v11323_v38 = vld [vmem:[#allocation2 + $0x8] sm:$0xff]  }
 0x359   :  { %v4154_v57 = vpop.f32.mrf.mxu1  ;;  %v3993_v32 = vpop.f32.mrf.mxu0  ;;  %5934 = vmatprep.subr.bf16.mxu0 %v11844_v3 }
 0x35a   :  { %4538 = vst [vmem:[%s16169_s3 + $0xa0] sm:$0xff] %v4474_v58  ;;  %v4411_v48 = vmul.f32 %v13435_v50, %v4153_v5  ;;  %v10476_v21 = vpack.c.bf16 %v4153_v5, %v4150_v30  ;;  %v4348_v57 = vld [vmem:[%s16169_s3 + $0xc0] sm:$0xff] }
 0x35b   :  { %v4157_v0 = vpop.f32.mrf.mxu1  ;;  %v13697_v46 = vpop.f32.mrf.mxu0 }
 0x35c   :  { %v4475_v62 = vadd.f32 %v4411_v48, %v4345_v59  ;;  %10814 = vst [vmem:[#allocation2 + $0x50] sm:$0xff] %v10476_v21   ;;  %v4158_v9 = vadd.f32 %v4157_v0, %v13385_v2  ;;  %5935 = vmatpush1.bf16.msra.mxu0 %v11321_v4  ;;  %v11324_v59 = vld [vmem:[#allocation2] sm:$0xff]  }
 0x35d   :  { %v4159_v10 = vpop.f32.mrf.mxu1  ;;  %v3998_v52 = vpop.f32.mrf.mxu0  ;;  %5936 = vmatprep.subr.bf16.mxu0 %v11844_v3 }
 0x35e   :  { %4539 = vst [vmem:[%s16169_s3 + $0xa8] sm:$0xff] %v4475_v62  ;;  %v4412_v60 = vmul.f32 %v13435_v50, %v4158_v9  ;;  %v4349_v10 = vld [vmem:[%s16169_s3 + $0xc8] sm:$0xff] }
 0x35f   :  { %v4160_v17 = vpop.f32.mrf.mxu1  ;;  %v13708_v13 = vpop.f32.mrf.mxu0 }
 0x360   :  { %v4476_v2 = vadd.f32 %v4412_v60, %v4346_v14  ;;  %v4161_v39 = vadd.f32 %v4160_v17, %v13390_v7  ;;  %5937 = vmatpush1.bf16.msra.mxu0 %v11322_v18 }
 0x361   :  { %v4162_v25 = vpop.f32.mrf.mxu1  ;;  %v4001_v26 = vpop.f32.mrf.mxu0  ;;  %5938 = vmatprep.subr.bf16.mxu0 %v11844_v3 }
 0x362   :  { %4540 = vst [vmem:[%s16169_s3 + $0xb0] sm:$0xff] %v4476_v2  ;;  %v4413_v30 = vmul.f32 %v13435_v50, %v4161_v39  ;;  %v10481_v29 = vpack.c.bf16 %v4161_v39, %v4158_v9  ;;  %v4350_v39 = vld [vmem:[%s16169_s3 + $0xd0] sm:$0xff] }
 0x363   :  { %v4165_v54 = vpop.f32.mrf.mxu1  ;;  %v13719_v41 = vpop.f32.mrf.mxu0 }
 0x364   :  { %v4477_v7 = vadd.f32 %v4413_v30, %v4347_v42  ;;  %10815 = vst [vmem:[#allocation2 + $0x58] sm:$0xff] %v10481_v29   ;;  %v4166_v43 = vadd.f32 %v4165_v54, %v13395_v11  ;;  %5939 = vmatpush1.bf16.msra.mxu0 %v11323_v38 }
 0x365   :  { %v4167_v44 = vpop.f32.mrf.mxu1  ;;  %v4006_v58 = vpop.f32.mrf.mxu0  ;;  %5940 = vmatprep.subr.bf16.mxu0 %v11844_v3 }
 0x366   :  { %4541 = vst [vmem:[%s16169_s3 + $0xb8] sm:$0xff] %v4477_v7  ;;  %v4414_v5 = vmul.f32 %v13435_v50, %v4166_v43  ;;  %v4351_v7 = vld [vmem:[%s16169_s3 + $0xd8] sm:$0xff] }
 0x367   :  { %v4168_v32 = vpop.f32.mrf.mxu1  ;;  %v13730_v48 = vpop.f32.mrf.mxu0 }
 0x368   :  { %v4478_v11 = vadd.f32 %v4414_v5, %v4348_v57  ;;  %v4169_v21 = vadd.f32 %v4168_v32, %v13400_v15  ;;  %5941 = vmatpush1.bf16.msra.mxu0 %v11324_v59  ;;  %v4352_v59 = vld [vmem:[%s16169_s3 + $0xe0] sm:$0xff] }
 0x369   :  { %v4170_v0 = vpop.f32.mrf.mxu1  ;;  %v4009_v4 = vpop.f32.mrf.mxu0  ;;  %5942 = vmatprep.subr.bf16.mxu0 %v11844_v3 }
 0x36a   :  { %4542 = vst [vmem:[%s16169_s3 + $0xc0] sm:$0xff] %v4478_v11  ;;  %v4415_v62 = vmul.f32 %v13435_v50, %v4169_v21  ;;  %v10486_v9 = vpack.c.bf16 %v4169_v21, %v4166_v43 }
 0x36b   :  { %v4173_v52 = vpop.f32.mrf.mxu1  ;;  %v13741_v60 = vpop.f32.mrf.mxu0 }
 0x36c   :  { %v4479_v15 = vadd.f32 %v4415_v62, %v4349_v10  ;;  %10816 = vst [vmem:[#allocation2 + $0x60] sm:$0xff] %v10486_v9   ;;  %v4174_v14 = vadd.f32 %v4173_v52, %v13405_v19  ;;  %v4353_v52 = vld [vmem:[%s16169_s3 + $0xe8] sm:$0xff] }
 0x36d   :  { %v4175_v17 = vpop.f32.mrf.mxu1  ;;  %v4014_v18 = vpop.f32.mrf.mxu0 }
 0x36e   :  { %4543 = vst [vmem:[%s16169_s3 + $0xc8] sm:$0xff] %v4479_v15  ;;  %v4416_v2 = vmul.f32 %v13435_v50, %v4174_v14 }
 0x36f   :  { %v4176_v25 = vpop.f32.mrf.mxu1  ;;  %v13751_v26 = vpop.f32.mrf.mxu0 }
 0x370   :  { %v4480_v42 = vadd.f32 %v4416_v2, %v4350_v39  ;;  %v4177_v30 = vadd.f32 %v4176_v25, %v13410_v23  ;;  %v4354_v25 = vld [vmem:[%s16169_s3 + $0xf0] sm:$0xff] }
 0x371   :  { %v4178_v29 = vpop.f32.mrf.mxu1  ;;  %v4017_v19 = vpop.f32.mrf.mxu0 }
 0x372   :  { %4544 = vst [vmem:[%s16169_s3 + $0xd0] sm:$0xff] %v4480_v42  ;;  %v4417_v54 = vmul.f32 %v13435_v50, %v4177_v30  ;;  %v10491_v38 = vpack.c.bf16 %v4177_v30, %v4174_v14 }
 0x373   :  { %v4181_v43 = vpop.f32.mrf.mxu1  ;;  %v13761_v44 = vpop.f32.mrf.mxu0 }
 0x374   :  { %v4481_v58 = vadd.f32 %v4417_v54, %v4351_v7  ;;  %10817 = vst [vmem:[#allocation2 + $0x68] sm:$0xff] %v10491_v38   ;;  %v4182_v23 = vadd.f32 %v4181_v43, %v13415_v27  ;;  %v4355_v43 = vld [vmem:[%s16169_s3 + $0xf8] sm:$0xff] }
 0x375   :  { %v4183_v5 = vpop.f32.mrf.mxu1  ;;  %v4022_v57 = vpop.f32.mrf.mxu0 }
 0x376   :  { %4545 = vst [vmem:[%s16169_s3 + $0xd8] sm:$0xff] %v4481_v58  ;;  %v4418_v32 = vmul.f32 %v13435_v50, %v4182_v23 }
 0x377   :  { %v4184_v11 = vpop.f32.mrf.mxu1  ;;  %v13771_v21 = vpop.f32.mrf.mxu0 }
 0x378   :  { %v4482_v0 = vadd.f32 %v4418_v32, %v4352_v59  ;;  %v4185_v4 = vadd.f32 %v4184_v11, %v13420_v31  ;;  %v4356_v32 = vld [vmem:[%s16169_s3 + $0x100] sm:$0xff] }
 0x379   :  { %v4186_v62 = vpop.f32.mrf.mxu1  ;;  %v4025_v27 = vpop.f32.mrf.mxu0 }
 0x37a   :  { %4546 = vst [vmem:[%s16169_s3 + $0xe0] sm:$0xff] %v4482_v0  ;;  %v4419_v9 = vmul.f32 %v13435_v50, %v4185_v4  ;;  %v10496_v10 = vpack.c.bf16 %v4185_v4, %v4182_v23 }
 0x37b   :  { %v4189_v15 = vpop.f32.mrf.mxu1  ;;  %v13781_v14 = vpop.f32.mrf.mxu0 }
 0x37c   :  { %v4483_v17 = vadd.f32 %v4419_v9, %v4353_v52  ;;  %10818 = vst [vmem:[#allocation2 + $0x70] sm:$0xff] %v10496_v10   ;;  %v4190_v31 = vadd.f32 %v4189_v15, %v13425_v35 }
 0x37d   :  { %v4191_v18 = vpop.f32.mrf.mxu1  ;;  %v4030_v2 = vpop.f32.mrf.mxu0 }
 0x37e   :  { %4547 = vst [vmem:[%s16169_s3 + $0xe8] sm:$0xff] %v4483_v17  ;;  %v4420_v39 = vmul.f32 %v13435_v50, %v4190_v31 }
 0x37f   :  { %v4192_v42 = vpop.f32.mrf.mxu1  ;;  %v13791_v30 = vpop.f32.mrf.mxu0 }
 0x380   :  { %v4484_v29 = vadd.f32 %v4420_v39, %v4354_v25  ;;  %v4193_v19 = vadd.f32 %v4192_v42, %v13430_v40  ;;  %v4359_v42 = vld [vmem:[%s16169_s3 + $0x118] sm:$0xff] }
 0x381   :  { %v4194_v54 = vpop.f32.mrf.mxu1  ;;  %v4033_v35 = vpop.f32.mrf.mxu0 }
 0x382   :  { %4548 = vst [vmem:[%s16169_s3 + $0xf0] sm:$0xff] %v4484_v29  ;;  %v4421_v38 = vmul.f32 %v13435_v50, %v4193_v19  ;;  %v10501_v7 = vpack.c.bf16 %v4193_v19, %v4190_v31  ;;  %v4358_v31 = vld [vmem:[%s16169_s3 + $0x110] sm:$0xff]  ;;  %v11327_v35 = vld [vmem:[#allocation2 + $0x68] sm:$0xff]  }
 0x383   :  { %v4197_v58 = vpop.f32.mrf.mxu1  ;;  %v11326_v2 = vld [vmem:[#allocation2 + $0x70] sm:$0xff]  }
 0x384   :  { %v4485_v23 = vadd.f32 %v4421_v38, %v4355_v43  ;;  %10819 = vst [vmem:[#allocation2 + $0x78] sm:$0xff] %v10501_v7   ;;  %v4198_v5 = vadd.f32 %v4197_v58, %v13437_v51  ;;  %v4357_v51 = vld [vmem:[%s16169_s3 + $0x108] sm:$0xff]  ;;  %v4360_v58 = vld [vmem:[%s16169_s3 + $0x120] sm:$0xff] }
 0x385   :  { %v4199_v57 = vpop.f32.mrf.mxu1 }
 0x386   :  { %4549 = vst [vmem:[%s16169_s3 + $0xf8] sm:$0xff] %v4485_v23  ;;  %v4422_v40 = vmul.f32 %v13435_v50, %v4198_v5 }
 0x387   :  { %v4200_v59 = vpop.f32.mrf.mxu1 }
 0x388   :  { %v4486_v11 = vadd.f32 %v4422_v40, %v4356_v32  ;;  %v4201_v0 = vadd.f32 %v4200_v59, %v13447_v1  ;;  %v4361_v32 = vld [vmem:[%s16169_s3 + $0x128] sm:$0xff] }
 0x389   :  { %v4202_v4 = vpop.f32.mrf.mxu1 }
 0x38a   :  { %4550 = vst [vmem:[%s16169_s3 + $0x100] sm:$0xff] %v4486_v11  ;;  %v4423_v62 = vmul.f32 %v13435_v50, %v4201_v0  ;;  %v10506_v27 = vpack.c.bf16 %v4201_v0, %v4198_v5  ;;  %v11328_v5 = vld [vmem:[#allocation2 + $0x60] sm:$0xff]   ;;  %v11329_v4 = vld [vmem:[#allocation2 + $0x58] sm:$0xff]  }
 0x38b   :  { %v4205_v9 = vpop.f32.mrf.mxu1  ;;  %v11325_v10 = vld [vmem:[#allocation2 + $0x78] sm:$0xff]  }
 0x38c   :  { %v4487_v52 = vadd.f32 %v4423_v62, %v4357_v51  ;;  %10820 = vst [vmem:[#allocation2 + $0x80] sm:$0xff] %v10506_v27   ;;  %v4206_v15 = vadd.f32 %v4205_v9, %v13460_v49  ;;  %5943 = vmatpush2.bf16.msra.mxu0 %v11325_v10  ;;  %v4362_v9 = vld [vmem:[%s16169_s3 + $0x130] sm:$0xff] }
 0x38d   :  { %v4207_v17 = vpop.f32.mrf.mxu1  ;;  %5944 = vmatprep.subr.bf16.mxu0 %v11844_v3 }
 0x38e   :  { %4551 = vst [vmem:[%s16169_s3 + $0x108] sm:$0xff] %v4487_v52  ;;  %v4424_v1 = vmul.f32 %v13435_v50, %v4206_v15  ;;  %v11330_v52 = vld [vmem:[#allocation2 + $0x50] sm:$0xff]  }
 0x38f   :  { %v4208_v18 = vpop.f32.mrf.mxu1 }
 0x390   :  { %v4488_v39 = vadd.f32 %v4424_v1, %v4358_v31  ;;  %v4209_v25 = vadd.f32 %v4208_v18, %v13473_v37  ;;  %5945 = vmatpush2.bf16.msra.mxu0 %v11326_v2  ;;  %v4363_v1 = vld [vmem:[%s16169_s3 + $0x138] sm:$0xff]  ;;  %v11349_v2 = vld [vmem:[%s16167_s1 + $0x4] ss:$16 sps:$4 sm:$0xff]  }
 0x391   :  { %v4210_v49 = vpop.f32.mrf.mxu1  ;;  %5946 = vmatprep.subr.bf16.mxu0 %v11844_v3  ;;  %5958 = vmatprep.mubr.bf16.mxu0 %v11349_v2  ;;  %v11361_v2 = vld [vmem:[%s16167_s1 + $0x40] ss:$16 sps:$4 sm:$0xff]  }
 0x392   :  { %4552 = vst [vmem:[%s16169_s3 + $0x110] sm:$0xff] %v4488_v39  ;;  %v4425_v29 = vmul.f32 %v13435_v50, %v4209_v25  ;;  %v10511_v19 = vpack.c.bf16 %v4209_v25, %v4206_v15  ;;  %v11331_v39 = vld [vmem:[#allocation2 + $0x48] sm:$0xff]  }
 0x393   :  { %v4213_v54 = vpop.f32.mrf.mxu1 }
 0x394   :  { %v4489_v38 = vadd.f32 %v4425_v29, %v4359_v42  ;;  %10821 = vst [vmem:[#allocation2 + $0x88] sm:$0xff] %v10511_v19   ;;  %v4214_v37 = vadd.f32 %v4213_v54, %v13486_v56  ;;  %5947 = vmatpush2.bf16.msra.mxu0 %v11327_v35  ;;  %v4364_v19 = vld [vmem:[%s16169_s3 + $0x140] sm:$0xff] }
 0x395   :  { %v4215_v7 = vpop.f32.mrf.mxu1  ;;  %5948 = vmatprep.subr.bf16.mxu0 %v11844_v3  ;;  %v11332_v35 = vld [vmem:[#allocation2 + $0x40] sm:$0xff]  }
 0x396   :  { %4553 = vst [vmem:[%s16169_s3 + $0x118] sm:$0xff] %v4489_v38  ;;  %v4426_v43 = vmul.f32 %v13435_v50, %v4214_v37 }
 0x397   :  { %v4216_v23 = vpop.f32.mrf.mxu1 }
 0x398   :  { %v4490_v57 = vadd.f32 %v4426_v43, %v4360_v58  ;;  %v4217_v40 = vadd.f32 %v4216_v23, %v13499_v12  ;;  %5949 = vmatpush2.bf16.msra.mxu0 %v11328_v5  ;;  %v11354_v43 = vld [vmem:[%s16167_s1 + $0xc] ss:$16 sps:$4 sm:$0xff]  }
 0x399   :  { %v4218_v56 = vpop.f32.mrf.mxu1  ;;  %5950 = vmatprep.subr.bf16.mxu0 %v11844_v3  ;;  %6247 = vmatprep.mubr.bf16.mxu1 %v11354_v43 }
 0x39a   :  { %4554 = vst [vmem:[%s16169_s3 + $0x120] sm:$0xff] %v4490_v57  ;;  %v4427_v59 = vmul.f32 %v13435_v50, %v4217_v40  ;;  %v10516_v11 = vpack.c.bf16 %v4217_v40, %v4214_v37  ;;  %v11347_v37 = vld [vmem:[%s16167_s1] ss:$16 sps:$4 sm:$0xff]   ;;  %v11357_v56 = vld [vmem:[%s16167_s1 + $0x24] ss:$16 sps:$4 sm:$0xff]  }
 0x39b   :  { %v4221_v0 = vpop.f32.mrf.mxu1 }
 0x39c   :  { %v4491_v51 = vadd.f32 %v4427_v59, %v4361_v32  ;;  %10822 = vst [vmem:[#allocation2 + $0x90] sm:$0xff] %v10516_v11   ;;  %v4222_v12 = vadd.f32 %v4221_v0, %v13512_v63  ;;  %5951 = vmatpush2.bf16.msra.mxu0 %v11329_v4  ;;  %v4366_v11 = vld [vmem:[%s16169_s3 + $0x150] sm:$0xff] }
 0x39d   :  { %v4223_v62 = vpop.f32.mrf.mxu1  ;;  %5952 = vmatprep.subr.bf16.mxu0 %v11844_v3 }
 0x39e   :  { %4555 = vst [vmem:[%s16169_s3 + $0x128] sm:$0xff] %v4491_v51  ;;  %v4428_v27 = vmul.f32 %v13435_v50, %v4222_v12  ;;  %v11355_v51 = vld [vmem:[%s16167_s1 + $0x20] ss:$16 sps:$4 sm:$0xff]  }
 0x39f   :  { %v4224_v10 = vpop.f32.mrf.mxu1 }
 0x3a0   :  { %v4492_v15 = vadd.f32 %v4428_v27, %v4362_v9  ;;  %v4225_v17 = vadd.f32 %v4224_v10, %v13525_v53  ;;  %5953 = vmatpush2.bf16.msra.mxu0 %v11330_v52  ;;  %v4367_v9 = vld [vmem:[%s16169_s3 + $0x158] sm:$0xff] }
 0x3a1   :  { %v4226_v63 = vpop.f32.mrf.mxu1  ;;  %5954 = vmatprep.subr.bf16.mxu0 %v11844_v3 }
 0x3a2   :  { %4556 = vst [vmem:[%s16169_s3 + $0x130] sm:$0xff] %v4492_v15  ;;  %v4429_v31 = vmul.f32 %v13435_v50, %v4225_v17  ;;  %v10521_v18 = vpack.c.bf16 %v4225_v17, %v4222_v12  ;;  %v11363_v15 = vld [vmem:[%s16167_s1 + $0x44] ss:$16 sps:$4 sm:$0xff]  }
 0x3a3   :  { %v4229_v53 = vpop.f32.mrf.mxu1 }
 0x3a4   :  { %v4493_v25 = vadd.f32 %v4429_v31, %v4363_v1  ;;  %10823 = vst [vmem:[#allocation2 + $0x98] sm:$0xff] %v10521_v18   ;;  %v4230_v49 = vadd.f32 %v4229_v53, %v13538_v8  ;;  %5955 = vmatpush2.bf16.msra.mxu0 %v11331_v39  ;;  %v4368_v1 = vld [vmem:[%s16169_s3 + $0x160] sm:$0xff] }
 0x3a5   :  { %v4231_v42 = vpop.f32.mrf.mxu1  ;;  %5956 = vmatprep.subr.bf16.mxu0 %v11844_v3 }
 0x3a6   :  { %4557 = vst [vmem:[%s16169_s3 + $0x138] sm:$0xff] %v4493_v25  ;;  %v4430_v29 = vmul.f32 %v13435_v50, %v4230_v49 }
 0x3a7   :  { %v4232_v54 = vpop.f32.mrf.mxu1 }
 0x3a8   :  { %v4494_v38 = vadd.f32 %v4430_v29, %v4364_v19  ;;  %v4233_v8 = vadd.f32 %v4232_v54, %v13551_v22  ;;  %5957 = vmatpush2.bf16.msra.mxu0 %v11332_v35  ;;  %v4365_v22 = vld [vmem:[%s16169_s3 + $0x148] sm:$0xff]  ;;  %v11369_v19 = vld [vmem:[%s16167_s1 + $0x64] ss:$16 sps:$4 sm:$0xff]  }
 0x3a9   :  { %v4234_v7 = vpop.f32.mrf.mxu1  ;;  %8106 = vmatprep.subr.bf16.mxu0 %v11844_v3 }
 0x3aa   :  { %4558 = vst [vmem:[%s16169_s3 + $0x140] sm:$0xff] %v4494_v38  ;;  %v4431_v58 = vmul.f32 %v13435_v50, %v4233_v8  ;;  %v10526_v23 = vpack.c.bf16 %v4233_v8, %v4230_v49  ;;  %v4369_v49 = vld [vmem:[%s16169_s3 + $0x168] sm:$0xff]  ;;  %v4370_v38 = vld [vmem:[%s16169_s3 + $0x170] sm:$0xff] }
 0x3ab   :  { %v4237_v5 = vpop.f32.mrf.mxu1  ;;  %5959 = vmatmul.mubr.bf16.vlgmr.msra.gmra.mxu0 %v11347_v37  ;;  %v11367_v7 = vld [vmem:[%s16167_s1 + $0x60] ss:$16 sps:$4 sm:$0xff]  }
 0x3ac   :  { %v4495_v57 = vadd.f32 %v4431_v58, %v4365_v22  ;;  %10824 = vst [vmem:[#allocation2 + $0xa0] sm:$0xff] %v10526_v23   ;;  %v4238_v40 = vadd.f32 %v4237_v5, %v13564_v16  ;;  %5966 = vmatprep.mubr.bf16.mxu0 %v11357_v56  ;;  %v4371_v22 = vld [vmem:[%s16169_s3 + $0x178] sm:$0xff] }
 0x3ad   :  { %v4239_v32 = vpop.f32.mrf.mxu1 }
 0x3ae   :  { %4559 = vst [vmem:[%s16169_s3 + $0x148] sm:$0xff] %v4495_v57  ;;  %v4432_v59 = vmul.f32 %v13435_v50, %v4238_v40 }
 0x3af   :  { %v4240_v0 = vpop.f32.mrf.mxu1 }
 0x3b0   :  { %v4496_v4 = vadd.f32 %v4432_v59, %v4366_v11  ;;  %v4241_v16 = vadd.f32 %v4240_v0, %v13577_v61  ;;  %v4372_v59 = vld [vmem:[%s16169_s3 + $0x180] sm:$0xff] }
 0x3b1   :  { %v4242_v12 = vpop.f32.mrf.mxu1 }
 0x3b2   :  { %4560 = vst [vmem:[%s16169_s3 + $0x150] sm:$0xff] %v4496_v4  ;;  %v4433_v62 = vmul.f32 %v13435_v50, %v4241_v16  ;;  %v10531_v27 = vpack.c.bf16 %v4241_v16, %v4238_v40  ;;  %v11375_v40 = vld [vmem:[%s16167_s1 + $0x84] ss:$16 sps:$4 sm:$0xff]   ;;  %v11373_v4 = vld [vmem:[%s16167_s1 + $0x80] ss:$16 sps:$4 sm:$0xff]  }
 0x3b3   :  { %v4245_v10 = vpop.f32.mrf.mxu1  ;;  %5967 = vmatmul.mubr.bf16.gmra.mxu0 %v11355_v51  ;;  %v4373_v51 = vld [vmem:[%s16169_s3 + $0x188] sm:$0xff] }
 0x3b4   :  { %v4497_v52 = vadd.f32 %v4433_v62, %v4367_v9  ;;  %10825 = vst [vmem:[#allocation2 + $0xa8] sm:$0xff] %v10531_v27   ;;  %v4246_v61 = vadd.f32 %v4245_v10, %v13590_v24  ;;  %5974 = vmatprep.mubr.bf16.mxu0 %v11363_v15 }
 0x3b5   :  { %v4247_v17 = vpop.f32.mrf.mxu1 }
 0x3b6   :  { %4561 = vst [vmem:[%s16169_s3 + $0x158] sm:$0xff] %v4497_v52  ;;  %v4434_v63 = vmul.f32 %v13435_v50, %v4246_v61  ;;  %v11381_v52 = vld [vmem:[%s16167_s1 + $0xa4] ss:$16 sps:$4 sm:$0xff]  }
 0x3b7   :  { %v4248_v31 = vpop.f32.mrf.mxu1 }
 0x3b8   :  { %v4498_v18 = vadd.f32 %v4434_v63, %v4368_v1  ;;  %v4249_v24 = vadd.f32 %v4248_v31, %v13603_v33 }
 0x3b9   :  { %v4250_v53 = vpop.f32.mrf.mxu1 }
 0x3ba   :  { %4562 = vst [vmem:[%s16169_s3 + $0x160] sm:$0xff] %v4498_v18  ;;  %v4435_v39 = vmul.f32 %v13435_v50, %v4249_v24  ;;  %v10536_v25 = vpack.c.bf16 %v4249_v24, %v4246_v61  ;;  %v11379_v18 = vld [vmem:[%s16167_s1 + $0xa0] ss:$16 sps:$4 sm:$0xff]  }
 0x3bb   :  { %v4253_v42 = vpop.f32.mrf.mxu1  ;;  %5975 = vmatmul.mubr.bf16.gmra.mxu0 %v11361_v2  ;;  %v4375_v2 = vld [vmem:[%s16169_s3 + $0x198] sm:$0xff] }
 0x3bc   :  { %v4499_v29 = vadd.f32 %v4435_v39, %v4369_v49  ;;  %10826 = vst [vmem:[#allocation2 + $0xb0] sm:$0xff] %v10536_v25   ;;  %v4254_v33 = vadd.f32 %v4253_v42, %v13613_v55  ;;  %5982 = vmatprep.mubr.bf16.mxu0 %v11369_v19  ;;  %v11335_v25 = vld [vmem:[#allocation2 + $0xa8] sm:$0xff]  }
 0x3bd   :  { %v4255_v54 = vpop.f32.mrf.mxu1 }
 0x3be   :  { %4563 = vst [vmem:[%s16169_s3 + $0x168] sm:$0xff] %v4499_v29  ;;  %v4436_v35 = vmul.f32 %v13435_v50, %v4254_v33  ;;  %v11387_v29 = vld [vmem:[%s16167_s1 + $0xc4] ss:$16 sps:$4 sm:$0xff]  }
 0x3bf   :  { %v4256_v8 = vpop.f32.mrf.mxu1 }
 0x3c0   :  { %v4500_v37 = vadd.f32 %v4436_v35, %v4370_v38  ;;  %v4257_v55 = vadd.f32 %v4256_v8, %v13623_v6  ;;  %v11336_v35 = vld [vmem:[#allocation2 + $0xa0] sm:$0xff]  }
 0x3c1   :  { %v4258_v43 = vpop.f32.mrf.mxu1 }
 0x3c2   :  { %4564 = vst [vmem:[%s16169_s3 + $0x170] sm:$0xff] %v4500_v37  ;;  %v4437_v58 = vmul.f32 %v13435_v50, %v4257_v55  ;;  %v10541_v23 = vpack.c.bf16 %v4257_v55, %v4254_v33  ;;  %v11385_v37 = vld [vmem:[%s16167_s1 + $0xc0] ss:$16 sps:$4 sm:$0xff]  }
 0x3c3   :  { %v4261_v5 = vpop.f32.mrf.mxu1  ;;  %5983 = vmatmul.mubr.bf16.gmra.mxu0 %v11367_v7  ;;  %v11334_v63 = vld [vmem:[#allocation2 + $0xb0] sm:$0xff]   ;;  %v4377_v7 = vld [vmem:[%s16169_s3 + $0x1a8] sm:$0xff] }
 0x3c4   :  { %v4501_v57 = vadd.f32 %v4437_v58, %v4371_v22  ;;  %10827 = vst [vmem:[#allocation2 + $0xb8] sm:$0xff] %v10541_v23   ;;  %v4262_v6 = vadd.f32 %v4261_v5, %v13633_v20  ;;  %5990 = vmatprep.mubr.bf16.mxu0 %v11375_v40  ;;  %v11337_v23 = vld [vmem:[#allocation2 + $0x98] sm:$0xff]  }
 0x3c5   :  { %v4263_v56 = vpop.f32.mrf.mxu1 }
 0x3c6   :  { %4565 = vst [vmem:[%s16169_s3 + $0x178] sm:$0xff] %v4501_v57  ;;  %v4438_v32 = vmul.f32 %v13435_v50, %v4262_v6  ;;  %v11393_v57 = vld [vmem:[%s16167_s1 + $0xe4] ss:$16 sps:$4 sm:$0xff]  }
 0x3c7   :  { %v4264_v11 = vpop.f32.mrf.mxu1 }
 0x3c8   :  { %v4502_v0 = vadd.f32 %v4438_v32, %v4372_v59  ;;  %v4265_v20 = vadd.f32 %v4264_v11, %v13643_v34  ;;  %v11338_v32 = vld [vmem:[#allocation2 + $0x90] sm:$0xff]  }
 0x3c9   :  { %v4266_v16 = vpop.f32.mrf.mxu1 }
 0x3ca   :  { %4566 = vst [vmem:[%s16169_s3 + $0x180] sm:$0xff] %v4502_v0  ;;  %v4439_v12 = vmul.f32 %v13435_v50, %v4265_v20  ;;  %v10546_v62 = vpack.c.bf16 %v4265_v20, %v4262_v6  ;;  %v11391_v0 = vld [vmem:[%s16167_s1 + $0xe0] ss:$16 sps:$4 sm:$0xff]  }
 0x3cb   :  { %v4269_v27 = vpop.f32.mrf.mxu1  ;;  %v11333_v9 = vld [vmem:[#allocation2 + $0xb8] sm:$0xff]   ;;  %5991 = vmatmul.mubr.bf16.gmra.mxu0 %v11373_v4 }
 0x3cc   :  { %v4503_v10 = vadd.f32 %v4439_v12, %v4373_v51  ;;  %10828 = vst [vmem:[#allocation2 + $0xc0] sm:$0xff] %v10546_v62   ;;  %v4270_v34 = vadd.f32 %v4269_v27, %v13653_v45  ;;  %6216 = vmatpush1.bf16.msra.mxu1 %v11333_v9  ;;  %5998 = vmatprep.mubr.bf16.mxu0 %v11381_v52  ;;  %v4374_v45 = vld [vmem:[%s16169_s3 + $0x190] sm:$0xff]  ;;  %v4379_v4 = vld [vmem:[%s16169_s3 + $0x1b8] sm:$0xff]  ;;  %v11339_v12 = vld [vmem:[#allocation2 + $0x88] sm:$0xff]  }
 0x3cd   :  { %v4271_v61 = vpop.f32.mrf.mxu1  ;;  %6217 = vmatprep.subr.bf16.mxu1 %v11844_v3  ;;  %v11399_v9 = vld [vmem:[%s16167_s1 + $0x104] ss:$16 sps:$4 sm:$0xff]  }
 0x3ce   :  { %4567 = vst [vmem:[%s16169_s3 + $0x188] sm:$0xff] %v4503_v10  ;;  %v4440_v15 = vmul.f32 %v13435_v50, %v4270_v34  ;;  %v11340_v61 = vld [vmem:[#allocation2 + $0x80] sm:$0xff]  }
 0x3cf   :  { %v4272_v17 = vpop.f32.mrf.mxu1 }
 0x3d0   :  { %v4504_v1 = vadd.f32 %v4440_v15, %v4374_v45  ;;  %v4273_v31 = vadd.f32 %v4272_v17, %v13664_v36  ;;  %6218 = vmatpush1.bf16.msra.mxu1 %v11334_v63  ;;  %v11397_v17 = vld [vmem:[%s16167_s1 + $0x100] ss:$16 sps:$4 sm:$0xff]  }
 0x3d1   :  { %v4274_v24 = vpop.f32.mrf.mxu1  ;;  %6219 = vmatprep.subr.bf16.mxu1 %v11844_v3 }
 0x3d2   :  { %4568 = vst [vmem:[%s16169_s3 + $0x190] sm:$0xff] %v4504_v1  ;;  %v4441_v53 = vmul.f32 %v13435_v50, %v4273_v31  ;;  %v10551_v39 = vpack.c.bf16 %v4273_v31, %v4270_v34 }
 0x3d3   :  { %v4277_v36 = vpop.f32.mrf.mxu1  ;;  %5999 = vmatmul.mubr.bf16.gmra.mxu0 %v11379_v18  ;;  %v4381_v18 = vld [vmem:[%s16169_s3 + $0x1c8] sm:$0xff] }
 0x3d4   :  { %v4505_v49 = vadd.f32 %v4441_v53, %v4375_v2  ;;  %10829 = vst [vmem:[#allocation2 + $0xc8] sm:$0xff] %v10551_v39   ;;  %v4278_v42 = vadd.f32 %v4277_v36, %v13675_v28  ;;  %6220 = vmatpush1.bf16.msra.mxu1 %v11335_v25  ;;  %6006 = vmatprep.mubr.bf16.mxu0 %v11387_v29  ;;  %v4376_v28 = vld [vmem:[%s16169_s3 + $0x1a0] sm:$0xff]  ;;  %v4382_v25 = vld [vmem:[%s16169_s3 + $0x1d0] sm:$0xff] }
 0x3d5   :  { %v4279_v33 = vpop.f32.mrf.mxu1  ;;  %6221 = vmatprep.subr.bf16.mxu1 %v11844_v3  ;;  %v11405_v53 = vld [vmem:[%s16167_s1 + $0x124] ss:$16 sps:$4 sm:$0xff]   ;;  %v11403_v29 = vld [vmem:[%s16167_s1 + $0x120] ss:$16 sps:$4 sm:$0xff]  }
 0x3d6   :  { %4569 = vst [vmem:[%s16169_s3 + $0x198] sm:$0xff] %v4505_v49  ;;  %v4442_v19 = vmul.f32 %v13435_v50, %v4278_v42 }
 0x3d7   :  { %v4280_v54 = vpop.f32.mrf.mxu1 }
 0x3d8   :  { %v4506_v38 = vadd.f32 %v4442_v19, %v4376_v28  ;;  %v4281_v8 = vadd.f32 %v4280_v54, %v13686_v47  ;;  %6222 = vmatpush1.bf16.msra.mxu1 %v11336_v35  ;;  %v4383_v54 = vld [vmem:[%s16169_s3 + $0x1d8] sm:$0xff] }
 0x3d9   :  { %v4282_v55 = vpop.f32.mrf.mxu1  ;;  %6223 = vmatprep.subr.bf16.mxu1 %v11844_v3 }
 0x3da   :  { %4570 = vst [vmem:[%s16169_s3 + $0x1a0] sm:$0xff] %v4506_v38  ;;  %v4443_v43 = vmul.f32 %v13435_v50, %v4281_v8  ;;  %v10556_v58 = vpack.c.bf16 %v4281_v8, %v4278_v42  ;;  %v11411_v8 = vld [vmem:[%s16167_s1 + $0x144] ss:$16 sps:$4 sm:$0xff]  }
 0x3db   :  { %v4285_v47 = vpop.f32.mrf.mxu1  ;;  %6007 = vmatmul.mubr.bf16.gmra.mxu0 %v11385_v37 }
 0x3dc   :  { %v4507_v22 = vadd.f32 %v4443_v43, %v4377_v7  ;;  %10830 = vst [vmem:[#allocation2 + $0xd0] sm:$0xff] %v10556_v58   ;;  %v4286_v5 = vadd.f32 %v4285_v47, %v13697_v46  ;;  %6224 = vmatpush1.bf16.msra.mxu1 %v11337_v23  ;;  %6014 = vmatprep.mubr.bf16.mxu0 %v11393_v57  ;;  %v4378_v46 = vld [vmem:[%s16169_s3 + $0x1b0] sm:$0xff]  ;;  %v4384_v7 = vld [vmem:[%s16169_s3 + $0x1e0] sm:$0xff]  ;;  %v4385_v57 = vld [vmem:[%s16169_s3 + $0x1e8] sm:$0xff] }
 0x3dd   :  { %v4287_v6 = vpop.f32.mrf.mxu1  ;;  %6225 = vmatprep.subr.bf16.mxu1 %v11844_v3  ;;  %v11409_v47 = vld [vmem:[%s16167_s1 + $0x140] ss:$16 sps:$4 sm:$0xff]  }
 0x3de   :  { %4571 = vst [vmem:[%s16169_s3 + $0x1a8] sm:$0xff] %v4507_v22  ;;  %v4444_v40 = vmul.f32 %v13435_v50, %v4286_v5 }
 0x3df   :  { %v4288_v56 = vpop.f32.mrf.mxu1 }
 0x3e0   :  { %v4508_v59 = vadd.f32 %v4444_v40, %v4378_v46  ;;  %v4289_v11 = vadd.f32 %v4288_v56, %v13708_v13  ;;  %6226 = vmatpush1.bf16.msra.mxu1 %v11338_v32  ;;  %v11417_v46 = vld [vmem:[%s16167_s1 + $0x164] ss:$16 sps:$4 sm:$0xff]  }
 0x3e1   :  { %v4290_v20 = vpop.f32.mrf.mxu1  ;;  %6227 = vmatprep.subr.bf16.mxu1 %v11844_v3 }
 0x3e2   :  { %4572 = vst [vmem:[%s16169_s3 + $0x1b0] sm:$0xff] %v4508_v59  ;;  %v4445_v16 = vmul.f32 %v13435_v50, %v4289_v11  ;;  %v10561_v51 = vpack.c.bf16 %v4289_v11, %v4286_v5  ;;  %v4386_v59 = vld [vmem:[%s16169_s3 + $0x1f0] sm:$0xff] }
 0x3e3   :  { %v4293_v13 = vpop.f32.mrf.mxu1  ;;  %6015 = vmatmul.mubr.bf16.gmra.mxu0 %v11391_v0  ;;  %v11415_v20 = vld [vmem:[%s16167_s1 + $0x160] ss:$16 sps:$4 sm:$0xff]  }
 0x3e4   :  { %v4509_v62 = vadd.f32 %v4445_v16, %v4379_v4  ;;  %10831 = vst [vmem:[#allocation2 + $0xd8] sm:$0xff] %v10561_v51   ;;  %v4294_v27 = vadd.f32 %v4293_v13, %v13719_v41  ;;  %6228 = vmatpush1.bf16.msra.mxu1 %v11339_v12  ;;  %6022 = vmatprep.mubr.bf16.mxu0 %v11399_v9  ;;  %v4380_v41 = vld [vmem:[%s16169_s3 + $0x1c0] sm:$0xff]  ;;  %v4387_v13 = vld [vmem:[%s16169_s3 + $0x1f8] sm:$0xff] }
 0x3e5   :  { %v4295_v10 = vpop.f32.mrf.mxu1  ;;  %6229 = vmatprep.subr.bf16.mxu1 %v11844_v3 }
 0x3e6   :  { %4573 = vst [vmem:[%s16169_s3 + $0x1b8] sm:$0xff] %v4509_v62  ;;  %v4446_v34 = vmul.f32 %v13435_v50, %v4294_v27  ;;  %v11427_v10 = vld [vmem:[%s16167_s1 + $0x1a0] ss:$16 sps:$4 sm:$0xff]  }
 0x3e7   :  { %v4296_v52 = vpop.f32.mrf.mxu1 }
 0x3e8   :  { %v4510_v15 = vadd.f32 %v4446_v34, %v4380_v41  ;;  %v4297_v45 = vadd.f32 %v4296_v52, %v13730_v48  ;;  %6230 = vmatpush1.bf16.msra.mxu1 %v11340_v61  ;;  %v11435_v41 = vld [vmem:[%s16167_s1 + $0x1c4] ss:$16 sps:$4 sm:$0xff]   ;;  %v11433_v61 = vld [vmem:[%s16167_s1 + $0x1c0] ss:$16 sps:$4 sm:$0xff]  }
 0x3e9   :  { %v4298_v63 = vpop.f32.mrf.mxu1  ;;  %6231 = vmatprep.subr.bf16.mxu1 %v11844_v3 }
 0x3ea   :  { %4574 = vst [vmem:[%s16169_s3 + $0x1c0] sm:$0xff] %v4510_v15  ;;  %v4447_v1 = vmul.f32 %v13435_v50, %v4297_v45  ;;  %v10566_v31 = vpack.c.bf16 %v4297_v45, %v4294_v27  ;;  %v11429_v27 = vld [vmem:[%s16167_s1 + $0x1a4] ss:$16 sps:$4 sm:$0xff]   ;;  %v11439_v63 = vld [vmem:[%s16167_s1 + $0x1e0] ss:$16 sps:$4 sm:$0xff]  }
 0x3eb   :  { %v4301_v48 = vpop.f32.mrf.mxu1  ;;  %6023 = vmatmul.mubr.bf16.gmra.mxu0 %v11397_v17  ;;  %v11345_v15 = vld [vmem:[#allocation2 + $0xd8] sm:$0xff]   ;;  %v11441_v45 = vld [vmem:[%s16167_s1 + $0x1e4] ss:$16 sps:$4 sm:$0xff]  }
 0x3ec   :  { %v4511_v24 = vadd.f32 %v4447_v1, %v4381_v18  ;;  %10832 = vst [vmem:[#allocation2 + $0xe0] sm:$0xff] %v10566_v31   ;;  %v4302_v2 = vadd.f32 %v4301_v48, %v13741_v60  ;;  %6030 = vmatprep.mubr.bf16.mxu0 %v11405_v53  ;;  %v11346_v17 = vld [vmem:[#allocation2 + $0xd0] sm:$0xff]   ;;  %v11350_v1 = vld [vmem:[#allocation2 + $0xc8] sm:$0xff]   ;;  %v11351_v18 = vld [vmem:[#allocation2 + $0xc0] sm:$0xff]  }
 0x3ed   :  { %v4303_v39 = vpop.f32.mrf.mxu1  ;;  %v11447_v31 = vld [vmem:[%s16167_s1 + $0x204] ss:$16 sps:$4 sm:$0xff]   ;;  %v11352_v48 = vld [vmem:[%s16167_s1 + $0x8] ss:$16 sps:$4 sm:$0xff]  }
 0x3ee   :  { %4575 = vst [vmem:[%s16169_s3 + $0x1c8] sm:$0xff] %v4511_v24  ;;  %v4448_v36 = vmul.f32 %v13435_v50, %v4302_v2  ;;  %v11445_v24 = vld [vmem:[%s16167_s1 + $0x200] ss:$16 sps:$4 sm:$0xff]   ;;  %v11453_v53 = vld [vmem:[%s16167_s1 + $0x224] ss:$16 sps:$4 sm:$0xff]  }
 0x3ef   :  { %v4304_v49 = vpop.f32.mrf.mxu1  ;;  %v11358_v39 = vld [vmem:[%s16167_s1 + $0x28] ss:$16 sps:$4 sm:$0xff]  }
 0x3f0   :  { %v4512_v42 = vadd.f32 %v4448_v36, %v4382_v25  ;;  %v4305_v60 = vadd.f32 %v4304_v49, %v13751_v26  ;;  %v11451_v36 = vld [vmem:[%s16167_s1 + $0x220] ss:$16 sps:$4 sm:$0xff]   ;;  %v11366_v25 = vld [vmem:[%s16167_s1 + $0x4c] ss:$16 sps:$4 sm:$0xff]   ;;  %v11459_v49 = vld [vmem:[%s16167_s1 + $0x244] ss:$16 sps:$4 sm:$0xff]  }
 0x3f1   :  { %v4306_v33 = vpop.f32.mrf.mxu1 }
 0x3f2   :  { %4576 = vst [vmem:[%s16169_s3 + $0x1d0] sm:$0xff] %v4512_v42  ;;  %v4449_v19 = vmul.f32 %v13435_v50, %v4305_v60  ;;  %v10571_v28 = vpack.c.bf16 %v4305_v60, %v4302_v2  ;;  %v11360_v2 = vld [vmem:[%s16167_s1 + $0x2c] ss:$16 sps:$4 sm:$0xff]   ;;  %v11364_v42 = vld [vmem:[%s16167_s1 + $0x48] ss:$16 sps:$4 sm:$0xff]  }
 0x3f3   :  { %v4309_v35 = vpop.f32.mrf.mxu1  ;;  %6031 = vmatmul.mubr.bf16.gmra.mxu0 %v11403_v29  ;;  %v11344_v52 = vld [vmem:[#allocation2 + $0xe0] sm:$0xff]   ;;  %v11372_v29 = vld [vmem:[%s16167_s1 + $0x6c] ss:$16 sps:$4 sm:$0xff]  }
 0x3f4   :  { %v4513_v38 = vadd.f32 %v4449_v19, %v4383_v54  ;;  %10833 = vst [vmem:[#allocation2 + $0xe8] sm:$0xff] %v10571_v28   ;;  %v4310_v26 = vadd.f32 %v4309_v35, %v13761_v44  ;;  %6038 = vmatprep.mubr.bf16.mxu0 %v11411_v8  ;;  %v11457_v60 = vld [vmem:[%s16167_s1 + $0x240] ss:$16 sps:$4 sm:$0xff]   ;;  %v11465_v33 = vld [vmem:[%s16167_s1 + $0x264] ss:$16 sps:$4 sm:$0xff]  }
 0x3f5   :  { %v4311_v37 = vpop.f32.mrf.mxu1  ;;  %v11370_v19 = vld [vmem:[%s16167_s1 + $0x68] ss:$16 sps:$4 sm:$0xff]   ;;  %v11463_v28 = vld [vmem:[%s16167_s1 + $0x260] ss:$16 sps:$4 sm:$0xff]   ;;  %v11378_v54 = vld [vmem:[%s16167_s1 + $0x8c] ss:$16 sps:$4 sm:$0xff]  }
 0x3f6   :  { %4577 = vst [vmem:[%s16169_s3 + $0x1d8] sm:$0xff] %v4513_v38  ;;  %v4450_v55 = vmul.f32 %v13435_v50, %v4310_v26  ;;  %v11471_v35 = vld [vmem:[%s16167_s1 + $0x284] ss:$16 sps:$4 sm:$0xff]   ;;  %v11376_v38 = vld [vmem:[%s16167_s1 + $0x88] ss:$16 sps:$4 sm:$0xff]  }
 0x3f7   :  { %v4312_v43 = vpop.f32.mrf.mxu1  ;;  %v11384_v8 = vld [vmem:[%s16167_s1 + $0xac] ss:$16 sps:$4 sm:$0xff]   ;;  %v11477_v37 = vld [vmem:[%s16167_s1 + $0x2a4] ss:$16 sps:$4 sm:$0xff]  }
 0x3f8   :  { %v4514_v58 = vadd.f32 %v4450_v55, %v4384_v7  ;;  %v4313_v44 = vadd.f32 %v4312_v43, %v13771_v21  ;;  %v11382_v55 = vld [vmem:[%s16167_s1 + $0xa8] ss:$16 sps:$4 sm:$0xff]   ;;  %v11475_v7 = vld [vmem:[%s16167_s1 + $0x2a0] ss:$16 sps:$4 sm:$0xff]   ;;  %v11390_v43 = vld [vmem:[%s16167_s1 + $0xcc] ss:$16 sps:$4 sm:$0xff]  }
 0x3f9   :  { %v4314_v23 = vpop.f32.mrf.mxu1 }
 0x3fa   :  { %4578 = vst [vmem:[%s16169_s3 + $0x1e0] sm:$0xff] %v4514_v58  ;;  %v4451_v22 = vmul.f32 %v13435_v50, %v4313_v44  ;;  %v10576_v5 = vpack.c.bf16 %v4313_v44, %v4310_v26  ;;  %v11469_v26 = vld [vmem:[%s16167_s1 + $0x280] ss:$16 sps:$4 sm:$0xff]   ;;  %v11483_v58 = vld [vmem:[%s16167_s1 + $0x2c4] ss:$16 sps:$4 sm:$0xff]  }
 0x3fb   :  { %v4317_v6 = vpop.f32.mrf.mxu1  ;;  %6039 = vmatmul.mubr.bf16.gmra.mxu0 %v11409_v47  ;;  %v11343_v34 = vld [vmem:[#allocation2 + $0xe8] sm:$0xff]   ;;  %v11481_v47 = vld [vmem:[%s16167_s1 + $0x2c0] ss:$16 sps:$4 sm:$0xff]  }
 0x3fc   :  { %v4515_v40 = vadd.f32 %v4451_v22, %v4385_v57  ;;  %10834 = vst [vmem:[#allocation2 + $0xf0] sm:$0xff] %v10576_v5   ;;  %v4318_v21 = vadd.f32 %v4317_v6, %v13781_v14  ;;  %6046 = vmatprep.mubr.bf16.mxu0 %v11417_v46  ;;  %v11388_v44 = vld [vmem:[%s16167_s1 + $0xc8] ss:$16 sps:$4 sm:$0xff]   ;;  %v11396_v23 = vld [vmem:[%s16167_s1 + $0xec] ss:$16 sps:$4 sm:$0xff]  }
 0x3fd   :  { %v4319_v56 = vpop.f32.mrf.mxu1  ;;  %v11489_v22 = vld [vmem:[%s16167_s1 + $0x2e4] ss:$16 sps:$4 sm:$0xff]   ;;  %v11394_v5 = vld [vmem:[%s16167_s1 + $0xe8] ss:$16 sps:$4 sm:$0xff]   ;;  %v11487_v57 = vld [vmem:[%s16167_s1 + $0x2e0] ss:$16 sps:$4 sm:$0xff]  }
 0x3fe   :  { %4579 = vst [vmem:[%s16169_s3 + $0x1e8] sm:$0xff] %v4515_v40  ;;  %v4452_v32 = vmul.f32 %v13435_v50, %v4318_v21  ;;  %v11402_v6 = vld [vmem:[%s16167_s1 + $0x10c] ss:$16 sps:$4 sm:$0xff]   ;;  %v11495_v40 = vld [vmem:[%s16167_s1 + $0x304] ss:$16 sps:$4 sm:$0xff]  }
 0x3ff   :  { %v4320_v11 = vpop.f32.mrf.mxu1  ;;  %v11493_v46 = vld [vmem:[%s16167_s1 + $0x300] ss:$16 sps:$4 sm:$0xff]   ;;  %v11408_v56 = vld [vmem:[%s16167_s1 + $0x12c] ss:$16 sps:$4 sm:$0xff]  }
 0x400   :  { %v4516_v0 = vadd.f32 %v4452_v32, %v4386_v59  ;;  %v4321_v14 = vadd.f32 %v4320_v11, %v13791_v30  ;;  %v11423_v30 = vld [vmem:[%s16167_s1 + $0x184] ss:$16 sps:$4 sm:$0xff]  }
 0x401   :  { %v4322_v4 = vpop.f32.mrf.mxu1  ;;  %v11501_v32 = vld [vmem:[%s16167_s1 + $0x324] ss:$16 sps:$4 sm:$0xff]  }
 0x402   :  { %4580 = vst [vmem:[%s16169_s3 + $0x1f0] sm:$0xff] %v4516_v0  ;;  %v4453_v16 = vmul.f32 %v13435_v50, %v4321_v14  ;;  %v10581_v51 = vpack.c.bf16 %v4321_v14, %v4318_v21  ;;  %v11421_v50 = vld [vmem:[%s16167_s1 + $0x180] ss:$16 sps:$4 sm:$0xff]   ;;  %v11400_v21 = vld [vmem:[%s16167_s1 + $0x108] ss:$16 sps:$4 sm:$0xff]  }
 0x403   :  { %6047 = vmatmul.mubr.bf16.gmra.mxu0 %v11415_v20  ;;  %v11342_v9 = vld [vmem:[#allocation2 + $0xf0] sm:$0xff]   ;;  %v11406_v0 = vld [vmem:[%s16167_s1 + $0x128] ss:$16 sps:$4 sm:$0xff]   ;;  %v11414_v4 = vld [vmem:[%s16167_s1 + $0x14c] ss:$16 sps:$4 sm:$0xff]  }
 0x404   :  { %v4517_v12 = vadd.f32 %v4453_v16, %v4387_v13  ;;  %10835 = vst [vmem:[#allocation2 + $0xf8] sm:$0xff] %v10581_v51   ;;  %6054 = vmatprep.mubr.bf16.mxu0 %v11423_v30  ;;  %v11499_v20 = vld [vmem:[%s16167_s1 + $0x320] ss:$16 sps:$4 sm:$0xff]   ;;  %v11507_v51 = vld [vmem:[%s16167_s1 + $0x344] ss:$16 sps:$4 sm:$0xff]  }
 0x405   :  { %v11412_v30 = vld [vmem:[%s16167_s1 + $0x148] ss:$16 sps:$4 sm:$0xff]  }
 0x406   :  { %4581 = vst [vmem:[%s16169_s3 + $0x1f8] sm:$0xff] %v4517_v12 }
 0x40b   :  { %v11341_v62 = vld [vmem:[#allocation2 + $0xf8] sm:$0xff]   ;;  %6055 = vmatmul.mubr.bf16.gmra.mxu0 %v11421_v50 }
 0x40c   :  { %6232 = vmatpush2.bf16.msra.mxu1 %v11341_v62  ;;  %6062 = vmatprep.mubr.bf16.mxu0 %v11429_v27  ;;  %v11505_v62 = vld [vmem:[%s16167_s1 + $0x340] ss:$16 sps:$4 sm:$0xff]   ;;  %v11420_v27 = vld [vmem:[%s16167_s1 + $0x16c] ss:$16 sps:$4 sm:$0xff]  }
 0x40d   :  { %6233 = vmatprep.subr.bf16.mxu1 %v11844_v3 }
 0x410   :  { %6234 = vmatpush2.bf16.msra.mxu1 %v11342_v9 }
 0x411   :  { %6235 = vmatprep.subr.bf16.mxu1 %v11844_v3 }
 0x413   :  { %6063 = vmatmul.mubr.bf16.gmra.mxu0 %v11427_v10  ;;  %v11513_v10 = vld [vmem:[%s16167_s1 + $0x364] ss:$16 sps:$4 sm:$0xff]  }
 0x414   :  { %6236 = vmatpush2.bf16.msra.mxu1 %v11343_v34  ;;  %6070 = vmatprep.mubr.bf16.mxu0 %v11435_v41 }
 0x415   :  { %6237 = vmatprep.subr.bf16.mxu1 %v11844_v3 }
 0x418   :  { %6238 = vmatpush2.bf16.msra.mxu1 %v11344_v52  ;;  %v11418_v52 = vld [vmem:[%s16167_s1 + $0x168] ss:$16 sps:$4 sm:$0xff]  }
 0x419   :  { %6239 = vmatprep.subr.bf16.mxu1 %v11844_v3 }
 0x41b   :  { %6071 = vmatmul.mubr.bf16.gmra.mxu0 %v11433_v61 }
 0x41c   :  { %6240 = vmatpush2.bf16.msra.mxu1 %v11345_v15  ;;  %6078 = vmatprep.mubr.bf16.mxu0 %v11441_v45  ;;  %v11511_v15 = vld [vmem:[%s16167_s1 + $0x360] ss:$16 sps:$4 sm:$0xff]   ;;  %v11426_v45 = vld [vmem:[%s16167_s1 + $0x18c] ss:$16 sps:$4 sm:$0xff]  }
 0x41d   :  { %6241 = vmatprep.subr.bf16.mxu1 %v11844_v3 }
 0x420   :  { %6242 = vmatpush2.bf16.msra.mxu1 %v11346_v17 }
 0x421   :  { %6243 = vmatprep.subr.bf16.mxu1 %v11844_v3 }
 0x423   :  { %6079 = vmatmul.mubr.bf16.gmra.mxu0 %v11439_v63  ;;  %v11519_v63 = vld [vmem:[%s16167_s1 + $0x384] ss:$16 sps:$4 sm:$0xff]  }
 0x424   :  { %6244 = vmatpush2.bf16.msra.mxu1 %v11350_v1  ;;  %6086 = vmatprep.mubr.bf16.mxu0 %v11447_v31 }
 0x425   :  { %6245 = vmatprep.subr.bf16.mxu1 %v11844_v3 }
 0x428   :  { %6246 = vmatpush2.bf16.msra.mxu1 %v11351_v18  ;;  %v11424_v18 = vld [vmem:[%s16167_s1 + $0x188] ss:$16 sps:$4 sm:$0xff]  }
 0x429   :  { %8395 = vmatprep.subr.bf16.mxu1 %v11844_v3 }
 0x42b   :  { %6248 = vmatmul.mubr.bf16.vlgmr.msra.gmra.mxu1 %v11352_v48  ;;  %6087 = vmatmul.mubr.bf16.gmra.mxu0 %v11445_v24  ;;  %v11517_v24 = vld [vmem:[%s16167_s1 + $0x380] ss:$16 sps:$4 sm:$0xff]  }
 0x42c   :  { %6255 = vmatprep.mubr.bf16.mxu1 %v11360_v2  ;;  %6094 = vmatprep.mubr.bf16.mxu0 %v11453_v53  ;;  %v11432_v2 = vld [vmem:[%s16167_s1 + $0x1ac] ss:$16 sps:$4 sm:$0xff]  }
 0x433   :  { %6256 = vmatmul.mubr.bf16.gmra.mxu1 %v11358_v39  ;;  %6095 = vmatmul.mubr.bf16.gmra.mxu0 %v11451_v36  ;;  %v11525_v39 = vld [vmem:[%s16167_s1 + $0x3a4] ss:$16 sps:$4 sm:$0xff]  }
 0x434   :  { %6263 = vmatprep.mubr.bf16.mxu1 %v11366_v25  ;;  %6102 = vmatprep.mubr.bf16.mxu0 %v11459_v49  ;;  %v11430_v49 = vld [vmem:[%s16167_s1 + $0x1a8] ss:$16 sps:$4 sm:$0xff]  }
 0x43b   :  { %6264 = vmatmul.mubr.bf16.gmra.mxu1 %v11364_v42  ;;  %6103 = vmatmul.mubr.bf16.gmra.mxu0 %v11457_v60  ;;  %v11523_v60 = vld [vmem:[%s16167_s1 + $0x3a0] ss:$16 sps:$4 sm:$0xff]  }
 0x43c   :  { %6271 = vmatprep.mubr.bf16.mxu1 %v11372_v29  ;;  %6110 = vmatprep.mubr.bf16.mxu0 %v11465_v33  ;;  %v11438_v29 = vld [vmem:[%s16167_s1 + $0x1cc] ss:$16 sps:$4 sm:$0xff]  }
 0x443   :  { %6272 = vmatmul.mubr.bf16.gmra.mxu1 %v11370_v19  ;;  %6111 = vmatmul.mubr.bf16.gmra.mxu0 %v11463_v28  ;;  %v11531_v19 = vld [vmem:[%s16167_s1 + $0x3c4] ss:$16 sps:$4 sm:$0xff]  }
 0x444   :  { %6279 = vmatprep.mubr.bf16.mxu1 %v11378_v54  ;;  %6118 = vmatprep.mubr.bf16.mxu0 %v11471_v35  ;;  %v11436_v35 = vld [vmem:[%s16167_s1 + $0x1c8] ss:$16 sps:$4 sm:$0xff]  }
 0x44b   :  { %6280 = vmatmul.mubr.bf16.gmra.mxu1 %v11376_v38  ;;  %6119 = vmatmul.mubr.bf16.gmra.mxu0 %v11469_v26  ;;  %v11529_v26 = vld [vmem:[%s16167_s1 + $0x3c0] ss:$16 sps:$4 sm:$0xff]  }
 0x44c   :  { %6287 = vmatprep.mubr.bf16.mxu1 %v11384_v8  ;;  %6126 = vmatprep.mubr.bf16.mxu0 %v11477_v37  ;;  %v11444_v8 = vld [vmem:[%s16167_s1 + $0x1ec] ss:$16 sps:$4 sm:$0xff]  }
 0x453   :  { %6288 = vmatmul.mubr.bf16.gmra.mxu1 %v11382_v55  ;;  %6127 = vmatmul.mubr.bf16.gmra.mxu0 %v11475_v7  ;;  %v11537_v55 = vld [vmem:[%s16167_s1 + $0x3e4] ss:$16 sps:$4 sm:$0xff]  }
 0x454   :  { %6295 = vmatprep.mubr.bf16.mxu1 %v11390_v43  ;;  %6134 = vmatprep.mubr.bf16.mxu0 %v11483_v58  ;;  %v11442_v58 = vld [vmem:[%s16167_s1 + $0x1e8] ss:$16 sps:$4 sm:$0xff]  }
 0x45b   :  { %6296 = vmatmul.mubr.bf16.gmra.mxu1 %v11388_v44  ;;  %6135 = vmatmul.mubr.bf16.gmra.mxu0 %v11481_v47  ;;  %v11535_v47 = vld [vmem:[%s16167_s1 + $0x3e0] ss:$16 sps:$4 sm:$0xff]  }
 0x45c   :  { %6303 = vmatprep.mubr.bf16.mxu1 %v11396_v23  ;;  %6142 = vmatprep.mubr.bf16.mxu0 %v11489_v22  ;;  %v11450_v23 = vld [vmem:[%s16167_s1 + $0x20c] ss:$16 sps:$4 sm:$0xff]  }
 0x463   :  { %6304 = vmatmul.mubr.bf16.gmra.mxu1 %v11394_v5  ;;  %6143 = vmatmul.mubr.bf16.gmra.mxu0 %v11487_v57 }
 0x464   :  { %6311 = vmatprep.mubr.bf16.mxu1 %v11402_v6  ;;  %6150 = vmatprep.mubr.bf16.mxu0 %v11495_v40  ;;  %v11448_v6 = vld [vmem:[%s16167_s1 + $0x208] ss:$16 sps:$4 sm:$0xff]  }
 0x46b   :  { %6312 = vmatmul.mubr.bf16.gmra.mxu1 %v11400_v21  ;;  %v14294_v59 = vpop.f32.mrf.mxu0  ;;  %6151 = vmatmul.mubr.bf16.gmra.mxu0 %v11493_v46  ;;  %v11456_v21 = vld [vmem:[%s16167_s1 + $0x22c] ss:$16 sps:$4 sm:$0xff]  }
 0x46c   :  { %6319 = vmatprep.mubr.bf16.mxu1 %v11408_v56  ;;  %6158 = vmatprep.mubr.bf16.mxu0 %v11501_v32 }
 0x46d   :  { %v5962_v11 = vpop.f32.mrf.mxu0 }
 0x46e   :  { %v11454_v11 = vld [vmem:[%s16167_s1 + $0x228] ss:$16 sps:$4 sm:$0xff]  }
 0x46f   :  { %v14299_v14 = vpop.f32.mrf.mxu0 }
 0x471   :  { %v5965_v16 = vpop.f32.mrf.mxu0 }
 0x473   :  { %6320 = vmatmul.mubr.bf16.gmra.mxu1 %v11406_v0  ;;  %v14310_v13 = vpop.f32.mrf.mxu0  ;;  %6159 = vmatmul.mubr.bf16.gmra.mxu0 %v11499_v20  ;;  %v11462_v20 = vld [vmem:[%s16167_s1 + $0x24c] ss:$16 sps:$4 sm:$0xff]  }
 0x474   :  { %6327 = vmatprep.mubr.bf16.mxu1 %v11414_v4  ;;  %6166 = vmatprep.mubr.bf16.mxu0 %v11507_v51 }
 0x475   :  { %v5970_v12 = vpop.f32.mrf.mxu0 }
 0x476   :  { %v11460_v12 = vld [vmem:[%s16167_s1 + $0x248] ss:$16 sps:$4 sm:$0xff]  }
 0x477   :  { %v14315_v50 = vpop.f32.mrf.mxu0 }
 0x479   :  { %v5973_v9 = vpop.f32.mrf.mxu0 }
 0x47b   :  { %6328 = vmatmul.mubr.bf16.gmra.mxu1 %v11412_v30  ;;  %v14326_v34 = vpop.f32.mrf.mxu0  ;;  %6167 = vmatmul.mubr.bf16.gmra.mxu0 %v11505_v62  ;;  %v11468_v62 = vld [vmem:[%s16167_s1 + $0x26c] ss:$16 sps:$4 sm:$0xff]  }
 0x47c   :  { %6335 = vmatprep.mubr.bf16.mxu1 %v11420_v27  ;;  %6174 = vmatprep.mubr.bf16.mxu0 %v11513_v10 }
 0x47d   :  { %v5978_v41 = vpop.f32.mrf.mxu0 }
 0x47e   :  { %v11466_v41 = vld [vmem:[%s16167_s1 + $0x268] ss:$16 sps:$4 sm:$0xff]  }
 0x47f   :  { %v14331_v61 = vpop.f32.mrf.mxu0 }
 0x481   :  { %v5981_v17 = vpop.f32.mrf.mxu0 }
 0x483   :  { %6336 = vmatmul.mubr.bf16.gmra.mxu1 %v11418_v52  ;;  %v14342_v1 = vpop.f32.mrf.mxu0  ;;  %6175 = vmatmul.mubr.bf16.gmra.mxu0 %v11511_v15  ;;  %v11474_v15 = vld [vmem:[%s16167_s1 + $0x28c] ss:$16 sps:$4 sm:$0xff]  }
 0x484   :  { %6343 = vmatprep.mubr.bf16.mxu1 %v11426_v45  ;;  %6182 = vmatprep.mubr.bf16.mxu0 %v11519_v63 }
 0x485   :  { %v5986_v31 = vpop.f32.mrf.mxu0 }
 0x486   :  { %v11472_v31 = vld [vmem:[%s16167_s1 + $0x288] ss:$16 sps:$4 sm:$0xff]  }
 0x487   :  { %v14347_v48 = vpop.f32.mrf.mxu0 }
 0x489   :  { %v5989_v53 = vpop.f32.mrf.mxu0 }
 0x48b   :  { %6344 = vmatmul.mubr.bf16.gmra.mxu1 %v11424_v18  ;;  %v14358_v36 = vpop.f32.mrf.mxu0  ;;  %6183 = vmatmul.mubr.bf16.gmra.mxu0 %v11517_v24  ;;  %v11480_v24 = vld [vmem:[%s16167_s1 + $0x2ac] ss:$16 sps:$4 sm:$0xff]  }
 0x48c   :  { %6351 = vmatprep.mubr.bf16.mxu1 %v11432_v2  ;;  %6190 = vmatprep.mubr.bf16.mxu0 %v11525_v39 }
 0x48d   :  { %v5994_v25 = vpop.f32.mrf.mxu0 }
 0x48e   :  { %v11478_v25 = vld [vmem:[%s16167_s1 + $0x2a8] ss:$16 sps:$4 sm:$0xff]  }
 0x48f   :  { %v14363_v42 = vpop.f32.mrf.mxu0 }
 0x491   :  { %v5997_v33 = vpop.f32.mrf.mxu0 }
 0x493   :  { %6352 = vmatmul.mubr.bf16.gmra.mxu1 %v11430_v49  ;;  %v14374_v28 = vpop.f32.mrf.mxu0  ;;  %6191 = vmatmul.mubr.bf16.gmra.mxu0 %v11523_v60  ;;  %v11486_v60 = vld [vmem:[%s16167_s1 + $0x2cc] ss:$16 sps:$4 sm:$0xff]  }
 0x494   :  { %6359 = vmatprep.mubr.bf16.mxu1 %v11438_v29  ;;  %6198 = vmatprep.mubr.bf16.mxu0 %v11531_v19 }
 0x495   :  { %v6002_v54 = vpop.f32.mrf.mxu0 }
 0x496   :  { %v11484_v54 = vld [vmem:[%s16167_s1 + $0x2c8] ss:$16 sps:$4 sm:$0xff]  }
 0x497   :  { %v14379_v38 = vpop.f32.mrf.mxu0 }
 0x499   :  { %v6005_v37 = vpop.f32.mrf.mxu0 }
 0x49b   :  { %6360 = vmatmul.mubr.bf16.gmra.mxu1 %v11436_v35  ;;  %v14390_v7 = vpop.f32.mrf.mxu0  ;;  %6199 = vmatmul.mubr.bf16.gmra.mxu0 %v11529_v26  ;;  %v11492_v26 = vld [vmem:[%s16167_s1 + $0x2ec] ss:$16 sps:$4 sm:$0xff]  }
 0x49c   :  { %6367 = vmatprep.mubr.bf16.mxu1 %v11444_v8  ;;  %6206 = vmatprep.mubr.bf16.mxu0 %v11537_v55 }
 0x49d   :  { %v6010_v43 = vpop.f32.mrf.mxu0 }
 0x49e   :  { %v11490_v43 = vld [vmem:[%s16167_s1 + $0x2e8] ss:$16 sps:$4 sm:$0xff]  }
 0x49f   :  { %v14395_v44 = vpop.f32.mrf.mxu0 }
 0x4a1   :  { %v6013_v22 = vpop.f32.mrf.mxu0 }
 0x4a3   :  { %6368 = vmatmul.mubr.bf16.gmra.mxu1 %v11442_v58  ;;  %v14403_v5 = vpop.f32.mrf.mxu0  ;;  %6207 = vmatmul.mubr.bf16.gmra.mxu0 %v11535_v47  ;;  %v11498_v47 = vld [vmem:[%s16167_s1 + $0x30c] ss:$16 sps:$4 sm:$0xff]  }
 0x4a4   :  { %6375 = vmatprep.mubr.bf16.mxu1 %v11450_v23 }
 0x4a5   :  { %v6018_v57 = vpop.f32.mrf.mxu0 }
 0x4a7   :  { %v14408_v40 = vpop.f32.mrf.mxu0 }
 0x4a9   :  { %v6021_v46 = vpop.f32.mrf.mxu0 }
 0x4aa   :  { %v11504_v46 = vld [vmem:[%s16167_s1 + $0x32c] ss:$16 sps:$4 sm:$0xff]  }
 0x4ab   :  { %6376 = vmatmul.mubr.bf16.gmra.mxu1 %v11448_v6  ;;  %v14413_v56 = vpop.f32.mrf.mxu0  ;;  %v11496_v6 = vld [vmem:[%s16167_s1 + $0x308] ss:$16 sps:$4 sm:$0xff]  }
 0x4ac   :  { %6383 = vmatprep.mubr.bf16.mxu1 %v11456_v21 }
 0x4ad   :  { %v6026_v32 = vpop.f32.mrf.mxu0 }
 0x4af   :  { %v14418_v0 = vpop.f32.mrf.mxu0 }
 0x4b1   :  { %v6029_v4 = vpop.f32.mrf.mxu0 }
 0x4b3   :  { %6384 = vmatmul.mubr.bf16.gmra.mxu1 %v11454_v11  ;;  %v14423_v16 = vpop.f32.mrf.mxu0 }
 0x4b4   :  { %6391 = vmatprep.mubr.bf16.mxu1 %v11462_v20  ;;  %v14493_v20 = vstv %s9621_s29 }
 0x4b5   :  { %v6034_v51 = vpop.f32.mrf.mxu0 }
 0x4b7   :  { %v14428_v30 = vpop.f32.mrf.mxu0 }
 0x4b9   :  { %v6037_v27 = vpop.f32.mrf.mxu0 }
 0x4bb   :  { %6392 = vmatmul.mubr.bf16.gmra.mxu1 %v11460_v12  ;;  %v14433_v9 = vpop.f32.mrf.mxu0 }
 0x4bc   :  { %6399 = vmatprep.mubr.bf16.mxu1 %v11468_v62 }
 0x4bd   :  { %v6042_v10 = vpop.f32.mrf.mxu0 }
 0x4be   :  { %v6504_v10 = vld [vmem:[%s16169_s3] sm:$0xff] }
 0x4bf   :  { %v14438_v52 = vpop.f32.mrf.mxu0 }
 0x4c1   :  { %v6045_v45 = vpop.f32.mrf.mxu0 }
 0x4c3   :  { %6400 = vmatmul.mubr.bf16.gmra.mxu1 %v11466_v41  ;;  %v14443_v17 = vpop.f32.mrf.mxu0 }
 0x4c4   :  { %6407 = vmatprep.mubr.bf16.mxu1 %v11474_v15  ;;  %v11502_v15 = vld [vmem:[%s16167_s1 + $0x328] ss:$16 sps:$4 sm:$0xff]  }
 0x4c5   :  { %v6050_v63 = vpop.f32.mrf.mxu0 }
 0x4c7   :  { %v14448_v18 = vpop.f32.mrf.mxu0 }
 0x4c9   :  { %v6053_v2 = vpop.f32.mrf.mxu0 }
 0x4cb   :  { %6408 = vmatmul.mubr.bf16.gmra.mxu1 %v11472_v31  ;;  %v14453_v53 = vpop.f32.mrf.mxu0 }
 0x4cc   :  { %6415 = vmatprep.mubr.bf16.mxu1 %v11480_v24 }
 0x4cd   :  { %v6058_v39 = vpop.f32.mrf.mxu0 }
 0x4cf   :  { %v14458_v49 = vpop.f32.mrf.mxu0 }
 0x4d1   :  { %v6061_v29 = vpop.f32.mrf.mxu0 }
 0x4d3   :  { %6416 = vmatmul.mubr.bf16.gmra.mxu1 %v11478_v25  ;;  %v14463_v33 = vpop.f32.mrf.mxu0 }
 0x4d4   :  { %6423 = vmatprep.mubr.bf16.mxu1 %v11486_v60  ;;  %v6505_v60 = vld [vmem:[%s16169_s3 + $0x8] sm:$0xff] }
 0x4d5   :  { %v6066_v19 = vpop.f32.mrf.mxu0 }
 0x4d7   :  { %v14468_v35 = vpop.f32.mrf.mxu0 }
 0x4d9   :  { %v6069_v8 = vpop.f32.mrf.mxu0 }
 0x4db   :  { %6424 = vmatmul.mubr.bf16.gmra.mxu1 %v11484_v54  ;;  %v14473_v37 = vpop.f32.mrf.mxu0 }
 0x4dc   :  { %6431 = vmatprep.mubr.bf16.mxu1 %v11492_v26 }
 0x4dd   :  { %v6074_v55 = vpop.f32.mrf.mxu0 }
 0x4df   :  { %v14478_v58 = vpop.f32.mrf.mxu0 }
 0x4e1   :  { %v6077_v23 = vpop.f32.mrf.mxu0 }
 0x4e2   :  { %v11508_v23 = vld [vmem:[%s16167_s1 + $0x348] ss:$16 sps:$4 sm:$0xff]  }
 0x4e3   :  { %6432 = vmatmul.mubr.bf16.gmra.mxu1 %v11490_v43  ;;  %v14483_v22 = vpop.f32.mrf.mxu0  ;;  %v6506_v43 = vld [vmem:[%s16169_s3 + $0x10] sm:$0xff] }
 0x4e4   :  { %6439 = vmatprep.mubr.bf16.mxu1 %v11498_v47 }
 0x4e5   :  { %v6082_v57 = vpop.f32.mrf.mxu0 }
 0x4e7   :  { %v14488_v21 = vpop.f32.mrf.mxu0 }
 0x4e9   :  { %v6085_v32 = vpop.f32.mrf.mxu0 }
 0x4eb   :  { %v6249_v11 = vpop.f32.mrf.mxu1  ;;  %6440 = vmatmul.mubr.bf16.gmra.mxu1 %v11496_v6  ;;  %v14495_v4 = vpop.f32.mrf.mxu0 }
 0x4ec   :  { %v6250_v51 = vadd.f32 %v6249_v11, %v14294_v59  ;;  %6447 = vmatprep.mubr.bf16.mxu1 %v11504_v46  ;;  %v11510_v59 = vld [vmem:[%s16167_s1 + $0x34c] ss:$16 sps:$4 sm:$0xff]  }
 0x4ed   :  { %v6251_v12 = vpop.f32.mrf.mxu1  ;;  %v6090_v62 = vpop.f32.mrf.mxu0  ;;  %v11516_v46 = vld [vmem:[%s16167_s1 + $0x36c] ss:$16 sps:$4 sm:$0xff]  }
 0x4ee   :  { %v6570_v27 = vmul.f32 %v14493_v20, %v6250_v51  ;;  %v6507_v62 = vld [vmem:[%s16169_s3 + $0x18] sm:$0xff] }
 0x4ef   :  { %v6252_v41 = vpop.f32.mrf.mxu1  ;;  %v14505_v45 = vpop.f32.mrf.mxu0 }
 0x4f0   :  { %v6634_v63 = vadd.f32 %v6570_v27, %v6504_v10  ;;  %v6253_v31 = vadd.f32 %v6252_v41, %v14299_v14 }
 0x4f1   :  { %v6254_v24 = vpop.f32.mrf.mxu1  ;;  %v6093_v2 = vpop.f32.mrf.mxu0 }
 0x4f2   :  { %6698 = vst [vmem:[%s16169_s3] sm:$0xff] %v6634_v63  ;;  %v6571_v39 = vmul.f32 %v14493_v20, %v6253_v31  ;;  %v10586_v25 = vpack.c.bf16 %v6253_v31, %v6250_v51  ;;  %v11514_v2 = vld [vmem:[%s16167_s1 + $0x368] ss:$16 sps:$4 sm:$0xff]  }
 0x4f3   :  { %v6257_v29 = vpop.f32.mrf.mxu1  ;;  %6448 = vmatmul.mubr.bf16.gmra.mxu1 %v11502_v15  ;;  %v14518_v14 = vpop.f32.mrf.mxu0 }
 0x4f4   :  { %v6635_v19 = vadd.f32 %v6571_v39, %v6505_v60  ;;  %10587 = vst [vmem:[#allocation2] sm:$0xff] %v10586_v25   ;;  %v6258_v54 = vadd.f32 %v6257_v29, %v14310_v13  ;;  %6455 = vmatprep.mubr.bf16.mxu1 %v11510_v59  ;;  %v6508_v59 = vld [vmem:[%s16169_s3 + $0x20] sm:$0xff]  ;;  %v11522_v60 = vld [vmem:[%s16167_s1 + $0x38c] ss:$16 sps:$4 sm:$0xff]  }
 0x4f5   :  { %v6259_v26 = vpop.f32.mrf.mxu1  ;;  %v6098_v8 = vpop.f32.mrf.mxu0 }
 0x4f6   :  { %6699 = vst [vmem:[%s16169_s3 + $0x8] sm:$0xff] %v6635_v19  ;;  %v6572_v55 = vmul.f32 %v14493_v20, %v6258_v54  ;;  %v6509_v8 = vld [vmem:[%s16169_s3 + $0x28] sm:$0xff] }
 0x4f7   :  { %v6260_v47 = vpop.f32.mrf.mxu1  ;;  %v14531_v57 = vpop.f32.mrf.mxu0 }
 0x4f8   :  { %v6636_v13 = vadd.f32 %v6572_v55, %v6506_v43  ;;  %v6261_v6 = vadd.f32 %v6260_v47, %v14315_v50 }
 0x4f9   :  { %v6262_v32 = vpop.f32.mrf.mxu1  ;;  %v6101_v11 = vpop.f32.mrf.mxu0 }
 0x4fa   :  { %6700 = vst [vmem:[%s16169_s3 + $0x10] sm:$0xff] %v6636_v13  ;;  %v6573_v51 = vmul.f32 %v14493_v20, %v6261_v6  ;;  %v10591_v12 = vpack.c.bf16 %v6261_v6, %v6258_v54  ;;  %v11520_v11 = vld [vmem:[%s16167_s1 + $0x388] ss:$16 sps:$4 sm:$0xff]  }
 0x4fb   :  { %v6265_v27 = vpop.f32.mrf.mxu1  ;;  %6456 = vmatmul.mubr.bf16.gmra.mxu1 %v11508_v23  ;;  %v14544_v50 = vpop.f32.mrf.mxu0 }
 0x4fc   :  { %v6637_v10 = vadd.f32 %v6573_v51, %v6507_v62  ;;  %10836 = vst [vmem:[#allocation2 + $0x8] sm:$0xff] %v10591_v12   ;;  %v6266_v41 = vadd.f32 %v6265_v27, %v14326_v34  ;;  %6463 = vmatprep.mubr.bf16.mxu1 %v11516_v46  ;;  %v6510_v46 = vld [vmem:[%s16169_s3 + $0x30] sm:$0xff]  ;;  %v11528_v62 = vld [vmem:[%s16167_s1 + $0x3ac] ss:$16 sps:$4 sm:$0xff]  }
 0x4fd   :  { %v6267_v15 = vpop.f32.mrf.mxu1  ;;  %v6106_v63 = vpop.f32.mrf.mxu0 }
 0x4fe   :  { %6701 = vst [vmem:[%s16169_s3 + $0x18] sm:$0xff] %v6637_v10  ;;  %v6574_v31 = vmul.f32 %v14493_v20, %v6266_v41  ;;  %v6511_v63 = vld [vmem:[%s16169_s3 + $0x38] sm:$0xff] }
 0x4ff   :  { %v6268_v24 = vpop.f32.mrf.mxu1  ;;  %v14557_v39 = vpop.f32.mrf.mxu0 }
 0x500   :  { %v6638_v34 = vadd.f32 %v6574_v31, %v6508_v59  ;;  %v6269_v25 = vadd.f32 %v6268_v24, %v14331_v61 }
 0x501   :  { %v6270_v29 = vpop.f32.mrf.mxu1  ;;  %v6109_v19 = vpop.f32.mrf.mxu0 }
 0x502   :  { %6702 = vst [vmem:[%s16169_s3 + $0x20] sm:$0xff] %v6638_v34  ;;  %v6575_v54 = vmul.f32 %v14493_v20, %v6269_v25  ;;  %v10596_v26 = vpack.c.bf16 %v6269_v25, %v6266_v41  ;;  %v11526_v19 = vld [vmem:[%s16167_s1 + $0x3a8] ss:$16 sps:$4 sm:$0xff]  }
 0x503   :  { %v6273_v55 = vpop.f32.mrf.mxu1  ;;  %6464 = vmatmul.mubr.bf16.gmra.mxu1 %v11514_v2  ;;  %v14570_v61 = vpop.f32.mrf.mxu0 }
 0x504   :  { %v6639_v43 = vadd.f32 %v6575_v54, %v6509_v8  ;;  %10837 = vst [vmem:[#allocation2 + $0x10] sm:$0xff] %v10596_v26   ;;  %v6274_v47 = vadd.f32 %v6273_v55, %v14342_v1  ;;  %6471 = vmatprep.mubr.bf16.mxu1 %v11522_v60  ;;  %v6512_v60 = vld [vmem:[%s16169_s3 + $0x40] sm:$0xff]  ;;  %v11534_v8 = vld [vmem:[%s16167_s1 + $0x3cc] ss:$16 sps:$4 sm:$0xff]  }
 0x505   :  { %v6275_v23 = vpop.f32.mrf.mxu1  ;;  %v6114_v13 = vpop.f32.mrf.mxu0 }
 0x506   :  { %6703 = vst [vmem:[%s16169_s3 + $0x28] sm:$0xff] %v6639_v43  ;;  %v6576_v6 = vmul.f32 %v14493_v20, %v6274_v47  ;;  %v6513_v13 = vld [vmem:[%s16169_s3 + $0x48] sm:$0xff] }
 0x507   :  { %v6276_v32 = vpop.f32.mrf.mxu1  ;;  %v14583_v51 = vpop.f32.mrf.mxu0 }
 0x508   :  { %v6640_v1 = vadd.f32 %v6576_v6, %v6510_v46  ;;  %v6277_v12 = vadd.f32 %v6276_v32, %v14347_v48 }
 0x509   :  { %v6278_v27 = vpop.f32.mrf.mxu1  ;;  %v6117_v10 = vpop.f32.mrf.mxu0 }
 0x50a   :  { %6704 = vst [vmem:[%s16169_s3 + $0x30] sm:$0xff] %v6640_v1  ;;  %v6577_v41 = vmul.f32 %v14493_v20, %v6277_v12  ;;  %v10601_v15 = vpack.c.bf16 %v6277_v12, %v6274_v47  ;;  %v11532_v10 = vld [vmem:[%s16167_s1 + $0x3c8] ss:$16 sps:$4 sm:$0xff]  }
 0x50b   :  { %v6281_v31 = vpop.f32.mrf.mxu1  ;;  %6472 = vmatmul.mubr.bf16.gmra.mxu1 %v11520_v11  ;;  %v14596_v48 = vpop.f32.mrf.mxu0 }
 0x50c   :  { %v6641_v59 = vadd.f32 %v6577_v41, %v6511_v63  ;;  %10838 = vst [vmem:[#allocation2 + $0x18] sm:$0xff] %v10601_v15   ;;  %v6282_v24 = vadd.f32 %v6281_v31, %v14358_v36  ;;  %6479 = vmatprep.mubr.bf16.mxu1 %v11528_v62  ;;  %v6514_v62 = vld [vmem:[%s16169_s3 + $0x50] sm:$0xff]  ;;  %v11540_v63 = vld [vmem:[%s16167_s1 + $0x3ec] ss:$16 sps:$4 sm:$0xff]  }
 0x50d   :  { %v6283_v2 = vpop.f32.mrf.mxu1  ;;  %v6122_v34 = vpop.f32.mrf.mxu0 }
 0x50e   :  { %6705 = vst [vmem:[%s16169_s3 + $0x38] sm:$0xff] %v6641_v59  ;;  %v6578_v25 = vmul.f32 %v14493_v20, %v6282_v24  ;;  %v6515_v34 = vld [vmem:[%s16169_s3 + $0x58] sm:$0xff] }
 0x50f   :  { %v6284_v29 = vpop.f32.mrf.mxu1  ;;  %v14609_v54 = vpop.f32.mrf.mxu0 }
 0x510   :  { %v6642_v36 = vadd.f32 %v6578_v25, %v6512_v60  ;;  %v6285_v26 = vadd.f32 %v6284_v29, %v14363_v42 }
 0x511   :  { %v6286_v55 = vpop.f32.mrf.mxu1  ;;  %v6125_v43 = vpop.f32.mrf.mxu0 }
 0x512   :  { %6706 = vst [vmem:[%s16169_s3 + $0x40] sm:$0xff] %v6642_v36  ;;  %v6579_v47 = vmul.f32 %v14493_v20, %v6285_v26  ;;  %v10606_v23 = vpack.c.bf16 %v6285_v26, %v6282_v24  ;;  %v11538_v43 = vld [vmem:[%s16167_s1 + $0x3e8] ss:$16 sps:$4 sm:$0xff]  }
 0x513   :  { %v6289_v6 = vpop.f32.mrf.mxu1  ;;  %6480 = vmatmul.mubr.bf16.gmra.mxu1 %v11526_v19  ;;  %v14622_v42 = vpop.f32.mrf.mxu0 }
 0x514   :  { %v6643_v46 = vadd.f32 %v6579_v47, %v6513_v13  ;;  %10839 = vst [vmem:[#allocation2 + $0x20] sm:$0xff] %v10606_v23   ;;  %v6290_v32 = vadd.f32 %v6289_v6, %v14374_v28  ;;  %6487 = vmatprep.mubr.bf16.mxu1 %v11534_v8  ;;  %v6516_v8 = vld [vmem:[%s16169_s3 + $0x60] sm:$0xff] }
 0x515   :  { %v6291_v11 = vpop.f32.mrf.mxu1  ;;  %v6130_v1 = vpop.f32.mrf.mxu0 }
 0x516   :  { %6707 = vst [vmem:[%s16169_s3 + $0x48] sm:$0xff] %v6643_v46  ;;  %v6580_v12 = vmul.f32 %v14493_v20, %v6290_v32  ;;  %v6517_v11 = vld [vmem:[%s16169_s3 + $0x68] sm:$0xff] }
 0x517   :  { %v6292_v27 = vpop.f32.mrf.mxu1  ;;  %v14635_v41 = vpop.f32.mrf.mxu0 }
 0x518   :  { %v6644_v28 = vadd.f32 %v6580_v12, %v6514_v62  ;;  %v6293_v15 = vadd.f32 %v6292_v27, %v14379_v38 }
 0x519   :  { %v6294_v31 = vpop.f32.mrf.mxu1  ;;  %v6133_v59 = vpop.f32.mrf.mxu0 }
 0x51a   :  { %6708 = vst [vmem:[%s16169_s3 + $0x50] sm:$0xff] %v6644_v28  ;;  %v6581_v24 = vmul.f32 %v14493_v20, %v6293_v15  ;;  %v10611_v2 = vpack.c.bf16 %v6293_v15, %v6290_v32  ;;  %v6518_v15 = vld [vmem:[%s16169_s3 + $0x70] sm:$0xff] }
 0x51b   :  { %v6297_v25 = vpop.f32.mrf.mxu1  ;;  %6488 = vmatmul.mubr.bf16.gmra.mxu1 %v11532_v10  ;;  %v14648_v38 = vpop.f32.mrf.mxu0 }
 0x51c   :  { %v6645_v60 = vadd.f32 %v6581_v24, %v6515_v34  ;;  %10840 = vst [vmem:[#allocation2 + $0x28] sm:$0xff] %v10611_v2   ;;  %v6298_v29 = vadd.f32 %v6297_v25, %v14390_v7  ;;  %6495 = vmatprep.mubr.bf16.mxu1 %v11540_v63 }
 0x51d   :  { %v6299_v19 = vpop.f32.mrf.mxu1  ;;  %v6138_v36 = vpop.f32.mrf.mxu0 }
 0x51e   :  { %6709 = vst [vmem:[%s16169_s3 + $0x58] sm:$0xff] %v6645_v60  ;;  %v6582_v26 = vmul.f32 %v14493_v20, %v6298_v29  ;;  %v6519_v60 = vld [vmem:[%s16169_s3 + $0x78] sm:$0xff] }
 0x51f   :  { %v6300_v55 = vpop.f32.mrf.mxu1  ;;  %v14661_v47 = vpop.f32.mrf.mxu0 }
 0x520   :  { %v6646_v7 = vadd.f32 %v6582_v26, %v6516_v8  ;;  %v6301_v23 = vadd.f32 %v6300_v55, %v14395_v44 }
 0x521   :  { %v6302_v13 = vpop.f32.mrf.mxu1  ;;  %v6141_v6 = vpop.f32.mrf.mxu0 }
 0x522   :  { %6710 = vst [vmem:[%s16169_s3 + $0x60] sm:$0xff] %v6646_v7  ;;  %v6583_v46 = vmul.f32 %v14493_v20, %v6301_v23  ;;  %v10616_v32 = vpack.c.bf16 %v6301_v23, %v6298_v29 }
 0x523   :  { %v6305_v1 = vpop.f32.mrf.mxu1  ;;  %6496 = vmatmul.mubr.bf16.gmra.mxu1 %v11538_v43  ;;  %v14671_v12 = vpop.f32.mrf.mxu0  ;;  %v6520_v43 = vld [vmem:[%s16169_s3 + $0x80] sm:$0xff] }
 0x524   :  { %v6647_v62 = vadd.f32 %v6583_v46, %v6517_v11  ;;  %10841 = vst [vmem:[#allocation2 + $0x30] sm:$0xff] %v10616_v32   ;;  %v6306_v44 = vadd.f32 %v6305_v1, %v14403_v5  ;;  %v6521_v32 = vld [vmem:[%s16169_s3 + $0x88] sm:$0xff] }
 0x525   :  { %v6307_v27 = vpop.f32.mrf.mxu1  ;;  %v6146_v10 = vpop.f32.mrf.mxu0 }
 0x526   :  { %6711 = vst [vmem:[%s16169_s3 + $0x68] sm:$0xff] %v6647_v62  ;;  %v6584_v28 = vmul.f32 %v14493_v20, %v6306_v44 }
 0x527   :  { %v6308_v63 = vpop.f32.mrf.mxu1  ;;  %v14681_v31 = vpop.f32.mrf.mxu0 }
 0x528   :  { %v6648_v59 = vadd.f32 %v6584_v28, %v6518_v15  ;;  %v6309_v24 = vadd.f32 %v6308_v63, %v14408_v40 }
 0x529   :  { %v6310_v2 = vpop.f32.mrf.mxu1  ;;  %v6149_v5 = vpop.f32.mrf.mxu0 }
 0x52a   :  { %6712 = vst [vmem:[%s16169_s3 + $0x70] sm:$0xff] %v6648_v59  ;;  %v6585_v34 = vmul.f32 %v14493_v20, %v6309_v24  ;;  %v10621_v25 = vpack.c.bf16 %v6309_v24, %v6306_v44  ;;  %v6522_v59 = vld [vmem:[%s16169_s3 + $0x90] sm:$0xff] }
 0x52b   :  { %v6313_v29 = vpop.f32.mrf.mxu1  ;;  %v14691_v19 = vpop.f32.mrf.mxu0  ;;  %v11542_v2 = vld [vmem:[#allocation2 + $0x30] sm:$0xff]  }
 0x52c   :  { %v6649_v36 = vadd.f32 %v6585_v34, %v6519_v60  ;;  %10842 = vst [vmem:[#allocation2 + $0x38] sm:$0xff] %v10621_v25   ;;  %v6314_v40 = vadd.f32 %v6313_v29, %v14413_v56  ;;  %v6523_v29 = vld [vmem:[%s16169_s3 + $0x98] sm:$0xff] }
 0x52d   :  { %v6315_v26 = vpop.f32.mrf.mxu1  ;;  %v6154_v8 = vpop.f32.mrf.mxu0 }
 0x52e   :  { %6713 = vst [vmem:[%s16169_s3 + $0x78] sm:$0xff] %v6649_v36  ;;  %v6586_v55 = vmul.f32 %v14493_v20, %v6314_v40  ;;  %v11543_v8 = vld [vmem:[#allocation2 + $0x28] sm:$0xff]  }
 0x52f   :  { %v6316_v7 = vpop.f32.mrf.mxu1  ;;  %v14701_v23 = vpop.f32.mrf.mxu0 }
 0x530   :  { %v6650_v13 = vadd.f32 %v6586_v55, %v6520_v43  ;;  %v6317_v6 = vadd.f32 %v6316_v7, %v14418_v0 }
 0x531   :  { %v6318_v46 = vpop.f32.mrf.mxu1  ;;  %v6157_v56 = vpop.f32.mrf.mxu0 }
 0x532   :  { %6714 = vst [vmem:[%s16169_s3 + $0x80] sm:$0xff] %v6650_v13  ;;  %v6587_v11 = vmul.f32 %v14493_v20, %v6317_v6  ;;  %v10626_v1 = vpack.c.bf16 %v6317_v6, %v6314_v40  ;;  %v6524_v46 = vld [vmem:[%s16169_s3 + $0xa0] sm:$0xff] }
 0x533   :  { %v6321_v62 = vpop.f32.mrf.mxu1  ;;  %v11541_v44 = vld [vmem:[#allocation2 + $0x38] sm:$0xff]   ;;  %v14711_v27 = vpop.f32.mrf.mxu0 }
 0x534   :  { %v6651_v10 = vadd.f32 %v6587_v11, %v6521_v32  ;;  %10843 = vst [vmem:[#allocation2 + $0x40] sm:$0xff] %v10626_v1   ;;  %v6322_v0 = vadd.f32 %v6321_v62, %v14423_v16  ;;  %8107 = vmatpush1.bf16.msra.mxu0 %v11541_v44  ;;  %v11544_v32 = vld [vmem:[#allocation2 + $0x20] sm:$0xff]  }
 0x535   :  { %v6323_v28 = vpop.f32.mrf.mxu1  ;;  %v6162_v15 = vpop.f32.mrf.mxu0  ;;  %8108 = vmatprep.subr.bf16.mxu0 %v11844_v3 }
 0x536   :  { %6715 = vst [vmem:[%s16169_s3 + $0x88] sm:$0xff] %v6651_v10  ;;  %v6588_v63 = vmul.f32 %v14493_v20, %v6322_v0  ;;  %v6525_v10 = vld [vmem:[%s16169_s3 + $0xa8] sm:$0xff] }
 0x537   :  { %v6324_v24 = vpop.f32.mrf.mxu1  ;;  %v14722_v5 = vpop.f32.mrf.mxu0 }
 0x538   :  { %v6652_v16 = vadd.f32 %v6588_v63, %v6522_v59  ;;  %v6325_v34 = vadd.f32 %v6324_v24, %v14428_v30  ;;  %8109 = vmatpush1.bf16.msra.mxu0 %v11542_v2  ;;  %v11545_v63 = vld [vmem:[#allocation2 + $0x18] sm:$0xff]  }
 0x539   :  { %v6326_v25 = vpop.f32.mrf.mxu1  ;;  %v6165_v60 = vpop.f32.mrf.mxu0  ;;  %8110 = vmatprep.subr.bf16.mxu0 %v11844_v3 }
 0x53a   :  { %6716 = vst [vmem:[%s16169_s3 + $0x90] sm:$0xff] %v6652_v16  ;;  %v6589_v36 = vmul.f32 %v14493_v20, %v6325_v34  ;;  %v10631_v40 = vpack.c.bf16 %v6325_v34, %v6322_v0  ;;  %v6526_v25 = vld [vmem:[%s16169_s3 + $0xb0] sm:$0xff] }
 0x53b   :  { %v6329_v26 = vpop.f32.mrf.mxu1  ;;  %v14733_v55 = vpop.f32.mrf.mxu0 }
 0x53c   :  { %v6653_v30 = vadd.f32 %v6589_v36, %v6523_v29  ;;  %10844 = vst [vmem:[#allocation2 + $0x48] sm:$0xff] %v10631_v40   ;;  %v6330_v43 = vadd.f32 %v6329_v26, %v14433_v9  ;;  %8111 = vmatpush1.bf16.msra.mxu0 %v11543_v8  ;;  %v11546_v29 = vld [vmem:[#allocation2 + $0x10] sm:$0xff]  }
 0x53d   :  { %v6331_v7 = vpop.f32.mrf.mxu1  ;;  %v6170_v13 = vpop.f32.mrf.mxu0  ;;  %8112 = vmatprep.subr.bf16.mxu0 %v11844_v3 }
 0x53e   :  { %6717 = vst [vmem:[%s16169_s3 + $0x98] sm:$0xff] %v6653_v30  ;;  %v6590_v6 = vmul.f32 %v14493_v20, %v6330_v43  ;;  %v6527_v30 = vld [vmem:[%s16169_s3 + $0xb8] sm:$0xff] }
 0x53f   :  { %v6332_v56 = vpop.f32.mrf.mxu1  ;;  %v14744_v11 = vpop.f32.mrf.mxu0 }
 0x540   :  { %v6654_v9 = vadd.f32 %v6590_v6, %v6524_v46  ;;  %v6333_v1 = vadd.f32 %v6332_v56, %v14438_v52  ;;  %8113 = vmatpush1.bf16.msra.mxu0 %v11544_v32  ;;  %v11547_v6 = vld [vmem:[#allocation2 + $0x8] sm:$0xff]  }
 0x541   :  { %v6334_v62 = vpop.f32.mrf.mxu1  ;;  %v6173_v44 = vpop.f32.mrf.mxu0  ;;  %8114 = vmatprep.subr.bf16.mxu0 %v11844_v3 }
 0x542   :  { %6718 = vst [vmem:[%s16169_s3 + $0xa0] sm:$0xff] %v6654_v9  ;;  %v6591_v0 = vmul.f32 %v14493_v20, %v6333_v1  ;;  %v10636_v28 = vpack.c.bf16 %v6333_v1, %v6330_v43  ;;  %v6528_v62 = vld [vmem:[%s16169_s3 + $0xc0] sm:$0xff] }
 0x543   :  { %v6337_v15 = vpop.f32.mrf.mxu1  ;;  %v14755_v59 = vpop.f32.mrf.mxu0 }
 0x544   :  { %v6655_v52 = vadd.f32 %v6591_v0, %v6525_v10  ;;  %10845 = vst [vmem:[#allocation2 + $0x50] sm:$0xff] %v10636_v28   ;;  %v6338_v24 = vadd.f32 %v6337_v15, %v14443_v17  ;;  %8115 = vmatpush1.bf16.msra.mxu0 %v11545_v63  ;;  %v11548_v10 = vld [vmem:[#allocation2] sm:$0xff]  }
 0x545   :  { %v6339_v2 = vpop.f32.mrf.mxu1  ;;  %v6178_v16 = vpop.f32.mrf.mxu0  ;;  %8116 = vmatprep.subr.bf16.mxu0 %v11844_v3 }
 0x546   :  { %6719 = vst [vmem:[%s16169_s3 + $0xa8] sm:$0xff] %v6655_v52  ;;  %v6592_v34 = vmul.f32 %v14493_v20, %v6338_v24  ;;  %v6529_v2 = vld [vmem:[%s16169_s3 + $0xc8] sm:$0xff] }
 0x547   :  { %v6340_v60 = vpop.f32.mrf.mxu1  ;;  %v14766_v36 = vpop.f32.mrf.mxu0 }
 0x548   :  { %v6656_v17 = vadd.f32 %v6592_v34, %v6526_v25  ;;  %v6341_v40 = vadd.f32 %v6340_v60, %v14448_v18  ;;  %8117 = vmatpush1.bf16.msra.mxu0 %v11546_v29 }
 0x549   :  { %v6342_v26 = vpop.f32.mrf.mxu1  ;;  %v6181_v8 = vpop.f32.mrf.mxu0  ;;  %8118 = vmatprep.subr.bf16.mxu0 %v11844_v3 }
 0x54a   :  { %6720 = vst [vmem:[%s16169_s3 + $0xb0] sm:$0xff] %v6656_v17  ;;  %v6593_v43 = vmul.f32 %v14493_v20, %v6341_v40  ;;  %v10641_v7 = vpack.c.bf16 %v6341_v40, %v6338_v24  ;;  %v6530_v40 = vld [vmem:[%s16169_s3 + $0xd0] sm:$0xff] }
 0x54b   :  { %v6345_v13 = vpop.f32.mrf.mxu1  ;;  %v14777_v46 = vpop.f32.mrf.mxu0 }
 0x54c   :  { %v6657_v18 = vadd.f32 %v6593_v43, %v6527_v30  ;;  %10846 = vst [vmem:[#allocation2 + $0x58] sm:$0xff] %v10641_v7   ;;  %v6346_v56 = vadd.f32 %v6345_v13, %v14453_v53  ;;  %8119 = vmatpush1.bf16.msra.mxu0 %v11547_v6 }
 0x54d   :  { %v6347_v32 = vpop.f32.mrf.mxu1  ;;  %v6186_v9 = vpop.f32.mrf.mxu0  ;;  %8120 = vmatprep.subr.bf16.mxu0 %v11844_v3 }
 0x54e   :  { %6721 = vst [vmem:[%s16169_s3 + $0xb8] sm:$0xff] %v6657_v18  ;;  %v6594_v1 = vmul.f32 %v14493_v20, %v6346_v56  ;;  %v6531_v18 = vld [vmem:[%s16169_s3 + $0xd8] sm:$0xff] }
 0x54f   :  { %v6348_v44 = vpop.f32.mrf.mxu1  ;;  %v14788_v0 = vpop.f32.mrf.mxu0 }
 0x550   :  { %v6658_v53 = vadd.f32 %v6594_v1, %v6528_v62  ;;  %v6349_v28 = vadd.f32 %v6348_v44, %v14458_v49  ;;  %8121 = vmatpush1.bf16.msra.mxu0 %v11548_v10  ;;  %v6532_v10 = vld [vmem:[%s16169_s3 + $0xe0] sm:$0xff] }
 0x551   :  { %v6350_v15 = vpop.f32.mrf.mxu1  ;;  %v6189_v63 = vpop.f32.mrf.mxu0  ;;  %8122 = vmatprep.subr.bf16.mxu0 %v11844_v3 }
 0x552   :  { %6722 = vst [vmem:[%s16169_s3 + $0xc0] sm:$0xff] %v6658_v53  ;;  %v6595_v52 = vmul.f32 %v14493_v20, %v6349_v28  ;;  %v10646_v24 = vpack.c.bf16 %v6349_v28, %v6346_v56 }
 0x553   :  { %v6353_v16 = vpop.f32.mrf.mxu1  ;;  %v14799_v34 = vpop.f32.mrf.mxu0 }
 0x554   :  { %v6659_v49 = vadd.f32 %v6595_v52, %v6529_v2  ;;  %10847 = vst [vmem:[#allocation2 + $0x60] sm:$0xff] %v10646_v24   ;;  %v6354_v25 = vadd.f32 %v6353_v16, %v14463_v33  ;;  %v6533_v16 = vld [vmem:[%s16169_s3 + $0xe8] sm:$0xff] }
 0x555   :  { %v6355_v60 = vpop.f32.mrf.mxu1  ;;  %v6194_v29 = vpop.f32.mrf.mxu0 }
 0x556   :  { %6723 = vst [vmem:[%s16169_s3 + $0xc8] sm:$0xff] %v6659_v49  ;;  %v6596_v17 = vmul.f32 %v14493_v20, %v6354_v25 }
 0x557   :  { %v6356_v26 = vpop.f32.mrf.mxu1  ;;  %v14809_v8 = vpop.f32.mrf.mxu0 }
 0x558   :  { %v6660_v30 = vadd.f32 %v6596_v17, %v6530_v40  ;;  %v6357_v43 = vadd.f32 %v6356_v26, %v14468_v35  ;;  %v6534_v26 = vld [vmem:[%s16169_s3 + $0xf0] sm:$0xff] }
 0x559   :  { %v6358_v7 = vpop.f32.mrf.mxu1  ;;  %v6197_v33 = vpop.f32.mrf.mxu0 }
 0x55a   :  { %6724 = vst [vmem:[%s16169_s3 + $0xd0] sm:$0xff] %v6660_v30  ;;  %v6597_v13 = vmul.f32 %v14493_v20, %v6357_v43  ;;  %v10651_v6 = vpack.c.bf16 %v6357_v43, %v6354_v25 }
 0x55b   :  { %v6361_v56 = vpop.f32.mrf.mxu1  ;;  %v14819_v32 = vpop.f32.mrf.mxu0 }
 0x55c   :  { %v6661_v9 = vadd.f32 %v6597_v13, %v6531_v18  ;;  %10848 = vst [vmem:[#allocation2 + $0x68] sm:$0xff] %v10651_v6   ;;  %v6362_v35 = vadd.f32 %v6361_v56, %v14473_v37  ;;  %v6535_v56 = vld [vmem:[%s16169_s3 + $0xf8] sm:$0xff] }
 0x55d   :  { %v6363_v1 = vpop.f32.mrf.mxu1  ;;  %v6202_v62 = vpop.f32.mrf.mxu0 }
 0x55e   :  { %6725 = vst [vmem:[%s16169_s3 + $0xd8] sm:$0xff] %v6661_v9  ;;  %v6598_v44 = vmul.f32 %v14493_v20, %v6362_v35 }
 0x55f   :  { %v6364_v53 = vpop.f32.mrf.mxu1  ;;  %v14829_v28 = vpop.f32.mrf.mxu0 }
 0x560   :  { %v6662_v15 = vadd.f32 %v6598_v44, %v6532_v10  ;;  %v6365_v63 = vadd.f32 %v6364_v53, %v14478_v58  ;;  %v6536_v44 = vld [vmem:[%s16169_s3 + $0x100] sm:$0xff] }
 0x561   :  { %v6366_v52 = vpop.f32.mrf.mxu1  ;;  %v6205_v37 = vpop.f32.mrf.mxu0 }
 0x562   :  { %6726 = vst [vmem:[%s16169_s3 + $0xe0] sm:$0xff] %v6662_v15  ;;  %v6599_v24 = vmul.f32 %v14493_v20, %v6365_v63  ;;  %v10656_v2 = vpack.c.bf16 %v6365_v63, %v6362_v35 }
 0x563   :  { %v6369_v49 = vpop.f32.mrf.mxu1  ;;  %v14839_v25 = vpop.f32.mrf.mxu0 }
 0x564   :  { %v6663_v60 = vadd.f32 %v6599_v24, %v6533_v16  ;;  %10849 = vst [vmem:[#allocation2 + $0x70] sm:$0xff] %v10656_v2   ;;  %v6370_v58 = vadd.f32 %v6369_v49, %v14483_v22 }
 0x565   :  { %v6371_v29 = vpop.f32.mrf.mxu1  ;;  %v6210_v17 = vpop.f32.mrf.mxu0 }
 0x566   :  { %6727 = vst [vmem:[%s16169_s3 + $0xe8] sm:$0xff] %v6663_v60  ;;  %v6600_v40 = vmul.f32 %v14493_v20, %v6370_v58 }
 0x567   :  { %v6372_v30 = vpop.f32.mrf.mxu1  ;;  %v14849_v43 = vpop.f32.mrf.mxu0 }
 0x568   :  { %v6664_v7 = vadd.f32 %v6600_v40, %v6534_v26  ;;  %v6373_v33 = vadd.f32 %v6372_v30, %v14488_v21  ;;  %v6539_v30 = vld [vmem:[%s16169_s3 + $0x118] sm:$0xff] }
 0x569   :  { %v6374_v13 = vpop.f32.mrf.mxu1  ;;  %v6213_v22 = vpop.f32.mrf.mxu0 }
 0x56a   :  { %6728 = vst [vmem:[%s16169_s3 + $0xf0] sm:$0xff] %v6664_v7  ;;  %v6601_v6 = vmul.f32 %v14493_v20, %v6373_v33  ;;  %v10661_v18 = vpack.c.bf16 %v6373_v33, %v6370_v58  ;;  %v6538_v58 = vld [vmem:[%s16169_s3 + $0x110] sm:$0xff]  ;;  %v11551_v22 = vld [vmem:[#allocation2 + $0x68] sm:$0xff]  }
 0x56b   :  { %v6377_v9 = vpop.f32.mrf.mxu1  ;;  %v11550_v17 = vld [vmem:[#allocation2 + $0x70] sm:$0xff]  }
 0x56c   :  { %v6665_v35 = vadd.f32 %v6601_v6, %v6535_v56  ;;  %10850 = vst [vmem:[#allocation2 + $0x78] sm:$0xff] %v10661_v18   ;;  %v6378_v1 = vadd.f32 %v6377_v9, %v14495_v4  ;;  %v6537_v4 = vld [vmem:[%s16169_s3 + $0x108] sm:$0xff]  ;;  %v6540_v9 = vld [vmem:[%s16169_s3 + $0x120] sm:$0xff] }
 0x56d   :  { %v6379_v62 = vpop.f32.mrf.mxu1 }
 0x56e   :  { %6729 = vst [vmem:[%s16169_s3 + $0xf8] sm:$0xff] %v6665_v35  ;;  %v6602_v21 = vmul.f32 %v14493_v20, %v6378_v1 }
 0x56f   :  { %v6380_v10 = vpop.f32.mrf.mxu1 }
 0x570   :  { %v6666_v53 = vadd.f32 %v6602_v21, %v6536_v44  ;;  %v6381_v15 = vadd.f32 %v6380_v10, %v14505_v45  ;;  %v6541_v44 = vld [vmem:[%s16169_s3 + $0x128] sm:$0xff] }
 0x571   :  { %v6382_v63 = vpop.f32.mrf.mxu1 }
 0x572   :  { %6730 = vst [vmem:[%s16169_s3 + $0x100] sm:$0xff] %v6666_v53  ;;  %v6603_v52 = vmul.f32 %v14493_v20, %v6381_v15  ;;  %v10666_v37 = vpack.c.bf16 %v6381_v15, %v6378_v1  ;;  %v11552_v1 = vld [vmem:[#allocation2 + $0x60] sm:$0xff]   ;;  %v11553_v63 = vld [vmem:[#allocation2 + $0x58] sm:$0xff]  }
 0x573   :  { %v6385_v24 = vpop.f32.mrf.mxu1  ;;  %v11549_v2 = vld [vmem:[#allocation2 + $0x78] sm:$0xff]  }
 0x574   :  { %v6667_v16 = vadd.f32 %v6603_v52, %v6537_v4  ;;  %10851 = vst [vmem:[#allocation2 + $0x80] sm:$0xff] %v10666_v37   ;;  %v6386_v49 = vadd.f32 %v6385_v24, %v14518_v14  ;;  %8123 = vmatpush2.bf16.msra.mxu0 %v11549_v2  ;;  %v6542_v24 = vld [vmem:[%s16169_s3 + $0x130] sm:$0xff] }
 0x575   :  { %v6387_v60 = vpop.f32.mrf.mxu1  ;;  %8124 = vmatprep.subr.bf16.mxu0 %v11844_v3 }
 0x576   :  { %6731 = vst [vmem:[%s16169_s3 + $0x108] sm:$0xff] %v6667_v16  ;;  %v6604_v45 = vmul.f32 %v14493_v20, %v6386_v49  ;;  %v11554_v16 = vld [vmem:[#allocation2 + $0x50] sm:$0xff]  }
 0x577   :  { %v6388_v29 = vpop.f32.mrf.mxu1 }
 0x578   :  { %v6668_v40 = vadd.f32 %v6604_v45, %v6538_v58  ;;  %v6389_v26 = vadd.f32 %v6388_v29, %v14531_v57  ;;  %8125 = vmatpush2.bf16.msra.mxu0 %v11550_v17  ;;  %v6543_v45 = vld [vmem:[%s16169_s3 + $0x138] sm:$0xff] }
 0x579   :  { %v6390_v14 = vpop.f32.mrf.mxu1  ;;  %8126 = vmatprep.subr.bf16.mxu0 %v11844_v3 }
 0x57a   :  { %6732 = vst [vmem:[%s16169_s3 + $0x110] sm:$0xff] %v6668_v40  ;;  %v6605_v7 = vmul.f32 %v14493_v20, %v6389_v26  ;;  %v10671_v33 = vpack.c.bf16 %v6389_v26, %v6386_v49  ;;  %v11555_v40 = vld [vmem:[#allocation2 + $0x48] sm:$0xff]   ;;  %v11575_v14 = vld [vmem:[%s16167_s1 + $0x4] ss:$16 sps:$4 sm:$0xff]  }
 0x57b   :  { %v6393_v13 = vpop.f32.mrf.mxu1  ;;  %8138 = vmatprep.mubr.bf16.mxu0 %v11575_v14  ;;  %v6549_v14 = vld [vmem:[%s16169_s3 + $0x168] sm:$0xff] }
 0x57c   :  { %v6669_v6 = vadd.f32 %v6605_v7, %v6539_v30  ;;  %10852 = vst [vmem:[#allocation2 + $0x88] sm:$0xff] %v10671_v33   ;;  %v6394_v57 = vadd.f32 %v6393_v13, %v14544_v50  ;;  %8127 = vmatpush2.bf16.msra.mxu0 %v11551_v22  ;;  %v6544_v33 = vld [vmem:[%s16169_s3 + $0x140] sm:$0xff] }
 0x57d   :  { %v6395_v18 = vpop.f32.mrf.mxu1  ;;  %8128 = vmatprep.subr.bf16.mxu0 %v11844_v3  ;;  %v11556_v13 = vld [vmem:[#allocation2 + $0x40] sm:$0xff]  }
 0x57e   :  { %6733 = vst [vmem:[%s16169_s3 + $0x118] sm:$0xff] %v6669_v6  ;;  %v6606_v56 = vmul.f32 %v14493_v20, %v6394_v57 }
 0x57f   :  { %v6396_v35 = vpop.f32.mrf.mxu1 }
 0x580   :  { %v6670_v62 = vadd.f32 %v6606_v56, %v6540_v9  ;;  %v6397_v21 = vadd.f32 %v6396_v35, %v14557_v39  ;;  %8129 = vmatpush2.bf16.msra.mxu0 %v11552_v1  ;;  %v11578_v56 = vld [vmem:[%s16167_s1 + $0xc] ss:$16 sps:$4 sm:$0xff]  }
 0x581   :  { %v6398_v50 = vpop.f32.mrf.mxu1  ;;  %8130 = vmatprep.subr.bf16.mxu0 %v11844_v3  ;;  %8427 = vmatprep.mubr.bf16.mxu1 %v11578_v56 }
 0x582   :  { %6734 = vst [vmem:[%s16169_s3 + $0x120] sm:$0xff] %v6670_v62  ;;  %v6607_v10 = vmul.f32 %v14493_v20, %v6397_v21  ;;  %v10676_v53 = vpack.c.bf16 %v6397_v21, %v6394_v57  ;;  %v11573_v57 = vld [vmem:[%s16167_s1] ss:$16 sps:$4 sm:$0xff]   ;;  %v11581_v50 = vld [vmem:[%s16167_s1 + $0x24] ss:$16 sps:$4 sm:$0xff]  }
 0x583   :  { %v6401_v15 = vpop.f32.mrf.mxu1 }
 0x584   :  { %v6671_v4 = vadd.f32 %v6607_v10, %v6541_v44  ;;  %10853 = vst [vmem:[#allocation2 + $0x90] sm:$0xff] %v10676_v53   ;;  %v6402_v39 = vadd.f32 %v6401_v15, %v14570_v61  ;;  %8131 = vmatpush2.bf16.msra.mxu0 %v11553_v63  ;;  %v6546_v53 = vld [vmem:[%s16169_s3 + $0x150] sm:$0xff] }
 0x585   :  { %v6403_v52 = vpop.f32.mrf.mxu1  ;;  %8132 = vmatprep.subr.bf16.mxu0 %v11844_v3 }
 0x586   :  { %6735 = vst [vmem:[%s16169_s3 + $0x128] sm:$0xff] %v6671_v4  ;;  %v6608_v37 = vmul.f32 %v14493_v20, %v6402_v39  ;;  %v11579_v4 = vld [vmem:[%s16167_s1 + $0x20] ss:$16 sps:$4 sm:$0xff]  }
 0x587   :  { %v6404_v2 = vpop.f32.mrf.mxu1 }
 0x588   :  { %v6672_v49 = vadd.f32 %v6608_v37, %v6542_v24  ;;  %v6405_v60 = vadd.f32 %v6404_v2, %v14583_v51  ;;  %8133 = vmatpush2.bf16.msra.mxu0 %v11554_v16  ;;  %v6547_v24 = vld [vmem:[%s16169_s3 + $0x158] sm:$0xff] }
 0x589   :  { %v6406_v61 = vpop.f32.mrf.mxu1  ;;  %8134 = vmatprep.subr.bf16.mxu0 %v11844_v3 }
 0x58a   :  { %6736 = vst [vmem:[%s16169_s3 + $0x130] sm:$0xff] %v6672_v49  ;;  %v6609_v58 = vmul.f32 %v14493_v20, %v6405_v60  ;;  %v10681_v29 = vpack.c.bf16 %v6405_v60, %v6402_v39  ;;  %v11587_v49 = vld [vmem:[%s16167_s1 + $0x44] ss:$16 sps:$4 sm:$0xff]  }
 0x58b   :  { %v6409_v17 = vpop.f32.mrf.mxu1 }
 0x58c   :  { %v6673_v26 = vadd.f32 %v6609_v58, %v6543_v45  ;;  %10854 = vst [vmem:[#allocation2 + $0x98] sm:$0xff] %v10681_v29   ;;  %v6410_v51 = vadd.f32 %v6409_v17, %v14596_v48  ;;  %8135 = vmatpush2.bf16.msra.mxu0 %v11555_v40  ;;  %v6548_v45 = vld [vmem:[%s16169_s3 + $0x160] sm:$0xff] }
 0x58d   :  { %v6411_v30 = vpop.f32.mrf.mxu1  ;;  %8136 = vmatprep.subr.bf16.mxu0 %v11844_v3  ;;  %v11585_v17 = vld [vmem:[%s16167_s1 + $0x40] ss:$16 sps:$4 sm:$0xff]  }
 0x58e   :  { %6737 = vst [vmem:[%s16169_s3 + $0x138] sm:$0xff] %v6673_v26  ;;  %v6610_v7 = vmul.f32 %v14493_v20, %v6410_v51 }
 0x58f   :  { %v6412_v48 = vpop.f32.mrf.mxu1 }
 0x590   :  { %v6674_v22 = vadd.f32 %v6610_v7, %v6544_v33  ;;  %v6413_v6 = vadd.f32 %v6412_v48, %v14609_v54  ;;  %8137 = vmatpush2.bf16.msra.mxu0 %v11556_v13  ;;  %v6545_v54 = vld [vmem:[%s16169_s3 + $0x148] sm:$0xff]  ;;  %v11593_v33 = vld [vmem:[%s16167_s1 + $0x64] ss:$16 sps:$4 sm:$0xff]  }
 0x591   :  { %v6414_v18 = vpop.f32.mrf.mxu1 }
 0x592   :  { %6738 = vst [vmem:[%s16169_s3 + $0x140] sm:$0xff] %v6674_v22  ;;  %v6611_v9 = vmul.f32 %v14493_v20, %v6413_v6  ;;  %v10686_v35 = vpack.c.bf16 %v6413_v6, %v6410_v51  ;;  %v6550_v22 = vld [vmem:[%s16169_s3 + $0x170] sm:$0xff] }
 0x593   :  { %v6417_v1 = vpop.f32.mrf.mxu1  ;;  %8139 = vmatmul.mubr.bf16.vlgmr.msra.gmra.mxu0 %v11573_v57  ;;  %v11591_v18 = vld [vmem:[%s16167_s1 + $0x60] ss:$16 sps:$4 sm:$0xff]  }
 0x594   :  { %v6675_v62 = vadd.f32 %v6611_v9, %v6545_v54  ;;  %10855 = vst [vmem:[#allocation2 + $0xa0] sm:$0xff] %v10686_v35   ;;  %v6418_v21 = vadd.f32 %v6417_v1, %v14622_v42  ;;  %8146 = vmatprep.mubr.bf16.mxu0 %v11581_v50  ;;  %v6551_v54 = vld [vmem:[%s16169_s3 + $0x178] sm:$0xff] }
 0x595   :  { %v6419_v44 = vpop.f32.mrf.mxu1 }
 0x596   :  { %6739 = vst [vmem:[%s16169_s3 + $0x148] sm:$0xff] %v6675_v62  ;;  %v6612_v10 = vmul.f32 %v14493_v20, %v6418_v21 }
 0x597   :  { %v6420_v15 = vpop.f32.mrf.mxu1 }
 0x598   :  { %v6676_v63 = vadd.f32 %v6612_v10, %v6546_v53  ;;  %v6421_v42 = vadd.f32 %v6420_v15, %v14635_v41  ;;  %v6552_v10 = vld [vmem:[%s16169_s3 + $0x180] sm:$0xff] }
 0x599   :  { %v6422_v39 = vpop.f32.mrf.mxu1 }
 0x59a   :  { %6740 = vst [vmem:[%s16169_s3 + $0x150] sm:$0xff] %v6676_v63  ;;  %v6613_v52 = vmul.f32 %v14493_v20, %v6421_v42  ;;  %v10691_v37 = vpack.c.bf16 %v6421_v42, %v6418_v21  ;;  %v11599_v21 = vld [vmem:[%s16167_s1 + $0x84] ss:$16 sps:$4 sm:$0xff]   ;;  %v11597_v63 = vld [vmem:[%s16167_s1 + $0x80] ss:$16 sps:$4 sm:$0xff]  }
 0x59b   :  { %v6425_v2 = vpop.f32.mrf.mxu1  ;;  %8147 = vmatmul.mubr.bf16.gmra.mxu0 %v11579_v4  ;;  %v6553_v4 = vld [vmem:[%s16169_s3 + $0x188] sm:$0xff] }
 0x59c   :  { %v6677_v16 = vadd.f32 %v6613_v52, %v6547_v24  ;;  %10856 = vst [vmem:[#allocation2 + $0xa8] sm:$0xff] %v10691_v37   ;;  %v6426_v41 = vadd.f32 %v6425_v2, %v14648_v38  ;;  %8154 = vmatprep.mubr.bf16.mxu0 %v11587_v49 }
 0x59d   :  { %v6427_v60 = vpop.f32.mrf.mxu1 }
 0x59e   :  { %6741 = vst [vmem:[%s16169_s3 + $0x158] sm:$0xff] %v6677_v16  ;;  %v6614_v61 = vmul.f32 %v14493_v20, %v6426_v41  ;;  %v11605_v16 = vld [vmem:[%s16167_s1 + $0xa4] ss:$16 sps:$4 sm:$0xff]  }
 0x59f   :  { %v6428_v58 = vpop.f32.mrf.mxu1 }
 0x5a0   :  { %v6678_v29 = vadd.f32 %v6614_v61, %v6548_v45  ;;  %v6429_v38 = vadd.f32 %v6428_v58, %v14661_v47 }
 0x5a1   :  { %v6430_v40 = vpop.f32.mrf.mxu1 }
 0x5a2   :  { %6742 = vst [vmem:[%s16169_s3 + $0x160] sm:$0xff] %v6678_v29  ;;  %v6615_v26 = vmul.f32 %v14493_v20, %v6429_v38  ;;  %v10696_v51 = vpack.c.bf16 %v6429_v38, %v6426_v41  ;;  %v11603_v29 = vld [vmem:[%s16167_s1 + $0xa0] ss:$16 sps:$4 sm:$0xff]  }
 0x5a3   :  { %v6433_v30 = vpop.f32.mrf.mxu1  ;;  %8155 = vmatmul.mubr.bf16.gmra.mxu0 %v11585_v17  ;;  %v6555_v17 = vld [vmem:[%s16169_s3 + $0x198] sm:$0xff] }
 0x5a4   :  { %v6679_v7 = vadd.f32 %v6615_v26, %v6549_v14  ;;  %10857 = vst [vmem:[#allocation2 + $0xb0] sm:$0xff] %v10696_v51   ;;  %v6434_v47 = vadd.f32 %v6433_v30, %v14671_v12  ;;  %8162 = vmatprep.mubr.bf16.mxu0 %v11593_v33  ;;  %v11559_v51 = vld [vmem:[#allocation2 + $0xa8] sm:$0xff]  }
 0x5a5   :  { %v6435_v48 = vpop.f32.mrf.mxu1 }
 0x5a6   :  { %6743 = vst [vmem:[%s16169_s3 + $0x168] sm:$0xff] %v6679_v7  ;;  %v6616_v13 = vmul.f32 %v14493_v20, %v6434_v47  ;;  %v11611_v7 = vld [vmem:[%s16167_s1 + $0xc4] ss:$16 sps:$4 sm:$0xff]  }
 0x5a7   :  { %v6436_v6 = vpop.f32.mrf.mxu1 }
 0x5a8   :  { %v6680_v57 = vadd.f32 %v6616_v13, %v6550_v22  ;;  %v6437_v12 = vadd.f32 %v6436_v6, %v14681_v31  ;;  %v11560_v13 = vld [vmem:[#allocation2 + $0xa0] sm:$0xff]  }
 0x5a9   :  { %v6438_v56 = vpop.f32.mrf.mxu1 }
 0x5aa   :  { %6744 = vst [vmem:[%s16169_s3 + $0x170] sm:$0xff] %v6680_v57  ;;  %v6617_v9 = vmul.f32 %v14493_v20, %v6437_v12  ;;  %v10701_v35 = vpack.c.bf16 %v6437_v12, %v6434_v47  ;;  %v11609_v57 = vld [vmem:[%s16167_s1 + $0xc0] ss:$16 sps:$4 sm:$0xff]  }
 0x5ab   :  { %v6441_v1 = vpop.f32.mrf.mxu1  ;;  %8163 = vmatmul.mubr.bf16.gmra.mxu0 %v11591_v18  ;;  %v11558_v61 = vld [vmem:[#allocation2 + $0xb0] sm:$0xff]   ;;  %v6557_v18 = vld [vmem:[%s16169_s3 + $0x1a8] sm:$0xff] }
 0x5ac   :  { %v6681_v62 = vadd.f32 %v6617_v9, %v6551_v54  ;;  %10858 = vst [vmem:[#allocation2 + $0xb8] sm:$0xff] %v10701_v35   ;;  %v6442_v31 = vadd.f32 %v6441_v1, %v14691_v19  ;;  %8170 = vmatprep.mubr.bf16.mxu0 %v11599_v21  ;;  %v11561_v35 = vld [vmem:[#allocation2 + $0x98] sm:$0xff]  }
 0x5ad   :  { %v6443_v50 = vpop.f32.mrf.mxu1 }
 0x5ae   :  { %6745 = vst [vmem:[%s16169_s3 + $0x178] sm:$0xff] %v6681_v62  ;;  %v6618_v44 = vmul.f32 %v14493_v20, %v6442_v31  ;;  %v11617_v62 = vld [vmem:[%s16167_s1 + $0xe4] ss:$16 sps:$4 sm:$0xff]  }
 0x5af   :  { %v6444_v53 = vpop.f32.mrf.mxu1 }
 0x5b0   :  { %v6682_v15 = vadd.f32 %v6618_v44, %v6552_v10  ;;  %v6445_v19 = vadd.f32 %v6444_v53, %v14701_v23  ;;  %v11562_v44 = vld [vmem:[#allocation2 + $0x90] sm:$0xff]  }
 0x5b1   :  { %v6446_v42 = vpop.f32.mrf.mxu1 }
 0x5b2   :  { %6746 = vst [vmem:[%s16169_s3 + $0x180] sm:$0xff] %v6682_v15  ;;  %v6619_v39 = vmul.f32 %v14493_v20, %v6445_v19  ;;  %v10706_v52 = vpack.c.bf16 %v6445_v19, %v6442_v31  ;;  %v11615_v15 = vld [vmem:[%s16167_s1 + $0xe0] ss:$16 sps:$4 sm:$0xff]  }
 0x5b3   :  { %v6449_v37 = vpop.f32.mrf.mxu1  ;;  %v11557_v24 = vld [vmem:[#allocation2 + $0xb8] sm:$0xff]   ;;  %8171 = vmatmul.mubr.bf16.gmra.mxu0 %v11597_v63 }
 0x5b4   :  { %v6683_v2 = vadd.f32 %v6619_v39, %v6553_v4  ;;  %10859 = vst [vmem:[#allocation2 + $0xc0] sm:$0xff] %v10706_v52   ;;  %v6450_v23 = vadd.f32 %v6449_v37, %v14711_v27  ;;  %8396 = vmatpush1.bf16.msra.mxu1 %v11557_v24  ;;  %8178 = vmatprep.mubr.bf16.mxu0 %v11605_v16  ;;  %v6554_v27 = vld [vmem:[%s16169_s3 + $0x190] sm:$0xff]  ;;  %v6559_v63 = vld [vmem:[%s16169_s3 + $0x1b8] sm:$0xff]  ;;  %v11563_v39 = vld [vmem:[#allocation2 + $0x88] sm:$0xff]  }
 0x5b5   :  { %v6451_v41 = vpop.f32.mrf.mxu1  ;;  %8397 = vmatprep.subr.bf16.mxu1 %v11844_v3  ;;  %v11623_v24 = vld [vmem:[%s16167_s1 + $0x104] ss:$16 sps:$4 sm:$0xff]  }
 0x5b6   :  { %6747 = vst [vmem:[%s16169_s3 + $0x188] sm:$0xff] %v6683_v2  ;;  %v6620_v49 = vmul.f32 %v14493_v20, %v6450_v23  ;;  %v11564_v41 = vld [vmem:[#allocation2 + $0x80] sm:$0xff]  }
 0x5b7   :  { %v6452_v60 = vpop.f32.mrf.mxu1 }
 0x5b8   :  { %v6684_v45 = vadd.f32 %v6620_v49, %v6554_v27  ;;  %v6453_v58 = vadd.f32 %v6452_v60, %v14722_v5  ;;  %8398 = vmatpush1.bf16.msra.mxu1 %v11558_v61  ;;  %v11621_v60 = vld [vmem:[%s16167_s1 + $0x100] ss:$16 sps:$4 sm:$0xff]  }
 0x5b9   :  { %v6454_v38 = vpop.f32.mrf.mxu1  ;;  %8399 = vmatprep.subr.bf16.mxu1 %v11844_v3 }
 0x5ba   :  { %6748 = vst [vmem:[%s16169_s3 + $0x190] sm:$0xff] %v6684_v45  ;;  %v6621_v40 = vmul.f32 %v14493_v20, %v6453_v58  ;;  %v10711_v26 = vpack.c.bf16 %v6453_v58, %v6450_v23 }
 0x5bb   :  { %v6457_v5 = vpop.f32.mrf.mxu1  ;;  %8179 = vmatmul.mubr.bf16.gmra.mxu0 %v11603_v29  ;;  %v6561_v29 = vld [vmem:[%s16169_s3 + $0x1c8] sm:$0xff] }
 0x5bc   :  { %v6685_v14 = vadd.f32 %v6621_v40, %v6555_v17  ;;  %10860 = vst [vmem:[#allocation2 + $0xc8] sm:$0xff] %v10711_v26   ;;  %v6458_v30 = vadd.f32 %v6457_v5, %v14733_v55  ;;  %8400 = vmatpush1.bf16.msra.mxu1 %v11559_v51  ;;  %8186 = vmatprep.mubr.bf16.mxu0 %v11611_v7  ;;  %v6556_v55 = vld [vmem:[%s16169_s3 + $0x1a0] sm:$0xff]  ;;  %v6562_v51 = vld [vmem:[%s16169_s3 + $0x1d0] sm:$0xff] }
 0x5bd   :  { %v6459_v47 = vpop.f32.mrf.mxu1  ;;  %8401 = vmatprep.subr.bf16.mxu1 %v11844_v3  ;;  %v11629_v40 = vld [vmem:[%s16167_s1 + $0x124] ss:$16 sps:$4 sm:$0xff]   ;;  %v11627_v7 = vld [vmem:[%s16167_s1 + $0x120] ss:$16 sps:$4 sm:$0xff]  }
 0x5be   :  { %6749 = vst [vmem:[%s16169_s3 + $0x198] sm:$0xff] %v6685_v14  ;;  %v6622_v33 = vmul.f32 %v14493_v20, %v6458_v30 }
 0x5bf   :  { %v6460_v48 = vpop.f32.mrf.mxu1 }
 0x5c0   :  { %v6686_v22 = vadd.f32 %v6622_v33, %v6556_v55  ;;  %v6461_v6 = vadd.f32 %v6460_v48, %v14744_v11  ;;  %8402 = vmatpush1.bf16.msra.mxu1 %v11560_v13  ;;  %v6563_v48 = vld [vmem:[%s16169_s3 + $0x1d8] sm:$0xff] }
 0x5c1   :  { %v6462_v12 = vpop.f32.mrf.mxu1  ;;  %8403 = vmatprep.subr.bf16.mxu1 %v11844_v3 }
 0x5c2   :  { %6750 = vst [vmem:[%s16169_s3 + $0x1a0] sm:$0xff] %v6686_v22  ;;  %v6623_v56 = vmul.f32 %v14493_v20, %v6461_v6  ;;  %v10716_v9 = vpack.c.bf16 %v6461_v6, %v6458_v30  ;;  %v11635_v6 = vld [vmem:[%s16167_s1 + $0x144] ss:$16 sps:$4 sm:$0xff]  }
 0x5c3   :  { %v6465_v11 = vpop.f32.mrf.mxu1  ;;  %8187 = vmatmul.mubr.bf16.gmra.mxu0 %v11609_v57 }
 0x5c4   :  { %v6687_v54 = vadd.f32 %v6623_v56, %v6557_v18  ;;  %10861 = vst [vmem:[#allocation2 + $0xd0] sm:$0xff] %v10716_v9   ;;  %v6466_v1 = vadd.f32 %v6465_v11, %v14755_v59  ;;  %8404 = vmatpush1.bf16.msra.mxu1 %v11561_v35  ;;  %8194 = vmatprep.mubr.bf16.mxu0 %v11617_v62  ;;  %v6558_v59 = vld [vmem:[%s16169_s3 + $0x1b0] sm:$0xff]  ;;  %v6564_v18 = vld [vmem:[%s16169_s3 + $0x1e0] sm:$0xff]  ;;  %v6565_v62 = vld [vmem:[%s16169_s3 + $0x1e8] sm:$0xff] }
 0x5c5   :  { %v6467_v31 = vpop.f32.mrf.mxu1  ;;  %8405 = vmatprep.subr.bf16.mxu1 %v11844_v3  ;;  %v11633_v11 = vld [vmem:[%s16167_s1 + $0x140] ss:$16 sps:$4 sm:$0xff]  }
 0x5c6   :  { %6751 = vst [vmem:[%s16169_s3 + $0x1a8] sm:$0xff] %v6687_v54  ;;  %v6624_v21 = vmul.f32 %v14493_v20, %v6466_v1 }
 0x5c7   :  { %v6468_v50 = vpop.f32.mrf.mxu1 }
 0x5c8   :  { %v6688_v10 = vadd.f32 %v6624_v21, %v6558_v59  ;;  %v6469_v53 = vadd.f32 %v6468_v50, %v14766_v36  ;;  %8406 = vmatpush1.bf16.msra.mxu1 %v11562_v44  ;;  %v11641_v59 = vld [vmem:[%s16167_s1 + $0x164] ss:$16 sps:$4 sm:$0xff]  }
 0x5c9   :  { %v6470_v19 = vpop.f32.mrf.mxu1  ;;  %8407 = vmatprep.subr.bf16.mxu1 %v11844_v3 }
 0x5ca   :  { %6752 = vst [vmem:[%s16169_s3 + $0x1b0] sm:$0xff] %v6688_v10  ;;  %v6625_v42 = vmul.f32 %v14493_v20, %v6469_v53  ;;  %v10721_v4 = vpack.c.bf16 %v6469_v53, %v6466_v1  ;;  %v6566_v10 = vld [vmem:[%s16169_s3 + $0x1f0] sm:$0xff] }
 0x5cb   :  { %v6473_v36 = vpop.f32.mrf.mxu1  ;;  %8195 = vmatmul.mubr.bf16.gmra.mxu0 %v11615_v15  ;;  %v11639_v19 = vld [vmem:[%s16167_s1 + $0x160] ss:$16 sps:$4 sm:$0xff]  }
 0x5cc   :  { %v6689_v52 = vadd.f32 %v6625_v42, %v6559_v63  ;;  %10862 = vst [vmem:[#allocation2 + $0xd8] sm:$0xff] %v10721_v4   ;;  %v6474_v37 = vadd.f32 %v6473_v36, %v14777_v46  ;;  %8408 = vmatpush1.bf16.msra.mxu1 %v11563_v39  ;;  %8202 = vmatprep.mubr.bf16.mxu0 %v11623_v24  ;;  %v6560_v46 = vld [vmem:[%s16169_s3 + $0x1c0] sm:$0xff]  ;;  %v6567_v36 = vld [vmem:[%s16169_s3 + $0x1f8] sm:$0xff] }
 0x5cd   :  { %v6475_v2 = vpop.f32.mrf.mxu1  ;;  %8409 = vmatprep.subr.bf16.mxu1 %v11844_v3 }
 0x5ce   :  { %6753 = vst [vmem:[%s16169_s3 + $0x1b8] sm:$0xff] %v6689_v52  ;;  %v6626_v23 = vmul.f32 %v14493_v20, %v6474_v37  ;;  %v11651_v2 = vld [vmem:[%s16167_s1 + $0x1a0] ss:$16 sps:$4 sm:$0xff]  }
 0x5cf   :  { %v6476_v16 = vpop.f32.mrf.mxu1 }
 0x5d0   :  { %v6690_v49 = vadd.f32 %v6626_v23, %v6560_v46  ;;  %v6477_v27 = vadd.f32 %v6476_v16, %v14788_v0  ;;  %8410 = vmatpush1.bf16.msra.mxu1 %v11564_v41  ;;  %v11659_v46 = vld [vmem:[%s16167_s1 + $0x1c4] ss:$16 sps:$4 sm:$0xff]   ;;  %v11657_v41 = vld [vmem:[%s16167_s1 + $0x1c0] ss:$16 sps:$4 sm:$0xff]  }
 0x5d1   :  { %v6478_v61 = vpop.f32.mrf.mxu1  ;;  %8411 = vmatprep.subr.bf16.mxu1 %v11844_v3 }
 0x5d2   :  { %6754 = vst [vmem:[%s16169_s3 + $0x1c0] sm:$0xff] %v6690_v49  ;;  %v6627_v45 = vmul.f32 %v14493_v20, %v6477_v27  ;;  %v10726_v58 = vpack.c.bf16 %v6477_v27, %v6474_v37  ;;  %v11653_v37 = vld [vmem:[%s16167_s1 + $0x1a4] ss:$16 sps:$4 sm:$0xff]   ;;  %v11663_v61 = vld [vmem:[%s16167_s1 + $0x1e0] ss:$16 sps:$4 sm:$0xff]  }
 0x5d3   :  { %v6481_v0 = vpop.f32.mrf.mxu1  ;;  %8203 = vmatmul.mubr.bf16.gmra.mxu0 %v11621_v60  ;;  %v11569_v49 = vld [vmem:[#allocation2 + $0xd8] sm:$0xff]   ;;  %v11665_v27 = vld [vmem:[%s16167_s1 + $0x1e4] ss:$16 sps:$4 sm:$0xff]  }
 0x5d4   :  { %v6691_v38 = vadd.f32 %v6627_v45, %v6561_v29  ;;  %10863 = vst [vmem:[#allocation2 + $0xe0] sm:$0xff] %v10726_v58   ;;  %v6482_v17 = vadd.f32 %v6481_v0, %v14799_v34  ;;  %8210 = vmatprep.mubr.bf16.mxu0 %v11629_v40  ;;  %v11570_v60 = vld [vmem:[#allocation2 + $0xd0] sm:$0xff]   ;;  %v11571_v45 = vld [vmem:[#allocation2 + $0xc8] sm:$0xff]   ;;  %v11572_v29 = vld [vmem:[#allocation2 + $0xc0] sm:$0xff]  }
 0x5d5   :  { %v6483_v26 = vpop.f32.mrf.mxu1  ;;  %v11671_v58 = vld [vmem:[%s16167_s1 + $0x204] ss:$16 sps:$4 sm:$0xff]   ;;  %v11576_v0 = vld [vmem:[%s16167_s1 + $0x8] ss:$16 sps:$4 sm:$0xff]  }
 0x5d6   :  { %6755 = vst [vmem:[%s16169_s3 + $0x1c8] sm:$0xff] %v6691_v38  ;;  %v6628_v5 = vmul.f32 %v14493_v20, %v6482_v17  ;;  %v11669_v38 = vld [vmem:[%s16167_s1 + $0x200] ss:$16 sps:$4 sm:$0xff]   ;;  %v11677_v40 = vld [vmem:[%s16167_s1 + $0x224] ss:$16 sps:$4 sm:$0xff]  }
 0x5d7   :  { %v6484_v14 = vpop.f32.mrf.mxu1  ;;  %v11675_v26 = vld [vmem:[%s16167_s1 + $0x220] ss:$16 sps:$4 sm:$0xff]  }
 0x5d8   :  { %v6692_v30 = vadd.f32 %v6628_v5, %v6562_v51  ;;  %v6485_v34 = vadd.f32 %v6484_v14, %v14809_v8  ;;  %v11590_v5 = vld [vmem:[%s16167_s1 + $0x4c] ss:$16 sps:$4 sm:$0xff]   ;;  %v11683_v51 = vld [vmem:[%s16167_s1 + $0x244] ss:$16 sps:$4 sm:$0xff]   ;;  %v11588_v14 = vld [vmem:[%s16167_s1 + $0x48] ss:$16 sps:$4 sm:$0xff]  }
 0x5d9   :  { %v6486_v47 = vpop.f32.mrf.mxu1 }
 0x5da   :  { %6756 = vst [vmem:[%s16169_s3 + $0x1d0] sm:$0xff] %v6692_v30  ;;  %v6629_v33 = vmul.f32 %v14493_v20, %v6485_v34  ;;  %v10731_v55 = vpack.c.bf16 %v6485_v34, %v6482_v17  ;;  %v11584_v17 = vld [vmem:[%s16167_s1 + $0x2c] ss:$16 sps:$4 sm:$0xff]   ;;  %v11681_v30 = vld [vmem:[%s16167_s1 + $0x240] ss:$16 sps:$4 sm:$0xff]  }
 0x5db   :  { %v6489_v13 = vpop.f32.mrf.mxu1  ;;  %8211 = vmatmul.mubr.bf16.gmra.mxu0 %v11627_v7  ;;  %v11568_v16 = vld [vmem:[#allocation2 + $0xe0] sm:$0xff]   ;;  %v11596_v34 = vld [vmem:[%s16167_s1 + $0x6c] ss:$16 sps:$4 sm:$0xff]   ;;  %v11594_v47 = vld [vmem:[%s16167_s1 + $0x68] ss:$16 sps:$4 sm:$0xff]  }
 0x5dc   :  { %v6693_v22 = vadd.f32 %v6629_v33, %v6563_v48  ;;  %10864 = vst [vmem:[#allocation2 + $0xe8] sm:$0xff] %v10731_v55   ;;  %v6490_v8 = vadd.f32 %v6489_v13, %v14819_v32  ;;  %8218 = vmatprep.mubr.bf16.mxu0 %v11635_v6  ;;  %v11689_v7 = vld [vmem:[%s16167_s1 + $0x264] ss:$16 sps:$4 sm:$0xff]   ;;  %v11687_v33 = vld [vmem:[%s16167_s1 + $0x260] ss:$16 sps:$4 sm:$0xff]  }
 0x5dd   :  { %v6491_v57 = vpop.f32.mrf.mxu1  ;;  %v11602_v55 = vld [vmem:[%s16167_s1 + $0x8c] ss:$16 sps:$4 sm:$0xff]   ;;  %v11695_v48 = vld [vmem:[%s16167_s1 + $0x284] ss:$16 sps:$4 sm:$0xff]   ;;  %v11600_v13 = vld [vmem:[%s16167_s1 + $0x88] ss:$16 sps:$4 sm:$0xff]  }
 0x5de   :  { %6757 = vst [vmem:[%s16169_s3 + $0x1d8] sm:$0xff] %v6693_v22  ;;  %v6630_v12 = vmul.f32 %v14493_v20, %v6490_v8  ;;  %v11693_v22 = vld [vmem:[%s16167_s1 + $0x280] ss:$16 sps:$4 sm:$0xff]   ;;  %v11701_v6 = vld [vmem:[%s16167_s1 + $0x2a4] ss:$16 sps:$4 sm:$0xff]  }
 0x5df   :  { %v6492_v56 = vpop.f32.mrf.mxu1  ;;  %v11606_v57 = vld [vmem:[%s16167_s1 + $0xa8] ss:$16 sps:$4 sm:$0xff]  }
 0x5e0   :  { %v6694_v9 = vadd.f32 %v6630_v12, %v6564_v18  ;;  %v6493_v32 = vadd.f32 %v6492_v56, %v14829_v28  ;;  %v11699_v12 = vld [vmem:[%s16167_s1 + $0x2a0] ss:$16 sps:$4 sm:$0xff]   ;;  %v11614_v18 = vld [vmem:[%s16167_s1 + $0xcc] ss:$16 sps:$4 sm:$0xff]   ;;  %v11707_v56 = vld [vmem:[%s16167_s1 + $0x2c4] ss:$16 sps:$4 sm:$0xff]  }
 0x5e1   :  { %v6494_v35 = vpop.f32.mrf.mxu1 }
 0x5e2   :  { %6758 = vst [vmem:[%s16169_s3 + $0x1e0] sm:$0xff] %v6694_v9  ;;  %v6631_v54 = vmul.f32 %v14493_v20, %v6493_v32  ;;  %v10736_v1 = vpack.c.bf16 %v6493_v32, %v6490_v8  ;;  %v11608_v8 = vld [vmem:[%s16167_s1 + $0xac] ss:$16 sps:$4 sm:$0xff]   ;;  %v11612_v9 = vld [vmem:[%s16167_s1 + $0xc8] ss:$16 sps:$4 sm:$0xff]  }
 0x5e3   :  { %v6497_v31 = vpop.f32.mrf.mxu1  ;;  %8219 = vmatmul.mubr.bf16.gmra.mxu0 %v11633_v11  ;;  %v11567_v23 = vld [vmem:[#allocation2 + $0xe8] sm:$0xff]   ;;  %v11705_v32 = vld [vmem:[%s16167_s1 + $0x2c0] ss:$16 sps:$4 sm:$0xff]   ;;  %v11713_v35 = vld [vmem:[%s16167_s1 + $0x2e4] ss:$16 sps:$4 sm:$0xff]  }
 0x5e4   :  { %v6695_v21 = vadd.f32 %v6631_v54, %v6565_v62  ;;  %10865 = vst [vmem:[#allocation2 + $0xf0] sm:$0xff] %v10736_v1   ;;  %v6498_v28 = vadd.f32 %v6497_v31, %v14839_v25  ;;  %8226 = vmatprep.mubr.bf16.mxu0 %v11641_v59  ;;  %v11620_v11 = vld [vmem:[%s16167_s1 + $0xec] ss:$16 sps:$4 sm:$0xff]   ;;  %v11618_v54 = vld [vmem:[%s16167_s1 + $0xe8] ss:$16 sps:$4 sm:$0xff]  }
 0x5e5   :  { %v6499_v50 = vpop.f32.mrf.mxu1  ;;  %v11711_v1 = vld [vmem:[%s16167_s1 + $0x2e0] ss:$16 sps:$4 sm:$0xff]   ;;  %v11626_v62 = vld [vmem:[%s16167_s1 + $0x10c] ss:$16 sps:$4 sm:$0xff]   ;;  %v11719_v31 = vld [vmem:[%s16167_s1 + $0x304] ss:$16 sps:$4 sm:$0xff]  }
 0x5e6   :  { %6759 = vst [vmem:[%s16169_s3 + $0x1e8] sm:$0xff] %v6695_v21  ;;  %v6632_v44 = vmul.f32 %v14493_v20, %v6498_v28  ;;  %v11624_v21 = vld [vmem:[%s16167_s1 + $0x108] ss:$16 sps:$4 sm:$0xff]   ;;  %v11632_v59 = vld [vmem:[%s16167_s1 + $0x12c] ss:$16 sps:$4 sm:$0xff]  }
 0x5e7   :  { %v6500_v53 = vpop.f32.mrf.mxu1  ;;  %v11725_v50 = vld [vmem:[%s16167_s1 + $0x324] ss:$16 sps:$4 sm:$0xff]  }
 0x5e8   :  { %v6696_v15 = vadd.f32 %v6632_v44, %v6566_v10  ;;  %v6501_v25 = vadd.f32 %v6500_v53, %v14849_v43  ;;  %v11647_v43 = vld [vmem:[%s16167_s1 + $0x184] ss:$16 sps:$4 sm:$0xff]   ;;  %v11630_v53 = vld [vmem:[%s16167_s1 + $0x128] ss:$16 sps:$4 sm:$0xff]  }
 0x5e9   :  { %v6502_v63 = vpop.f32.mrf.mxu1 }
 0x5ea   :  { %6760 = vst [vmem:[%s16169_s3 + $0x1f0] sm:$0xff] %v6696_v15  ;;  %v6633_v42 = vmul.f32 %v14493_v20, %v6501_v25  ;;  %v10741_v4 = vpack.c.bf16 %v6501_v25, %v6498_v28  ;;  %v11645_v20 = vld [vmem:[%s16167_s1 + $0x180] ss:$16 sps:$4 sm:$0xff]  }
 0x5eb   :  { %8227 = vmatmul.mubr.bf16.gmra.mxu0 %v11639_v19  ;;  %v11566_v24 = vld [vmem:[#allocation2 + $0xf0] sm:$0xff]   ;;  %v11638_v19 = vld [vmem:[%s16167_s1 + $0x14c] ss:$16 sps:$4 sm:$0xff]  }
 0x5ec   :  { %v6697_v39 = vadd.f32 %v6633_v42, %v6567_v36  ;;  %10866 = vst [vmem:[#allocation2 + $0xf8] sm:$0xff] %v10741_v4   ;;  %8234 = vmatprep.mubr.bf16.mxu0 %v11647_v43  ;;  %v11717_v28 = vld [vmem:[%s16167_s1 + $0x300] ss:$16 sps:$4 sm:$0xff]   ;;  %v11731_v42 = vld [vmem:[%s16167_s1 + $0x344] ss:$16 sps:$4 sm:$0xff]  }
 0x5ed   :  { %v11723_v25 = vld [vmem:[%s16167_s1 + $0x320] ss:$16 sps:$4 sm:$0xff]  }
 0x5ee   :  { %6761 = vst [vmem:[%s16169_s3 + $0x1f8] sm:$0xff] %v6697_v39  ;;  %v11636_v39 = vld [vmem:[%s16167_s1 + $0x148] ss:$16 sps:$4 sm:$0xff]  }
 0x5f3   :  { %v11565_v52 = vld [vmem:[#allocation2 + $0xf8] sm:$0xff]   ;;  %8235 = vmatmul.mubr.bf16.gmra.mxu0 %v11645_v20  ;;  %v11729_v20 = vld [vmem:[%s16167_s1 + $0x340] ss:$16 sps:$4 sm:$0xff]  }
 0x5f4   :  { %8412 = vmatpush2.bf16.msra.mxu1 %v11565_v52  ;;  %8242 = vmatprep.mubr.bf16.mxu0 %v11653_v37  ;;  %v11644_v52 = vld [vmem:[%s16167_s1 + $0x16c] ss:$16 sps:$4 sm:$0xff]  }
 0x5f5   :  { %8413 = vmatprep.subr.bf16.mxu1 %v11844_v3 }
 0x5f8   :  { %8414 = vmatpush2.bf16.msra.mxu1 %v11566_v24  ;;  %v11737_v24 = vld [vmem:[%s16167_s1 + $0x364] ss:$16 sps:$4 sm:$0xff]  }
 0x5f9   :  { %8415 = vmatprep.subr.bf16.mxu1 %v11844_v3 }
 0x5fb   :  { %8243 = vmatmul.mubr.bf16.gmra.mxu0 %v11651_v2 }
 0x5fc   :  { %8416 = vmatpush2.bf16.msra.mxu1 %v11567_v23  ;;  %8250 = vmatprep.mubr.bf16.mxu0 %v11659_v46  ;;  %v11642_v46 = vld [vmem:[%s16167_s1 + $0x168] ss:$16 sps:$4 sm:$0xff]  }
 0x5fd   :  { %8417 = vmatprep.subr.bf16.mxu1 %v11844_v3 }
 0x600   :  { %8418 = vmatpush2.bf16.msra.mxu1 %v11568_v16 }
 0x601   :  { %8419 = vmatprep.subr.bf16.mxu1 %v11844_v3 }
 0x603   :  { %8251 = vmatmul.mubr.bf16.gmra.mxu0 %v11657_v41  ;;  %v11735_v41 = vld [vmem:[%s16167_s1 + $0x360] ss:$16 sps:$4 sm:$0xff]  }
 0x604   :  { %8420 = vmatpush2.bf16.msra.mxu1 %v11569_v49  ;;  %8258 = vmatprep.mubr.bf16.mxu0 %v11665_v27  ;;  %v11650_v49 = vld [vmem:[%s16167_s1 + $0x18c] ss:$16 sps:$4 sm:$0xff]  }
 0x605   :  { %8421 = vmatprep.subr.bf16.mxu1 %v11844_v3 }
 0x608   :  { %8422 = vmatpush2.bf16.msra.mxu1 %v11570_v60  ;;  %v11743_v60 = vld [vmem:[%s16167_s1 + $0x384] ss:$16 sps:$4 sm:$0xff]  }
 0x609   :  { %8423 = vmatprep.subr.bf16.mxu1 %v11844_v3 }
 0x60b   :  { %8259 = vmatmul.mubr.bf16.gmra.mxu0 %v11663_v61 }
 0x60c   :  { %8424 = vmatpush2.bf16.msra.mxu1 %v11571_v45  ;;  %8266 = vmatprep.mubr.bf16.mxu0 %v11671_v58  ;;  %v11648_v58 = vld [vmem:[%s16167_s1 + $0x188] ss:$16 sps:$4 sm:$0xff]  }
 0x60d   :  { %8425 = vmatprep.subr.bf16.mxu1 %v11844_v3  ;;  %v11582_v3 = vld [vmem:[%s16167_s1 + $0x28] ss:$16 sps:$4 sm:$0xff]  }
 0x610   :  { %8426 = vmatpush2.bf16.msra.mxu1 %v11572_v29 }
 0x613   :  { %8428 = vmatmul.mubr.bf16.vlgmr.msra.gmra.mxu1 %v11576_v0  ;;  %8267 = vmatmul.mubr.bf16.gmra.mxu0 %v11669_v38  ;;  %v11741_v0 = vld [vmem:[%s16167_s1 + $0x380] ss:$16 sps:$4 sm:$0xff]   ;;  %v11656_v38 = vld [vmem:[%s16167_s1 + $0x1ac] ss:$16 sps:$4 sm:$0xff]  }
 0x614   :  { %8435 = vmatprep.mubr.bf16.mxu1 %v11584_v17  ;;  %8274 = vmatprep.mubr.bf16.mxu0 %v11677_v40  ;;  %v11749_v40 = vld [vmem:[%s16167_s1 + $0x3a4] ss:$16 sps:$4 sm:$0xff]  }
 0x61b   :  { %8436 = vmatmul.mubr.bf16.gmra.mxu1 %v11582_v3  ;;  %8275 = vmatmul.mubr.bf16.gmra.mxu0 %v11675_v26 }
 0x61c   :  { %8443 = vmatprep.mubr.bf16.mxu1 %v11590_v5  ;;  %8282 = vmatprep.mubr.bf16.mxu0 %v11683_v51  ;;  %v11654_v5 = vld [vmem:[%s16167_s1 + $0x1a8] ss:$16 sps:$4 sm:$0xff]  }
 0x623   :  { %8444 = vmatmul.mubr.bf16.gmra.mxu1 %v11588_v14  ;;  %8283 = vmatmul.mubr.bf16.gmra.mxu0 %v11681_v30  ;;  %v11747_v14 = vld [vmem:[%s16167_s1 + $0x3a0] ss:$16 sps:$4 sm:$0xff]   ;;  %v11662_v30 = vld [vmem:[%s16167_s1 + $0x1cc] ss:$16 sps:$4 sm:$0xff]  }
 0x624   :  { %8451 = vmatprep.mubr.bf16.mxu1 %v11596_v34  ;;  %8290 = vmatprep.mubr.bf16.mxu0 %v11689_v7  ;;  %v11755_v7 = vld [vmem:[%s16167_s1 + $0x3c4] ss:$16 sps:$4 sm:$0xff]  }
 0x62b   :  { %8452 = vmatmul.mubr.bf16.gmra.mxu1 %v11594_v47  ;;  %8291 = vmatmul.mubr.bf16.gmra.mxu0 %v11687_v33 }
 0x62c   :  { %8459 = vmatprep.mubr.bf16.mxu1 %v11602_v55  ;;  %8298 = vmatprep.mubr.bf16.mxu0 %v11695_v48  ;;  %v11660_v55 = vld [vmem:[%s16167_s1 + $0x1c8] ss:$16 sps:$4 sm:$0xff]  }
 0x633   :  { %8460 = vmatmul.mubr.bf16.gmra.mxu1 %v11600_v13  ;;  %8299 = vmatmul.mubr.bf16.gmra.mxu0 %v11693_v22  ;;  %v11753_v13 = vld [vmem:[%s16167_s1 + $0x3c0] ss:$16 sps:$4 sm:$0xff]   ;;  %v11668_v22 = vld [vmem:[%s16167_s1 + $0x1ec] ss:$16 sps:$4 sm:$0xff]  }
 0x634   :  { %8467 = vmatprep.mubr.bf16.mxu1 %v11608_v8  ;;  %8306 = vmatprep.mubr.bf16.mxu0 %v11701_v6  ;;  %v11761_v6 = vld [vmem:[%s16167_s1 + $0x3e4] ss:$16 sps:$4 sm:$0xff]  }
 0x63b   :  { %8468 = vmatmul.mubr.bf16.gmra.mxu1 %v11606_v57  ;;  %8307 = vmatmul.mubr.bf16.gmra.mxu0 %v11699_v12 }
 0x63c   :  { %8475 = vmatprep.mubr.bf16.mxu1 %v11614_v18  ;;  %8314 = vmatprep.mubr.bf16.mxu0 %v11707_v56  ;;  %v11666_v18 = vld [vmem:[%s16167_s1 + $0x1e8] ss:$16 sps:$4 sm:$0xff]  }
 0x643   :  { %8476 = vmatmul.mubr.bf16.gmra.mxu1 %v11612_v9  ;;  %8315 = vmatmul.mubr.bf16.gmra.mxu0 %v11705_v32  ;;  %v11759_v9 = vld [vmem:[%s16167_s1 + $0x3e0] ss:$16 sps:$4 sm:$0xff]   ;;  %v11674_v32 = vld [vmem:[%s16167_s1 + $0x20c] ss:$16 sps:$4 sm:$0xff]  }
 0x644   :  { %8483 = vmatprep.mubr.bf16.mxu1 %v11620_v11  ;;  %8322 = vmatprep.mubr.bf16.mxu0 %v11713_v35 }
 0x64b   :  { %8484 = vmatmul.mubr.bf16.gmra.mxu1 %v11618_v54  ;;  %8323 = vmatmul.mubr.bf16.gmra.mxu0 %v11711_v1  ;;  %v11672_v1 = vld [vmem:[%s16167_s1 + $0x208] ss:$16 sps:$4 sm:$0xff]  }
 0x64c   :  { %8491 = vmatprep.mubr.bf16.mxu1 %v11626_v62  ;;  %8330 = vmatprep.mubr.bf16.mxu0 %v11719_v31  ;;  %v11680_v31 = vld [vmem:[%s16167_s1 + $0x22c] ss:$16 sps:$4 sm:$0xff]  }
 0x653   :  { %8492 = vmatmul.mubr.bf16.gmra.mxu1 %v11624_v21  ;;  %v15350_v44 = vpop.f32.mrf.mxu0  ;;  %8331 = vmatmul.mubr.bf16.gmra.mxu0 %v11717_v28 }
 0x654   :  { %8499 = vmatprep.mubr.bf16.mxu1 %v11632_v59  ;;  %8338 = vmatprep.mubr.bf16.mxu0 %v11725_v50  ;;  %v11678_v50 = vld [vmem:[%s16167_s1 + $0x228] ss:$16 sps:$4 sm:$0xff]  }
 0x655   :  { %v8142_v10 = vpop.f32.mrf.mxu0 }
 0x657   :  { %v15355_v15 = vpop.f32.mrf.mxu0 }
 0x659   :  { %v8145_v63 = vpop.f32.mrf.mxu0 }
 0x65b   :  { %8500 = vmatmul.mubr.bf16.gmra.mxu1 %v11630_v53  ;;  %v15366_v4 = vpop.f32.mrf.mxu0  ;;  %8339 = vmatmul.mubr.bf16.gmra.mxu0 %v11723_v25  ;;  %v11686_v53 = vld [vmem:[%s16167_s1 + $0x24c] ss:$16 sps:$4 sm:$0xff]  }
 0x65c   :  { %8507 = vmatprep.mubr.bf16.mxu1 %v11638_v19  ;;  %8346 = vmatprep.mubr.bf16.mxu0 %v11731_v42  ;;  %v11684_v42 = vld [vmem:[%s16167_s1 + $0x248] ss:$16 sps:$4 sm:$0xff]  }
 0x65d   :  { %v8150_v36 = vpop.f32.mrf.mxu0 }
 0x65f   :  { %v15371_v43 = vpop.f32.mrf.mxu0 }
 0x661   :  { %v8153_v37 = vpop.f32.mrf.mxu0 }
 0x663   :  { %8508 = vmatmul.mubr.bf16.gmra.mxu1 %v11636_v39  ;;  %v15382_v2 = vpop.f32.mrf.mxu0  ;;  %8347 = vmatmul.mubr.bf16.gmra.mxu0 %v11729_v20  ;;  %v11692_v39 = vld [vmem:[%s16167_s1 + $0x26c] ss:$16 sps:$4 sm:$0xff]  }
 0x664   :  { %8515 = vmatprep.mubr.bf16.mxu1 %v11644_v52  ;;  %8354 = vmatprep.mubr.bf16.mxu0 %v11737_v24  ;;  %v11690_v24 = vld [vmem:[%s16167_s1 + $0x268] ss:$16 sps:$4 sm:$0xff]  }
 0x665   :  { %v8158_v23 = vpop.f32.mrf.mxu0 }
 0x667   :  { %v15387_v16 = vpop.f32.mrf.mxu0 }
 0x669   :  { %v8161_v27 = vpop.f32.mrf.mxu0 }
 0x66b   :  { %8516 = vmatmul.mubr.bf16.gmra.mxu1 %v11642_v46  ;;  %v15398_v61 = vpop.f32.mrf.mxu0  ;;  %8355 = vmatmul.mubr.bf16.gmra.mxu0 %v11735_v41  ;;  %v11698_v46 = vld [vmem:[%s16167_s1 + $0x28c] ss:$16 sps:$4 sm:$0xff]  }
 0x66c   :  { %8523 = vmatprep.mubr.bf16.mxu1 %v11650_v49  ;;  %8362 = vmatprep.mubr.bf16.mxu0 %v11743_v60  ;;  %v11696_v60 = vld [vmem:[%s16167_s1 + $0x288] ss:$16 sps:$4 sm:$0xff]  }
 0x66d   :  { %v8166_v45 = vpop.f32.mrf.mxu0 }
 0x66f   :  { %v15403_v29 = vpop.f32.mrf.mxu0 }
 0x671   :  { %v8169_v17 = vpop.f32.mrf.mxu0 }
 0x673   :  { %8524 = vmatmul.mubr.bf16.gmra.mxu1 %v11648_v58  ;;  %v15414_v3 = vpop.f32.mrf.mxu0  ;;  %8363 = vmatmul.mubr.bf16.gmra.mxu0 %v11741_v0  ;;  %v11704_v58 = vld [vmem:[%s16167_s1 + $0x2ac] ss:$16 sps:$4 sm:$0xff]  }
 0x674   :  { %8531 = vmatprep.mubr.bf16.mxu1 %v11656_v38  ;;  %8370 = vmatprep.mubr.bf16.mxu0 %v11749_v40  ;;  %v11702_v40 = vld [vmem:[%s16167_s1 + $0x2a8] ss:$16 sps:$4 sm:$0xff]  }
 0x675   :  { %v8174_v26 = vpop.f32.mrf.mxu0 }
 0x677   :  { %v15419_v51 = vpop.f32.mrf.mxu0 }
 0x679   :  { %v8177_v34 = vpop.f32.mrf.mxu0 }
 0x67b   :  { %8532 = vmatmul.mubr.bf16.gmra.mxu1 %v11654_v5  ;;  %v15430_v47 = vpop.f32.mrf.mxu0  ;;  %8371 = vmatmul.mubr.bf16.gmra.mxu0 %v11747_v14  ;;  %v11710_v5 = vld [vmem:[%s16167_s1 + $0x2cc] ss:$16 sps:$4 sm:$0xff]  }
 0x67c   :  { %8539 = vmatprep.mubr.bf16.mxu1 %v11662_v30  ;;  %8378 = vmatprep.mubr.bf16.mxu0 %v11755_v7  ;;  %v11708_v7 = vld [vmem:[%s16167_s1 + $0x2c8] ss:$16 sps:$4 sm:$0xff]  }
 0x67d   :  { %v8182_v33 = vpop.f32.mrf.mxu0 }
 0x67f   :  { %v15435_v48 = vpop.f32.mrf.mxu0 }
 0x681   :  { %v8185_v8 = vpop.f32.mrf.mxu0 }
 0x683   :  { %8540 = vmatmul.mubr.bf16.gmra.mxu1 %v11660_v55  ;;  %v15446_v57 = vpop.f32.mrf.mxu0  ;;  %8379 = vmatmul.mubr.bf16.gmra.mxu0 %v11753_v13  ;;  %v11716_v55 = vld [vmem:[%s16167_s1 + $0x2ec] ss:$16 sps:$4 sm:$0xff]  }
 0x684   :  { %8547 = vmatprep.mubr.bf16.mxu1 %v11668_v22  ;;  %8386 = vmatprep.mubr.bf16.mxu0 %v11761_v6  ;;  %v11714_v6 = vld [vmem:[%s16167_s1 + $0x2e8] ss:$16 sps:$4 sm:$0xff]  }
 0x685   :  { %v8190_v12 = vpop.f32.mrf.mxu0 }
 0x687   :  { %v15451_v56 = vpop.f32.mrf.mxu0 }
 0x689   :  { %v8193_v11 = vpop.f32.mrf.mxu0 }
 0x68b   :  { %8548 = vmatmul.mubr.bf16.gmra.mxu1 %v11666_v18  ;;  %v15459_v35 = vpop.f32.mrf.mxu0  ;;  %8387 = vmatmul.mubr.bf16.gmra.mxu0 %v11759_v9  ;;  %v11722_v18 = vld [vmem:[%s16167_s1 + $0x30c] ss:$16 sps:$4 sm:$0xff]  }
 0x68c   :  { %8555 = vmatprep.mubr.bf16.mxu1 %v11674_v32 }
 0x68d   :  { %v8198_v54 = vpop.f32.mrf.mxu0 }
 0x68e   :  { %v11720_v54 = vld [vmem:[%s16167_s1 + $0x308] ss:$16 sps:$4 sm:$0xff]  }
 0x68f   :  { %v15464_v62 = vpop.f32.mrf.mxu0 }
 0x691   :  { %v8201_v21 = vpop.f32.mrf.mxu0 }
 0x693   :  { %8556 = vmatmul.mubr.bf16.gmra.mxu1 %v11672_v1  ;;  %v15469_v28 = vpop.f32.mrf.mxu0 }
 0x694   :  { %8563 = vmatprep.mubr.bf16.mxu1 %v11680_v31  ;;  %v11728_v31 = vld [vmem:[%s16167_s1 + $0x32c] ss:$16 sps:$4 sm:$0xff]  }
 0x695   :  { %v8206_v59 = vpop.f32.mrf.mxu0 }
 0x697   :  { %v15474_v10 = vpop.f32.mrf.mxu0 }
 0x699   :  { %v8209_v25 = vpop.f32.mrf.mxu0 }
 0x69b   :  { %8564 = vmatmul.mubr.bf16.gmra.mxu1 %v11678_v50  ;;  %v15479_v19 = vpop.f32.mrf.mxu0  ;;  %v15549_v50 = vstv %s9846_s0 }
 0x69c   :  { %8571 = vmatprep.mubr.bf16.mxu1 %v11686_v53 }
 0x69d   :  { %v8214_v63 = vpop.f32.mrf.mxu0 }
 0x69f   :  { %v15484_v36 = vpop.f32.mrf.mxu0 }
 0x6a1   :  { %v8217_v20 = vpop.f32.mrf.mxu0 }
 0x6a2   :  { %v8684_v20 = vld [vmem:[%s16169_s3] sm:$0xff] }
 0x6a3   :  { %8572 = vmatmul.mubr.bf16.gmra.mxu1 %v11684_v42  ;;  %v15489_v52 = vpop.f32.mrf.mxu0 }
 0x6a4   :  { %8579 = vmatprep.mubr.bf16.mxu1 %v11692_v39 }
 0x6a5   :  { %v8222_v37 = vpop.f32.mrf.mxu0 }
 0x6a7   :  { %v15494_v23 = vpop.f32.mrf.mxu0 }
 0x6a9   :  { %v8225_v41 = vpop.f32.mrf.mxu0 }
 0x6ab   :  { %8580 = vmatmul.mubr.bf16.gmra.mxu1 %v11690_v24  ;;  %v15499_v49 = vpop.f32.mrf.mxu0  ;;  %v11726_v24 = vld [vmem:[%s16167_s1 + $0x328] ss:$16 sps:$4 sm:$0xff]  }
 0x6ac   :  { %8587 = vmatprep.mubr.bf16.mxu1 %v11698_v46 }
 0x6ad   :  { %v8230_v27 = vpop.f32.mrf.mxu0 }
 0x6af   :  { %v15504_v45 = vpop.f32.mrf.mxu0 }
 0x6b1   :  { %v8233_v0 = vpop.f32.mrf.mxu0 }
 0x6b3   :  { %8588 = vmatmul.mubr.bf16.gmra.mxu1 %v11696_v60  ;;  %v15509_v38 = vpop.f32.mrf.mxu0 }
 0x6b4   :  { %8595 = vmatprep.mubr.bf16.mxu1 %v11704_v58 }
 0x6b5   :  { %v8238_v17 = vpop.f32.mrf.mxu0 }
 0x6b6   :  { %v8685_v17 = vld [vmem:[%s16169_s3 + $0x8] sm:$0xff] }
 0x6b7   :  { %v15514_v26 = vpop.f32.mrf.mxu0 }
 0x6b9   :  { %v8241_v14 = vpop.f32.mrf.mxu0 }
 0x6bb   :  { %8596 = vmatmul.mubr.bf16.gmra.mxu1 %v11702_v40  ;;  %v15519_v30 = vpop.f32.mrf.mxu0 }
 0x6bc   :  { %8603 = vmatprep.mubr.bf16.mxu1 %v11710_v5 }
 0x6bd   :  { %v8246_v34 = vpop.f32.mrf.mxu0 }
 0x6bf   :  { %v15524_v33 = vpop.f32.mrf.mxu0 }
 0x6c1   :  { %v8249_v13 = vpop.f32.mrf.mxu0 }
 0x6c2   :  { %v8686_v13 = vld [vmem:[%s16169_s3 + $0x10] sm:$0xff] }
 0x6c3   :  { %8604 = vmatmul.mubr.bf16.gmra.mxu1 %v11708_v7  ;;  %v15529_v22 = vpop.f32.mrf.mxu0 }
 0x6c4   :  { %8611 = vmatprep.mubr.bf16.mxu1 %v11716_v55 }
 0x6c5   :  { %v8254_v8 = vpop.f32.mrf.mxu0 }
 0x6c7   :  { %v15534_v12 = vpop.f32.mrf.mxu0 }
 0x6c9   :  { %v8257_v9 = vpop.f32.mrf.mxu0 }
 0x6cb   :  { %8612 = vmatmul.mubr.bf16.gmra.mxu1 %v11714_v6  ;;  %v15539_v32 = vpop.f32.mrf.mxu0  ;;  %v11732_v6 = vld [vmem:[%s16167_s1 + $0x348] ss:$16 sps:$4 sm:$0xff]  }
 0x6cc   :  { %8619 = vmatprep.mubr.bf16.mxu1 %v11722_v18 }
 0x6cd   :  { %v8262_v11 = vpop.f32.mrf.mxu0 }
 0x6ce   :  { %v11740_v11 = vld [vmem:[%s16167_s1 + $0x36c] ss:$16 sps:$4 sm:$0xff]  }
 0x6cf   :  { %v15544_v1 = vpop.f32.mrf.mxu0 }
 0x6d1   :  { %v8265_v21 = vpop.f32.mrf.mxu0 }
 0x6d3   :  { %v8429_v59 = vpop.f32.mrf.mxu1  ;;  %8620 = vmatmul.mubr.bf16.gmra.mxu1 %v11720_v54  ;;  %v15551_v53 = vpop.f32.mrf.mxu0 }
 0x6d4   :  { %v8430_v25 = vadd.f32 %v8429_v59, %v15350_v44  ;;  %8627 = vmatprep.mubr.bf16.mxu1 %v11728_v31  ;;  %v11734_v44 = vld [vmem:[%s16167_s1 + $0x34c] ss:$16 sps:$4 sm:$0xff]  }
 0x6d5   :  { %v8431_v63 = vpop.f32.mrf.mxu1  ;;  %v8270_v42 = vpop.f32.mrf.mxu0  ;;  %v8687_v59 = vld [vmem:[%s16169_s3 + $0x18] sm:$0xff] }
 0x6d6   :  { %v8750_v39 = vmul.f32 %v15549_v50, %v8430_v25 }
 0x6d7   :  { %v8432_v37 = vpop.f32.mrf.mxu1  ;;  %v15561_v46 = vpop.f32.mrf.mxu0 }
 0x6d8   :  { %v8814_v41 = vadd.f32 %v8750_v39, %v8684_v20  ;;  %v8433_v27 = vadd.f32 %v8432_v37, %v15355_v15 }
 0x6d9   :  { %v8434_v60 = vpop.f32.mrf.mxu1  ;;  %v8273_v58 = vpop.f32.mrf.mxu0 }
 0x6da   :  { %8878 = vst [vmem:[%s16169_s3] sm:$0xff] %v8814_v41  ;;  %v8751_v0 = vmul.f32 %v15549_v50, %v8433_v27  ;;  %v11738_v27 = vld [vmem:[%s16167_s1 + $0x368] ss:$16 sps:$4 sm:$0xff]   ;;  %v11746_v58 = vld [vmem:[%s16167_s1 + $0x38c] ss:$16 sps:$4 sm:$0xff]  }
 0x6db   :  { %v8437_v40 = vpop.f32.mrf.mxu1  ;;  %8628 = vmatmul.mubr.bf16.gmra.mxu1 %v11726_v24  ;;  %v15574_v5 = vpop.f32.mrf.mxu0  ;;  %v8688_v24 = vld [vmem:[%s16169_s3 + $0x20] sm:$0xff] }
 0x6dc   :  { %v8815_v15 = vadd.f32 %v8751_v0, %v8685_v17  ;;  %v8438_v14 = vadd.f32 %v8437_v40, %v15366_v4  ;;  %8635 = vmatprep.mubr.bf16.mxu1 %v11734_v44 }
 0x6dd   :  { %v8439_v34 = vpop.f32.mrf.mxu1  ;;  %v8278_v7 = vpop.f32.mrf.mxu0 }
 0x6de   :  { %8879 = vst [vmem:[%s16169_s3 + $0x8] sm:$0xff] %v8815_v15  ;;  %v8752_v55 = vmul.f32 %v15549_v50, %v8438_v14  ;;  %v8689_v15 = vld [vmem:[%s16169_s3 + $0x28] sm:$0xff] }
 0x6df   :  { %v8440_v8 = vpop.f32.mrf.mxu1  ;;  %v15587_v18 = vpop.f32.mrf.mxu0 }
 0x6e0   :  { %v8816_v4 = vadd.f32 %v8752_v55, %v8686_v13  ;;  %v8441_v9 = vadd.f32 %v8440_v8, %v15371_v43 }
 0x6e1   :  { %v8442_v54 = vpop.f32.mrf.mxu1  ;;  %v8281_v31 = vpop.f32.mrf.mxu0 }
 0x6e2   :  { %8880 = vst [vmem:[%s16169_s3 + $0x10] sm:$0xff] %v8816_v4  ;;  %v8753_v21 = vmul.f32 %v15549_v50, %v8441_v9  ;;  %v11744_v9 = vld [vmem:[%s16167_s1 + $0x388] ss:$16 sps:$4 sm:$0xff]   ;;  %v11752_v31 = vld [vmem:[%s16167_s1 + $0x3ac] ss:$16 sps:$4 sm:$0xff]  }
 0x6e3   :  { %v8445_v25 = vpop.f32.mrf.mxu1  ;;  %8636 = vmatmul.mubr.bf16.gmra.mxu1 %v11732_v6  ;;  %v15600_v63 = vpop.f32.mrf.mxu0  ;;  %v8690_v6 = vld [vmem:[%s16169_s3 + $0x30] sm:$0xff] }
 0x6e4   :  { %v8817_v43 = vadd.f32 %v8753_v21, %v8687_v59  ;;  %v8446_v42 = vadd.f32 %v8445_v25, %v15382_v2  ;;  %8643 = vmatprep.mubr.bf16.mxu1 %v11740_v11 }
 0x6e5   :  { %v8447_v39 = vpop.f32.mrf.mxu1  ;;  %v8286_v20 = vpop.f32.mrf.mxu0 }
 0x6e6   :  { %8881 = vst [vmem:[%s16169_s3 + $0x18] sm:$0xff] %v8817_v43  ;;  %v8754_v37 = vmul.f32 %v15549_v50, %v8446_v42  ;;  %v8691_v43 = vld [vmem:[%s16169_s3 + $0x38] sm:$0xff] }
 0x6e7   :  { %v8448_v41 = vpop.f32.mrf.mxu1  ;;  %v15613_v44 = vpop.f32.mrf.mxu0 }
 0x6e8   :  { %v8818_v2 = vadd.f32 %v8754_v37, %v8688_v24  ;;  %v8449_v60 = vadd.f32 %v8448_v41, %v15387_v16 }
 0x6e9   :  { %v8450_v0 = vpop.f32.mrf.mxu1  ;;  %v8289_v17 = vpop.f32.mrf.mxu0 }
 0x6ea   :  { %8882 = vst [vmem:[%s16169_s3 + $0x20] sm:$0xff] %v8818_v2  ;;  %v8755_v40 = vmul.f32 %v15549_v50, %v8449_v60  ;;  %v11750_v60 = vld [vmem:[%s16167_s1 + $0x3a8] ss:$16 sps:$4 sm:$0xff]   ;;  %v11758_v17 = vld [vmem:[%s16167_s1 + $0x3cc] ss:$16 sps:$4 sm:$0xff]  }
 0x6eb   :  { %v8453_v14 = vpop.f32.mrf.mxu1  ;;  %8644 = vmatmul.mubr.bf16.gmra.mxu1 %v11738_v27  ;;  %v15626_v34 = vpop.f32.mrf.mxu0  ;;  %v8692_v27 = vld [vmem:[%s16169_s3 + $0x40] sm:$0xff] }
 0x6ec   :  { %v8819_v16 = vadd.f32 %v8755_v40, %v8689_v15  ;;  %v8454_v7 = vadd.f32 %v8453_v14, %v15398_v61  ;;  %8651 = vmatprep.mubr.bf16.mxu1 %v11746_v58 }
 0x6ed   :  { %v8455_v55 = vpop.f32.mrf.mxu1  ;;  %v8294_v13 = vpop.f32.mrf.mxu0 }
 0x6ee   :  { %8883 = vst [vmem:[%s16169_s3 + $0x28] sm:$0xff] %v8819_v16  ;;  %v8756_v8 = vmul.f32 %v15549_v50, %v8454_v7  ;;  %v8693_v16 = vld [vmem:[%s16169_s3 + $0x48] sm:$0xff] }
 0x6ef   :  { %v8456_v4 = vpop.f32.mrf.mxu1  ;;  %v15639_v11 = vpop.f32.mrf.mxu0 }
 0x6f0   :  { %v8820_v61 = vadd.f32 %v8756_v8, %v8690_v6  ;;  %v8457_v54 = vadd.f32 %v8456_v4, %v15403_v29 }
 0x6f1   :  { %v8458_v21 = vpop.f32.mrf.mxu1  ;;  %v8297_v59 = vpop.f32.mrf.mxu0 }
 0x6f2   :  { %8884 = vst [vmem:[%s16169_s3 + $0x30] sm:$0xff] %v8820_v61  ;;  %v8757_v25 = vmul.f32 %v15549_v50, %v8457_v54  ;;  %v11756_v54 = vld [vmem:[%s16167_s1 + $0x3c8] ss:$16 sps:$4 sm:$0xff]   ;;  %v11764_v59 = vld [vmem:[%s16167_s1 + $0x3ec] ss:$16 sps:$4 sm:$0xff]  }
 0x6f3   :  { %v8461_v42 = vpop.f32.mrf.mxu1  ;;  %8652 = vmatmul.mubr.bf16.gmra.mxu1 %v11744_v9  ;;  %v15652_v39 = vpop.f32.mrf.mxu0  ;;  %v8694_v9 = vld [vmem:[%s16169_s3 + $0x50] sm:$0xff] }
 0x6f4   :  { %v8821_v29 = vadd.f32 %v8757_v25, %v8691_v43  ;;  %v8462_v20 = vadd.f32 %v8461_v42, %v15414_v3  ;;  %8659 = vmatprep.mubr.bf16.mxu1 %v11752_v31 }
 0x6f5   :  { %v8463_v37 = vpop.f32.mrf.mxu1  ;;  %v8302_v24 = vpop.f32.mrf.mxu0 }
 0x6f6   :  { %8885 = vst [vmem:[%s16169_s3 + $0x38] sm:$0xff] %v8821_v29  ;;  %v8758_v41 = vmul.f32 %v15549_v50, %v8462_v20  ;;  %v8695_v29 = vld [vmem:[%s16169_s3 + $0x58] sm:$0xff] }
 0x6f7   :  { %v8464_v2 = vpop.f32.mrf.mxu1  ;;  %v15665_v58 = vpop.f32.mrf.mxu0 }
 0x6f8   :  { %v8822_v3 = vadd.f32 %v8758_v41, %v8692_v27  ;;  %v8465_v0 = vadd.f32 %v8464_v2, %v15419_v51 }
 0x6f9   :  { %v8466_v40 = vpop.f32.mrf.mxu1  ;;  %v8305_v15 = vpop.f32.mrf.mxu0 }
 0x6fa   :  { %8886 = vst [vmem:[%s16169_s3 + $0x40] sm:$0xff] %v8822_v3  ;;  %v8759_v14 = vmul.f32 %v15549_v50, %v8465_v0  ;;  %v11762_v0 = vld [vmem:[%s16167_s1 + $0x3e8] ss:$16 sps:$4 sm:$0xff]  }
 0x6fb   :  { %v8469_v7 = vpop.f32.mrf.mxu1  ;;  %8660 = vmatmul.mubr.bf16.gmra.mxu1 %v11750_v60  ;;  %v15678_v55 = vpop.f32.mrf.mxu0  ;;  %v8696_v60 = vld [vmem:[%s16169_s3 + $0x60] sm:$0xff] }
 0x6fc   :  { %v8823_v51 = vadd.f32 %v8759_v14, %v8693_v16  ;;  %v8470_v13 = vadd.f32 %v8469_v7, %v15430_v47  ;;  %8667 = vmatprep.mubr.bf16.mxu1 %v11758_v17  ;;  %v8697_v7 = vld [vmem:[%s16169_s3 + $0x68] sm:$0xff] }
 0x6fd   :  { %v8471_v8 = vpop.f32.mrf.mxu1  ;;  %v8310_v6 = vpop.f32.mrf.mxu0 }
 0x6fe   :  { %8887 = vst [vmem:[%s16169_s3 + $0x48] sm:$0xff] %v8823_v51  ;;  %v8760_v4 = vmul.f32 %v15549_v50, %v8470_v13 }
 0x6ff   :  { %v8472_v61 = vpop.f32.mrf.mxu1  ;;  %v15691_v31 = vpop.f32.mrf.mxu0 }
 0x700   :  { %v8824_v47 = vadd.f32 %v8760_v4, %v8694_v9  ;;  %v8473_v21 = vadd.f32 %v8472_v61, %v15435_v48  ;;  %v8698_v61 = vld [vmem:[%s16169_s3 + $0x70] sm:$0xff] }
 0x701   :  { %v8474_v25 = vpop.f32.mrf.mxu1  ;;  %v8313_v43 = vpop.f32.mrf.mxu0 }
 0x702   :  { %8888 = vst [vmem:[%s16169_s3 + $0x50] sm:$0xff] %v8824_v47  ;;  %v8761_v42 = vmul.f32 %v15549_v50, %v8473_v21 }
 0x703   :  { %v8477_v20 = vpop.f32.mrf.mxu1  ;;  %8668 = vmatmul.mubr.bf16.gmra.mxu1 %v11756_v54  ;;  %v15704_v37 = vpop.f32.mrf.mxu0 }
 0x704   :  { %v8825_v48 = vadd.f32 %v8761_v42, %v8695_v29  ;;  %v8478_v24 = vadd.f32 %v8477_v20, %v15446_v57  ;;  %8675 = vmatprep.mubr.bf16.mxu1 %v11764_v59  ;;  %v8699_v42 = vld [vmem:[%s16169_s3 + $0x78] sm:$0xff] }
 0x705   :  { %v8479_v41 = vpop.f32.mrf.mxu1  ;;  %v8318_v27 = vpop.f32.mrf.mxu0 }
 0x706   :  { %8889 = vst [vmem:[%s16169_s3 + $0x58] sm:$0xff] %v8825_v48  ;;  %v8762_v2 = vmul.f32 %v15549_v50, %v8478_v24 }
 0x707   :  { %v8480_v3 = vpop.f32.mrf.mxu1  ;;  %v15717_v17 = vpop.f32.mrf.mxu0 }
 0x708   :  { %v8826_v57 = vadd.f32 %v8762_v2, %v8696_v60  ;;  %v8481_v40 = vadd.f32 %v8480_v3, %v15451_v56  ;;  %v8700_v2 = vld [vmem:[%s16169_s3 + $0x80] sm:$0xff] }
 0x709   :  { %v8482_v15 = vpop.f32.mrf.mxu1  ;;  %v8321_v14 = vpop.f32.mrf.mxu0 }
 0x70a   :  { %8890 = vst [vmem:[%s16169_s3 + $0x60] sm:$0xff] %v8826_v57  ;;  %v8763_v16 = vmul.f32 %v15549_v50, %v8481_v40  ;;  %v8701_v14 = vld [vmem:[%s16169_s3 + $0x88] sm:$0xff] }
 0x70b   :  { %v8485_v51 = vpop.f32.mrf.mxu1  ;;  %8676 = vmatmul.mubr.bf16.gmra.mxu1 %v11762_v0  ;;  %v15727_v13 = vpop.f32.mrf.mxu0 }
 0x70c   :  { %v8827_v8 = vadd.f32 %v8763_v16, %v8697_v7  ;;  %v8486_v6 = vadd.f32 %v8485_v51, %v15459_v35 }
 0x70d   :  { %v8487_v56 = vpop.f32.mrf.mxu1  ;;  %v8326_v4 = vpop.f32.mrf.mxu0 }
 0x70e   :  { %8891 = vst [vmem:[%s16169_s3 + $0x68] sm:$0xff] %v8827_v8  ;;  %v8764_v9 = vmul.f32 %v15549_v50, %v8486_v6  ;;  %v8702_v4 = vld [vmem:[%s16169_s3 + $0x90] sm:$0xff] }
 0x70f   :  { %v8488_v54 = vpop.f32.mrf.mxu1  ;;  %v15737_v47 = vpop.f32.mrf.mxu0 }
 0x710   :  { %v8828_v21 = vadd.f32 %v8764_v9, %v8698_v61  ;;  %v8489_v59 = vadd.f32 %v8488_v54, %v15464_v62 }
 0x711   :  { %v8490_v25 = vpop.f32.mrf.mxu1  ;;  %v8329_v35 = vpop.f32.mrf.mxu0 }
 0x712   :  { %8892 = vst [vmem:[%s16169_s3 + $0x70] sm:$0xff] %v8828_v21  ;;  %v8765_v43 = vmul.f32 %v15549_v50, %v8489_v59  ;;  %v8703_v35 = vld [vmem:[%s16169_s3 + $0x98] sm:$0xff] }
 0x713   :  { %v8493_v29 = vpop.f32.mrf.mxu1  ;;  %v15747_v20 = vpop.f32.mrf.mxu0 }
 0x714   :  { %v8829_v48 = vadd.f32 %v8765_v43, %v8699_v42  ;;  %v8494_v24 = vadd.f32 %v8493_v29, %v15469_v28 }
 0x715   :  { %v8495_v41 = vpop.f32.mrf.mxu1  ;;  %v8334_v62 = vpop.f32.mrf.mxu0 }
 0x716   :  { %8893 = vst [vmem:[%s16169_s3 + $0x78] sm:$0xff] %v8829_v48  ;;  %v8766_v27 = vmul.f32 %v15549_v50, %v8494_v24  ;;  %v8704_v62 = vld [vmem:[%s16169_s3 + $0xa0] sm:$0xff] }
 0x717   :  { %v8496_v60 = vpop.f32.mrf.mxu1  ;;  %v15757_v3 = vpop.f32.mrf.mxu0 }
 0x718   :  { %v8830_v0 = vadd.f32 %v8766_v27, %v8700_v2  ;;  %v8497_v57 = vadd.f32 %v8496_v60, %v15474_v10 }
 0x719   :  { %v8498_v40 = vpop.f32.mrf.mxu1  ;;  %v8337_v28 = vpop.f32.mrf.mxu0 }
 0x71a   :  { %8894 = vst [vmem:[%s16169_s3 + $0x80] sm:$0xff] %v8830_v0  ;;  %v8767_v15 = vmul.f32 %v15549_v50, %v8497_v57  ;;  %v8705_v28 = vld [vmem:[%s16169_s3 + $0xa8] sm:$0xff] }
 0x71b   :  { %v8501_v16 = vpop.f32.mrf.mxu1  ;;  %v15767_v7 = vpop.f32.mrf.mxu0 }
 0x71c   :  { %v8831_v51 = vadd.f32 %v8767_v15, %v8701_v14  ;;  %v8502_v8 = vadd.f32 %v8501_v16, %v15479_v19 }
 0x71d   :  { %v8503_v6 = vpop.f32.mrf.mxu1  ;;  %v8342_v10 = vpop.f32.mrf.mxu0 }
 0x71e   :  { %8895 = vst [vmem:[%s16169_s3 + $0x88] sm:$0xff] %v8831_v51  ;;  %v8768_v56 = vmul.f32 %v15549_v50, %v8502_v8  ;;  %v8706_v10 = vld [vmem:[%s16169_s3 + $0xb0] sm:$0xff] }
 0x71f   :  { %v8504_v9 = vpop.f32.mrf.mxu1  ;;  %v15777_v61 = vpop.f32.mrf.mxu0 }
 0x720   :  { %v8832_v54 = vadd.f32 %v8768_v56, %v8702_v4  ;;  %v8505_v21 = vadd.f32 %v8504_v9, %v15484_v36 }
 0x721   :  { %v8506_v59 = vpop.f32.mrf.mxu1  ;;  %v8345_v19 = vpop.f32.mrf.mxu0 }
 0x722   :  { %8896 = vst [vmem:[%s16169_s3 + $0x90] sm:$0xff] %v8832_v54  ;;  %v8769_v25 = vmul.f32 %v15549_v50, %v8505_v21  ;;  %v8707_v19 = vld [vmem:[%s16169_s3 + $0xb8] sm:$0xff] }
 0x723   :  { %v8509_v43 = vpop.f32.mrf.mxu1  ;;  %v15787_v42 = vpop.f32.mrf.mxu0 }
 0x724   :  { %v8833_v29 = vadd.f32 %v8769_v25, %v8703_v35  ;;  %v8510_v48 = vadd.f32 %v8509_v43, %v15489_v52 }
 0x725   :  { %v8511_v24 = vpop.f32.mrf.mxu1  ;;  %v8350_v36 = vpop.f32.mrf.mxu0 }
 0x726   :  { %8897 = vst [vmem:[%s16169_s3 + $0x98] sm:$0xff] %v8833_v29  ;;  %v8770_v41 = vmul.f32 %v15549_v50, %v8510_v48  ;;  %v8708_v36 = vld [vmem:[%s16169_s3 + $0xc0] sm:$0xff] }
 0x727   :  { %v8512_v27 = vpop.f32.mrf.mxu1  ;;  %v15797_v2 = vpop.f32.mrf.mxu0 }
 0x728   :  { %v8834_v60 = vadd.f32 %v8770_v41, %v8704_v62  ;;  %v8513_v0 = vadd.f32 %v8512_v27, %v15494_v23 }
 0x729   :  { %v8514_v57 = vpop.f32.mrf.mxu1  ;;  %v8353_v52 = vpop.f32.mrf.mxu0 }
 0x72a   :  { %8898 = vst [vmem:[%s16169_s3 + $0xa0] sm:$0xff] %v8834_v60  ;;  %v8771_v40 = vmul.f32 %v15549_v50, %v8513_v0  ;;  %v8709_v52 = vld [vmem:[%s16169_s3 + $0xc8] sm:$0xff] }
 0x72b   :  { %v8517_v15 = vpop.f32.mrf.mxu1  ;;  %v15807_v14 = vpop.f32.mrf.mxu0 }
 0x72c   :  { %v8835_v16 = vadd.f32 %v8771_v40, %v8705_v28  ;;  %v8518_v51 = vadd.f32 %v8517_v15, %v15499_v49 }
 0x72d   :  { %v8519_v8 = vpop.f32.mrf.mxu1  ;;  %v8358_v23 = vpop.f32.mrf.mxu0 }
 0x72e   :  { %8899 = vst [vmem:[%s16169_s3 + $0xa8] sm:$0xff] %v8835_v16  ;;  %v8772_v6 = vmul.f32 %v15549_v50, %v8518_v51  ;;  %v8710_v23 = vld [vmem:[%s16169_s3 + $0xd0] sm:$0xff] }
 0x72f   :  { %v8520_v56 = vpop.f32.mrf.mxu1  ;;  %v15817_v4 = vpop.f32.mrf.mxu0 }
 0x730   :  { %v8836_v9 = vadd.f32 %v8772_v6, %v8706_v10  ;;  %v8521_v54 = vadd.f32 %v8520_v56, %v15504_v45 }
 0x731   :  { %v8522_v21 = vpop.f32.mrf.mxu1  ;;  %v8361_v49 = vpop.f32.mrf.mxu0 }
 0x732   :  { %8900 = vst [vmem:[%s16169_s3 + $0xb0] sm:$0xff] %v8836_v9  ;;  %v8773_v59 = vmul.f32 %v15549_v50, %v8521_v54  ;;  %v8711_v49 = vld [vmem:[%s16169_s3 + $0xd8] sm:$0xff] }
 0x733   :  { %v8525_v25 = vpop.f32.mrf.mxu1  ;;  %v15827_v35 = vpop.f32.mrf.mxu0 }
 0x734   :  { %v8837_v43 = vadd.f32 %v8773_v59, %v8707_v19  ;;  %v8526_v29 = vadd.f32 %v8525_v25, %v15509_v38 }
 0x735   :  { %v8527_v48 = vpop.f32.mrf.mxu1  ;;  %v8366_v45 = vpop.f32.mrf.mxu0 }
 0x736   :  { %8901 = vst [vmem:[%s16169_s3 + $0xb8] sm:$0xff] %v8837_v43  ;;  %v8774_v24 = vmul.f32 %v15549_v50, %v8526_v29  ;;  %v8712_v45 = vld [vmem:[%s16169_s3 + $0xe0] sm:$0xff] }
 0x737   :  { %v8528_v41 = vpop.f32.mrf.mxu1  ;;  %v15837_v62 = vpop.f32.mrf.mxu0 }
 0x738   :  { %v8838_v27 = vadd.f32 %v8774_v24, %v8708_v36  ;;  %v8529_v60 = vadd.f32 %v8528_v41, %v15514_v26 }
 0x739   :  { %v8530_v0 = vpop.f32.mrf.mxu1  ;;  %v8369_v38 = vpop.f32.mrf.mxu0 }
 0x73a   :  { %8902 = vst [vmem:[%s16169_s3 + $0xc0] sm:$0xff] %v8838_v27  ;;  %v8775_v57 = vmul.f32 %v15549_v50, %v8529_v60  ;;  %v8713_v38 = vld [vmem:[%s16169_s3 + $0xe8] sm:$0xff] }
 0x73b   :  { %v8533_v40 = vpop.f32.mrf.mxu1  ;;  %v15847_v28 = vpop.f32.mrf.mxu0 }
 0x73c   :  { %v8839_v15 = vadd.f32 %v8775_v57, %v8709_v52  ;;  %v8534_v16 = vadd.f32 %v8533_v40, %v15519_v30 }
 0x73d   :  { %v8535_v51 = vpop.f32.mrf.mxu1  ;;  %v8374_v26 = vpop.f32.mrf.mxu0 }
 0x73e   :  { %8903 = vst [vmem:[%s16169_s3 + $0xc8] sm:$0xff] %v8839_v15  ;;  %v8776_v8 = vmul.f32 %v15549_v50, %v8534_v16  ;;  %v8714_v26 = vld [vmem:[%s16169_s3 + $0xf0] sm:$0xff] }
 0x73f   :  { %v8536_v6 = vpop.f32.mrf.mxu1  ;;  %v15857_v10 = vpop.f32.mrf.mxu0 }
 0x740   :  { %v8840_v56 = vadd.f32 %v8776_v8, %v8710_v23  ;;  %v8537_v9 = vadd.f32 %v8536_v6, %v15524_v33 }
 0x741   :  { %v8538_v54 = vpop.f32.mrf.mxu1  ;;  %v8377_v30 = vpop.f32.mrf.mxu0 }
 0x742   :  { %8904 = vst [vmem:[%s16169_s3 + $0xd0] sm:$0xff] %v8840_v56  ;;  %v8777_v21 = vmul.f32 %v15549_v50, %v8537_v9  ;;  %v8715_v30 = vld [vmem:[%s16169_s3 + $0xf8] sm:$0xff] }
 0x743   :  { %v8541_v59 = vpop.f32.mrf.mxu1  ;;  %v15867_v19 = vpop.f32.mrf.mxu0 }
 0x744   :  { %v8841_v25 = vadd.f32 %v8777_v21, %v8711_v49  ;;  %v8542_v43 = vadd.f32 %v8541_v59, %v15529_v22 }
 0x745   :  { %v8543_v29 = vpop.f32.mrf.mxu1  ;;  %v8382_v33 = vpop.f32.mrf.mxu0 }
 0x746   :  { %8905 = vst [vmem:[%s16169_s3 + $0xd8] sm:$0xff] %v8841_v25  ;;  %v8778_v48 = vmul.f32 %v15549_v50, %v8542_v43  ;;  %v8716_v43 = vld [vmem:[%s16169_s3 + $0x100] sm:$0xff] }
 0x747   :  { %v8544_v24 = vpop.f32.mrf.mxu1  ;;  %v15877_v36 = vpop.f32.mrf.mxu0 }
 0x748   :  { %v8842_v41 = vadd.f32 %v8778_v48, %v8712_v45  ;;  %v8545_v27 = vadd.f32 %v8544_v24, %v15534_v12  ;;  %v8717_v24 = vld [vmem:[%s16169_s3 + $0x108] sm:$0xff] }
 0x749   :  { %v8546_v60 = vpop.f32.mrf.mxu1  ;;  %v8385_v22 = vpop.f32.mrf.mxu0 }
 0x74a   :  { %8906 = vst [vmem:[%s16169_s3 + $0xe0] sm:$0xff] %v8842_v41  ;;  %v8779_v0 = vmul.f32 %v15549_v50, %v8545_v27 }
 0x74b   :  { %v8549_v57 = vpop.f32.mrf.mxu1  ;;  %v15887_v52 = vpop.f32.mrf.mxu0 }
 0x74c   :  { %v8843_v40 = vadd.f32 %v8779_v0, %v8713_v38  ;;  %v8550_v15 = vadd.f32 %v8549_v57, %v15539_v32  ;;  %v8718_v0 = vld [vmem:[%s16169_s3 + $0x110] sm:$0xff] }
 0x74d   :  { %v8551_v16 = vpop.f32.mrf.mxu1  ;;  %v8390_v12 = vpop.f32.mrf.mxu0 }
 0x74e   :  { %8907 = vst [vmem:[%s16169_s3 + $0xe8] sm:$0xff] %v8843_v40  ;;  %v8780_v51 = vmul.f32 %v15549_v50, %v8550_v15  ;;  %v8719_v16 = vld [vmem:[%s16169_s3 + $0x118] sm:$0xff] }
 0x74f   :  { %v8552_v8 = vpop.f32.mrf.mxu1  ;;  %v15897_v23 = vpop.f32.mrf.mxu0 }
 0x750   :  { %v8844_v6 = vadd.f32 %v8780_v51, %v8714_v26  ;;  %v8553_v56 = vadd.f32 %v8552_v8, %v15544_v1 }
 0x751   :  { %v8554_v9 = vpop.f32.mrf.mxu1  ;;  %v8393_v32 = vpop.f32.mrf.mxu0 }
 0x752   :  { %8908 = vst [vmem:[%s16169_s3 + $0xf0] sm:$0xff] %v8844_v6  ;;  %v8781_v54 = vmul.f32 %v15549_v50, %v8553_v56  ;;  %v8720_v6 = vld [vmem:[%s16169_s3 + $0x120] sm:$0xff] }
 0x753   :  { %v8557_v21 = vpop.f32.mrf.mxu1 }
 0x754   :  { %v8845_v49 = vadd.f32 %v8781_v54, %v8715_v30  ;;  %v8558_v59 = vadd.f32 %v8557_v21, %v15551_v53  ;;  %v8721_v30 = vld [vmem:[%s16169_s3 + $0x128] sm:$0xff] }
 0x755   :  { %v8559_v25 = vpop.f32.mrf.mxu1 }
 0x756   :  { %8909 = vst [vmem:[%s16169_s3 + $0xf8] sm:$0xff] %v8845_v49  ;;  %v8782_v1 = vmul.f32 %v15549_v50, %v8558_v59 }
 0x757   :  { %v8560_v29 = vpop.f32.mrf.mxu1 }
 0x758   :  { %v8846_v33 = vadd.f32 %v8782_v1, %v8716_v43  ;;  %v8561_v48 = vadd.f32 %v8560_v29, %v15561_v46  ;;  %v8722_v1 = vld [vmem:[%s16169_s3 + $0x130] sm:$0xff] }
 0x759   :  { %v8562_v45 = vpop.f32.mrf.mxu1 }
 0x75a   :  { %8910 = vst [vmem:[%s16169_s3 + $0x100] sm:$0xff] %v8846_v33  ;;  %v8783_v53 = vmul.f32 %v15549_v50, %v8561_v48  ;;  %v8723_v45 = vld [vmem:[%s16169_s3 + $0x138] sm:$0xff] }
 0x75b   :  { %v8565_v41 = vpop.f32.mrf.mxu1 }
 0x75c   :  { %v8847_v27 = vadd.f32 %v8783_v53, %v8717_v24  ;;  %v8566_v60 = vadd.f32 %v8565_v41, %v15574_v5 }
 0x75d   :  { %v8567_v22 = vpop.f32.mrf.mxu1 }
 0x75e   :  { %8911 = vst [vmem:[%s16169_s3 + $0x108] sm:$0xff] %v8847_v27  ;;  %v8784_v46 = vmul.f32 %v15549_v50, %v8566_v60  ;;  %v8724_v60 = vld [vmem:[%s16169_s3 + $0x140] sm:$0xff] }
 0x75f   :  { %v8568_v38 = vpop.f32.mrf.mxu1 }
 0x760   :  { %v8848_v57 = vadd.f32 %v8784_v46, %v8718_v0  ;;  %v8569_v40 = vadd.f32 %v8568_v38, %v15587_v18 }
 0x761   :  { %v8570_v15 = vpop.f32.mrf.mxu1 }
 0x762   :  { %8912 = vst [vmem:[%s16169_s3 + $0x110] sm:$0xff] %v8848_v57  ;;  %v8785_v5 = vmul.f32 %v15549_v50, %v8569_v40  ;;  %v8725_v57 = vld [vmem:[%s16169_s3 + $0x148] sm:$0xff] }
 0x763   :  { %v8573_v12 = vpop.f32.mrf.mxu1 }
 0x764   :  { %v8849_v51 = vadd.f32 %v8785_v5, %v8719_v16  ;;  %v8574_v26 = vadd.f32 %v8573_v12, %v15600_v63  ;;  %v8726_v12 = vld [vmem:[%s16169_s3 + $0x150] sm:$0xff] }
 0x765   :  { %v8575_v8 = vpop.f32.mrf.mxu1 }
 0x766   :  { %8913 = vst [vmem:[%s16169_s3 + $0x118] sm:$0xff] %v8849_v51  ;;  %v8786_v18 = vmul.f32 %v15549_v50, %v8574_v26 }
 0x767   :  { %v8576_v56 = vpop.f32.mrf.mxu1 }
 0x768   :  { %v8850_v9 = vadd.f32 %v8786_v18, %v8720_v6  ;;  %v8577_v32 = vadd.f32 %v8576_v56, %v15613_v44  ;;  %v8727_v6 = vld [vmem:[%s16169_s3 + $0x158] sm:$0xff] }
 0x769   :  { %v8578_v54 = vpop.f32.mrf.mxu1 }
 0x76a   :  { %8914 = vst [vmem:[%s16169_s3 + $0x120] sm:$0xff] %v8850_v9  ;;  %v8787_v63 = vmul.f32 %v15549_v50, %v8577_v32 }
 0x76b   :  { %v8581_v21 = vpop.f32.mrf.mxu1 }
 0x76c   :  { %v8851_v49 = vadd.f32 %v8787_v63, %v8721_v30  ;;  %v8582_v59 = vadd.f32 %v8581_v21, %v15626_v34  ;;  %v8728_v63 = vld [vmem:[%s16169_s3 + $0x160] sm:$0xff] }
 0x76d   :  { %v8583_v25 = vpop.f32.mrf.mxu1 }
 0x76e   :  { %8915 = vst [vmem:[%s16169_s3 + $0x128] sm:$0xff] %v8851_v49  ;;  %v8788_v44 = vmul.f32 %v15549_v50, %v8582_v59  ;;  %v8729_v25 = vld [vmem:[%s16169_s3 + $0x168] sm:$0xff] }
 0x76f   :  { %v8584_v43 = vpop.f32.mrf.mxu1 }
 0x770   :  { %v8852_v29 = vadd.f32 %v8788_v44, %v8722_v1  ;;  %v8585_v33 = vadd.f32 %v8584_v43, %v15639_v11 }
 0x771   :  { %v8586_v48 = vpop.f32.mrf.mxu1 }
 0x772   :  { %8916 = vst [vmem:[%s16169_s3 + $0x130] sm:$0xff] %v8852_v29  ;;  %v8789_v34 = vmul.f32 %v15549_v50, %v8585_v33  ;;  %v8730_v33 = vld [vmem:[%s16169_s3 + $0x170] sm:$0xff] }
 0x773   :  { %v8589_v53 = vpop.f32.mrf.mxu1 }
 0x774   :  { %v8853_v24 = vadd.f32 %v8789_v34, %v8723_v45  ;;  %v8590_v41 = vadd.f32 %v8589_v53, %v15652_v39 }
 0x775   :  { %v8591_v27 = vpop.f32.mrf.mxu1 }
 0x776   :  { %8917 = vst [vmem:[%s16169_s3 + $0x138] sm:$0xff] %v8853_v24  ;;  %v8790_v11 = vmul.f32 %v15549_v50, %v8590_v41  ;;  %v8731_v24 = vld [vmem:[%s16169_s3 + $0x178] sm:$0xff] }
 0x777   :  { %v8592_v22 = vpop.f32.mrf.mxu1 }
 0x778   :  { %v8854_v46 = vadd.f32 %v8790_v11, %v8724_v60  ;;  %v8593_v0 = vadd.f32 %v8592_v22, %v15665_v58  ;;  %v8732_v22 = vld [vmem:[%s16169_s3 + $0x180] sm:$0xff] }
 0x779   :  { %v8594_v38 = vpop.f32.mrf.mxu1 }
 0x77a   :  { %8918 = vst [vmem:[%s16169_s3 + $0x140] sm:$0xff] %v8854_v46  ;;  %v8791_v39 = vmul.f32 %v15549_v50, %v8593_v0 }
 0x77b   :  { %v8597_v40 = vpop.f32.mrf.mxu1 }
 0x77c   :  { %v8855_v15 = vadd.f32 %v8791_v39, %v8725_v57  ;;  %v8598_v5 = vadd.f32 %v8597_v40, %v15678_v55  ;;  %v8733_v57 = vld [vmem:[%s16169_s3 + $0x188] sm:$0xff] }
 0x77d   :  { %v8599_v16 = vpop.f32.mrf.mxu1 }
 0x77e   :  { %8919 = vst [vmem:[%s16169_s3 + $0x148] sm:$0xff] %v8855_v15  ;;  %v8792_v58 = vmul.f32 %v15549_v50, %v8598_v5 }
 0x77f   :  { %v8600_v51 = vpop.f32.mrf.mxu1 }
 0x780   :  { %v8856_v26 = vadd.f32 %v8792_v58, %v8726_v12  ;;  %v8601_v8 = vadd.f32 %v8600_v51, %v15691_v31  ;;  %v8734_v58 = vld [vmem:[%s16169_s3 + $0x190] sm:$0xff] }
 0x781   :  { %v8602_v18 = vpop.f32.mrf.mxu1 }
 0x782   :  { %8920 = vst [vmem:[%s16169_s3 + $0x150] sm:$0xff] %v8856_v26  ;;  %v8793_v55 = vmul.f32 %v15549_v50, %v8601_v8  ;;  %v8735_v18 = vld [vmem:[%s16169_s3 + $0x198] sm:$0xff] }
 0x783   :  { %v8605_v56 = vpop.f32.mrf.mxu1 }
 0x784   :  { %v8857_v9 = vadd.f32 %v8793_v55, %v8727_v6  ;;  %v8606_v32 = vadd.f32 %v8605_v56, %v15704_v37 }
 0x785   :  { %v8607_v54 = vpop.f32.mrf.mxu1 }
 0x786   :  { %8921 = vst [vmem:[%s16169_s3 + $0x158] sm:$0xff] %v8857_v9  ;;  %v8794_v31 = vmul.f32 %v15549_v50, %v8606_v32  ;;  %v8736_v32 = vld [vmem:[%s16169_s3 + $0x1a0] sm:$0xff] }
 0x787   :  { %v8608_v30 = vpop.f32.mrf.mxu1 }
 0x788   :  { %v8858_v21 = vadd.f32 %v8794_v31, %v8728_v63  ;;  %v8609_v49 = vadd.f32 %v8608_v30, %v15717_v17 }
 0x789   :  { %v8610_v59 = vpop.f32.mrf.mxu1 }
 0x78a   :  { %8922 = vst [vmem:[%s16169_s3 + $0x160] sm:$0xff] %v8858_v21  ;;  %v8795_v37 = vmul.f32 %v15549_v50, %v8609_v49  ;;  %v8737_v21 = vld [vmem:[%s16169_s3 + $0x1a8] sm:$0xff] }
 0x78b   :  { %v8613_v44 = vpop.f32.mrf.mxu1 }
 0x78c   :  { %v8859_v1 = vadd.f32 %v8795_v37, %v8729_v25  ;;  %v8614_v43 = vadd.f32 %v8613_v44, %v15727_v13  ;;  %v8738_v44 = vld [vmem:[%s16169_s3 + $0x1b0] sm:$0xff] }
 0x78d   :  { %v8615_v29 = vpop.f32.mrf.mxu1 }
 0x78e   :  { %8923 = vst [vmem:[%s16169_s3 + $0x168] sm:$0xff] %v8859_v1  ;;  %v8796_v17 = vmul.f32 %v15549_v50, %v8614_v43 }
 0x78f   :  { %v8616_v48 = vpop.f32.mrf.mxu1 }
 0x790   :  { %v8860_v34 = vadd.f32 %v8796_v17, %v8730_v33  ;;  %v8617_v45 = vadd.f32 %v8616_v48, %v15737_v47  ;;  %v8739_v33 = vld [vmem:[%s16169_s3 + $0x1b8] sm:$0xff] }
 0x791   :  { %v8618_v53 = vpop.f32.mrf.mxu1 }
 0x792   :  { %8924 = vst [vmem:[%s16169_s3 + $0x170] sm:$0xff] %v8860_v34  ;;  %v8797_v13 = vmul.f32 %v15549_v50, %v8617_v45 }
 0x793   :  { %v8621_v41 = vpop.f32.mrf.mxu1 }
 0x794   :  { %v8861_v27 = vadd.f32 %v8797_v13, %v8731_v24  ;;  %v8622_v11 = vadd.f32 %v8621_v41, %v15747_v20  ;;  %v8740_v13 = vld [vmem:[%s16169_s3 + $0x1c0] sm:$0xff] }
 0x795   :  { %v8623_v60 = vpop.f32.mrf.mxu1 }
 0x796   :  { %8925 = vst [vmem:[%s16169_s3 + $0x178] sm:$0xff] %v8861_v27  ;;  %v8798_v47 = vmul.f32 %v15549_v50, %v8622_v11  ;;  %v8741_v60 = vld [vmem:[%s16169_s3 + $0x1c8] sm:$0xff] }
 0x797   :  { %v8624_v46 = vpop.f32.mrf.mxu1 }
 0x798   :  { %v8862_v0 = vadd.f32 %v8798_v47, %v8732_v22  ;;  %v8625_v38 = vadd.f32 %v8624_v46, %v15757_v3 }
 0x799   :  { %v8626_v39 = vpop.f32.mrf.mxu1 }
 0x79a   :  { %8926 = vst [vmem:[%s16169_s3 + $0x180] sm:$0xff] %v8862_v0  ;;  %v8799_v20 = vmul.f32 %v15549_v50, %v8625_v38  ;;  %v8742_v38 = vld [vmem:[%s16169_s3 + $0x1d0] sm:$0xff] }
 0x79b   :  { %v8629_v40 = vpop.f32.mrf.mxu1 }
 0x79c   :  { %v8863_v15 = vadd.f32 %v8799_v20, %v8733_v57  ;;  %v8630_v5 = vadd.f32 %v8629_v40, %v15767_v7 }
 0x79d   :  { %v8631_v16 = vpop.f32.mrf.mxu1 }
 0x79e   :  { %8927 = vst [vmem:[%s16169_s3 + $0x188] sm:$0xff] %v8863_v15  ;;  %v8800_v3 = vmul.f32 %v15549_v50, %v8630_v5  ;;  %v8743_v15 = vld [vmem:[%s16169_s3 + $0x1d8] sm:$0xff] }
 0x79f   :  { %v8632_v12 = vpop.f32.mrf.mxu1 }
 0x7a0   :  { %v8864_v51 = vadd.f32 %v8800_v3, %v8734_v58  ;;  %v8633_v26 = vadd.f32 %v8632_v12, %v15777_v61  ;;  %v8744_v12 = vld [vmem:[%s16169_s3 + $0x1e0] sm:$0xff] }
 0x7a1   :  { %v8634_v8 = vpop.f32.mrf.mxu1 }
 0x7a2   :  { %8928 = vst [vmem:[%s16169_s3 + $0x190] sm:$0xff] %v8864_v51  ;;  %v8801_v7 = vmul.f32 %v15549_v50, %v8633_v26 }
 0x7a3   :  { %v8637_v55 = vpop.f32.mrf.mxu1 }
 0x7a4   :  { %v8865_v6 = vadd.f32 %v8801_v7, %v8735_v18  ;;  %v8638_v56 = vadd.f32 %v8637_v55, %v15787_v42  ;;  %v8745_v18 = vld [vmem:[%s16169_s3 + $0x1e8] sm:$0xff] }
 0x7a5   :  { %v8639_v9 = vpop.f32.mrf.mxu1 }
 0x7a6   :  { %8929 = vst [vmem:[%s16169_s3 + $0x198] sm:$0xff] %v8865_v6  ;;  %v8802_v61 = vmul.f32 %v15549_v50, %v8638_v56 }
 0x7a7   :  { %v8640_v54 = vpop.f32.mrf.mxu1 }
 0x7a8   :  { %v8866_v31 = vadd.f32 %v8802_v61, %v8736_v32  ;;  %v8641_v63 = vadd.f32 %v8640_v54, %v15797_v2  ;;  %v8746_v61 = vld [vmem:[%s16169_s3 + $0x1f0] sm:$0xff] }
 0x7a9   :  { %v8642_v30 = vpop.f32.mrf.mxu1 }
 0x7aa   :  { %8930 = vst [vmem:[%s16169_s3 + $0x1a0] sm:$0xff] %v8866_v31  ;;  %v8803_v42 = vmul.f32 %v15549_v50, %v8641_v63  ;;  %v8747_v30 = vld [vmem:[%s16169_s3 + $0x1f8] sm:$0xff] }
 0x7ab   :  { %v8645_v49 = vpop.f32.mrf.mxu1 }
 0x7ac   :  { %v8867_v59 = vadd.f32 %v8803_v42, %v8737_v21  ;;  %v8646_v37 = vadd.f32 %v8645_v49, %v15807_v14 }
 0x7ad   :  { %v8647_v25 = vpop.f32.mrf.mxu1 }
 0x7ae   :  { %8931 = vst [vmem:[%s16169_s3 + $0x1a8] sm:$0xff] %v8867_v59  ;;  %v8804_v2 = vmul.f32 %v15549_v50, %v8646_v37 }
 0x7af   :  { %v8648_v1 = vpop.f32.mrf.mxu1 }
 0x7b0   :  { %v8868_v43 = vadd.f32 %v8804_v2, %v8738_v44  ;;  %v8649_v29 = vadd.f32 %v8648_v1, %v15817_v4 }
 0x7b1   :  { %v8650_v17 = vpop.f32.mrf.mxu1 }
 0x7b2   :  { %8932 = vst [vmem:[%s16169_s3 + $0x1b0] sm:$0xff] %v8868_v43  ;;  %v8805_v14 = vmul.f32 %v15549_v50, %v8649_v29 }
 0x7b3   :  { %v8653_v48 = vpop.f32.mrf.mxu1 }
 0x7b4   :  { %v8869_v34 = vadd.f32 %v8805_v14, %v8739_v33  ;;  %v8654_v45 = vadd.f32 %v8653_v48, %v15827_v35 }
 0x7b5   :  { %v8655_v53 = vpop.f32.mrf.mxu1 }
 0x7b6   :  { %8933 = vst [vmem:[%s16169_s3 + $0x1b8] sm:$0xff] %v8869_v34  ;;  %v8806_v4 = vmul.f32 %v15549_v50, %v8654_v45 }
 0x7b7   :  { %v8656_v24 = vpop.f32.mrf.mxu1 }
 0x7b8   :  { %v8870_v41 = vadd.f32 %v8806_v4, %v8740_v13  ;;  %v8657_v27 = vadd.f32 %v8656_v24, %v15837_v62 }
 0x7b9   :  { %v8658_v11 = vpop.f32.mrf.mxu1 }
 0x7ba   :  { %8934 = vst [vmem:[%s16169_s3 + $0x1c0] sm:$0xff] %v8870_v41  ;;  %v8807_v35 = vmul.f32 %v15549_v50, %v8657_v27 }
 0x7bb   :  { %v8661_v47 = vpop.f32.mrf.mxu1 }
 0x7bc   :  { %v8871_v22 = vadd.f32 %v8807_v35, %v8741_v60  ;;  %v8662_v46 = vadd.f32 %v8661_v47, %v15847_v28 }
 0x7bd   :  { %v8663_v0 = vpop.f32.mrf.mxu1 }
 0x7be   :  { %8935 = vst [vmem:[%s16169_s3 + $0x1c8] sm:$0xff] %v8871_v22  ;;  %v8808_v62 = vmul.f32 %v15549_v50, %v8662_v46 }
 0x7bf   :  { %v8664_v39 = vpop.f32.mrf.mxu1 }
 0x7c0   :  { %v8872_v20 = vadd.f32 %v8808_v62, %v8742_v38  ;;  %v8665_v57 = vadd.f32 %v8664_v39, %v15857_v10 }
 0x7c1   :  { %v8666_v40 = vpop.f32.mrf.mxu1 }
 0x7c2   :  { %8936 = vst [vmem:[%s16169_s3 + $0x1d0] sm:$0xff] %v8872_v20  ;;  %v8809_v28 = vmul.f32 %v15549_v50, %v8665_v57 }
 0x7c3   :  { %v8669_v5 = vpop.f32.mrf.mxu1 }
 0x7c4   :  { %v8873_v16 = vadd.f32 %v8809_v28, %v8743_v15  ;;  %v8670_v3 = vadd.f32 %v8669_v5, %v15867_v19 }
 0x7c5   :  { %v8671_v58 = vpop.f32.mrf.mxu1 }
 0x7c6   :  { %8937 = vst [vmem:[%s16169_s3 + $0x1d8] sm:$0xff] %v8873_v16  ;;  %v8810_v10 = vmul.f32 %v15549_v50, %v8670_v3 }
 0x7c7   :  { %v8672_v51 = vpop.f32.mrf.mxu1 }
 0x7c8   :  { %v8874_v26 = vadd.f32 %v8810_v10, %v8744_v12  ;;  %v8673_v8 = vadd.f32 %v8672_v51, %v15877_v36 }
 0x7c9   :  { %v8674_v7 = vpop.f32.mrf.mxu1 }
 0x7ca   :  { %8938 = vst [vmem:[%s16169_s3 + $0x1e0] sm:$0xff] %v8874_v26  ;;  %v8811_v19 = vmul.f32 %v15549_v50, %v8673_v8 }
 0x7cb   :  { %v8677_v55 = vpop.f32.mrf.mxu1 }
 0x7cc   :  { %v8875_v6 = vadd.f32 %v8811_v19, %v8745_v18  ;;  %v8678_v56 = vadd.f32 %v8677_v55, %v15887_v52 }
 0x7cd   :  { %v8679_v9 = vpop.f32.mrf.mxu1 }
 0x7ce   :  { %8939 = vst [vmem:[%s16169_s3 + $0x1e8] sm:$0xff] %v8875_v6  ;;  %v8812_v36 = vmul.f32 %v15549_v50, %v8678_v56 }
 0x7cf   :  { %v8680_v32 = vpop.f32.mrf.mxu1 }
 0x7d0   :  { %v8876_v54 = vadd.f32 %v8812_v36, %v8746_v61  ;;  %v8681_v31 = vadd.f32 %v8680_v32, %v15897_v23 }
 0x7d1   :  { %v8682_v63 = vpop.f32.mrf.mxu1 }
 0x7d2   :  { %8940 = vst [vmem:[%s16169_s3 + $0x1f0] sm:$0xff] %v8876_v54  ;;  %v8813_v52 = vmul.f32 %v15549_v50, %v8681_v31 }
 0x7d4   :  { %v8877_v42 = vadd.f32 %v8813_v52, %v8747_v30 }
 0x7d6   :  { %8941 = vst [vmem:[%s16169_s3 + $0x1f8] sm:$0xff] %v8877_v42 }
 0x7d7   :  { %8946 = vsyncpa [#allocation4], 1 }

</bundles_post_ra>
